<compile_context>
chip_gen: v7x
topology: tpu7x:2x2x1
jax: 0.10.0
libtpu: 0.0.40
codegen_flags: <defaults>
</compile_context>

<pallas_src>
import math

import jax
import jax.numpy as jnp
from jax.experimental import pallas as pl
from jax.experimental.pallas import tpu as pltpu

EPS = 1e-5
LANE = 128
ACT_DTYPE = jnp.bfloat16


def _round_up(x, m):
    return (x + m - 1) // m * m


def _pad_axis(x, axis, target):
    if x.shape[axis] == target:
        return x
    cfg = [(0, 0)] * x.ndim
    cfg[axis] = (0, target - x.shape[axis])
    return jnp.pad(x, cfg)


# ----------------------------------------------------------------------------
# Pallas kernels
# ----------------------------------------------------------------------------
def _make_gemm_kernel(has_bias, compute_stats):
    def kernel(*refs):
        if has_bias and compute_stats:
            a_ref, b_ref, bias_ref, y_ref, stats_ref, acc_ref = refs
        elif has_bias:
            a_ref, b_ref, bias_ref, y_ref, acc_ref = refs
        elif compute_stats:
            a_ref, b_ref, y_ref, stats_ref, acc_ref = refs
        else:
            a_ref, b_ref, y_ref, acc_ref = refs

        k = pl.program_id(1)

        @pl.when(k == 0)
        def _():
            acc_ref[...] = jnp.zeros_like(acc_ref)

        acc_ref[...] += jnp.dot(a_ref[...], b_ref[...],
                                preferred_element_type=jnp.float32)

        @pl.when(k == pl.num_programs(1) - 1)
        def _():
            y = acc_ref[...]
            if has_bias:
                y = y + bias_ref[...]
            y_ref[...] = y.astype(y_ref.dtype)
            if compute_stats:
                s1 = jnp.sum(y, axis=0, keepdims=True)
                s2 = jnp.sum(y * y, axis=0, keepdims=True)
                pad = jnp.zeros((6, y.shape[1]), jnp.float32)
                stats_ref[...] = jnp.concatenate([s1, s2, pad], axis=0)

    return kernel


def _choose_tk(K, max_tk=512):
    if K <= max_tk:
        return K
    best = LANE
    m = LANE
    while m <= max_tk:
        if K % m == 0:
            best = m
        m += LANE
    return best


def pallas_gemm(a, b, bias=None, compute_stats=False, out_dtype=jnp.float32,
                tm_max=256):
    """(M, K) @ (K, Cn) with fused bias add; optionally also emits per-channel
    sum / sum-of-squares (for BatchNorm) from the accumulator epilogue."""
    M, K = a.shape
    K2, Cn = b.shape
    assert K == K2 and K % LANE == 0 and Cn % LANE == 0

    tm = min(tm_max, _round_up(M, 8))
    Mp = _round_up(M, tm)
    tk = _choose_tk(K)
    m_tiles, k_tiles = Mp // tm, K // tk

    a = _pad_axis(a.astype(jnp.bfloat16), 0, Mp)
    b = b.astype(jnp.bfloat16)

    args = [a, b]
    in_specs = [pl.BlockSpec((tm, tk), lambda i, k: (i, k)),
                pl.BlockSpec((tk, Cn), lambda i, k: (k, 0))]
    if bias is not None:
        args.append(bias.reshape(1, Cn).astype(jnp.float32))
        in_specs.append(pl.BlockSpec((1, Cn), lambda i, k: (0, 0)))

    out_shape = jax.ShapeDtypeStruct((Mp, Cn), out_dtype)
    out_specs = pl.BlockSpec((tm, Cn), lambda i, k: (i, 0))
    if compute_stats:
        out_shape = (out_shape,
                     jax.ShapeDtypeStruct((m_tiles * 8, Cn), jnp.float32))
        out_specs = (out_specs, pl.BlockSpec((8, Cn), lambda i, k: (i, 0)))

    res = pl.pallas_call(
        _make_gemm_kernel(bias is not None, compute_stats),
        out_shape=out_shape,
        grid=(m_tiles, k_tiles),
        in_specs=in_specs,
        out_specs=out_specs,
        scratch_shapes=[pltpu.VMEM((tm, Cn), jnp.float32)],
        compiler_params=pltpu.CompilerParams(
            dimension_semantics=("parallel", "arbitrary")),
    )(*args)

    if compute_stats:
        y, stats = res
        stats = stats.reshape(m_tiles, 8, Cn)
        return y[:M], (stats[:, 0, :].sum(0), stats[:, 1, :].sum(0))
    return res[:M]


def _make_affine_kernel(relu, has_residual):
    def kernel(*refs):
        if has_residual:
            x_ref, s_ref, b_ref, r_ref, o_ref = refs
        else:
            x_ref, s_ref, b_ref, o_ref = refs
        y = x_ref[...].astype(jnp.float32) * s_ref[...] + b_ref[...]
        if has_residual:
            y = y + r_ref[...].astype(jnp.float32)
        if relu:
            y = jnp.maximum(y, 0.0)
        o_ref[...] = y.astype(o_ref.dtype)
    return kernel


def pallas_affine(x, scale, shift, residual=None, relu=False,
                  out_dtype=ACT_DTYPE, tm_max=512):
    """y = [relu](x * scale + shift [+ residual]); tiled/pipelined over rows."""
    M, C = x.shape
    assert C % LANE == 0
    tm = min(tm_max, _round_up(M, 8))
    Mp = _round_up(M, tm)

    args = [_pad_axis(x, 0, Mp),
            scale.reshape(1, C).astype(jnp.float32),
            shift.reshape(1, C).astype(jnp.float32)]
    in_specs = [pl.BlockSpec((tm, C), lambda i: (i, 0)),
                pl.BlockSpec((1, C), lambda i: (0, 0)),
                pl.BlockSpec((1, C), lambda i: (0, 0))]
    if residual is not None:
        args.append(_pad_axis(residual, 0, Mp))
        in_specs.append(pl.BlockSpec((tm, C), lambda i: (i, 0)))

    y = pl.pallas_call(
        _make_affine_kernel(relu, residual is not None),
        out_shape=jax.ShapeDtypeStruct((Mp, C), out_dtype),
        grid=(Mp // tm,),
        in_specs=in_specs,
        out_specs=pl.BlockSpec((tm, C), lambda i: (i, 0)),
        compiler_params=pltpu.CompilerParams(
            dimension_semantics=("parallel",)),
    )(*args)
    return y[:M]


# ----------------------------------------------------------------------------
# Network building blocks (glue in JAX, GEMM / elementwise in Pallas)
# ----------------------------------------------------------------------------
def conv2d_gemm(x, w_oihw, *, stride=1, pad=0, bias=None, compute_stats=False,
                out_dtype=ACT_DTYPE):
    """x: (N,H,W,Cp) channel-padded NHWC; w: (O,I,kh,kw) PyTorch layout."""
    O, I, kh, kw = w_oihw.shape
    N, H, W, Cp = x.shape
    Cpo = _round_up(O, LANE)

    wt = jnp.transpose(w_oihw, (2, 3, 1, 0))                  # (kh,kw,I,O)
    wt = jnp.pad(wt, ((0, 0), (0, 0), (0, Cp - I), (0, Cpo - O)))
    wmat = wt.reshape(kh * kw * Cp, Cpo).astype(jnp.bfloat16)

    xp = jnp.pad(x, ((0, 0), (pad, pad), (pad, pad), (0, 0)))
    Ho = (H + 2 * pad - kh) // stride + 1
    Wo = (W + 2 * pad - kw) // stride + 1
    # TODO(synk): fold the kh*kw taps into the GEMM K grid axis (halo'd input
    # blocks) instead of materializing duplicated im2col patches in HBM.
    cols = []
    for dh in range(kh):
        for dw in range(kw):
            cols.append(xp[:, dh: dh + (Ho - 1) * stride + 1: stride,
                            dw: dw + (Wo - 1) * stride + 1: stride, :])
    patches = jnp.concatenate(cols, axis=-1).astype(jnp.bfloat16)
    patches = patches.reshape(N * Ho * Wo, kh * kw * Cp)

    bias_p = None if bias is None else jnp.pad(bias, (0, Cpo - O))
    out = pallas_gemm(patches, wmat, bias=bias_p, compute_stats=compute_stats,
                      out_dtype=out_dtype)
    if compute_stats:
        y, (ssum, ssq) = out
        return y.reshape(N, Ho, Wo, Cpo), (ssum, ssq, N * Ho * Wo)
    return out.reshape(N, Ho, Wo, Cpo)


def _bn_scale_shift(bn, ssum, ssq, count, cpo):
    c = bn["gamma"].shape[0]
    gamma = jnp.pad(bn["gamma"], (0, cpo - c))
    beta = jnp.pad(bn["beta"], (0, cpo - c))
    mean = ssum / count
    var = jnp.maximum(ssq / count - mean * mean, 0.0)   # biased, training-mode
    scale = gamma * jax.lax.rsqrt(var + EPS)
    shift = beta - mean * scale
    return scale, shift


def conv_bn_act(x, w, bn, *, stride=1, pad=1, relu=True, residual=None):
    y, (ssum, ssq, cnt) = conv2d_gemm(x, w, stride=stride, pad=pad,
                                      compute_stats=True)
    N, Ho, Wo, Cpo = y.shape
    scale, shift = _bn_scale_shift(bn, ssum, ssq, cnt, Cpo)
    r = residual.reshape(-1, Cpo) if residual is not None else None
    out = pallas_affine(y.reshape(-1, Cpo), scale, shift, residual=r, relu=relu)
    return out.reshape(N, Ho, Wo, Cpo)


def residual_block(p, x, stride=1):
    if "sc_conv" in p:
        identity = conv_bn_act(x, p["sc_conv"], p["sc_bn"], stride=stride,
                               pad=0, relu=False)
    else:
        identity = x
    out = conv_bn_act(x, p["conv1"], p["bn1"], stride=stride, pad=1, relu=True)
    out = conv_bn_act(out, p["conv2"], p["bn2"], stride=1, pad=1, relu=True,
                      residual=identity)
    return out


def upconv2x2(x, w, b):
    """ConvTranspose2d(kernel=2, stride=2); bias fused into the GEMM epilogue."""
    N, H, W, Cp = x.shape
    Cin, Cout, _, _ = w.shape
    Cpo = _round_up(Cout, LANE)
    wt = jnp.transpose(w, (0, 2, 3, 1))                       # (Cin,2,2,Cout)
    wt = jnp.pad(wt, ((0, Cp - Cin), (0, 0), (0, 0), (0, Cpo - Cout)))
    wmat = wt.reshape(Cp, 4 * Cpo).astype(jnp.bfloat16)
    bias4 = jnp.tile(jnp.pad(b, (0, Cpo - Cout)), 4)
    y = pallas_gemm(x.reshape(N * H * W, Cp), wmat, bias=bias4,
                    out_dtype=ACT_DTYPE)
    # TODO(synk): write the four (dh,dw) sub-grids straight from the GEMM
    # out_spec instead of this JAX-side pixel-shuffle transpose.
    y = y.reshape(N, H, W, 2, 2, Cpo)
    y = jnp.transpose(y, (0, 1, 3, 2, 4, 5)).reshape(N, 2 * H, 2 * W, Cpo)
    return y


def encoder_fwd(p, x):
    x0 = conv_bn_act(x, p["initial"]["conv"], p["initial"]["bn"],
                     stride=1, pad=1, relu=True)
    x1 = residual_block(p["enc1"], x0, stride=1)
    x2 = residual_block(p["enc2"], x1, stride=2)
    x3 = residual_block(p["enc3"], x2, stride=2)
    x4 = residual_block(p["enc4"], x3, stride=2)
    return x4, [x1, x2, x3]


def decoder_block_fwd(p, x, skip):
    c_mid = p["up_w"].shape[1]
    c_skip = p["res"]["conv1"].shape[1] - c_mid
    x = upconv2x2(x, p["up_w"], p["up_b"])
    if x.shape[1:3] != skip.shape[1:3]:
        dY = skip.shape[1] - x.shape[1]
        dX = skip.shape[2] - x.shape[2]
        x = jnp.pad(x, ((0, 0), (dY // 2, dY - dY // 2),
                        (dX // 2, dX - dX // 2), (0, 0)))
    cat = jnp.concatenate([x[..., :c_mid], skip[..., :c_skip]], axis=-1)
    cat = _pad_axis(cat, -1, _round_up(cat.shape[-1], LANE))
    return residual_block(p["res"], cat, stride=1)


def decoder_fwd(p, x, skips):
    x = decoder_block_fwd(p["dec4"], x, skips[2])
    x = decoder_block_fwd(p["dec3"], x, skips[1])
    x = decoder_block_fwd(p["dec2"], x, skips[0])
    d1 = p["dec1"]
    x = conv_bn_act(x, d1["conv1"], d1["bn1"], stride=1, pad=1, relu=True)
    x = conv_bn_act(x, d1["conv2"], d1["bn2"], stride=1, pad=1, relu=True)
    return x


def resunet_fwd(params, x_nchw):
    x = jnp.transpose(x_nchw, (0, 2, 3, 1))
    x = _pad_axis(x, -1, _round_up(x.shape[-1], LANE)).astype(ACT_DTYPE)
    x, skips = encoder_fwd(params["encoder"], x)
    x = residual_block(params["bridge"], x, stride=1)
    x = decoder_fwd(params["decoder"], x, skips)
    out_c = params["final"]["w"].shape[0]
    y = conv2d_gemm(x, params["final"]["w"], stride=1, pad=0,
                    bias=params["final"]["b"], compute_stats=False,
                    out_dtype=jnp.float32)
    y = y[..., :out_c]
    return jnp.transpose(y, (0, 3, 1, 2))


# ----------------------------------------------------------------------------
# Deterministic parameter initialization (shapes mirror the PyTorch module)
# ----------------------------------------------------------------------------
def _bn_p(c):
    return {"gamma": jnp.ones((c,), jnp.float32),
            "beta": jnp.zeros((c,), jnp.float32)}


def _conv_w(key, o, i, kh, kw):
    fan_in = i * kh * kw
    return (jax.random.normal(key, (o, i, kh, kw), jnp.float32)
            / math.sqrt(fan_in))


def _resblock_p(key, in_c, out_c, stride):
    k1, k2, k3 = jax.random.split(key, 3)
    p = {"conv1": _conv_w(k1, out_c, in_c, 3, 3), "bn1": _bn_p(out_c),
         "conv2": _conv_w(k2, out_c, out_c, 3, 3), "bn2": _bn_p(out_c)}
    if stride != 1 or in_c != out_c:
        p["sc_conv"] = _conv_w(k3, out_c, in_c, 1, 1)
        p["sc_bn"] = _bn_p(out_c)
    return p


def make_params(key, input_channels, output_channels, base_channels):
    b = base_channels
    keys = iter(jax.random.split(key, 32))
    params = {
        "encoder": {
            "initial": {"conv": _conv_w(next(keys), b, input_channels, 3, 3),
                        "bn": _bn_p(b)},
            "enc1": _resblock_p(next(keys), b, b, 1),
            "enc2": _resblock_p(next(keys), b, 2 * b, 2),
            "enc3": _resblock_p(next(keys), 2 * b, 4 * b, 2),
            "enc4": _resblock_p(next(keys), 4 * b, 8 * b, 2),
        },
        "bridge": _resblock_p(next(keys), 8 * b, 8 * b, 1),
        "decoder": {
            "dec4": {
                "up_w": jax.random.normal(next(keys), (8 * b, 4 * b, 2, 2),
                                          jnp.float32) / math.sqrt(8 * b * 4),
                "up_b": jnp.zeros((4 * b,), jnp.float32),
                "res": _resblock_p(next(keys), 8 * b, 4 * b, 1),
            },
            "dec3": {
                "up_w": jax.random.normal(next(keys), (4 * b, 2 * b, 2, 2),
                                          jnp.float32) / math.sqrt(4 * b * 4),
                "up_b": jnp.zeros((2 * b,), jnp.float32),
                "res": _resblock_p(next(keys), 4 * b, 2 * b, 1),
            },
            "dec2": {
                "up_w": jax.random.normal(next(keys), (2 * b, b, 2, 2),
                                          jnp.float32) / math.sqrt(2 * b * 4),
                "up_b": jnp.zeros((b,), jnp.float32),
                "res": _resblock_p(next(keys), 2 * b, b, 1),
            },
            "dec1": {"conv1": _conv_w(next(keys), b, b, 3, 3), "bn1": _bn_p(b),
                     "conv2": _conv_w(next(keys), b, b, 3, 3), "bn2": _bn_p(b)},
        },
        "final": {"w": _conv_w(next(keys), output_channels, b, 1, 1),
                  "b": jnp.zeros((output_channels,), jnp.float32)},
    }
    return params


# ----------------------------------------------------------------------------
if __name__ == "__main__":
    input_channels, output_channels, base_channels = 3, 2, 8
    N, H, W = 2, 16, 16

    key = jax.random.PRNGKey(0)
    pkey, xkey = jax.random.split(key)
    params = make_params(pkey, input_channels, output_channels, base_channels)

    # PyTorch-style NCHW input.
    x_nchw = jax.random.normal(xkey, (N, input_channels, H, W), jnp.float32)

    fwd = jax.jit(resunet_fwd)
    out_nchw = fwd(params, x_nchw)
    jax.block_until_ready(out_nchw)

    assert out_nchw.shape == (N, output_channels, H, W)
    assert bool(jnp.all(jnp.isfinite(out_nchw)))
    print("KERNEL_OK")
</pallas_src>

<mosaic_0001>
module attributes {stable_mosaic.version = 11 : i64} {
  func.func @kernel(%arg0: i32, %arg1: i32, %arg2: memref<256x384xbf16, #tpu.memory_space<vmem>>, %arg3: memref<384x128xbf16, #tpu.memory_space<vmem>>, %arg4: memref<256x128xbf16, #tpu.memory_space<vmem>>, %arg5: memref<8x128xf32, #tpu.memory_space<vmem>>, %arg6: memref<256x128xf32, #tpu.memory_space<vmem>>) attributes {dimension_semantics = [#tpu.dimension_semantics<parallel>, #tpu.dimension_semantics<arbitrary>], iteration_bounds = array<i64: 2, 3>, scalar_prefetch = 0 : i64, scratch_operands = 1 : i64, tpu.core_type = #tpu.core_type<tc>, window_params = [{transform_indices = @transform_0, window_bounds = array<i64: 256, 384>}, {transform_indices = @transform_1, window_bounds = array<i64: 384, 128>}, {transform_indices = @transform_2, window_bounds = array<i64: 256, 128>}, {transform_indices = @transform_3, window_bounds = array<i64: 8, 128>}]} {
    %c0_i32 = arith.constant 0 : i32
    %0 = arith.cmpi eq, %arg1, %c0_i32 : i32
    %1 = arith.extui %0 : i1 to i32
    %c0_i32_0 = arith.constant 0 : i32
    %2 = arith.cmpi ne, %1, %c0_i32_0 : i32
    scf.if %2 {
      %cst_9 = arith.constant 0.000000e+00 : f32
      %12 = vector.broadcast %cst_9 : f32 to vector<256x128xf32>
      %c0_10 = arith.constant 0 : index
      %c0_11 = arith.constant 0 : index
      %13 = vector.load %arg6[%c0_10, %c0_11] : memref<256x128xf32, #tpu.memory_space<vmem>>, vector<256x128xf32>
      tpu.vector_store %arg6[%c0_10, %c0_11], %12 {strides = array<i32>} : memref<256x128xf32, #tpu.memory_space<vmem>>, vector<256x128xf32>,
    } else {
    }
    %c0 = arith.constant 0 : index
    %c0_1 = arith.constant 0 : index
    %3 = vector.load %arg6[%c0, %c0_1] : memref<256x128xf32, #tpu.memory_space<vmem>>, vector<256x128xf32>
    %c0_2 = arith.constant 0 : index
    %c0_3 = arith.constant 0 : index
    %4 = vector.load %arg2[%c0_2, %c0_3] : memref<256x384xbf16, #tpu.memory_space<vmem>>, vector<256x384xbf16>
    %c0_4 = arith.constant 0 : index
    %c0_5 = arith.constant 0 : index
    %5 = vector.load %arg3[%c0_4, %c0_5] : memref<384x128xbf16, #tpu.memory_space<vmem>>, vector<384x128xbf16>
    %cst = arith.constant dense<0.000000e+00> : vector<256x128xf32>
    %6 = tpu.matmul %4, %5, %cst {dimension_numbers = #tpu.dot_dimension_numbers<[1], [0], [0], [1], [0, 0, 1, 1], [], []>} : vector<256x384xbf16>, vector<384x128xbf16>, vector<256x128xf32> -> vector<256x128xf32>
    %7 = arith.addf %3, %6 : vector<256x128xf32>
    %c0_6 = arith.constant 0 : index
    %c0_7 = arith.constant 0 : index
    %8 = vector.load %arg6[%c0_6, %c0_7] : memref<256x128xf32, #tpu.memory_space<vmem>>, vector<256x128xf32>
    tpu.vector_store %arg6[%c0_6, %c0_7], %7 {strides = array<i32>} : memref<256x128xf32, #tpu.memory_space<vmem>>, vector<256x128xf32>,
    %c2_i32 = arith.constant 2 : i32
    %9 = arith.cmpi eq, %arg1, %c2_i32 : i32
    %10 = arith.extui %9 : i1 to i32
    %c0_i32_8 = arith.constant 0 : i32
    %11 = arith.cmpi ne, %10, %c0_i32_8 : i32
    scf.if %11 {
      %c0_9 = arith.constant 0 : index
      %c0_10 = arith.constant 0 : index
      %12 = vector.load %arg6[%c0_9, %c0_10] : memref<256x128xf32, #tpu.memory_space<vmem>>, vector<256x128xf32>
      %13 = arith.truncf %12 : vector<256x128xf32> to vector<256x128xbf16>
      %c0_11 = arith.constant 0 : index
      %c0_12 = arith.constant 0 : index
      %14 = vector.load %arg4[%c0_11, %c0_12] : memref<256x128xbf16, #tpu.memory_space<vmem>>, vector<256x128xbf16>
      tpu.vector_store %arg4[%c0_11, %c0_12], %13 {strides = array<i32>} : memref<256x128xbf16, #tpu.memory_space<vmem>>, vector<256x128xbf16>,
      %cst_13 = arith.constant dense<0.000000e+00> : vector<128xf32>
      %15 = vector.multi_reduction <add>, %12, %cst_13 [0] : vector<256x128xf32> to vector<128xf32>
      %16 = vector.shape_cast %15 : vector<128xf32> to vector<1x128xf32>
      %17 = arith.mulf %12, %12 : vector<256x128xf32>
      %cst_14 = arith.constant dense<0.000000e+00> : vector<128xf32>
      %18 = vector.multi_reduction <add>, %17, %cst_14 [0] : vector<256x128xf32> to vector<128xf32>
      %19 = vector.shape_cast %18 : vector<128xf32> to vector<1x128xf32>
      %cst_15 = arith.constant 0.000000e+00 : f32
      %20 = vector.broadcast %cst_15 : f32 to vector<6x128xf32>
      %21 = tpu.concatenate %16, %19, %20 in 0 : vector<1x128xf32>, vector<1x128xf32>, vector<6x128xf32> -> vector<8x128xf32>
      %c0_16 = arith.constant 0 : index
      %c0_17 = arith.constant 0 : index
      %22 = vector.load %arg5[%c0_16, %c0_17] : memref<8x128xf32, #tpu.memory_space<vmem>>, vector<8x128xf32>
      tpu.vector_store %arg5[%c0_16, %c0_17], %21 {strides = array<i32>} : memref<8x128xf32, #tpu.memory_space<vmem>>, vector<8x128xf32>,
    } else {
    }
    return
  }
  func.func @transform_0(%arg0: i32, %arg1: i32) -> (i32, i32) {
    %c0_i32 = arith.constant 0 : i32
    return %arg0, %arg1 : i32, i32
  }
  func.func @transform_1(%arg0: i32, %arg1: i32) -> (i32, i32) {
    %c0_i32 = arith.constant 0 : i32
    %c0_i32_0 = arith.constant 0 : i32
    return %arg1, %c0_i32 : i32, i32
  }
  func.func @transform_2(%arg0: i32, %arg1: i32) -> (i32, i32) {
    %c0_i32 = arith.constant 0 : i32
    %c0_i32_0 = arith.constant 0 : i32
    return %arg0, %c0_i32 : i32, i32
  }
  func.func @transform_3(%arg0: i32, %arg1: i32) -> (i32, i32) {
    %c0_i32 = arith.constant 0 : i32
    %c0_i32_0 = arith.constant 0 : i32
    return %arg0, %c0_i32 : i32, i32
  }
}

module attributes {stable_mosaic.version = 11 : i64} {
  func.func @kernel(%arg0: i32, %arg1: memref<512x128xbf16, #tpu.memory_space<vmem>>, %arg2: memref<1x128xf32, #tpu.memory_space<vmem>>, %arg3: memref<1x128xf32, #tpu.memory_space<vmem>>, %arg4: memref<512x128xbf16, #tpu.memory_space<vmem>>) attributes {dimension_semantics = [#tpu.dimension_semantics<parallel>], iteration_bounds = array<i64: 1>, scalar_prefetch = 0 : i64, scratch_operands = 0 : i64, tpu.core_type = #tpu.core_type<tc>, window_params = [{transform_indices = @transform_0, window_bounds = array<i64: 512, 128>}, {pipeline_mode = #tpu.pipeline_mode<synchronous>, transform_indices = @transform_1, window_bounds = array<i64: 1, 128>}, {pipeline_mode = #tpu.pipeline_mode<synchronous>, transform_indices = @transform_2, window_bounds = array<i64: 1, 128>}, {transform_indices = @transform_3, window_bounds = array<i64: 512, 128>}]} {
    %c0 = arith.constant 0 : index
    %c0_0 = arith.constant 0 : index
    %0 = vector.load %arg1[%c0, %c0_0] : memref<512x128xbf16, #tpu.memory_space<vmem>>, vector<512x128xbf16>
    %1 = arith.extf %0 : vector<512x128xbf16> to vector<512x128xf32>
    %c0_1 = arith.constant 0 : index
    %c0_2 = arith.constant 0 : index
    %2 = vector.load %arg2[%c0_1, %c0_2] : memref<1x128xf32, #tpu.memory_space<vmem>>, vector<1x128xf32>
    %3 = vector.broadcast %2 : vector<1x128xf32> to vector<512x128xf32>
    %4 = arith.mulf %1, %3 : vector<512x128xf32>
    %c0_3 = arith.constant 0 : index
    %c0_4 = arith.constant 0 : index
    %5 = vector.load %arg3[%c0_3, %c0_4] : memref<1x128xf32, #tpu.memory_space<vmem>>, vector<1x128xf32>
    %6 = vector.broadcast %5 : vector<1x128xf32> to vector<512x128xf32>
    %7 = arith.addf %4, %6 : vector<512x128xf32>
    %cst = arith.constant 0.000000e+00 : f32
    %8 = vector.broadcast %cst : f32 to vector<512x128xf32>
    %9 = arith.maximumf %7, %8 : vector<512x128xf32>
    %10 = arith.truncf %9 : vector<512x128xf32> to vector<512x128xbf16>
    %c0_5 = arith.constant 0 : index
    %c0_6 = arith.constant 0 : index
    %11 = vector.load %arg4[%c0_5, %c0_6] : memref<512x128xbf16, #tpu.memory_space<vmem>>, vector<512x128xbf16>
    tpu.vector_store %arg4[%c0_5, %c0_6], %10 {strides = array<i32>} : memref<512x128xbf16, #tpu.memory_space<vmem>>, vector<512x128xbf16>,
    return
  }
  func.func @transform_0(%arg0: i32) -> (i32, i32) {
    %c0_i32 = arith.constant 0 : i32
    %c0_i32_0 = arith.constant 0 : i32
    return %arg0, %c0_i32 : i32, i32
  }
  func.func @transform_1(%arg0: i32) -> (i32, i32) {
    %c0_i32 = arith.constant 0 : i32
    %c0_i32_0 = arith.constant 0 : i32
    %c0_i32_1 = arith.constant 0 : i32
    return %c0_i32, %c0_i32_0 : i32, i32
  }
  func.func @transform_2(%arg0: i32) -> (i32, i32) {
    %c0_i32 = arith.constant 0 : i32
    %c0_i32_0 = arith.constant 0 : i32
    %c0_i32_1 = arith.constant 0 : i32
    return %c0_i32, %c0_i32_0 : i32, i32
  }
  func.func @transform_3(%arg0: i32) -> (i32, i32) {
    %c0_i32 = arith.constant 0 : i32
    %c0_i32_0 = arith.constant 0 : i32
    return %arg0, %c0_i32 : i32, i32
  }
}

module attributes {stable_mosaic.version = 11 : i64} {
  func.func @kernel(%arg0: i32, %arg1: memref<512x128xbf16, #tpu.memory_space<vmem>>, %arg2: memref<1x128xf32, #tpu.memory_space<vmem>>, %arg3: memref<1x128xf32, #tpu.memory_space<vmem>>, %arg4: memref<512x128xbf16, #tpu.memory_space<vmem>>, %arg5: memref<512x128xbf16, #tpu.memory_space<vmem>>) attributes {dimension_semantics = [#tpu.dimension_semantics<parallel>], iteration_bounds = array<i64: 1>, scalar_prefetch = 0 : i64, scratch_operands = 0 : i64, tpu.core_type = #tpu.core_type<tc>, window_params = [{transform_indices = @transform_0, window_bounds = array<i64: 512, 128>}, {pipeline_mode = #tpu.pipeline_mode<synchronous>, transform_indices = @transform_1, window_bounds = array<i64: 1, 128>}, {pipeline_mode = #tpu.pipeline_mode<synchronous>, transform_indices = @transform_2, window_bounds = array<i64: 1, 128>}, {transform_indices = @transform_3, window_bounds = array<i64: 512, 128>}, {transform_indices = @transform_4, window_bounds = array<i64: 512, 128>}]} {
    %c0 = arith.constant 0 : index
    %c0_0 = arith.constant 0 : index
    %0 = vector.load %arg1[%c0, %c0_0] : memref<512x128xbf16, #tpu.memory_space<vmem>>, vector<512x128xbf16>
    %1 = arith.extf %0 : vector<512x128xbf16> to vector<512x128xf32>
    %c0_1 = arith.constant 0 : index
    %c0_2 = arith.constant 0 : index
    %2 = vector.load %arg2[%c0_1, %c0_2] : memref<1x128xf32, #tpu.memory_space<vmem>>, vector<1x128xf32>
    %3 = vector.broadcast %2 : vector<1x128xf32> to vector<512x128xf32>
    %4 = arith.mulf %1, %3 : vector<512x128xf32>
    %c0_3 = arith.constant 0 : index
    %c0_4 = arith.constant 0 : index
    %5 = vector.load %arg3[%c0_3, %c0_4] : memref<1x128xf32, #tpu.memory_space<vmem>>, vector<1x128xf32>
    %6 = vector.broadcast %5 : vector<1x128xf32> to vector<512x128xf32>
    %7 = arith.addf %4, %6 : vector<512x128xf32>
    %c0_5 = arith.constant 0 : index
    %c0_6 = arith.constant 0 : index
    %8 = vector.load %arg4[%c0_5, %c0_6] : memref<512x128xbf16, #tpu.memory_space<vmem>>, vector<512x128xbf16>
    %9 = arith.extf %8 : vector<512x128xbf16> to vector<512x128xf32>
    %10 = arith.addf %7, %9 : vector<512x128xf32>
    %cst = arith.constant 0.000000e+00 : f32
    %11 = vector.broadcast %cst : f32 to vector<512x128xf32>
    %12 = arith.maximumf %10, %11 : vector<512x128xf32>
    %13 = arith.truncf %12 : vector<512x128xf32> to vector<512x128xbf16>
    %c0_7 = arith.constant 0 : index
    %c0_8 = arith.constant 0 : index
    %14 = vector.load %arg5[%c0_7, %c0_8] : memref<512x128xbf16, #tpu.memory_space<vmem>>, vector<512x128xbf16>
    tpu.vector_store %arg5[%c0_7, %c0_8], %13 {strides = array<i32>} : memref<512x128xbf16, #tpu.memory_space<vmem>>, vector<512x128xbf16>,
    return
  }
  func.func @transform_0(%arg0: i32) -> (i32, i32) {
    %c0_i32 = arith.constant 0 : i32
    %c0_i32_0 = arith.constant 0 : i32
    return %arg0, %c0_i32 : i32, i32
  }
  func.func @transform_1(%arg0: i32) -> (i32, i32) {
    %c0_i32 = arith.constant 0 : i32
    %c0_i32_0 = arith.constant 0 : i32
    %c0_i32_1 = arith.constant 0 : i32
    return %c0_i32, %c0_i32_0 : i32, i32
  }
  func.func @transform_2(%arg0: i32) -> (i32, i32) {
    %c0_i32 = arith.constant 0 : i32
    %c0_i32_0 = arith.constant 0 : i32
    %c0_i32_1 = arith.constant 0 : i32
    return %c0_i32, %c0_i32_0 : i32, i32
  }
  func.func @transform_3(%arg0: i32) -> (i32, i32) {
    %c0_i32 = arith.constant 0 : i32
    %c0_i32_0 = arith.constant 0 : i32
    return %arg0, %c0_i32 : i32, i32
  }
  func.func @transform_4(%arg0: i32) -> (i32, i32) {
    %c0_i32 = arith.constant 0 : i32
    %c0_i32_0 = arith.constant 0 : i32
    return %arg0, %c0_i32 : i32, i32
  }
}

module attributes {stable_mosaic.version = 11 : i64} {
  func.func @kernel(%arg0: i32, %arg1: i32, %arg2: memref<128x128xbf16, #tpu.memory_space<vmem>>, %arg3: memref<128x128xbf16, #tpu.memory_space<vmem>>, %arg4: memref<128x128xbf16, #tpu.memory_space<vmem>>, %arg5: memref<8x128xf32, #tpu.memory_space<vmem>>, %arg6: memref<128x128xf32, #tpu.memory_space<vmem>>) attributes {dimension_semantics = [#tpu.dimension_semantics<parallel>, #tpu.dimension_semantics<arbitrary>], iteration_bounds = array<i64: 1, 1>, scalar_prefetch = 0 : i64, scratch_operands = 1 : i64, tpu.core_type = #tpu.core_type<tc>, window_params = [{transform_indices = @transform_0, window_bounds = array<i64: 128, 128>}, {transform_indices = @transform_1, window_bounds = array<i64: 128, 128>}, {transform_indices = @transform_2, window_bounds = array<i64: 128, 128>}, {transform_indices = @transform_3, window_bounds = array<i64: 8, 128>}]} {
    %c0_i32 = arith.constant 0 : i32
    %0 = arith.cmpi eq, %arg1, %c0_i32 : i32
    %1 = arith.extui %0 : i1 to i32
    %c0_i32_0 = arith.constant 0 : i32
    %2 = arith.cmpi ne, %1, %c0_i32_0 : i32
    scf.if %2 {
      %cst_10 = arith.constant 0.000000e+00 : f32
      %12 = vector.broadcast %cst_10 : f32 to vector<128x128xf32>
      %c0_11 = arith.constant 0 : index
      %c0_12 = arith.constant 0 : index
      %13 = vector.load %arg6[%c0_11, %c0_12] : memref<128x128xf32, #tpu.memory_space<vmem>>, vector<128x128xf32>
      tpu.vector_store %arg6[%c0_11, %c0_12], %12 {strides = array<i32>} : memref<128x128xf32, #tpu.memory_space<vmem>>, vector<128x128xf32>,
    } else {
    }
    %c0 = arith.constant 0 : index
    %c0_1 = arith.constant 0 : index
    %3 = vector.load %arg6[%c0, %c0_1] : memref<128x128xf32, #tpu.memory_space<vmem>>, vector<128x128xf32>
    %c0_2 = arith.constant 0 : index
    %c0_3 = arith.constant 0 : index
    %4 = vector.load %arg2[%c0_2, %c0_3] : memref<128x128xbf16, #tpu.memory_space<vmem>>, vector<128x128xbf16>
    %c0_4 = arith.constant 0 : index
    %c0_5 = arith.constant 0 : index
    %5 = vector.load %arg3[%c0_4, %c0_5] : memref<128x128xbf16, #tpu.memory_space<vmem>>, vector<128x128xbf16>
    %cst = arith.constant dense<0.000000e+00> : vector<128x128xf32>
    %6 = tpu.matmul %4, %5, %cst {dimension_numbers = #tpu.dot_dimension_numbers<[1], [0], [0], [1], [0, 0, 1, 1], [], []>} : vector<128x128xbf16>, vector<128x128xbf16>, vector<128x128xf32> -> vector<128x128xf32>
    %7 = arith.addf %3, %6 : vector<128x128xf32>
    %c0_6 = arith.constant 0 : index
    %c0_7 = arith.constant 0 : index
    %8 = vector.load %arg6[%c0_6, %c0_7] : memref<128x128xf32, #tpu.memory_space<vmem>>, vector<128x128xf32>
    tpu.vector_store %arg6[%c0_6, %c0_7], %7 {strides = array<i32>} : memref<128x128xf32, #tpu.memory_space<vmem>>, vector<128x128xf32>,
    %c0_i32_8 = arith.constant 0 : i32
    %9 = arith.cmpi eq, %arg1, %c0_i32_8 : i32
    %10 = arith.extui %9 : i1 to i32
    %c0_i32_9 = arith.constant 0 : i32
    %11 = arith.cmpi ne, %10, %c0_i32_9 : i32
    scf.if %11 {
      %c0_10 = arith.constant 0 : index
      %c0_11 = arith.constant 0 : index
      %12 = vector.load %arg6[%c0_10, %c0_11] : memref<128x128xf32, #tpu.memory_space<vmem>>, vector<128x128xf32>
      %13 = arith.truncf %12 : vector<128x128xf32> to vector<128x128xbf16>
      %c0_12 = arith.constant 0 : index
      %c0_13 = arith.constant 0 : index
      %14 = vector.load %arg4[%c0_12, %c0_13] : memref<128x128xbf16, #tpu.memory_space<vmem>>, vector<128x128xbf16>
      tpu.vector_store %arg4[%c0_12, %c0_13], %13 {strides = array<i32>} : memref<128x128xbf16, #tpu.memory_space<vmem>>, vector<128x128xbf16>,
      %cst_14 = arith.constant dense<0.000000e+00> : vector<128xf32>
      %15 = vector.multi_reduction <add>, %12, %cst_14 [0] : vector<128x128xf32> to vector<128xf32>
      %16 = vector.shape_cast %15 : vector<128xf32> to vector<1x128xf32>
      %17 = arith.mulf %12, %12 : vector<128x128xf32>
      %cst_15 = arith.constant dense<0.000000e+00> : vector<128xf32>
      %18 = vector.multi_reduction <add>, %17, %cst_15 [0] : vector<128x128xf32> to vector<128xf32>
      %19 = vector.shape_cast %18 : vector<128xf32> to vector<1x128xf32>
      %cst_16 = arith.constant 0.000000e+00 : f32
      %20 = vector.broadcast %cst_16 : f32 to vector<6x128xf32>
      %21 = tpu.concatenate %16, %19, %20 in 0 : vector<1x128xf32>, vector<1x128xf32>, vector<6x128xf32> -> vector<8x128xf32>
      %c0_17 = arith.constant 0 : index
      %c0_18 = arith.constant 0 : index
      %22 = vector.load %arg5[%c0_17, %c0_18] : memref<8x128xf32, #tpu.memory_space<vmem>>, vector<8x128xf32>
      tpu.vector_store %arg5[%c0_17, %c0_18], %21 {strides = array<i32>} : memref<8x128xf32, #tpu.memory_space<vmem>>, vector<8x128xf32>,
    } else {
    }
    return
  }
  func.func @transform_0(%arg0: i32, %arg1: i32) -> (i32, i32) {
    %c0_i32 = arith.constant 0 : i32
    return %arg0, %arg1 : i32, i32
  }
  func.func @transform_1(%arg0: i32, %arg1: i32) -> (i32, i32) {
    %c0_i32 = arith.constant 0 : i32
    %c0_i32_0 = arith.constant 0 : i32
    return %arg1, %c0_i32 : i32, i32
  }
  func.func @transform_2(%arg0: i32, %arg1: i32) -> (i32, i32) {
    %c0_i32 = arith.constant 0 : i32
    %c0_i32_0 = arith.constant 0 : i32
    return %arg0, %c0_i32 : i32, i32
  }
  func.func @transform_3(%arg0: i32, %arg1: i32) -> (i32, i32) {
    %c0_i32 = arith.constant 0 : i32
    %c0_i32_0 = arith.constant 0 : i32
    return %arg0, %c0_i32 : i32, i32
  }
}

module attributes {stable_mosaic.version = 11 : i64} {
  func.func @kernel(%arg0: i32, %arg1: memref<128x128xbf16, #tpu.memory_space<vmem>>, %arg2: memref<1x128xf32, #tpu.memory_space<vmem>>, %arg3: memref<1x128xf32, #tpu.memory_space<vmem>>, %arg4: memref<128x128xbf16, #tpu.memory_space<vmem>>) attributes {dimension_semantics = [#tpu.dimension_semantics<parallel>], iteration_bounds = array<i64: 1>, scalar_prefetch = 0 : i64, scratch_operands = 0 : i64, tpu.core_type = #tpu.core_type<tc>, window_params = [{transform_indices = @transform_0, window_bounds = array<i64: 128, 128>}, {pipeline_mode = #tpu.pipeline_mode<synchronous>, transform_indices = @transform_1, window_bounds = array<i64: 1, 128>}, {pipeline_mode = #tpu.pipeline_mode<synchronous>, transform_indices = @transform_2, window_bounds = array<i64: 1, 128>}, {transform_indices = @transform_3, window_bounds = array<i64: 128, 128>}]} {
    %c0 = arith.constant 0 : index
    %c0_0 = arith.constant 0 : index
    %0 = vector.load %arg1[%c0, %c0_0] : memref<128x128xbf16, #tpu.memory_space<vmem>>, vector<128x128xbf16>
    %1 = arith.extf %0 : vector<128x128xbf16> to vector<128x128xf32>
    %c0_1 = arith.constant 0 : index
    %c0_2 = arith.constant 0 : index
    %2 = vector.load %arg2[%c0_1, %c0_2] : memref<1x128xf32, #tpu.memory_space<vmem>>, vector<1x128xf32>
    %3 = vector.broadcast %2 : vector<1x128xf32> to vector<128x128xf32>
    %4 = arith.mulf %1, %3 : vector<128x128xf32>
    %c0_3 = arith.constant 0 : index
    %c0_4 = arith.constant 0 : index
    %5 = vector.load %arg3[%c0_3, %c0_4] : memref<1x128xf32, #tpu.memory_space<vmem>>, vector<1x128xf32>
    %6 = vector.broadcast %5 : vector<1x128xf32> to vector<128x128xf32>
    %7 = arith.addf %4, %6 : vector<128x128xf32>
    %8 = arith.truncf %7 : vector<128x128xf32> to vector<128x128xbf16>
    %c0_5 = arith.constant 0 : index
    %c0_6 = arith.constant 0 : index
    %9 = vector.load %arg4[%c0_5, %c0_6] : memref<128x128xbf16, #tpu.memory_space<vmem>>, vector<128x128xbf16>
    tpu.vector_store %arg4[%c0_5, %c0_6], %8 {strides = array<i32>} : memref<128x128xbf16, #tpu.memory_space<vmem>>, vector<128x128xbf16>,
    return
  }
  func.func @transform_0(%arg0: i32) -> (i32, i32) {
    %c0_i32 = arith.constant 0 : i32
    %c0_i32_0 = arith.constant 0 : i32
    return %arg0, %c0_i32 : i32, i32
  }
  func.func @transform_1(%arg0: i32) -> (i32, i32) {
    %c0_i32 = arith.constant 0 : i32
    %c0_i32_0 = arith.constant 0 : i32
    %c0_i32_1 = arith.constant 0 : i32
    return %c0_i32, %c0_i32_0 : i32, i32
  }
  func.func @transform_2(%arg0: i32) -> (i32, i32) {
    %c0_i32 = arith.constant 0 : i32
    %c0_i32_0 = arith.constant 0 : i32
    %c0_i32_1 = arith.constant 0 : i32
    return %c0_i32, %c0_i32_0 : i32, i32
  }
  func.func @transform_3(%arg0: i32) -> (i32, i32) {
    %c0_i32 = arith.constant 0 : i32
    %c0_i32_0 = arith.constant 0 : i32
    return %arg0, %c0_i32 : i32, i32
  }
}

module attributes {stable_mosaic.version = 11 : i64} {
  func.func @kernel(%arg0: i32, %arg1: memref<128x128xbf16, #tpu.memory_space<vmem>>, %arg2: memref<1x128xf32, #tpu.memory_space<vmem>>, %arg3: memref<1x128xf32, #tpu.memory_space<vmem>>, %arg4: memref<128x128xbf16, #tpu.memory_space<vmem>>) attributes {dimension_semantics = [#tpu.dimension_semantics<parallel>], iteration_bounds = array<i64: 1>, scalar_prefetch = 0 : i64, scratch_operands = 0 : i64, tpu.core_type = #tpu.core_type<tc>, window_params = [{transform_indices = @transform_0, window_bounds = array<i64: 128, 128>}, {pipeline_mode = #tpu.pipeline_mode<synchronous>, transform_indices = @transform_1, window_bounds = array<i64: 1, 128>}, {pipeline_mode = #tpu.pipeline_mode<synchronous>, transform_indices = @transform_2, window_bounds = array<i64: 1, 128>}, {transform_indices = @transform_3, window_bounds = array<i64: 128, 128>}]} {
    %c0 = arith.constant 0 : index
    %c0_0 = arith.constant 0 : index
    %0 = vector.load %arg1[%c0, %c0_0] : memref<128x128xbf16, #tpu.memory_space<vmem>>, vector<128x128xbf16>
    %1 = arith.extf %0 : vector<128x128xbf16> to vector<128x128xf32>
    %c0_1 = arith.constant 0 : index
    %c0_2 = arith.constant 0 : index
    %2 = vector.load %arg2[%c0_1, %c0_2] : memref<1x128xf32, #tpu.memory_space<vmem>>, vector<1x128xf32>
    %3 = vector.broadcast %2 : vector<1x128xf32> to vector<128x128xf32>
    %4 = arith.mulf %1, %3 : vector<128x128xf32>
    %c0_3 = arith.constant 0 : index
    %c0_4 = arith.constant 0 : index
    %5 = vector.load %arg3[%c0_3, %c0_4] : memref<1x128xf32, #tpu.memory_space<vmem>>, vector<1x128xf32>
    %6 = vector.broadcast %5 : vector<1x128xf32> to vector<128x128xf32>
    %7 = arith.addf %4, %6 : vector<128x128xf32>
    %cst = arith.constant 0.000000e+00 : f32
    %8 = vector.broadcast %cst : f32 to vector<128x128xf32>
    %9 = arith.maximumf %7, %8 : vector<128x128xf32>
    %10 = arith.truncf %9 : vector<128x128xf32> to vector<128x128xbf16>
    %c0_5 = arith.constant 0 : index
    %c0_6 = arith.constant 0 : index
    %11 = vector.load %arg4[%c0_5, %c0_6] : memref<128x128xbf16, #tpu.memory_space<vmem>>, vector<128x128xbf16>
    tpu.vector_store %arg4[%c0_5, %c0_6], %10 {strides = array<i32>} : memref<128x128xbf16, #tpu.memory_space<vmem>>, vector<128x128xbf16>,
    return
  }
  func.func @transform_0(%arg0: i32) -> (i32, i32) {
    %c0_i32 = arith.constant 0 : i32
    %c0_i32_0 = arith.constant 0 : i32
    return %arg0, %c0_i32 : i32, i32
  }
  func.func @transform_1(%arg0: i32) -> (i32, i32) {
    %c0_i32 = arith.constant 0 : i32
    %c0_i32_0 = arith.constant 0 : i32
    %c0_i32_1 = arith.constant 0 : i32
    return %c0_i32, %c0_i32_0 : i32, i32
  }
  func.func @transform_2(%arg0: i32) -> (i32, i32) {
    %c0_i32 = arith.constant 0 : i32
    %c0_i32_0 = arith.constant 0 : i32
    %c0_i32_1 = arith.constant 0 : i32
    return %c0_i32, %c0_i32_0 : i32, i32
  }
  func.func @transform_3(%arg0: i32) -> (i32, i32) {
    %c0_i32 = arith.constant 0 : i32
    %c0_i32_0 = arith.constant 0 : i32
    return %arg0, %c0_i32 : i32, i32
  }
}

module attributes {stable_mosaic.version = 11 : i64} {
  func.func @kernel(%arg0: i32, %arg1: i32, %arg2: memref<128x384xbf16, #tpu.memory_space<vmem>>, %arg3: memref<384x128xbf16, #tpu.memory_space<vmem>>, %arg4: memref<128x128xbf16, #tpu.memory_space<vmem>>, %arg5: memref<8x128xf32, #tpu.memory_space<vmem>>, %arg6: memref<128x128xf32, #tpu.memory_space<vmem>>) attributes {dimension_semantics = [#tpu.dimension_semantics<parallel>, #tpu.dimension_semantics<arbitrary>], iteration_bounds = array<i64: 1, 3>, scalar_prefetch = 0 : i64, scratch_operands = 1 : i64, tpu.core_type = #tpu.core_type<tc>, window_params = [{transform_indices = @transform_0, window_bounds = array<i64: 128, 384>}, {transform_indices = @transform_1, window_bounds = array<i64: 384, 128>}, {transform_indices = @transform_2, window_bounds = array<i64: 128, 128>}, {transform_indices = @transform_3, window_bounds = array<i64: 8, 128>}]} {
    %c0_i32 = arith.constant 0 : i32
    %0 = arith.cmpi eq, %arg1, %c0_i32 : i32
    %1 = arith.extui %0 : i1 to i32
    %c0_i32_0 = arith.constant 0 : i32
    %2 = arith.cmpi ne, %1, %c0_i32_0 : i32
    scf.if %2 {
      %cst_9 = arith.constant 0.000000e+00 : f32
      %12 = vector.broadcast %cst_9 : f32 to vector<128x128xf32>
      %c0_10 = arith.constant 0 : index
      %c0_11 = arith.constant 0 : index
      %13 = vector.load %arg6[%c0_10, %c0_11] : memref<128x128xf32, #tpu.memory_space<vmem>>, vector<128x128xf32>
      tpu.vector_store %arg6[%c0_10, %c0_11], %12 {strides = array<i32>} : memref<128x128xf32, #tpu.memory_space<vmem>>, vector<128x128xf32>,
    } else {
    }
    %c0 = arith.constant 0 : index
    %c0_1 = arith.constant 0 : index
    %3 = vector.load %arg6[%c0, %c0_1] : memref<128x128xf32, #tpu.memory_space<vmem>>, vector<128x128xf32>
    %c0_2 = arith.constant 0 : index
    %c0_3 = arith.constant 0 : index
    %4 = vector.load %arg2[%c0_2, %c0_3] : memref<128x384xbf16, #tpu.memory_space<vmem>>, vector<128x384xbf16>
    %c0_4 = arith.constant 0 : index
    %c0_5 = arith.constant 0 : index
    %5 = vector.load %arg3[%c0_4, %c0_5] : memref<384x128xbf16, #tpu.memory_space<vmem>>, vector<384x128xbf16>
    %cst = arith.constant dense<0.000000e+00> : vector<128x128xf32>
    %6 = tpu.matmul %4, %5, %cst {dimension_numbers = #tpu.dot_dimension_numbers<[1], [0], [0], [1], [0, 0, 1, 1], [], []>} : vector<128x384xbf16>, vector<384x128xbf16>, vector<128x128xf32> -> vector<128x128xf32>
    %7 = arith.addf %3, %6 : vector<128x128xf32>
    %c0_6 = arith.constant 0 : index
    %c0_7 = arith.constant 0 : index
    %8 = vector.load %arg6[%c0_6, %c0_7] : memref<128x128xf32, #tpu.memory_space<vmem>>, vector<128x128xf32>
    tpu.vector_store %arg6[%c0_6, %c0_7], %7 {strides = array<i32>} : memref<128x128xf32, #tpu.memory_space<vmem>>, vector<128x128xf32>,
    %c2_i32 = arith.constant 2 : i32
    %9 = arith.cmpi eq, %arg1, %c2_i32 : i32
    %10 = arith.extui %9 : i1 to i32
    %c0_i32_8 = arith.constant 0 : i32
    %11 = arith.cmpi ne, %10, %c0_i32_8 : i32
    scf.if %11 {
      %c0_9 = arith.constant 0 : index
      %c0_10 = arith.constant 0 : index
      %12 = vector.load %arg6[%c0_9, %c0_10] : memref<128x128xf32, #tpu.memory_space<vmem>>, vector<128x128xf32>
      %13 = arith.truncf %12 : vector<128x128xf32> to vector<128x128xbf16>
      %c0_11 = arith.constant 0 : index
      %c0_12 = arith.constant 0 : index
      %14 = vector.load %arg4[%c0_11, %c0_12] : memref<128x128xbf16, #tpu.memory_space<vmem>>, vector<128x128xbf16>
      tpu.vector_store %arg4[%c0_11, %c0_12], %13 {strides = array<i32>} : memref<128x128xbf16, #tpu.memory_space<vmem>>, vector<128x128xbf16>,
      %cst_13 = arith.constant dense<0.000000e+00> : vector<128xf32>
      %15 = vector.multi_reduction <add>, %12, %cst_13 [0] : vector<128x128xf32> to vector<128xf32>
      %16 = vector.shape_cast %15 : vector<128xf32> to vector<1x128xf32>
      %17 = arith.mulf %12, %12 : vector<128x128xf32>
      %cst_14 = arith.constant dense<0.000000e+00> : vector<128xf32>
      %18 = vector.multi_reduction <add>, %17, %cst_14 [0] : vector<128x128xf32> to vector<128xf32>
      %19 = vector.shape_cast %18 : vector<128xf32> to vector<1x128xf32>
      %cst_15 = arith.constant 0.000000e+00 : f32
      %20 = vector.broadcast %cst_15 : f32 to vector<6x128xf32>
      %21 = tpu.concatenate %16, %19, %20 in 0 : vector<1x128xf32>, vector<1x128xf32>, vector<6x128xf32> -> vector<8x128xf32>
      %c0_16 = arith.constant 0 : index
      %c0_17 = arith.constant 0 : index
      %22 = vector.load %arg5[%c0_16, %c0_17] : memref<8x128xf32, #tpu.memory_space<vmem>>, vector<8x128xf32>
      tpu.vector_store %arg5[%c0_16, %c0_17], %21 {strides = array<i32>} : memref<8x128xf32, #tpu.memory_space<vmem>>, vector<8x128xf32>,
    } else {
    }
    return
  }
  func.func @transform_0(%arg0: i32, %arg1: i32) -> (i32, i32) {
    %c0_i32 = arith.constant 0 : i32
    return %arg0, %arg1 : i32, i32
  }
  func.func @transform_1(%arg0: i32, %arg1: i32) -> (i32, i32) {
    %c0_i32 = arith.constant 0 : i32
    %c0_i32_0 = arith.constant 0 : i32
    return %arg1, %c0_i32 : i32, i32
  }
  func.func @transform_2(%arg0: i32, %arg1: i32) -> (i32, i32) {
    %c0_i32 = arith.constant 0 : i32
    %c0_i32_0 = arith.constant 0 : i32
    return %arg0, %c0_i32 : i32, i32
  }
  func.func @transform_3(%arg0: i32, %arg1: i32) -> (i32, i32) {
    %c0_i32 = arith.constant 0 : i32
    %c0_i32_0 = arith.constant 0 : i32
    return %arg0, %c0_i32 : i32, i32
  }
}

module attributes {stable_mosaic.version = 11 : i64} {
  func.func @kernel(%arg0: i32, %arg1: memref<128x128xbf16, #tpu.memory_space<vmem>>, %arg2: memref<1x128xf32, #tpu.memory_space<vmem>>, %arg3: memref<1x128xf32, #tpu.memory_space<vmem>>, %arg4: memref<128x128xbf16, #tpu.memory_space<vmem>>, %arg5: memref<128x128xbf16, #tpu.memory_space<vmem>>) attributes {dimension_semantics = [#tpu.dimension_semantics<parallel>], iteration_bounds = array<i64: 1>, scalar_prefetch = 0 : i64, scratch_operands = 0 : i64, tpu.core_type = #tpu.core_type<tc>, window_params = [{transform_indices = @transform_0, window_bounds = array<i64: 128, 128>}, {pipeline_mode = #tpu.pipeline_mode<synchronous>, transform_indices = @transform_1, window_bounds = array<i64: 1, 128>}, {pipeline_mode = #tpu.pipeline_mode<synchronous>, transform_indices = @transform_2, window_bounds = array<i64: 1, 128>}, {transform_indices = @transform_3, window_bounds = array<i64: 128, 128>}, {transform_indices = @transform_4, window_bounds = array<i64: 128, 128>}]} {
    %c0 = arith.constant 0 : index
    %c0_0 = arith.constant 0 : index
    %0 = vector.load %arg1[%c0, %c0_0] : memref<128x128xbf16, #tpu.memory_space<vmem>>, vector<128x128xbf16>
    %1 = arith.extf %0 : vector<128x128xbf16> to vector<128x128xf32>
    %c0_1 = arith.constant 0 : index
    %c0_2 = arith.constant 0 : index
    %2 = vector.load %arg2[%c0_1, %c0_2] : memref<1x128xf32, #tpu.memory_space<vmem>>, vector<1x128xf32>
    %3 = vector.broadcast %2 : vector<1x128xf32> to vector<128x128xf32>
    %4 = arith.mulf %1, %3 : vector<128x128xf32>
    %c0_3 = arith.constant 0 : index
    %c0_4 = arith.constant 0 : index
    %5 = vector.load %arg3[%c0_3, %c0_4] : memref<1x128xf32, #tpu.memory_space<vmem>>, vector<1x128xf32>
    %6 = vector.broadcast %5 : vector<1x128xf32> to vector<128x128xf32>
    %7 = arith.addf %4, %6 : vector<128x128xf32>
    %c0_5 = arith.constant 0 : index
    %c0_6 = arith.constant 0 : index
    %8 = vector.load %arg4[%c0_5, %c0_6] : memref<128x128xbf16, #tpu.memory_space<vmem>>, vector<128x128xbf16>
    %9 = arith.extf %8 : vector<128x128xbf16> to vector<128x128xf32>
    %10 = arith.addf %7, %9 : vector<128x128xf32>
    %cst = arith.constant 0.000000e+00 : f32
    %11 = vector.broadcast %cst : f32 to vector<128x128xf32>
    %12 = arith.maximumf %10, %11 : vector<128x128xf32>
    %13 = arith.truncf %12 : vector<128x128xf32> to vector<128x128xbf16>
    %c0_7 = arith.constant 0 : index
    %c0_8 = arith.constant 0 : index
    %14 = vector.load %arg5[%c0_7, %c0_8] : memref<128x128xbf16, #tpu.memory_space<vmem>>, vector<128x128xbf16>
    tpu.vector_store %arg5[%c0_7, %c0_8], %13 {strides = array<i32>} : memref<128x128xbf16, #tpu.memory_space<vmem>>, vector<128x128xbf16>,
    return
  }
  func.func @transform_0(%arg0: i32) -> (i32, i32) {
    %c0_i32 = arith.constant 0 : i32
    %c0_i32_0 = arith.constant 0 : i32
    return %arg0, %c0_i32 : i32, i32
  }
  func.func @transform_1(%arg0: i32) -> (i32, i32) {
    %c0_i32 = arith.constant 0 : i32
    %c0_i32_0 = arith.constant 0 : i32
    %c0_i32_1 = arith.constant 0 : i32
    return %c0_i32, %c0_i32_0 : i32, i32
  }
  func.func @transform_2(%arg0: i32) -> (i32, i32) {
    %c0_i32 = arith.constant 0 : i32
    %c0_i32_0 = arith.constant 0 : i32
    %c0_i32_1 = arith.constant 0 : i32
    return %c0_i32, %c0_i32_0 : i32, i32
  }
  func.func @transform_3(%arg0: i32) -> (i32, i32) {
    %c0_i32 = arith.constant 0 : i32
    %c0_i32_0 = arith.constant 0 : i32
    return %arg0, %c0_i32 : i32, i32
  }
  func.func @transform_4(%arg0: i32) -> (i32, i32) {
    %c0_i32 = arith.constant 0 : i32
    %c0_i32_0 = arith.constant 0 : i32
    return %arg0, %c0_i32 : i32, i32
  }
}

module attributes {stable_mosaic.version = 11 : i64} {
  func.func @kernel(%arg0: i32, %arg1: memref<32x128xbf16, #tpu.memory_space<vmem>>, %arg2: memref<1x128xf32, #tpu.memory_space<vmem>>, %arg3: memref<1x128xf32, #tpu.memory_space<vmem>>, %arg4: memref<32x128xbf16, #tpu.memory_space<vmem>>) attributes {dimension_semantics = [#tpu.dimension_semantics<parallel>], iteration_bounds = array<i64: 1>, scalar_prefetch = 0 : i64, scratch_operands = 0 : i64, tpu.core_type = #tpu.core_type<tc>, window_params = [{transform_indices = @transform_0, window_bounds = array<i64: 32, 128>}, {pipeline_mode = #tpu.pipeline_mode<synchronous>, transform_indices = @transform_1, window_bounds = array<i64: 1, 128>}, {pipeline_mode = #tpu.pipeline_mode<synchronous>, transform_indices = @transform_2, window_bounds = array<i64: 1, 128>}, {transform_indices = @transform_3, window_bounds = array<i64: 32, 128>}]} {
    %c0 = arith.constant 0 : index
    %c0_0 = arith.constant 0 : index
    %0 = vector.load %arg1[%c0, %c0_0] : memref<32x128xbf16, #tpu.memory_space<vmem>>, vector<32x128xbf16>
    %1 = arith.extf %0 : vector<32x128xbf16> to vector<32x128xf32>
    %c0_1 = arith.constant 0 : index
    %c0_2 = arith.constant 0 : index
    %2 = vector.load %arg2[%c0_1, %c0_2] : memref<1x128xf32, #tpu.memory_space<vmem>>, vector<1x128xf32>
    %3 = vector.broadcast %2 : vector<1x128xf32> to vector<32x128xf32>
    %4 = arith.mulf %1, %3 : vector<32x128xf32>
    %c0_3 = arith.constant 0 : index
    %c0_4 = arith.constant 0 : index
    %5 = vector.load %arg3[%c0_3, %c0_4] : memref<1x128xf32, #tpu.memory_space<vmem>>, vector<1x128xf32>
    %6 = vector.broadcast %5 : vector<1x128xf32> to vector<32x128xf32>
    %7 = arith.addf %4, %6 : vector<32x128xf32>
    %8 = arith.truncf %7 : vector<32x128xf32> to vector<32x128xbf16>
    %c0_5 = arith.constant 0 : index
    %c0_6 = arith.constant 0 : index
    %9 = vector.load %arg4[%c0_5, %c0_6] : memref<32x128xbf16, #tpu.memory_space<vmem>>, vector<32x128xbf16>
    tpu.vector_store %arg4[%c0_5, %c0_6], %8 {strides = array<i32>} : memref<32x128xbf16, #tpu.memory_space<vmem>>, vector<32x128xbf16>,
    return
  }
  func.func @transform_0(%arg0: i32) -> (i32, i32) {
    %c0_i32 = arith.constant 0 : i32
    %c0_i32_0 = arith.constant 0 : i32
    return %arg0, %c0_i32 : i32, i32
  }
  func.func @transform_1(%arg0: i32) -> (i32, i32) {
    %c0_i32 = arith.constant 0 : i32
    %c0_i32_0 = arith.constant 0 : i32
    %c0_i32_1 = arith.constant 0 : i32
    return %c0_i32, %c0_i32_0 : i32, i32
  }
  func.func @transform_2(%arg0: i32) -> (i32, i32) {
    %c0_i32 = arith.constant 0 : i32
    %c0_i32_0 = arith.constant 0 : i32
    %c0_i32_1 = arith.constant 0 : i32
    return %c0_i32, %c0_i32_0 : i32, i32
  }
  func.func @transform_3(%arg0: i32) -> (i32, i32) {
    %c0_i32 = arith.constant 0 : i32
    %c0_i32_0 = arith.constant 0 : i32
    return %arg0, %c0_i32 : i32, i32
  }
}

module attributes {stable_mosaic.version = 11 : i64} {
  func.func @kernel(%arg0: i32, %arg1: i32, %arg2: memref<32x128xbf16, #tpu.memory_space<vmem>>, %arg3: memref<128x128xbf16, #tpu.memory_space<vmem>>, %arg4: memref<32x128xbf16, #tpu.memory_space<vmem>>, %arg5: memref<8x128xf32, #tpu.memory_space<vmem>>, %arg6: memref<32x128xf32, #tpu.memory_space<vmem>>) attributes {dimension_semantics = [#tpu.dimension_semantics<parallel>, #tpu.dimension_semantics<arbitrary>], iteration_bounds = array<i64: 1, 1>, scalar_prefetch = 0 : i64, scratch_operands = 1 : i64, tpu.core_type = #tpu.core_type<tc>, window_params = [{transform_indices = @transform_0, window_bounds = array<i64: 32, 128>}, {transform_indices = @transform_1, window_bounds = array<i64: 128, 128>}, {transform_indices = @transform_2, window_bounds = array<i64: 32, 128>}, {transform_indices = @transform_3, window_bounds = array<i64: 8, 128>}]} {
    %c0_i32 = arith.constant 0 : i32
    %0 = arith.cmpi eq, %arg1, %c0_i32 : i32
    %1 = arith.extui %0 : i1 to i32
    %c0_i32_0 = arith.constant 0 : i32
    %2 = arith.cmpi ne, %1, %c0_i32_0 : i32
    scf.if %2 {
      %cst_10 = arith.constant 0.000000e+00 : f32
      %12 = vector.broadcast %cst_10 : f32 to vector<32x128xf32>
      %c0_11 = arith.constant 0 : index
      %c0_12 = arith.constant 0 : index
      %13 = vector.load %arg6[%c0_11, %c0_12] : memref<32x128xf32, #tpu.memory_space<vmem>>, vector<32x128xf32>
      tpu.vector_store %arg6[%c0_11, %c0_12], %12 {strides = array<i32>} : memref<32x128xf32, #tpu.memory_space<vmem>>, vector<32x128xf32>,
    } else {
    }
    %c0 = arith.constant 0 : index
    %c0_1 = arith.constant 0 : index
    %3 = vector.load %arg6[%c0, %c0_1] : memref<32x128xf32, #tpu.memory_space<vmem>>, vector<32x128xf32>
    %c0_2 = arith.constant 0 : index
    %c0_3 = arith.constant 0 : index
    %4 = vector.load %arg2[%c0_2, %c0_3] : memref<32x128xbf16, #tpu.memory_space<vmem>>, vector<32x128xbf16>
    %c0_4 = arith.constant 0 : index
    %c0_5 = arith.constant 0 : index
    %5 = vector.load %arg3[%c0_4, %c0_5] : memref<128x128xbf16, #tpu.memory_space<vmem>>, vector<128x128xbf16>
    %cst = arith.constant dense<0.000000e+00> : vector<32x128xf32>
    %6 = tpu.matmul %4, %5, %cst {dimension_numbers = #tpu.dot_dimension_numbers<[1], [0], [0], [1], [0, 0, 1, 1], [], []>} : vector<32x128xbf16>, vector<128x128xbf16>, vector<32x128xf32> -> vector<32x128xf32>
    %7 = arith.addf %3, %6 : vector<32x128xf32>
    %c0_6 = arith.constant 0 : index
    %c0_7 = arith.constant 0 : index
    %8 = vector.load %arg6[%c0_6, %c0_7] : memref<32x128xf32, #tpu.memory_space<vmem>>, vector<32x128xf32>
    tpu.vector_store %arg6[%c0_6, %c0_7], %7 {strides = array<i32>} : memref<32x128xf32, #tpu.memory_space<vmem>>, vector<32x128xf32>,
    %c0_i32_8 = arith.constant 0 : i32
    %9 = arith.cmpi eq, %arg1, %c0_i32_8 : i32
    %10 = arith.extui %9 : i1 to i32
    %c0_i32_9 = arith.constant 0 : i32
    %11 = arith.cmpi ne, %10, %c0_i32_9 : i32
    scf.if %11 {
      %c0_10 = arith.constant 0 : index
      %c0_11 = arith.constant 0 : index
      %12 = vector.load %arg6[%c0_10, %c0_11] : memref<32x128xf32, #tpu.memory_space<vmem>>, vector<32x128xf32>
      %13 = arith.truncf %12 : vector<32x128xf32> to vector<32x128xbf16>
      %c0_12 = arith.constant 0 : index
      %c0_13 = arith.constant 0 : index
      %14 = vector.load %arg4[%c0_12, %c0_13] : memref<32x128xbf16, #tpu.memory_space<vmem>>, vector<32x128xbf16>
      tpu.vector_store %arg4[%c0_12, %c0_13], %13 {strides = array<i32>} : memref<32x128xbf16, #tpu.memory_space<vmem>>, vector<32x128xbf16>,
      %cst_14 = arith.constant dense<0.000000e+00> : vector<128xf32>
      %15 = vector.multi_reduction <add>, %12, %cst_14 [0] : vector<32x128xf32> to vector<128xf32>
      %16 = vector.shape_cast %15 : vector<128xf32> to vector<1x128xf32>
      %17 = arith.mulf %12, %12 : vector<32x128xf32>
      %cst_15 = arith.constant dense<0.000000e+00> : vector<128xf32>
      %18 = vector.multi_reduction <add>, %17, %cst_15 [0] : vector<32x128xf32> to vector<128xf32>
      %19 = vector.shape_cast %18 : vector<128xf32> to vector<1x128xf32>
      %cst_16 = arith.constant 0.000000e+00 : f32
      %20 = vector.broadcast %cst_16 : f32 to vector<6x128xf32>
      %21 = tpu.concatenate %16, %19, %20 in 0 : vector<1x128xf32>, vector<1x128xf32>, vector<6x128xf32> -> vector<8x128xf32>
      %c0_17 = arith.constant 0 : index
      %c0_18 = arith.constant 0 : index
      %22 = vector.load %arg5[%c0_17, %c0_18] : memref<8x128xf32, #tpu.memory_space<vmem>>, vector<8x128xf32>
      tpu.vector_store %arg5[%c0_17, %c0_18], %21 {strides = array<i32>} : memref<8x128xf32, #tpu.memory_space<vmem>>, vector<8x128xf32>,
    } else {
    }
    return
  }
  func.func @transform_0(%arg0: i32, %arg1: i32) -> (i32, i32) {
    %c0_i32 = arith.constant 0 : i32
    return %arg0, %arg1 : i32, i32
  }
  func.func @transform_1(%arg0: i32, %arg1: i32) -> (i32, i32) {
    %c0_i32 = arith.constant 0 : i32
    %c0_i32_0 = arith.constant 0 : i32
    return %arg1, %c0_i32 : i32, i32
  }
  func.func @transform_2(%arg0: i32, %arg1: i32) -> (i32, i32) {
    %c0_i32 = arith.constant 0 : i32
    %c0_i32_0 = arith.constant 0 : i32
    return %arg0, %c0_i32 : i32, i32
  }
  func.func @transform_3(%arg0: i32, %arg1: i32) -> (i32, i32) {
    %c0_i32 = arith.constant 0 : i32
    %c0_i32_0 = arith.constant 0 : i32
    return %arg0, %c0_i32 : i32, i32
  }
}

module attributes {stable_mosaic.version = 11 : i64} {
  func.func @kernel(%arg0: i32, %arg1: memref<32x128xbf16, #tpu.memory_space<vmem>>, %arg2: memref<1x128xf32, #tpu.memory_space<vmem>>, %arg3: memref<1x128xf32, #tpu.memory_space<vmem>>, %arg4: memref<32x128xbf16, #tpu.memory_space<vmem>>) attributes {dimension_semantics = [#tpu.dimension_semantics<parallel>], iteration_bounds = array<i64: 1>, scalar_prefetch = 0 : i64, scratch_operands = 0 : i64, tpu.core_type = #tpu.core_type<tc>, window_params = [{transform_indices = @transform_0, window_bounds = array<i64: 32, 128>}, {pipeline_mode = #tpu.pipeline_mode<synchronous>, transform_indices = @transform_1, window_bounds = array<i64: 1, 128>}, {pipeline_mode = #tpu.pipeline_mode<synchronous>, transform_indices = @transform_2, window_bounds = array<i64: 1, 128>}, {transform_indices = @transform_3, window_bounds = array<i64: 32, 128>}]} {
    %c0 = arith.constant 0 : index
    %c0_0 = arith.constant 0 : index
    %0 = vector.load %arg1[%c0, %c0_0] : memref<32x128xbf16, #tpu.memory_space<vmem>>, vector<32x128xbf16>
    %1 = arith.extf %0 : vector<32x128xbf16> to vector<32x128xf32>
    %c0_1 = arith.constant 0 : index
    %c0_2 = arith.constant 0 : index
    %2 = vector.load %arg2[%c0_1, %c0_2] : memref<1x128xf32, #tpu.memory_space<vmem>>, vector<1x128xf32>
    %3 = vector.broadcast %2 : vector<1x128xf32> to vector<32x128xf32>
    %4 = arith.mulf %1, %3 : vector<32x128xf32>
    %c0_3 = arith.constant 0 : index
    %c0_4 = arith.constant 0 : index
    %5 = vector.load %arg3[%c0_3, %c0_4] : memref<1x128xf32, #tpu.memory_space<vmem>>, vector<1x128xf32>
    %6 = vector.broadcast %5 : vector<1x128xf32> to vector<32x128xf32>
    %7 = arith.addf %4, %6 : vector<32x128xf32>
    %cst = arith.constant 0.000000e+00 : f32
    %8 = vector.broadcast %cst : f32 to vector<32x128xf32>
    %9 = arith.maximumf %7, %8 : vector<32x128xf32>
    %10 = arith.truncf %9 : vector<32x128xf32> to vector<32x128xbf16>
    %c0_5 = arith.constant 0 : index
    %c0_6 = arith.constant 0 : index
    %11 = vector.load %arg4[%c0_5, %c0_6] : memref<32x128xbf16, #tpu.memory_space<vmem>>, vector<32x128xbf16>
    tpu.vector_store %arg4[%c0_5, %c0_6], %10 {strides = array<i32>} : memref<32x128xbf16, #tpu.memory_space<vmem>>, vector<32x128xbf16>,
    return
  }
  func.func @transform_0(%arg0: i32) -> (i32, i32) {
    %c0_i32 = arith.constant 0 : i32
    %c0_i32_0 = arith.constant 0 : i32
    return %arg0, %c0_i32 : i32, i32
  }
  func.func @transform_1(%arg0: i32) -> (i32, i32) {
    %c0_i32 = arith.constant 0 : i32
    %c0_i32_0 = arith.constant 0 : i32
    %c0_i32_1 = arith.constant 0 : i32
    return %c0_i32, %c0_i32_0 : i32, i32
  }
  func.func @transform_2(%arg0: i32) -> (i32, i32) {
    %c0_i32 = arith.constant 0 : i32
    %c0_i32_0 = arith.constant 0 : i32
    %c0_i32_1 = arith.constant 0 : i32
    return %c0_i32, %c0_i32_0 : i32, i32
  }
  func.func @transform_3(%arg0: i32) -> (i32, i32) {
    %c0_i32 = arith.constant 0 : i32
    %c0_i32_0 = arith.constant 0 : i32
    return %arg0, %c0_i32 : i32, i32
  }
}

module attributes {stable_mosaic.version = 11 : i64} {
  func.func @kernel(%arg0: i32, %arg1: i32, %arg2: memref<32x384xbf16, #tpu.memory_space<vmem>>, %arg3: memref<384x128xbf16, #tpu.memory_space<vmem>>, %arg4: memref<32x128xbf16, #tpu.memory_space<vmem>>, %arg5: memref<8x128xf32, #tpu.memory_space<vmem>>, %arg6: memref<32x128xf32, #tpu.memory_space<vmem>>) attributes {dimension_semantics = [#tpu.dimension_semantics<parallel>, #tpu.dimension_semantics<arbitrary>], iteration_bounds = array<i64: 1, 3>, scalar_prefetch = 0 : i64, scratch_operands = 1 : i64, tpu.core_type = #tpu.core_type<tc>, window_params = [{transform_indices = @transform_0, window_bounds = array<i64: 32, 384>}, {transform_indices = @transform_1, window_bounds = array<i64: 384, 128>}, {transform_indices = @transform_2, window_bounds = array<i64: 32, 128>}, {transform_indices = @transform_3, window_bounds = array<i64: 8, 128>}]} {
    %c0_i32 = arith.constant 0 : i32
    %0 = arith.cmpi eq, %arg1, %c0_i32 : i32
    %1 = arith.extui %0 : i1 to i32
    %c0_i32_0 = arith.constant 0 : i32
    %2 = arith.cmpi ne, %1, %c0_i32_0 : i32
    scf.if %2 {
      %cst_9 = arith.constant 0.000000e+00 : f32
      %12 = vector.broadcast %cst_9 : f32 to vector<32x128xf32>
      %c0_10 = arith.constant 0 : index
      %c0_11 = arith.constant 0 : index
      %13 = vector.load %arg6[%c0_10, %c0_11] : memref<32x128xf32, #tpu.memory_space<vmem>>, vector<32x128xf32>
      tpu.vector_store %arg6[%c0_10, %c0_11], %12 {strides = array<i32>} : memref<32x128xf32, #tpu.memory_space<vmem>>, vector<32x128xf32>,
    } else {
    }
    %c0 = arith.constant 0 : index
    %c0_1 = arith.constant 0 : index
    %3 = vector.load %arg6[%c0, %c0_1] : memref<32x128xf32, #tpu.memory_space<vmem>>, vector<32x128xf32>
    %c0_2 = arith.constant 0 : index
    %c0_3 = arith.constant 0 : index
    %4 = vector.load %arg2[%c0_2, %c0_3] : memref<32x384xbf16, #tpu.memory_space<vmem>>, vector<32x384xbf16>
    %c0_4 = arith.constant 0 : index
    %c0_5 = arith.constant 0 : index
    %5 = vector.load %arg3[%c0_4, %c0_5] : memref<384x128xbf16, #tpu.memory_space<vmem>>, vector<384x128xbf16>
    %cst = arith.constant dense<0.000000e+00> : vector<32x128xf32>
    %6 = tpu.matmul %4, %5, %cst {dimension_numbers = #tpu.dot_dimension_numbers<[1], [0], [0], [1], [0, 0, 1, 1], [], []>} : vector<32x384xbf16>, vector<384x128xbf16>, vector<32x128xf32> -> vector<32x128xf32>
    %7 = arith.addf %3, %6 : vector<32x128xf32>
    %c0_6 = arith.constant 0 : index
    %c0_7 = arith.constant 0 : index
    %8 = vector.load %arg6[%c0_6, %c0_7] : memref<32x128xf32, #tpu.memory_space<vmem>>, vector<32x128xf32>
    tpu.vector_store %arg6[%c0_6, %c0_7], %7 {strides = array<i32>} : memref<32x128xf32, #tpu.memory_space<vmem>>, vector<32x128xf32>,
    %c2_i32 = arith.constant 2 : i32
    %9 = arith.cmpi eq, %arg1, %c2_i32 : i32
    %10 = arith.extui %9 : i1 to i32
    %c0_i32_8 = arith.constant 0 : i32
    %11 = arith.cmpi ne, %10, %c0_i32_8 : i32
    scf.if %11 {
      %c0_9 = arith.constant 0 : index
      %c0_10 = arith.constant 0 : index
      %12 = vector.load %arg6[%c0_9, %c0_10] : memref<32x128xf32, #tpu.memory_space<vmem>>, vector<32x128xf32>
      %13 = arith.truncf %12 : vector<32x128xf32> to vector<32x128xbf16>
      %c0_11 = arith.constant 0 : index
      %c0_12 = arith.constant 0 : index
      %14 = vector.load %arg4[%c0_11, %c0_12] : memref<32x128xbf16, #tpu.memory_space<vmem>>, vector<32x128xbf16>
      tpu.vector_store %arg4[%c0_11, %c0_12], %13 {strides = array<i32>} : memref<32x128xbf16, #tpu.memory_space<vmem>>, vector<32x128xbf16>,
      %cst_13 = arith.constant dense<0.000000e+00> : vector<128xf32>
      %15 = vector.multi_reduction <add>, %12, %cst_13 [0] : vector<32x128xf32> to vector<128xf32>
      %16 = vector.shape_cast %15 : vector<128xf32> to vector<1x128xf32>
      %17 = arith.mulf %12, %12 : vector<32x128xf32>
      %cst_14 = arith.constant dense<0.000000e+00> : vector<128xf32>
      %18 = vector.multi_reduction <add>, %17, %cst_14 [0] : vector<32x128xf32> to vector<128xf32>
      %19 = vector.shape_cast %18 : vector<128xf32> to vector<1x128xf32>
      %cst_15 = arith.constant 0.000000e+00 : f32
      %20 = vector.broadcast %cst_15 : f32 to vector<6x128xf32>
      %21 = tpu.concatenate %16, %19, %20 in 0 : vector<1x128xf32>, vector<1x128xf32>, vector<6x128xf32> -> vector<8x128xf32>
      %c0_16 = arith.constant 0 : index
      %c0_17 = arith.constant 0 : index
      %22 = vector.load %arg5[%c0_16, %c0_17] : memref<8x128xf32, #tpu.memory_space<vmem>>, vector<8x128xf32>
      tpu.vector_store %arg5[%c0_16, %c0_17], %21 {strides = array<i32>} : memref<8x128xf32, #tpu.memory_space<vmem>>, vector<8x128xf32>,
    } else {
    }
    return
  }
  func.func @transform_0(%arg0: i32, %arg1: i32) -> (i32, i32) {
    %c0_i32 = arith.constant 0 : i32
    return %arg0, %arg1 : i32, i32
  }
  func.func @transform_1(%arg0: i32, %arg1: i32) -> (i32, i32) {
    %c0_i32 = arith.constant 0 : i32
    %c0_i32_0 = arith.constant 0 : i32
    return %arg1, %c0_i32 : i32, i32
  }
  func.func @transform_2(%arg0: i32, %arg1: i32) -> (i32, i32) {
    %c0_i32 = arith.constant 0 : i32
    %c0_i32_0 = arith.constant 0 : i32
    return %arg0, %c0_i32 : i32, i32
  }
  func.func @transform_3(%arg0: i32, %arg1: i32) -> (i32, i32) {
    %c0_i32 = arith.constant 0 : i32
    %c0_i32_0 = arith.constant 0 : i32
    return %arg0, %c0_i32 : i32, i32
  }
}

module attributes {stable_mosaic.version = 11 : i64} {
  func.func @kernel(%arg0: i32, %arg1: i32, %arg2: memref<8x128xbf16, #tpu.memory_space<vmem>>, %arg3: memref<128x128xbf16, #tpu.memory_space<vmem>>, %arg4: memref<8x128xbf16, #tpu.memory_space<vmem>>, %arg5: memref<8x128xf32, #tpu.memory_space<vmem>>, %arg6: memref<8x128xf32, #tpu.memory_space<vmem>>) attributes {dimension_semantics = [#tpu.dimension_semantics<parallel>, #tpu.dimension_semantics<arbitrary>], iteration_bounds = array<i64: 1, 1>, scalar_prefetch = 0 : i64, scratch_operands = 1 : i64, tpu.core_type = #tpu.core_type<tc>, window_params = [{transform_indices = @transform_0, window_bounds = array<i64: 8, 128>}, {transform_indices = @transform_1, window_bounds = array<i64: 128, 128>}, {transform_indices = @transform_2, window_bounds = array<i64: 8, 128>}, {transform_indices = @transform_3, window_bounds = array<i64: 8, 128>}]} {
    %c0_i32 = arith.constant 0 : i32
    %0 = arith.cmpi eq, %arg1, %c0_i32 : i32
    %1 = arith.extui %0 : i1 to i32
    %c0_i32_0 = arith.constant 0 : i32
    %2 = arith.cmpi ne, %1, %c0_i32_0 : i32
    scf.if %2 {
      %cst_10 = arith.constant 0.000000e+00 : f32
      %12 = vector.broadcast %cst_10 : f32 to vector<8x128xf32>
      %c0_11 = arith.constant 0 : index
      %c0_12 = arith.constant 0 : index
      %13 = vector.load %arg6[%c0_11, %c0_12] : memref<8x128xf32, #tpu.memory_space<vmem>>, vector<8x128xf32>
      tpu.vector_store %arg6[%c0_11, %c0_12], %12 {strides = array<i32>} : memref<8x128xf32, #tpu.memory_space<vmem>>, vector<8x128xf32>,
    } else {
    }
    %c0 = arith.constant 0 : index
    %c0_1 = arith.constant 0 : index
    %3 = vector.load %arg6[%c0, %c0_1] : memref<8x128xf32, #tpu.memory_space<vmem>>, vector<8x128xf32>
    %c0_2 = arith.constant 0 : index
    %c0_3 = arith.constant 0 : index
    %4 = vector.load %arg2[%c0_2, %c0_3] : memref<8x128xbf16, #tpu.memory_space<vmem>>, vector<8x128xbf16>
    %c0_4 = arith.constant 0 : index
    %c0_5 = arith.constant 0 : index
    %5 = vector.load %arg3[%c0_4, %c0_5] : memref<128x128xbf16, #tpu.memory_space<vmem>>, vector<128x128xbf16>
    %cst = arith.constant dense<0.000000e+00> : vector<8x128xf32>
    %6 = tpu.matmul %4, %5, %cst {dimension_numbers = #tpu.dot_dimension_numbers<[1], [0], [0], [1], [0, 0, 1, 1], [], []>} : vector<8x128xbf16>, vector<128x128xbf16>, vector<8x128xf32> -> vector<8x128xf32>
    %7 = arith.addf %3, %6 : vector<8x128xf32>
    %c0_6 = arith.constant 0 : index
    %c0_7 = arith.constant 0 : index
    %8 = vector.load %arg6[%c0_6, %c0_7] : memref<8x128xf32, #tpu.memory_space<vmem>>, vector<8x128xf32>
    tpu.vector_store %arg6[%c0_6, %c0_7], %7 {strides = array<i32>} : memref<8x128xf32, #tpu.memory_space<vmem>>, vector<8x128xf32>,
    %c0_i32_8 = arith.constant 0 : i32
    %9 = arith.cmpi eq, %arg1, %c0_i32_8 : i32
    %10 = arith.extui %9 : i1 to i32
    %c0_i32_9 = arith.constant 0 : i32
    %11 = arith.cmpi ne, %10, %c0_i32_9 : i32
    scf.if %11 {
      %c0_10 = arith.constant 0 : index
      %c0_11 = arith.constant 0 : index
      %12 = vector.load %arg6[%c0_10, %c0_11] : memref<8x128xf32, #tpu.memory_space<vmem>>, vector<8x128xf32>
      %13 = arith.truncf %12 : vector<8x128xf32> to vector<8x128xbf16>
      %c0_12 = arith.constant 0 : index
      %c0_13 = arith.constant 0 : index
      %14 = vector.load %arg4[%c0_12, %c0_13] : memref<8x128xbf16, #tpu.memory_space<vmem>>, vector<8x128xbf16>
      tpu.vector_store %arg4[%c0_12, %c0_13], %13 {strides = array<i32>} : memref<8x128xbf16, #tpu.memory_space<vmem>>, vector<8x128xbf16>,
      %cst_14 = arith.constant dense<0.000000e+00> : vector<128xf32>
      %15 = vector.multi_reduction <add>, %12, %cst_14 [0] : vector<8x128xf32> to vector<128xf32>
      %16 = vector.shape_cast %15 : vector<128xf32> to vector<1x128xf32>
      %17 = arith.mulf %12, %12 : vector<8x128xf32>
      %cst_15 = arith.constant dense<0.000000e+00> : vector<128xf32>
      %18 = vector.multi_reduction <add>, %17, %cst_15 [0] : vector<8x128xf32> to vector<128xf32>
      %19 = vector.shape_cast %18 : vector<128xf32> to vector<1x128xf32>
      %cst_16 = arith.constant 0.000000e+00 : f32
      %20 = vector.broadcast %cst_16 : f32 to vector<6x128xf32>
      %21 = tpu.concatenate %16, %19, %20 in 0 : vector<1x128xf32>, vector<1x128xf32>, vector<6x128xf32> -> vector<8x128xf32>
      %c0_17 = arith.constant 0 : index
      %c0_18 = arith.constant 0 : index
      %22 = vector.load %arg5[%c0_17, %c0_18] : memref<8x128xf32, #tpu.memory_space<vmem>>, vector<8x128xf32>
      tpu.vector_store %arg5[%c0_17, %c0_18], %21 {strides = array<i32>} : memref<8x128xf32, #tpu.memory_space<vmem>>, vector<8x128xf32>,
    } else {
    }
    return
  }
  func.func @transform_0(%arg0: i32, %arg1: i32) -> (i32, i32) {
    %c0_i32 = arith.constant 0 : i32
    return %arg0, %arg1 : i32, i32
  }
  func.func @transform_1(%arg0: i32, %arg1: i32) -> (i32, i32) {
    %c0_i32 = arith.constant 0 : i32
    %c0_i32_0 = arith.constant 0 : i32
    return %arg1, %c0_i32 : i32, i32
  }
  func.func @transform_2(%arg0: i32, %arg1: i32) -> (i32, i32) {
    %c0_i32 = arith.constant 0 : i32
    %c0_i32_0 = arith.constant 0 : i32
    return %arg0, %c0_i32 : i32, i32
  }
  func.func @transform_3(%arg0: i32, %arg1: i32) -> (i32, i32) {
    %c0_i32 = arith.constant 0 : i32
    %c0_i32_0 = arith.constant 0 : i32
    return %arg0, %c0_i32 : i32, i32
  }
}

module attributes {stable_mosaic.version = 11 : i64} {
  func.func @kernel(%arg0: i32, %arg1: memref<32x128xbf16, #tpu.memory_space<vmem>>, %arg2: memref<1x128xf32, #tpu.memory_space<vmem>>, %arg3: memref<1x128xf32, #tpu.memory_space<vmem>>, %arg4: memref<32x128xbf16, #tpu.memory_space<vmem>>, %arg5: memref<32x128xbf16, #tpu.memory_space<vmem>>) attributes {dimension_semantics = [#tpu.dimension_semantics<parallel>], iteration_bounds = array<i64: 1>, scalar_prefetch = 0 : i64, scratch_operands = 0 : i64, tpu.core_type = #tpu.core_type<tc>, window_params = [{transform_indices = @transform_0, window_bounds = array<i64: 32, 128>}, {pipeline_mode = #tpu.pipeline_mode<synchronous>, transform_indices = @transform_1, window_bounds = array<i64: 1, 128>}, {pipeline_mode = #tpu.pipeline_mode<synchronous>, transform_indices = @transform_2, window_bounds = array<i64: 1, 128>}, {transform_indices = @transform_3, window_bounds = array<i64: 32, 128>}, {transform_indices = @transform_4, window_bounds = array<i64: 32, 128>}]} {
    %c0 = arith.constant 0 : index
    %c0_0 = arith.constant 0 : index
    %0 = vector.load %arg1[%c0, %c0_0] : memref<32x128xbf16, #tpu.memory_space<vmem>>, vector<32x128xbf16>
    %1 = arith.extf %0 : vector<32x128xbf16> to vector<32x128xf32>
    %c0_1 = arith.constant 0 : index
    %c0_2 = arith.constant 0 : index
    %2 = vector.load %arg2[%c0_1, %c0_2] : memref<1x128xf32, #tpu.memory_space<vmem>>, vector<1x128xf32>
    %3 = vector.broadcast %2 : vector<1x128xf32> to vector<32x128xf32>
    %4 = arith.mulf %1, %3 : vector<32x128xf32>
    %c0_3 = arith.constant 0 : index
    %c0_4 = arith.constant 0 : index
    %5 = vector.load %arg3[%c0_3, %c0_4] : memref<1x128xf32, #tpu.memory_space<vmem>>, vector<1x128xf32>
    %6 = vector.broadcast %5 : vector<1x128xf32> to vector<32x128xf32>
    %7 = arith.addf %4, %6 : vector<32x128xf32>
    %c0_5 = arith.constant 0 : index
    %c0_6 = arith.constant 0 : index
    %8 = vector.load %arg4[%c0_5, %c0_6] : memref<32x128xbf16, #tpu.memory_space<vmem>>, vector<32x128xbf16>
    %9 = arith.extf %8 : vector<32x128xbf16> to vector<32x128xf32>
    %10 = arith.addf %7, %9 : vector<32x128xf32>
    %cst = arith.constant 0.000000e+00 : f32
    %11 = vector.broadcast %cst : f32 to vector<32x128xf32>
    %12 = arith.maximumf %10, %11 : vector<32x128xf32>
    %13 = arith.truncf %12 : vector<32x128xf32> to vector<32x128xbf16>
    %c0_7 = arith.constant 0 : index
    %c0_8 = arith.constant 0 : index
    %14 = vector.load %arg5[%c0_7, %c0_8] : memref<32x128xbf16, #tpu.memory_space<vmem>>, vector<32x128xbf16>
    tpu.vector_store %arg5[%c0_7, %c0_8], %13 {strides = array<i32>} : memref<32x128xbf16, #tpu.memory_space<vmem>>, vector<32x128xbf16>,
    return
  }
  func.func @transform_0(%arg0: i32) -> (i32, i32) {
    %c0_i32 = arith.constant 0 : i32
    %c0_i32_0 = arith.constant 0 : i32
    return %arg0, %c0_i32 : i32, i32
  }
  func.func @transform_1(%arg0: i32) -> (i32, i32) {
    %c0_i32 = arith.constant 0 : i32
    %c0_i32_0 = arith.constant 0 : i32
    %c0_i32_1 = arith.constant 0 : i32
    return %c0_i32, %c0_i32_0 : i32, i32
  }
  func.func @transform_2(%arg0: i32) -> (i32, i32) {
    %c0_i32 = arith.constant 0 : i32
    %c0_i32_0 = arith.constant 0 : i32
    %c0_i32_1 = arith.constant 0 : i32
    return %c0_i32, %c0_i32_0 : i32, i32
  }
  func.func @transform_3(%arg0: i32) -> (i32, i32) {
    %c0_i32 = arith.constant 0 : i32
    %c0_i32_0 = arith.constant 0 : i32
    return %arg0, %c0_i32 : i32, i32
  }
  func.func @transform_4(%arg0: i32) -> (i32, i32) {
    %c0_i32 = arith.constant 0 : i32
    %c0_i32_0 = arith.constant 0 : i32
    return %arg0, %c0_i32 : i32, i32
  }
}

module attributes {stable_mosaic.version = 11 : i64} {
  func.func @kernel(%arg0: i32, %arg1: memref<8x128xbf16, #tpu.memory_space<vmem>>, %arg2: memref<1x128xf32, #tpu.memory_space<vmem>>, %arg3: memref<1x128xf32, #tpu.memory_space<vmem>>, %arg4: memref<8x128xbf16, #tpu.memory_space<vmem>>) attributes {dimension_semantics = [#tpu.dimension_semantics<parallel>], iteration_bounds = array<i64: 1>, scalar_prefetch = 0 : i64, scratch_operands = 0 : i64, tpu.core_type = #tpu.core_type<tc>, window_params = [{transform_indices = @transform_0, window_bounds = array<i64: 8, 128>}, {pipeline_mode = #tpu.pipeline_mode<synchronous>, transform_indices = @transform_1, window_bounds = array<i64: 1, 128>}, {pipeline_mode = #tpu.pipeline_mode<synchronous>, transform_indices = @transform_2, window_bounds = array<i64: 1, 128>}, {transform_indices = @transform_3, window_bounds = array<i64: 8, 128>}]} {
    %c0 = arith.constant 0 : index
    %c0_0 = arith.constant 0 : index
    %0 = vector.load %arg1[%c0, %c0_0] : memref<8x128xbf16, #tpu.memory_space<vmem>>, vector<8x128xbf16>
    %1 = arith.extf %0 : vector<8x128xbf16> to vector<8x128xf32>
    %c0_1 = arith.constant 0 : index
    %c0_2 = arith.constant 0 : index
    %2 = vector.load %arg2[%c0_1, %c0_2] : memref<1x128xf32, #tpu.memory_space<vmem>>, vector<1x128xf32>
    %3 = vector.broadcast %2 : vector<1x128xf32> to vector<8x128xf32>
    %4 = arith.mulf %1, %3 : vector<8x128xf32>
    %c0_3 = arith.constant 0 : index
    %c0_4 = arith.constant 0 : index
    %5 = vector.load %arg3[%c0_3, %c0_4] : memref<1x128xf32, #tpu.memory_space<vmem>>, vector<1x128xf32>
    %6 = vector.broadcast %5 : vector<1x128xf32> to vector<8x128xf32>
    %7 = arith.addf %4, %6 : vector<8x128xf32>
    %8 = arith.truncf %7 : vector<8x128xf32> to vector<8x128xbf16>
    %c0_5 = arith.constant 0 : index
    %c0_6 = arith.constant 0 : index
    %9 = vector.load %arg4[%c0_5, %c0_6] : memref<8x128xbf16, #tpu.memory_space<vmem>>, vector<8x128xbf16>
    tpu.vector_store %arg4[%c0_5, %c0_6], %8 {strides = array<i32>} : memref<8x128xbf16, #tpu.memory_space<vmem>>, vector<8x128xbf16>,
    return
  }
  func.func @transform_0(%arg0: i32) -> (i32, i32) {
    %c0_i32 = arith.constant 0 : i32
    %c0_i32_0 = arith.constant 0 : i32
    return %arg0, %c0_i32 : i32, i32
  }
  func.func @transform_1(%arg0: i32) -> (i32, i32) {
    %c0_i32 = arith.constant 0 : i32
    %c0_i32_0 = arith.constant 0 : i32
    %c0_i32_1 = arith.constant 0 : i32
    return %c0_i32, %c0_i32_0 : i32, i32
  }
  func.func @transform_2(%arg0: i32) -> (i32, i32) {
    %c0_i32 = arith.constant 0 : i32
    %c0_i32_0 = arith.constant 0 : i32
    %c0_i32_1 = arith.constant 0 : i32
    return %c0_i32, %c0_i32_0 : i32, i32
  }
  func.func @transform_3(%arg0: i32) -> (i32, i32) {
    %c0_i32 = arith.constant 0 : i32
    %c0_i32_0 = arith.constant 0 : i32
    return %arg0, %c0_i32 : i32, i32
  }
}

module attributes {stable_mosaic.version = 11 : i64} {
  func.func @kernel(%arg0: i32, %arg1: memref<8x128xbf16, #tpu.memory_space<vmem>>, %arg2: memref<1x128xf32, #tpu.memory_space<vmem>>, %arg3: memref<1x128xf32, #tpu.memory_space<vmem>>, %arg4: memref<8x128xbf16, #tpu.memory_space<vmem>>) attributes {dimension_semantics = [#tpu.dimension_semantics<parallel>], iteration_bounds = array<i64: 1>, scalar_prefetch = 0 : i64, scratch_operands = 0 : i64, tpu.core_type = #tpu.core_type<tc>, window_params = [{transform_indices = @transform_0, window_bounds = array<i64: 8, 128>}, {pipeline_mode = #tpu.pipeline_mode<synchronous>, transform_indices = @transform_1, window_bounds = array<i64: 1, 128>}, {pipeline_mode = #tpu.pipeline_mode<synchronous>, transform_indices = @transform_2, window_bounds = array<i64: 1, 128>}, {transform_indices = @transform_3, window_bounds = array<i64: 8, 128>}]} {
    %c0 = arith.constant 0 : index
    %c0_0 = arith.constant 0 : index
    %0 = vector.load %arg1[%c0, %c0_0] : memref<8x128xbf16, #tpu.memory_space<vmem>>, vector<8x128xbf16>
    %1 = arith.extf %0 : vector<8x128xbf16> to vector<8x128xf32>
    %c0_1 = arith.constant 0 : index
    %c0_2 = arith.constant 0 : index
    %2 = vector.load %arg2[%c0_1, %c0_2] : memref<1x128xf32, #tpu.memory_space<vmem>>, vector<1x128xf32>
    %3 = vector.broadcast %2 : vector<1x128xf32> to vector<8x128xf32>
    %4 = arith.mulf %1, %3 : vector<8x128xf32>
    %c0_3 = arith.constant 0 : index
    %c0_4 = arith.constant 0 : index
    %5 = vector.load %arg3[%c0_3, %c0_4] : memref<1x128xf32, #tpu.memory_space<vmem>>, vector<1x128xf32>
    %6 = vector.broadcast %5 : vector<1x128xf32> to vector<8x128xf32>
    %7 = arith.addf %4, %6 : vector<8x128xf32>
    %cst = arith.constant 0.000000e+00 : f32
    %8 = vector.broadcast %cst : f32 to vector<8x128xf32>
    %9 = arith.maximumf %7, %8 : vector<8x128xf32>
    %10 = arith.truncf %9 : vector<8x128xf32> to vector<8x128xbf16>
    %c0_5 = arith.constant 0 : index
    %c0_6 = arith.constant 0 : index
    %11 = vector.load %arg4[%c0_5, %c0_6] : memref<8x128xbf16, #tpu.memory_space<vmem>>, vector<8x128xbf16>
    tpu.vector_store %arg4[%c0_5, %c0_6], %10 {strides = array<i32>} : memref<8x128xbf16, #tpu.memory_space<vmem>>, vector<8x128xbf16>,
    return
  }
  func.func @transform_0(%arg0: i32) -> (i32, i32) {
    %c0_i32 = arith.constant 0 : i32
    %c0_i32_0 = arith.constant 0 : i32
    return %arg0, %c0_i32 : i32, i32
  }
  func.func @transform_1(%arg0: i32) -> (i32, i32) {
    %c0_i32 = arith.constant 0 : i32
    %c0_i32_0 = arith.constant 0 : i32
    %c0_i32_1 = arith.constant 0 : i32
    return %c0_i32, %c0_i32_0 : i32, i32
  }
  func.func @transform_2(%arg0: i32) -> (i32, i32) {
    %c0_i32 = arith.constant 0 : i32
    %c0_i32_0 = arith.constant 0 : i32
    %c0_i32_1 = arith.constant 0 : i32
    return %c0_i32, %c0_i32_0 : i32, i32
  }
  func.func @transform_3(%arg0: i32) -> (i32, i32) {
    %c0_i32 = arith.constant 0 : i32
    %c0_i32_0 = arith.constant 0 : i32
    return %arg0, %c0_i32 : i32, i32
  }
}

module attributes {stable_mosaic.version = 11 : i64} {
  func.func @kernel(%arg0: i32, %arg1: i32, %arg2: memref<8x384xbf16, #tpu.memory_space<vmem>>, %arg3: memref<384x128xbf16, #tpu.memory_space<vmem>>, %arg4: memref<8x128xbf16, #tpu.memory_space<vmem>>, %arg5: memref<8x128xf32, #tpu.memory_space<vmem>>, %arg6: memref<8x128xf32, #tpu.memory_space<vmem>>) attributes {dimension_semantics = [#tpu.dimension_semantics<parallel>, #tpu.dimension_semantics<arbitrary>], iteration_bounds = array<i64: 1, 3>, scalar_prefetch = 0 : i64, scratch_operands = 1 : i64, tpu.core_type = #tpu.core_type<tc>, window_params = [{transform_indices = @transform_0, window_bounds = array<i64: 8, 384>}, {transform_indices = @transform_1, window_bounds = array<i64: 384, 128>}, {transform_indices = @transform_2, window_bounds = array<i64: 8, 128>}, {transform_indices = @transform_3, window_bounds = array<i64: 8, 128>}]} {
    %c0_i32 = arith.constant 0 : i32
    %0 = arith.cmpi eq, %arg1, %c0_i32 : i32
    %1 = arith.extui %0 : i1 to i32
    %c0_i32_0 = arith.constant 0 : i32
    %2 = arith.cmpi ne, %1, %c0_i32_0 : i32
    scf.if %2 {
      %cst_9 = arith.constant 0.000000e+00 : f32
      %12 = vector.broadcast %cst_9 : f32 to vector<8x128xf32>
      %c0_10 = arith.constant 0 : index
      %c0_11 = arith.constant 0 : index
      %13 = vector.load %arg6[%c0_10, %c0_11] : memref<8x128xf32, #tpu.memory_space<vmem>>, vector<8x128xf32>
      tpu.vector_store %arg6[%c0_10, %c0_11], %12 {strides = array<i32>} : memref<8x128xf32, #tpu.memory_space<vmem>>, vector<8x128xf32>,
    } else {
    }
    %c0 = arith.constant 0 : index
    %c0_1 = arith.constant 0 : index
    %3 = vector.load %arg6[%c0, %c0_1] : memref<8x128xf32, #tpu.memory_space<vmem>>, vector<8x128xf32>
    %c0_2 = arith.constant 0 : index
    %c0_3 = arith.constant 0 : index
    %4 = vector.load %arg2[%c0_2, %c0_3] : memref<8x384xbf16, #tpu.memory_space<vmem>>, vector<8x384xbf16>
    %c0_4 = arith.constant 0 : index
    %c0_5 = arith.constant 0 : index
    %5 = vector.load %arg3[%c0_4, %c0_5] : memref<384x128xbf16, #tpu.memory_space<vmem>>, vector<384x128xbf16>
    %cst = arith.constant dense<0.000000e+00> : vector<8x128xf32>
    %6 = tpu.matmul %4, %5, %cst {dimension_numbers = #tpu.dot_dimension_numbers<[1], [0], [0], [1], [0, 0, 1, 1], [], []>} : vector<8x384xbf16>, vector<384x128xbf16>, vector<8x128xf32> -> vector<8x128xf32>
    %7 = arith.addf %3, %6 : vector<8x128xf32>
    %c0_6 = arith.constant 0 : index
    %c0_7 = arith.constant 0 : index
    %8 = vector.load %arg6[%c0_6, %c0_7] : memref<8x128xf32, #tpu.memory_space<vmem>>, vector<8x128xf32>
    tpu.vector_store %arg6[%c0_6, %c0_7], %7 {strides = array<i32>} : memref<8x128xf32, #tpu.memory_space<vmem>>, vector<8x128xf32>,
    %c2_i32 = arith.constant 2 : i32
    %9 = arith.cmpi eq, %arg1, %c2_i32 : i32
    %10 = arith.extui %9 : i1 to i32
    %c0_i32_8 = arith.constant 0 : i32
    %11 = arith.cmpi ne, %10, %c0_i32_8 : i32
    scf.if %11 {
      %c0_9 = arith.constant 0 : index
      %c0_10 = arith.constant 0 : index
      %12 = vector.load %arg6[%c0_9, %c0_10] : memref<8x128xf32, #tpu.memory_space<vmem>>, vector<8x128xf32>
      %13 = arith.truncf %12 : vector<8x128xf32> to vector<8x128xbf16>
      %c0_11 = arith.constant 0 : index
      %c0_12 = arith.constant 0 : index
      %14 = vector.load %arg4[%c0_11, %c0_12] : memref<8x128xbf16, #tpu.memory_space<vmem>>, vector<8x128xbf16>
      tpu.vector_store %arg4[%c0_11, %c0_12], %13 {strides = array<i32>} : memref<8x128xbf16, #tpu.memory_space<vmem>>, vector<8x128xbf16>,
      %cst_13 = arith.constant dense<0.000000e+00> : vector<128xf32>
      %15 = vector.multi_reduction <add>, %12, %cst_13 [0] : vector<8x128xf32> to vector<128xf32>
      %16 = vector.shape_cast %15 : vector<128xf32> to vector<1x128xf32>
      %17 = arith.mulf %12, %12 : vector<8x128xf32>
      %cst_14 = arith.constant dense<0.000000e+00> : vector<128xf32>
      %18 = vector.multi_reduction <add>, %17, %cst_14 [0] : vector<8x128xf32> to vector<128xf32>
      %19 = vector.shape_cast %18 : vector<128xf32> to vector<1x128xf32>
      %cst_15 = arith.constant 0.000000e+00 : f32
      %20 = vector.broadcast %cst_15 : f32 to vector<6x128xf32>
      %21 = tpu.concatenate %16, %19, %20 in 0 : vector<1x128xf32>, vector<1x128xf32>, vector<6x128xf32> -> vector<8x128xf32>
      %c0_16 = arith.constant 0 : index
      %c0_17 = arith.constant 0 : index
      %22 = vector.load %arg5[%c0_16, %c0_17] : memref<8x128xf32, #tpu.memory_space<vmem>>, vector<8x128xf32>
      tpu.vector_store %arg5[%c0_16, %c0_17], %21 {strides = array<i32>} : memref<8x128xf32, #tpu.memory_space<vmem>>, vector<8x128xf32>,
    } else {
    }
    return
  }
  func.func @transform_0(%arg0: i32, %arg1: i32) -> (i32, i32) {
    %c0_i32 = arith.constant 0 : i32
    return %arg0, %arg1 : i32, i32
  }
  func.func @transform_1(%arg0: i32, %arg1: i32) -> (i32, i32) {
    %c0_i32 = arith.constant 0 : i32
    %c0_i32_0 = arith.constant 0 : i32
    return %arg1, %c0_i32 : i32, i32
  }
  func.func @transform_2(%arg0: i32, %arg1: i32) -> (i32, i32) {
    %c0_i32 = arith.constant 0 : i32
    %c0_i32_0 = arith.constant 0 : i32
    return %arg0, %c0_i32 : i32, i32
  }
  func.func @transform_3(%arg0: i32, %arg1: i32) -> (i32, i32) {
    %c0_i32 = arith.constant 0 : i32
    %c0_i32_0 = arith.constant 0 : i32
    return %arg0, %c0_i32 : i32, i32
  }
}

module attributes {stable_mosaic.version = 11 : i64} {
  func.func @kernel(%arg0: i32, %arg1: memref<8x128xbf16, #tpu.memory_space<vmem>>, %arg2: memref<1x128xf32, #tpu.memory_space<vmem>>, %arg3: memref<1x128xf32, #tpu.memory_space<vmem>>, %arg4: memref<8x128xbf16, #tpu.memory_space<vmem>>, %arg5: memref<8x128xbf16, #tpu.memory_space<vmem>>) attributes {dimension_semantics = [#tpu.dimension_semantics<parallel>], iteration_bounds = array<i64: 1>, scalar_prefetch = 0 : i64, scratch_operands = 0 : i64, tpu.core_type = #tpu.core_type<tc>, window_params = [{transform_indices = @transform_0, window_bounds = array<i64: 8, 128>}, {pipeline_mode = #tpu.pipeline_mode<synchronous>, transform_indices = @transform_1, window_bounds = array<i64: 1, 128>}, {pipeline_mode = #tpu.pipeline_mode<synchronous>, transform_indices = @transform_2, window_bounds = array<i64: 1, 128>}, {transform_indices = @transform_3, window_bounds = array<i64: 8, 128>}, {transform_indices = @transform_4, window_bounds = array<i64: 8, 128>}]} {
    %c0 = arith.constant 0 : index
    %c0_0 = arith.constant 0 : index
    %0 = vector.load %arg1[%c0, %c0_0] : memref<8x128xbf16, #tpu.memory_space<vmem>>, vector<8x128xbf16>
    %1 = arith.extf %0 : vector<8x128xbf16> to vector<8x128xf32>
    %c0_1 = arith.constant 0 : index
    %c0_2 = arith.constant 0 : index
    %2 = vector.load %arg2[%c0_1, %c0_2] : memref<1x128xf32, #tpu.memory_space<vmem>>, vector<1x128xf32>
    %3 = vector.broadcast %2 : vector<1x128xf32> to vector<8x128xf32>
    %4 = arith.mulf %1, %3 : vector<8x128xf32>
    %c0_3 = arith.constant 0 : index
    %c0_4 = arith.constant 0 : index
    %5 = vector.load %arg3[%c0_3, %c0_4] : memref<1x128xf32, #tpu.memory_space<vmem>>, vector<1x128xf32>
    %6 = vector.broadcast %5 : vector<1x128xf32> to vector<8x128xf32>
    %7 = arith.addf %4, %6 : vector<8x128xf32>
    %c0_5 = arith.constant 0 : index
    %c0_6 = arith.constant 0 : index
    %8 = vector.load %arg4[%c0_5, %c0_6] : memref<8x128xbf16, #tpu.memory_space<vmem>>, vector<8x128xbf16>
    %9 = arith.extf %8 : vector<8x128xbf16> to vector<8x128xf32>
    %10 = arith.addf %7, %9 : vector<8x128xf32>
    %cst = arith.constant 0.000000e+00 : f32
    %11 = vector.broadcast %cst : f32 to vector<8x128xf32>
    %12 = arith.maximumf %10, %11 : vector<8x128xf32>
    %13 = arith.truncf %12 : vector<8x128xf32> to vector<8x128xbf16>
    %c0_7 = arith.constant 0 : index
    %c0_8 = arith.constant 0 : index
    %14 = vector.load %arg5[%c0_7, %c0_8] : memref<8x128xbf16, #tpu.memory_space<vmem>>, vector<8x128xbf16>
    tpu.vector_store %arg5[%c0_7, %c0_8], %13 {strides = array<i32>} : memref<8x128xbf16, #tpu.memory_space<vmem>>, vector<8x128xbf16>,
    return
  }
  func.func @transform_0(%arg0: i32) -> (i32, i32) {
    %c0_i32 = arith.constant 0 : i32
    %c0_i32_0 = arith.constant 0 : i32
    return %arg0, %c0_i32 : i32, i32
  }
  func.func @transform_1(%arg0: i32) -> (i32, i32) {
    %c0_i32 = arith.constant 0 : i32
    %c0_i32_0 = arith.constant 0 : i32
    %c0_i32_1 = arith.constant 0 : i32
    return %c0_i32, %c0_i32_0 : i32, i32
  }
  func.func @transform_2(%arg0: i32) -> (i32, i32) {
    %c0_i32 = arith.constant 0 : i32
    %c0_i32_0 = arith.constant 0 : i32
    %c0_i32_1 = arith.constant 0 : i32
    return %c0_i32, %c0_i32_0 : i32, i32
  }
  func.func @transform_3(%arg0: i32) -> (i32, i32) {
    %c0_i32 = arith.constant 0 : i32
    %c0_i32_0 = arith.constant 0 : i32
    return %arg0, %c0_i32 : i32, i32
  }
  func.func @transform_4(%arg0: i32) -> (i32, i32) {
    %c0_i32 = arith.constant 0 : i32
    %c0_i32_0 = arith.constant 0 : i32
    return %arg0, %c0_i32 : i32, i32
  }
}

module attributes {stable_mosaic.version = 11 : i64} {
  func.func @kernel(%arg0: i32, %arg1: i32, %arg2: memref<8x128xbf16, #tpu.memory_space<vmem>>, %arg3: memref<128x512xbf16, #tpu.memory_space<vmem>>, %arg4: memref<1x512xf32, #tpu.memory_space<vmem>>, %arg5: memref<8x512xbf16, #tpu.memory_space<vmem>>, %arg6: memref<8x512xf32, #tpu.memory_space<vmem>>) attributes {dimension_semantics = [#tpu.dimension_semantics<parallel>, #tpu.dimension_semantics<arbitrary>], iteration_bounds = array<i64: 1, 1>, scalar_prefetch = 0 : i64, scratch_operands = 1 : i64, tpu.core_type = #tpu.core_type<tc>, window_params = [{transform_indices = @transform_0, window_bounds = array<i64: 8, 128>}, {transform_indices = @transform_1, window_bounds = array<i64: 128, 512>}, {pipeline_mode = #tpu.pipeline_mode<synchronous>, transform_indices = @transform_2, window_bounds = array<i64: 1, 512>}, {transform_indices = @transform_3, window_bounds = array<i64: 8, 512>}]} {
    %c0_i32 = arith.constant 0 : i32
    %0 = arith.cmpi eq, %arg1, %c0_i32 : i32
    %1 = arith.extui %0 : i1 to i32
    %c0_i32_0 = arith.constant 0 : i32
    %2 = arith.cmpi ne, %1, %c0_i32_0 : i32
    scf.if %2 {
      %cst_10 = arith.constant 0.000000e+00 : f32
      %12 = vector.broadcast %cst_10 : f32 to vector<8x512xf32>
      %c0_11 = arith.constant 0 : index
      %c0_12 = arith.constant 0 : index
      %13 = vector.load %arg6[%c0_11, %c0_12] : memref<8x512xf32, #tpu.memory_space<vmem>>, vector<8x512xf32>
      tpu.vector_store %arg6[%c0_11, %c0_12], %12 {strides = array<i32>} : memref<8x512xf32, #tpu.memory_space<vmem>>, vector<8x512xf32>,
    } else {
    }
    %c0 = arith.constant 0 : index
    %c0_1 = arith.constant 0 : index
    %3 = vector.load %arg6[%c0, %c0_1] : memref<8x512xf32, #tpu.memory_space<vmem>>, vector<8x512xf32>
    %c0_2 = arith.constant 0 : index
    %c0_3 = arith.constant 0 : index
    %4 = vector.load %arg2[%c0_2, %c0_3] : memref<8x128xbf16, #tpu.memory_space<vmem>>, vector<8x128xbf16>
    %c0_4 = arith.constant 0 : index
    %c0_5 = arith.constant 0 : index
    %5 = vector.load %arg3[%c0_4, %c0_5] : memref<128x512xbf16, #tpu.memory_space<vmem>>, vector<128x512xbf16>
    %cst = arith.constant dense<0.000000e+00> : vector<8x512xf32>
    %6 = tpu.matmul %4, %5, %cst {dimension_numbers = #tpu.dot_dimension_numbers<[1], [0], [0], [1], [0, 0, 1, 1], [], []>} : vector<8x128xbf16>, vector<128x512xbf16>, vector<8x512xf32> -> vector<8x512xf32>
    %7 = arith.addf %3, %6 : vector<8x512xf32>
    %c0_6 = arith.constant 0 : index
    %c0_7 = arith.constant 0 : index
    %8 = vector.load %arg6[%c0_6, %c0_7] : memref<8x512xf32, #tpu.memory_space<vmem>>, vector<8x512xf32>
    tpu.vector_store %arg6[%c0_6, %c0_7], %7 {strides = array<i32>} : memref<8x512xf32, #tpu.memory_space<vmem>>, vector<8x512xf32>,
    %c0_i32_8 = arith.constant 0 : i32
    %9 = arith.cmpi eq, %arg1, %c0_i32_8 : i32
    %10 = arith.extui %9 : i1 to i32
    %c0_i32_9 = arith.constant 0 : i32
    %11 = arith.cmpi ne, %10, %c0_i32_9 : i32
    scf.if %11 {
      %c0_10 = arith.constant 0 : index
      %c0_11 = arith.constant 0 : index
      %12 = vector.load %arg6[%c0_10, %c0_11] : memref<8x512xf32, #tpu.memory_space<vmem>>, vector<8x512xf32>
      %c0_12 = arith.constant 0 : index
      %c0_13 = arith.constant 0 : index
      %13 = vector.load %arg4[%c0_12, %c0_13] : memref<1x512xf32, #tpu.memory_space<vmem>>, vector<1x512xf32>
      %14 = vector.broadcast %13 : vector<1x512xf32> to vector<8x512xf32>
      %15 = arith.addf %12, %14 : vector<8x512xf32>
      %16 = arith.truncf %15 : vector<8x512xf32> to vector<8x512xbf16>
      %c0_14 = arith.constant 0 : index
      %c0_15 = arith.constant 0 : index
      %17 = vector.load %arg5[%c0_14, %c0_15] : memref<8x512xbf16, #tpu.memory_space<vmem>>, vector<8x512xbf16>
      tpu.vector_store %arg5[%c0_14, %c0_15], %16 {strides = array<i32>} : memref<8x512xbf16, #tpu.memory_space<vmem>>, vector<8x512xbf16>,
    } else {
    }
    return
  }
  func.func @transform_0(%arg0: i32, %arg1: i32) -> (i32, i32) {
    %c0_i32 = arith.constant 0 : i32
    return %arg0, %arg1 : i32, i32
  }
  func.func @transform_1(%arg0: i32, %arg1: i32) -> (i32, i32) {
    %c0_i32 = arith.constant 0 : i32
    %c0_i32_0 = arith.constant 0 : i32
    return %arg1, %c0_i32 : i32, i32
  }
  func.func @transform_2(%arg0: i32, %arg1: i32) -> (i32, i32) {
    %c0_i32 = arith.constant 0 : i32
    %c0_i32_0 = arith.constant 0 : i32
    %c0_i32_1 = arith.constant 0 : i32
    return %c0_i32, %c0_i32_0 : i32, i32
  }
  func.func @transform_3(%arg0: i32, %arg1: i32) -> (i32, i32) {
    %c0_i32 = arith.constant 0 : i32
    %c0_i32_0 = arith.constant 0 : i32
    return %arg0, %c0_i32 : i32, i32
  }
}

module attributes {stable_mosaic.version = 11 : i64} {
  func.func @kernel(%arg0: i32, %arg1: i32, %arg2: memref<32x128xbf16, #tpu.memory_space<vmem>>, %arg3: memref<128x512xbf16, #tpu.memory_space<vmem>>, %arg4: memref<1x512xf32, #tpu.memory_space<vmem>>, %arg5: memref<32x512xbf16, #tpu.memory_space<vmem>>, %arg6: memref<32x512xf32, #tpu.memory_space<vmem>>) attributes {dimension_semantics = [#tpu.dimension_semantics<parallel>, #tpu.dimension_semantics<arbitrary>], iteration_bounds = array<i64: 1, 1>, scalar_prefetch = 0 : i64, scratch_operands = 1 : i64, tpu.core_type = #tpu.core_type<tc>, window_params = [{transform_indices = @transform_0, window_bounds = array<i64: 32, 128>}, {transform_indices = @transform_1, window_bounds = array<i64: 128, 512>}, {pipeline_mode = #tpu.pipeline_mode<synchronous>, transform_indices = @transform_2, window_bounds = array<i64: 1, 512>}, {transform_indices = @transform_3, window_bounds = array<i64: 32, 512>}]} {
    %c0_i32 = arith.constant 0 : i32
    %0 = arith.cmpi eq, %arg1, %c0_i32 : i32
    %1 = arith.extui %0 : i1 to i32
    %c0_i32_0 = arith.constant 0 : i32
    %2 = arith.cmpi ne, %1, %c0_i32_0 : i32
    scf.if %2 {
      %cst_10 = arith.constant 0.000000e+00 : f32
      %12 = vector.broadcast %cst_10 : f32 to vector<32x512xf32>
      %c0_11 = arith.constant 0 : index
      %c0_12 = arith.constant 0 : index
      %13 = vector.load %arg6[%c0_11, %c0_12] : memref<32x512xf32, #tpu.memory_space<vmem>>, vector<32x512xf32>
      tpu.vector_store %arg6[%c0_11, %c0_12], %12 {strides = array<i32>} : memref<32x512xf32, #tpu.memory_space<vmem>>, vector<32x512xf32>,
    } else {
    }
    %c0 = arith.constant 0 : index
    %c0_1 = arith.constant 0 : index
    %3 = vector.load %arg6[%c0, %c0_1] : memref<32x512xf32, #tpu.memory_space<vmem>>, vector<32x512xf32>
    %c0_2 = arith.constant 0 : index
    %c0_3 = arith.constant 0 : index
    %4 = vector.load %arg2[%c0_2, %c0_3] : memref<32x128xbf16, #tpu.memory_space<vmem>>, vector<32x128xbf16>
    %c0_4 = arith.constant 0 : index
    %c0_5 = arith.constant 0 : index
    %5 = vector.load %arg3[%c0_4, %c0_5] : memref<128x512xbf16, #tpu.memory_space<vmem>>, vector<128x512xbf16>
    %cst = arith.constant dense<0.000000e+00> : vector<32x512xf32>
    %6 = tpu.matmul %4, %5, %cst {dimension_numbers = #tpu.dot_dimension_numbers<[1], [0], [0], [1], [0, 0, 1, 1], [], []>} : vector<32x128xbf16>, vector<128x512xbf16>, vector<32x512xf32> -> vector<32x512xf32>
    %7 = arith.addf %3, %6 : vector<32x512xf32>
    %c0_6 = arith.constant 0 : index
    %c0_7 = arith.constant 0 : index
    %8 = vector.load %arg6[%c0_6, %c0_7] : memref<32x512xf32, #tpu.memory_space<vmem>>, vector<32x512xf32>
    tpu.vector_store %arg6[%c0_6, %c0_7], %7 {strides = array<i32>} : memref<32x512xf32, #tpu.memory_space<vmem>>, vector<32x512xf32>,
    %c0_i32_8 = arith.constant 0 : i32
    %9 = arith.cmpi eq, %arg1, %c0_i32_8 : i32
    %10 = arith.extui %9 : i1 to i32
    %c0_i32_9 = arith.constant 0 : i32
    %11 = arith.cmpi ne, %10, %c0_i32_9 : i32
    scf.if %11 {
      %c0_10 = arith.constant 0 : index
      %c0_11 = arith.constant 0 : index
      %12 = vector.load %arg6[%c0_10, %c0_11] : memref<32x512xf32, #tpu.memory_space<vmem>>, vector<32x512xf32>
      %c0_12 = arith.constant 0 : index
      %c0_13 = arith.constant 0 : index
      %13 = vector.load %arg4[%c0_12, %c0_13] : memref<1x512xf32, #tpu.memory_space<vmem>>, vector<1x512xf32>
      %14 = vector.broadcast %13 : vector<1x512xf32> to vector<32x512xf32>
      %15 = arith.addf %12, %14 : vector<32x512xf32>
      %16 = arith.truncf %15 : vector<32x512xf32> to vector<32x512xbf16>
      %c0_14 = arith.constant 0 : index
      %c0_15 = arith.constant 0 : index
      %17 = vector.load %arg5[%c0_14, %c0_15] : memref<32x512xbf16, #tpu.memory_space<vmem>>, vector<32x512xbf16>
      tpu.vector_store %arg5[%c0_14, %c0_15], %16 {strides = array<i32>} : memref<32x512xbf16, #tpu.memory_space<vmem>>, vector<32x512xbf16>,
    } else {
    }
    return
  }
  func.func @transform_0(%arg0: i32, %arg1: i32) -> (i32, i32) {
    %c0_i32 = arith.constant 0 : i32
    return %arg0, %arg1 : i32, i32
  }
  func.func @transform_1(%arg0: i32, %arg1: i32) -> (i32, i32) {
    %c0_i32 = arith.constant 0 : i32
    %c0_i32_0 = arith.constant 0 : i32
    return %arg1, %c0_i32 : i32, i32
  }
  func.func @transform_2(%arg0: i32, %arg1: i32) -> (i32, i32) {
    %c0_i32 = arith.constant 0 : i32
    %c0_i32_0 = arith.constant 0 : i32
    %c0_i32_1 = arith.constant 0 : i32
    return %c0_i32, %c0_i32_0 : i32, i32
  }
  func.func @transform_3(%arg0: i32, %arg1: i32) -> (i32, i32) {
    %c0_i32 = arith.constant 0 : i32
    %c0_i32_0 = arith.constant 0 : i32
    return %arg0, %c0_i32 : i32, i32
  }
}

module attributes {stable_mosaic.version = 11 : i64} {
  func.func @kernel(%arg0: i32, %arg1: i32, %arg2: memref<128x128xbf16, #tpu.memory_space<vmem>>, %arg3: memref<128x512xbf16, #tpu.memory_space<vmem>>, %arg4: memref<1x512xf32, #tpu.memory_space<vmem>>, %arg5: memref<128x512xbf16, #tpu.memory_space<vmem>>, %arg6: memref<128x512xf32, #tpu.memory_space<vmem>>) attributes {dimension_semantics = [#tpu.dimension_semantics<parallel>, #tpu.dimension_semantics<arbitrary>], iteration_bounds = array<i64: 1, 1>, scalar_prefetch = 0 : i64, scratch_operands = 1 : i64, tpu.core_type = #tpu.core_type<tc>, window_params = [{transform_indices = @transform_0, window_bounds = array<i64: 128, 128>}, {transform_indices = @transform_1, window_bounds = array<i64: 128, 512>}, {pipeline_mode = #tpu.pipeline_mode<synchronous>, transform_indices = @transform_2, window_bounds = array<i64: 1, 512>}, {transform_indices = @transform_3, window_bounds = array<i64: 128, 512>}]} {
    %c0_i32 = arith.constant 0 : i32
    %0 = arith.cmpi eq, %arg1, %c0_i32 : i32
    %1 = arith.extui %0 : i1 to i32
    %c0_i32_0 = arith.constant 0 : i32
    %2 = arith.cmpi ne, %1, %c0_i32_0 : i32
    scf.if %2 {
      %cst_10 = arith.constant 0.000000e+00 : f32
      %12 = vector.broadcast %cst_10 : f32 to vector<128x512xf32>
      %c0_11 = arith.constant 0 : index
      %c0_12 = arith.constant 0 : index
      %13 = vector.load %arg6[%c0_11, %c0_12] : memref<128x512xf32, #tpu.memory_space<vmem>>, vector<128x512xf32>
      tpu.vector_store %arg6[%c0_11, %c0_12], %12 {strides = array<i32>} : memref<128x512xf32, #tpu.memory_space<vmem>>, vector<128x512xf32>,
    } else {
    }
    %c0 = arith.constant 0 : index
    %c0_1 = arith.constant 0 : index
    %3 = vector.load %arg6[%c0, %c0_1] : memref<128x512xf32, #tpu.memory_space<vmem>>, vector<128x512xf32>
    %c0_2 = arith.constant 0 : index
    %c0_3 = arith.constant 0 : index
    %4 = vector.load %arg2[%c0_2, %c0_3] : memref<128x128xbf16, #tpu.memory_space<vmem>>, vector<128x128xbf16>
    %c0_4 = arith.constant 0 : index
    %c0_5 = arith.constant 0 : index
    %5 = vector.load %arg3[%c0_4, %c0_5] : memref<128x512xbf16, #tpu.memory_space<vmem>>, vector<128x512xbf16>
    %cst = arith.constant dense<0.000000e+00> : vector<128x512xf32>
    %6 = tpu.matmul %4, %5, %cst {dimension_numbers = #tpu.dot_dimension_numbers<[1], [0], [0], [1], [0, 0, 1, 1], [], []>} : vector<128x128xbf16>, vector<128x512xbf16>, vector<128x512xf32> -> vector<128x512xf32>
    %7 = arith.addf %3, %6 : vector<128x512xf32>
    %c0_6 = arith.constant 0 : index
    %c0_7 = arith.constant 0 : index
    %8 = vector.load %arg6[%c0_6, %c0_7] : memref<128x512xf32, #tpu.memory_space<vmem>>, vector<128x512xf32>
    tpu.vector_store %arg6[%c0_6, %c0_7], %7 {strides = array<i32>} : memref<128x512xf32, #tpu.memory_space<vmem>>, vector<128x512xf32>,
    %c0_i32_8 = arith.constant 0 : i32
    %9 = arith.cmpi eq, %arg1, %c0_i32_8 : i32
    %10 = arith.extui %9 : i1 to i32
    %c0_i32_9 = arith.constant 0 : i32
    %11 = arith.cmpi ne, %10, %c0_i32_9 : i32
    scf.if %11 {
      %c0_10 = arith.constant 0 : index
      %c0_11 = arith.constant 0 : index
      %12 = vector.load %arg6[%c0_10, %c0_11] : memref<128x512xf32, #tpu.memory_space<vmem>>, vector<128x512xf32>
      %c0_12 = arith.constant 0 : index
      %c0_13 = arith.constant 0 : index
      %13 = vector.load %arg4[%c0_12, %c0_13] : memref<1x512xf32, #tpu.memory_space<vmem>>, vector<1x512xf32>
      %14 = vector.broadcast %13 : vector<1x512xf32> to vector<128x512xf32>
      %15 = arith.addf %12, %14 : vector<128x512xf32>
      %16 = arith.truncf %15 : vector<128x512xf32> to vector<128x512xbf16>
      %c0_14 = arith.constant 0 : index
      %c0_15 = arith.constant 0 : index
      %17 = vector.load %arg5[%c0_14, %c0_15] : memref<128x512xbf16, #tpu.memory_space<vmem>>, vector<128x512xbf16>
      tpu.vector_store %arg5[%c0_14, %c0_15], %16 {strides = array<i32>} : memref<128x512xbf16, #tpu.memory_space<vmem>>, vector<128x512xbf16>,
    } else {
    }
    return
  }
  func.func @transform_0(%arg0: i32, %arg1: i32) -> (i32, i32) {
    %c0_i32 = arith.constant 0 : i32
    return %arg0, %arg1 : i32, i32
  }
  func.func @transform_1(%arg0: i32, %arg1: i32) -> (i32, i32) {
    %c0_i32 = arith.constant 0 : i32
    %c0_i32_0 = arith.constant 0 : i32
    return %arg1, %c0_i32 : i32, i32
  }
  func.func @transform_2(%arg0: i32, %arg1: i32) -> (i32, i32) {
    %c0_i32 = arith.constant 0 : i32
    %c0_i32_0 = arith.constant 0 : i32
    %c0_i32_1 = arith.constant 0 : i32
    return %c0_i32, %c0_i32_0 : i32, i32
  }
  func.func @transform_3(%arg0: i32, %arg1: i32) -> (i32, i32) {
    %c0_i32 = arith.constant 0 : i32
    %c0_i32_0 = arith.constant 0 : i32
    return %arg0, %c0_i32 : i32, i32
  }
}

module attributes {stable_mosaic.version = 11 : i64} {
  func.func @kernel(%arg0: i32, %arg1: i32, %arg2: memref<256x128xbf16, #tpu.memory_space<vmem>>, %arg3: memref<128x128xbf16, #tpu.memory_space<vmem>>, %arg4: memref<256x128xbf16, #tpu.memory_space<vmem>>, %arg5: memref<8x128xf32, #tpu.memory_space<vmem>>, %arg6: memref<256x128xf32, #tpu.memory_space<vmem>>) attributes {dimension_semantics = [#tpu.dimension_semantics<parallel>, #tpu.dimension_semantics<arbitrary>], iteration_bounds = array<i64: 2, 1>, scalar_prefetch = 0 : i64, scratch_operands = 1 : i64, tpu.core_type = #tpu.core_type<tc>, window_params = [{transform_indices = @transform_0, window_bounds = array<i64: 256, 128>}, {transform_indices = @transform_1, window_bounds = array<i64: 128, 128>}, {transform_indices = @transform_2, window_bounds = array<i64: 256, 128>}, {transform_indices = @transform_3, window_bounds = array<i64: 8, 128>}]} {
    %c0_i32 = arith.constant 0 : i32
    %0 = arith.cmpi eq, %arg1, %c0_i32 : i32
    %1 = arith.extui %0 : i1 to i32
    %c0_i32_0 = arith.constant 0 : i32
    %2 = arith.cmpi ne, %1, %c0_i32_0 : i32
    scf.if %2 {
      %cst_10 = arith.constant 0.000000e+00 : f32
      %12 = vector.broadcast %cst_10 : f32 to vector<256x128xf32>
      %c0_11 = arith.constant 0 : index
      %c0_12 = arith.constant 0 : index
      %13 = vector.load %arg6[%c0_11, %c0_12] : memref<256x128xf32, #tpu.memory_space<vmem>>, vector<256x128xf32>
      tpu.vector_store %arg6[%c0_11, %c0_12], %12 {strides = array<i32>} : memref<256x128xf32, #tpu.memory_space<vmem>>, vector<256x128xf32>,
    } else {
    }
    %c0 = arith.constant 0 : index
    %c0_1 = arith.constant 0 : index
    %3 = vector.load %arg6[%c0, %c0_1] : memref<256x128xf32, #tpu.memory_space<vmem>>, vector<256x128xf32>
    %c0_2 = arith.constant 0 : index
    %c0_3 = arith.constant 0 : index
    %4 = vector.load %arg2[%c0_2, %c0_3] : memref<256x128xbf16, #tpu.memory_space<vmem>>, vector<256x128xbf16>
    %c0_4 = arith.constant 0 : index
    %c0_5 = arith.constant 0 : index
    %5 = vector.load %arg3[%c0_4, %c0_5] : memref<128x128xbf16, #tpu.memory_space<vmem>>, vector<128x128xbf16>
    %cst = arith.constant dense<0.000000e+00> : vector<256x128xf32>
    %6 = tpu.matmul %4, %5, %cst {dimension_numbers = #tpu.dot_dimension_numbers<[1], [0], [0], [1], [0, 0, 1, 1], [], []>} : vector<256x128xbf16>, vector<128x128xbf16>, vector<256x128xf32> -> vector<256x128xf32>
    %7 = arith.addf %3, %6 : vector<256x128xf32>
    %c0_6 = arith.constant 0 : index
    %c0_7 = arith.constant 0 : index
    %8 = vector.load %arg6[%c0_6, %c0_7] : memref<256x128xf32, #tpu.memory_space<vmem>>, vector<256x128xf32>
    tpu.vector_store %arg6[%c0_6, %c0_7], %7 {strides = array<i32>} : memref<256x128xf32, #tpu.memory_space<vmem>>, vector<256x128xf32>,
    %c0_i32_8 = arith.constant 0 : i32
    %9 = arith.cmpi eq, %arg1, %c0_i32_8 : i32
    %10 = arith.extui %9 : i1 to i32
    %c0_i32_9 = arith.constant 0 : i32
    %11 = arith.cmpi ne, %10, %c0_i32_9 : i32
    scf.if %11 {
      %c0_10 = arith.constant 0 : index
      %c0_11 = arith.constant 0 : index
      %12 = vector.load %arg6[%c0_10, %c0_11] : memref<256x128xf32, #tpu.memory_space<vmem>>, vector<256x128xf32>
      %13 = arith.truncf %12 : vector<256x128xf32> to vector<256x128xbf16>
      %c0_12 = arith.constant 0 : index
      %c0_13 = arith.constant 0 : index
      %14 = vector.load %arg4[%c0_12, %c0_13] : memref<256x128xbf16, #tpu.memory_space<vmem>>, vector<256x128xbf16>
      tpu.vector_store %arg4[%c0_12, %c0_13], %13 {strides = array<i32>} : memref<256x128xbf16, #tpu.memory_space<vmem>>, vector<256x128xbf16>,
      %cst_14 = arith.constant dense<0.000000e+00> : vector<128xf32>
      %15 = vector.multi_reduction <add>, %12, %cst_14 [0] : vector<256x128xf32> to vector<128xf32>
      %16 = vector.shape_cast %15 : vector<128xf32> to vector<1x128xf32>
      %17 = arith.mulf %12, %12 : vector<256x128xf32>
      %cst_15 = arith.constant dense<0.000000e+00> : vector<128xf32>
      %18 = vector.multi_reduction <add>, %17, %cst_15 [0] : vector<256x128xf32> to vector<128xf32>
      %19 = vector.shape_cast %18 : vector<128xf32> to vector<1x128xf32>
      %cst_16 = arith.constant 0.000000e+00 : f32
      %20 = vector.broadcast %cst_16 : f32 to vector<6x128xf32>
      %21 = tpu.concatenate %16, %19, %20 in 0 : vector<1x128xf32>, vector<1x128xf32>, vector<6x128xf32> -> vector<8x128xf32>
      %c0_17 = arith.constant 0 : index
      %c0_18 = arith.constant 0 : index
      %22 = vector.load %arg5[%c0_17, %c0_18] : memref<8x128xf32, #tpu.memory_space<vmem>>, vector<8x128xf32>
      tpu.vector_store %arg5[%c0_17, %c0_18], %21 {strides = array<i32>} : memref<8x128xf32, #tpu.memory_space<vmem>>, vector<8x128xf32>,
    } else {
    }
    return
  }
  func.func @transform_0(%arg0: i32, %arg1: i32) -> (i32, i32) {
    %c0_i32 = arith.constant 0 : i32
    return %arg0, %arg1 : i32, i32
  }
  func.func @transform_1(%arg0: i32, %arg1: i32) -> (i32, i32) {
    %c0_i32 = arith.constant 0 : i32
    %c0_i32_0 = arith.constant 0 : i32
    return %arg1, %c0_i32 : i32, i32
  }
  func.func @transform_2(%arg0: i32, %arg1: i32) -> (i32, i32) {
    %c0_i32 = arith.constant 0 : i32
    %c0_i32_0 = arith.constant 0 : i32
    return %arg0, %c0_i32 : i32, i32
  }
  func.func @transform_3(%arg0: i32, %arg1: i32) -> (i32, i32) {
    %c0_i32 = arith.constant 0 : i32
    %c0_i32_0 = arith.constant 0 : i32
    return %arg0, %c0_i32 : i32, i32
  }
}

module attributes {stable_mosaic.version = 11 : i64} {
  func.func @kernel(%arg0: i32, %arg1: memref<512x128xbf16, #tpu.memory_space<vmem>>, %arg2: memref<1x128xf32, #tpu.memory_space<vmem>>, %arg3: memref<1x128xf32, #tpu.memory_space<vmem>>, %arg4: memref<512x128xbf16, #tpu.memory_space<vmem>>) attributes {dimension_semantics = [#tpu.dimension_semantics<parallel>], iteration_bounds = array<i64: 1>, scalar_prefetch = 0 : i64, scratch_operands = 0 : i64, tpu.core_type = #tpu.core_type<tc>, window_params = [{transform_indices = @transform_0, window_bounds = array<i64: 512, 128>}, {pipeline_mode = #tpu.pipeline_mode<synchronous>, transform_indices = @transform_1, window_bounds = array<i64: 1, 128>}, {pipeline_mode = #tpu.pipeline_mode<synchronous>, transform_indices = @transform_2, window_bounds = array<i64: 1, 128>}, {transform_indices = @transform_3, window_bounds = array<i64: 512, 128>}]} {
    %c0 = arith.constant 0 : index
    %c0_0 = arith.constant 0 : index
    %0 = vector.load %arg1[%c0, %c0_0] : memref<512x128xbf16, #tpu.memory_space<vmem>>, vector<512x128xbf16>
    %1 = arith.extf %0 : vector<512x128xbf16> to vector<512x128xf32>
    %c0_1 = arith.constant 0 : index
    %c0_2 = arith.constant 0 : index
    %2 = vector.load %arg2[%c0_1, %c0_2] : memref<1x128xf32, #tpu.memory_space<vmem>>, vector<1x128xf32>
    %3 = vector.broadcast %2 : vector<1x128xf32> to vector<512x128xf32>
    %4 = arith.mulf %1, %3 : vector<512x128xf32>
    %c0_3 = arith.constant 0 : index
    %c0_4 = arith.constant 0 : index
    %5 = vector.load %arg3[%c0_3, %c0_4] : memref<1x128xf32, #tpu.memory_space<vmem>>, vector<1x128xf32>
    %6 = vector.broadcast %5 : vector<1x128xf32> to vector<512x128xf32>
    %7 = arith.addf %4, %6 : vector<512x128xf32>
    %8 = arith.truncf %7 : vector<512x128xf32> to vector<512x128xbf16>
    %c0_5 = arith.constant 0 : index
    %c0_6 = arith.constant 0 : index
    %9 = vector.load %arg4[%c0_5, %c0_6] : memref<512x128xbf16, #tpu.memory_space<vmem>>, vector<512x128xbf16>
    tpu.vector_store %arg4[%c0_5, %c0_6], %8 {strides = array<i32>} : memref<512x128xbf16, #tpu.memory_space<vmem>>, vector<512x128xbf16>,
    return
  }
  func.func @transform_0(%arg0: i32) -> (i32, i32) {
    %c0_i32 = arith.constant 0 : i32
    %c0_i32_0 = arith.constant 0 : i32
    return %arg0, %c0_i32 : i32, i32
  }
  func.func @transform_1(%arg0: i32) -> (i32, i32) {
    %c0_i32 = arith.constant 0 : i32
    %c0_i32_0 = arith.constant 0 : i32
    %c0_i32_1 = arith.constant 0 : i32
    return %c0_i32, %c0_i32_0 : i32, i32
  }
  func.func @transform_2(%arg0: i32) -> (i32, i32) {
    %c0_i32 = arith.constant 0 : i32
    %c0_i32_0 = arith.constant 0 : i32
    %c0_i32_1 = arith.constant 0 : i32
    return %c0_i32, %c0_i32_0 : i32, i32
  }
  func.func @transform_3(%arg0: i32) -> (i32, i32) {
    %c0_i32 = arith.constant 0 : i32
    %c0_i32_0 = arith.constant 0 : i32
    return %arg0, %c0_i32 : i32, i32
  }
}

module attributes {stable_mosaic.version = 11 : i64} {
  func.func @kernel(%arg0: i32, %arg1: i32, %arg2: memref<256x128xbf16, #tpu.memory_space<vmem>>, %arg3: memref<128x128xbf16, #tpu.memory_space<vmem>>, %arg4: memref<1x128xf32, #tpu.memory_space<vmem>>, %arg5: memref<256x128xf32, #tpu.memory_space<vmem>>, %arg6: memref<256x128xf32, #tpu.memory_space<vmem>>) attributes {dimension_semantics = [#tpu.dimension_semantics<parallel>, #tpu.dimension_semantics<arbitrary>], iteration_bounds = array<i64: 2, 1>, scalar_prefetch = 0 : i64, scratch_operands = 1 : i64, tpu.core_type = #tpu.core_type<tc>, window_params = [{transform_indices = @transform_0, window_bounds = array<i64: 256, 128>}, {transform_indices = @transform_1, window_bounds = array<i64: 128, 128>}, {pipeline_mode = #tpu.pipeline_mode<synchronous>, transform_indices = @transform_2, window_bounds = array<i64: 1, 128>}, {transform_indices = @transform_3, window_bounds = array<i64: 256, 128>}]} {
    %c0_i32 = arith.constant 0 : i32
    %0 = arith.cmpi eq, %arg1, %c0_i32 : i32
    %1 = arith.extui %0 : i1 to i32
    %c0_i32_0 = arith.constant 0 : i32
    %2 = arith.cmpi ne, %1, %c0_i32_0 : i32
    scf.if %2 {
      %cst_10 = arith.constant 0.000000e+00 : f32
      %12 = vector.broadcast %cst_10 : f32 to vector<256x128xf32>
      %c0_11 = arith.constant 0 : index
      %c0_12 = arith.constant 0 : index
      %13 = vector.load %arg6[%c0_11, %c0_12] : memref<256x128xf32, #tpu.memory_space<vmem>>, vector<256x128xf32>
      tpu.vector_store %arg6[%c0_11, %c0_12], %12 {strides = array<i32>} : memref<256x128xf32, #tpu.memory_space<vmem>>, vector<256x128xf32>,
    } else {
    }
    %c0 = arith.constant 0 : index
    %c0_1 = arith.constant 0 : index
    %3 = vector.load %arg6[%c0, %c0_1] : memref<256x128xf32, #tpu.memory_space<vmem>>, vector<256x128xf32>
    %c0_2 = arith.constant 0 : index
    %c0_3 = arith.constant 0 : index
    %4 = vector.load %arg2[%c0_2, %c0_3] : memref<256x128xbf16, #tpu.memory_space<vmem>>, vector<256x128xbf16>
    %c0_4 = arith.constant 0 : index
    %c0_5 = arith.constant 0 : index
    %5 = vector.load %arg3[%c0_4, %c0_5] : memref<128x128xbf16, #tpu.memory_space<vmem>>, vector<128x128xbf16>
    %cst = arith.constant dense<0.000000e+00> : vector<256x128xf32>
    %6 = tpu.matmul %4, %5, %cst {dimension_numbers = #tpu.dot_dimension_numbers<[1], [0], [0], [1], [0, 0, 1, 1], [], []>} : vector<256x128xbf16>, vector<128x128xbf16>, vector<256x128xf32> -> vector<256x128xf32>
    %7 = arith.addf %3, %6 : vector<256x128xf32>
    %c0_6 = arith.constant 0 : index
    %c0_7 = arith.constant 0 : index
    %8 = vector.load %arg6[%c0_6, %c0_7] : memref<256x128xf32, #tpu.memory_space<vmem>>, vector<256x128xf32>
    tpu.vector_store %arg6[%c0_6, %c0_7], %7 {strides = array<i32>} : memref<256x128xf32, #tpu.memory_space<vmem>>, vector<256x128xf32>,
    %c0_i32_8 = arith.constant 0 : i32
    %9 = arith.cmpi eq, %arg1, %c0_i32_8 : i32
    %10 = arith.extui %9 : i1 to i32
    %c0_i32_9 = arith.constant 0 : i32
    %11 = arith.cmpi ne, %10, %c0_i32_9 : i32
    scf.if %11 {
      %c0_10 = arith.constant 0 : index
      %c0_11 = arith.constant 0 : index
      %12 = vector.load %arg6[%c0_10, %c0_11] : memref<256x128xf32, #tpu.memory_space<vmem>>, vector<256x128xf32>
      %c0_12 = arith.constant 0 : index
      %c0_13 = arith.constant 0 : index
      %13 = vector.load %arg4[%c0_12, %c0_13] : memref<1x128xf32, #tpu.memory_space<vmem>>, vector<1x128xf32>
      %14 = vector.broadcast %13 : vector<1x128xf32> to vector<256x128xf32>
      %15 = arith.addf %12, %14 : vector<256x128xf32>
      %c0_14 = arith.constant 0 : index
      %c0_15 = arith.constant 0 : index
      %16 = vector.load %arg5[%c0_14, %c0_15] : memref<256x128xf32, #tpu.memory_space<vmem>>, vector<256x128xf32>
      tpu.vector_store %arg5[%c0_14, %c0_15], %15 {strides = array<i32>} : memref<256x128xf32, #tpu.memory_space<vmem>>, vector<256x128xf32>,
    } else {
    }
    return
  }
  func.func @transform_0(%arg0: i32, %arg1: i32) -> (i32, i32) {
    %c0_i32 = arith.constant 0 : i32
    return %arg0, %arg1 : i32, i32
  }
  func.func @transform_1(%arg0: i32, %arg1: i32) -> (i32, i32) {
    %c0_i32 = arith.constant 0 : i32
    %c0_i32_0 = arith.constant 0 : i32
    return %arg1, %c0_i32 : i32, i32
  }
  func.func @transform_2(%arg0: i32, %arg1: i32) -> (i32, i32) {
    %c0_i32 = arith.constant 0 : i32
    %c0_i32_0 = arith.constant 0 : i32
    %c0_i32_1 = arith.constant 0 : i32
    return %c0_i32, %c0_i32_0 : i32, i32
  }
  func.func @transform_3(%arg0: i32, %arg1: i32) -> (i32, i32) {
    %c0_i32 = arith.constant 0 : i32
    %c0_i32_0 = arith.constant 0 : i32
    return %arg0, %c0_i32 : i32, i32
  }
}

</mosaic_0001>

<bundles_post_ra>
// kernel: resunet_fwd.55
= control target key start
LH: loop header
LB: loop body
LE: loop exit
PB: predicated region body
PF: predicated region fallthrough
CT: control target
= control target key end

     0   :  { %s1502_s0 = inlined_call_operand.vmem [shape: bf16[512,128], index: 0, kind: input, shape index: {}]   ;;  %s1503_s1 = inlined_call_operand.vmem [shape: f32[1,128], index: 1, kind: input, shape index: {}]   ;;  %s1504_s2 = inlined_call_operand.vmem [shape: f32[1,128], index: 2, kind: input, shape index: {}]   ;;  %s1505_s3 = inlined_call_operand.vmem [shape: bf16[512,128], index: 3, kind: output, shape index: {}]  }
   0x1   :  { %v803_v0 = vld [vmem:[%s1502_s0] sm:$0xff]   ;;  %v1090_v4 = vld [vmem:[%s1502_s0 + $0x8] sm:$0xff]   ;;  %v1091_v5 = vld [vmem:[%s1502_s0 + $0x10] sm:$0xff]  }
   0x2   :  { %v1178_v1 = vld [vmem:[%s1503_s1] ss:$0 sm:$0xff]  ;;  %v804_v2 = vunpack.c.l.bf16 %v803_v0  ;;  %v805_v3 = vunpack.c.h.bf16 %v803_v0  ;;  %v1092_v6 = vld [vmem:[%s1502_s0 + $0x18] sm:$0xff]   ;;  %v808_v8 = vunpack.c.l.bf16 %v1090_v4  ;;  %v809_v9 = vunpack.c.h.bf16 %v1090_v4  ;;  %v1094_v33 = vld [vmem:[%s1502_s0 + $0x28] sm:$0xff]  }
   0x3   :  { %v1192_v7 = vld [vmem:[%s1504_s2] ss:$0 sm:$0xff]  ;;  %v812_v10 = vunpack.c.l.bf16 %v1091_v5  ;;  %v813_v11 = vunpack.c.h.bf16 %v1091_v5  ;;  %v816_v14 = vunpack.c.l.bf16 %v1092_v6  ;;  %v817_v15 = vunpack.c.h.bf16 %v1092_v6  ;;  %v1095_v38 = vld [vmem:[%s1502_s0 + $0x30] sm:$0xff]   ;;  %v1096_v43 = vld [vmem:[%s1502_s0 + $0x38] sm:$0xff]  }
   0x4   :  { %v149_v12 = vmul.f32 %v804_v2, %v1178_v1  ;;  %v150_v13 = vmul.f32 %v805_v3, %v1178_v1  ;;  %v151_v16 = vmul.f32 %v808_v8, %v1178_v1  ;;  %v152_v17 = vmul.f32 %v809_v9, %v1178_v1  ;;  %v1093_v28 = vld [vmem:[%s1502_s0 + $0x20] sm:$0xff]  }
   0x5   :  { %v153_v18 = vmul.f32 %v812_v10, %v1178_v1  ;;  %v154_v19 = vmul.f32 %v813_v11, %v1178_v1  ;;  %v155_v22 = vmul.f32 %v816_v14, %v1178_v1  ;;  %v156_v23 = vmul.f32 %v817_v15, %v1178_v1  ;;  %v1097_v0 = vld [vmem:[%s1502_s0 + $0x40] sm:$0xff]   ;;  %v1098_v11 = vld [vmem:[%s1502_s0 + $0x48] sm:$0xff]  }
   0x6   :  { %v220_v20 = vadd.f32 %v1192_v7, %v149_v12  ;;  %v221_v21 = vadd.f32 %v1192_v7, %v150_v13  ;;  %v222_v24 = vadd.f32 %v1192_v7, %v151_v16  ;;  %v223_v25 = vadd.f32 %v1192_v7, %v152_v17  ;;  %v1099_v16 = vld [vmem:[%s1502_s0 + $0x50] sm:$0xff]  }
   0x7   :  { %v224_v26 = vadd.f32 %v1192_v7, %v153_v18  ;;  %v225_v27 = vadd.f32 %v1192_v7, %v154_v19  ;;  %v226_v31 = vadd.f32 %v1192_v7, %v155_v22  ;;  %v227_v32 = vadd.f32 %v1192_v7, %v156_v23 }
   0x8   :  { %v284_v29 = vmax.f32 %v220_v20, 0.0  ;;  %v285_v30 = vmax.f32 %v221_v21, 0.0  ;;  %v286_v34 = vmax.f32 %v222_v24, 0.0  ;;  %v287_v35 = vmax.f32 %v223_v25, 0.0  ;;  %v1100_v25 = vld [vmem:[%s1502_s0 + $0x58] sm:$0xff]  }
   0x9   :  { %v288_v36 = vmax.f32 %v224_v26, 0.0  ;;  %v289_v37 = vmax.f32 %v225_v27, 0.0  ;;  %v290_v40 = vmax.f32 %v226_v31, 0.0  ;;  %v291_v41 = vmax.f32 %v227_v32, 0.0 }
   0xa   :  { %v933_v39 = vpack.c.bf16 %v285_v30, %v284_v29  ;;  %v820_v42 = vunpack.c.l.bf16 %v1093_v28  ;;  %v938_v44 = vpack.c.bf16 %v287_v35, %v286_v34  ;;  %v821_v46 = vunpack.c.h.bf16 %v1093_v28 }
   0xb   :  { %v943_v45 = vpack.c.bf16 %v289_v37, %v288_v36  ;;  %v824_v47 = vunpack.c.l.bf16 %v1094_v33  ;;  %v948_v48 = vpack.c.bf16 %v291_v41, %v290_v40  ;;  %v825_v50 = vunpack.c.h.bf16 %v1094_v33 }
   0xc   :  { %934 = vst [vmem:[%s1505_s3] sm:$0xff] %v933_v39   ;;  %v157_v49 = vmul.f32 %v820_v42, %v1178_v1  ;;  %v828_v51 = vunpack.c.l.bf16 %v1095_v38  ;;  %1121 = vst [vmem:[%s1505_s3 + $0x8] sm:$0xff] %v938_v44   ;;  %v158_v52 = vmul.f32 %v821_v46, %v1178_v1  ;;  %v829_v54 = vunpack.c.h.bf16 %v1095_v38  ;;  %v1101_v38 = vld [vmem:[%s1502_s0 + $0x60] sm:$0xff]  }
   0xd   :  { %1122 = vst [vmem:[%s1505_s3 + $0x10] sm:$0xff] %v943_v45   ;;  %v159_v53 = vmul.f32 %v824_v47, %v1178_v1  ;;  %v832_v55 = vunpack.c.l.bf16 %v1096_v43  ;;  %1123 = vst [vmem:[%s1505_s3 + $0x18] sm:$0xff] %v948_v48   ;;  %v160_v57 = vmul.f32 %v825_v50, %v1178_v1  ;;  %v833_v59 = vunpack.c.h.bf16 %v1096_v43 }
   0xe   :  { %v228_v56 = vadd.f32 %v1192_v7, %v157_v49  ;;  %v161_v58 = vmul.f32 %v828_v51, %v1178_v1  ;;  %v229_v60 = vadd.f32 %v1192_v7, %v158_v52  ;;  %v162_v62 = vmul.f32 %v829_v54, %v1178_v1  ;;  %v1102_v51 = vld [vmem:[%s1502_s0 + $0x68] sm:$0xff]  }
   0xf   :  { %v230_v61 = vadd.f32 %v1192_v7, %v159_v53  ;;  %v163_v63 = vmul.f32 %v832_v55, %v1178_v1  ;;  %v231_v3 = vadd.f32 %v1192_v7, %v160_v57  ;;  %v164_v5 = vmul.f32 %v833_v59, %v1178_v1 }
  0x10   :  { %v292_v2 = vmax.f32 %v228_v56, 0.0  ;;  %v232_v4 = vadd.f32 %v1192_v7, %v161_v58  ;;  %v293_v6 = vmax.f32 %v229_v60, 0.0  ;;  %v233_v9 = vadd.f32 %v1192_v7, %v162_v62  ;;  %v1103_v60 = vld [vmem:[%s1502_s0 + $0x70] sm:$0xff]  }
  0x11   :  { %v294_v8 = vmax.f32 %v230_v61, 0.0  ;;  %v234_v10 = vadd.f32 %v1192_v7, %v163_v63  ;;  %v295_v12 = vmax.f32 %v231_v3, 0.0  ;;  %v235_v14 = vadd.f32 %v1192_v7, %v164_v5 }
  0x12   :  { %v296_v13 = vmax.f32 %v232_v4, 0.0  ;;  %v836_v15 = vunpack.c.l.bf16 %v1097_v0  ;;  %v953_v17 = vpack.c.bf16 %v293_v6, %v292_v2  ;;  %v297_v18 = vmax.f32 %v233_v9, 0.0  ;;  %v1104_v2 = vld [vmem:[%s1502_s0 + $0x78] sm:$0xff]  }
  0x13   :  { %v298_v19 = vmax.f32 %v234_v10, 0.0  ;;  %v837_v20 = vunpack.c.h.bf16 %v1097_v0  ;;  %v958_v21 = vpack.c.bf16 %v295_v12, %v294_v8  ;;  %v299_v22 = vmax.f32 %v235_v14, 0.0  ;;  %v1105_v12 = vld [vmem:[%s1502_s0 + $0x80] sm:$0xff]  }
  0x14   :  { %v165_v23 = vmul.f32 %v836_v15, %v1178_v1  ;;  %v840_v24 = vunpack.c.l.bf16 %v1098_v11  ;;  %1124 = vst [vmem:[%s1505_s3 + $0x20] sm:$0xff] %v953_v17   ;;  %v963_v26 = vpack.c.bf16 %v297_v18, %v296_v13  ;;  %v841_v28 = vunpack.c.h.bf16 %v1098_v11 }
  0x15   :  { %v166_v27 = vmul.f32 %v837_v20, %v1178_v1  ;;  %v844_v29 = vunpack.c.l.bf16 %v1099_v16  ;;  %1125 = vst [vmem:[%s1505_s3 + $0x28] sm:$0xff] %v958_v21   ;;  %v968_v30 = vpack.c.bf16 %v299_v22, %v298_v19  ;;  %v845_v33 = vunpack.c.h.bf16 %v1099_v16 }
  0x16   :  { %v236_v31 = vadd.f32 %v1192_v7, %v165_v23  ;;  %v167_v32 = vmul.f32 %v840_v24, %v1178_v1  ;;  %1126 = vst [vmem:[%s1505_s3 + $0x30] sm:$0xff] %v963_v26   ;;  %v168_v35 = vmul.f32 %v841_v28, %v1178_v1  ;;  %v848_v37 = vunpack.c.l.bf16 %v1100_v25 }
  0x17   :  { %v237_v34 = vadd.f32 %v1192_v7, %v166_v27  ;;  %v169_v36 = vmul.f32 %v844_v29, %v1178_v1  ;;  %1127 = vst [vmem:[%s1505_s3 + $0x38] sm:$0xff] %v968_v30   ;;  %v170_v41 = vmul.f32 %v845_v33, %v1178_v1  ;;  %v849_v42 = vunpack.c.h.bf16 %v1100_v25  ;;  %v1106_v29 = vld [vmem:[%s1502_s0 + $0x88] sm:$0xff]  }
  0x18   :  { %v300_v39 = vmax.f32 %v236_v31, 0.0  ;;  %v238_v40 = vadd.f32 %v1192_v7, %v167_v32  ;;  %v239_v44 = vadd.f32 %v1192_v7, %v168_v35  ;;  %v171_v46 = vmul.f32 %v848_v37, %v1178_v1 }
  0x19   :  { %v301_v43 = vmax.f32 %v237_v34, 0.0  ;;  %v240_v45 = vadd.f32 %v1192_v7, %v169_v36  ;;  %v241_v48 = vadd.f32 %v1192_v7, %v170_v41  ;;  %v172_v49 = vmul.f32 %v849_v42, %v1178_v1  ;;  %v1107_v34 = vld [vmem:[%s1502_s0 + $0x90] sm:$0xff]  }
  0x1a   :  { %v302_v47 = vmax.f32 %v238_v40, 0.0  ;;  %v852_v50 = vunpack.c.l.bf16 %v1101_v38  ;;  %v303_v53 = vmax.f32 %v239_v44, 0.0  ;;  %v242_v55 = vadd.f32 %v1192_v7, %v171_v46 }
  0x1b   :  { %v973_v52 = vpack.c.bf16 %v301_v43, %v300_v39  ;;  %v304_v54 = vmax.f32 %v240_v45, 0.0  ;;  %v305_v56 = vmax.f32 %v241_v48, 0.0  ;;  %v243_v57 = vadd.f32 %v1192_v7, %v172_v49  ;;  %v1108_v43 = vld [vmem:[%s1502_s0 + $0x98] sm:$0xff]  }
  0x1c   :  { %v853_v58 = vunpack.c.h.bf16 %v1101_v38  ;;  %v173_v59 = vmul.f32 %v852_v50, %v1178_v1  ;;  %v978_v61 = vpack.c.bf16 %v303_v53, %v302_v47  ;;  %v306_v62 = vmax.f32 %v242_v55, 0.0 }
  0x1d   :  { %1128 = vst [vmem:[%s1505_s3 + $0x40] sm:$0xff] %v973_v52   ;;  %v856_v63 = vunpack.c.l.bf16 %v1102_v51  ;;  %v857_v0 = vunpack.c.h.bf16 %v1102_v51  ;;  %v983_v3 = vpack.c.bf16 %v305_v56, %v304_v54  ;;  %v307_v4 = vmax.f32 %v243_v57, 0.0  ;;  %v1109_v56 = vld [vmem:[%s1502_s0 + $0xa0] sm:$0xff]  }
  0x1e   :  { %v174_v5 = vmul.f32 %v853_v58, %v1178_v1  ;;  %v244_v6 = vadd.f32 %v1192_v7, %v173_v59  ;;  %1129 = vst [vmem:[%s1505_s3 + $0x48] sm:$0xff] %v978_v61   ;;  %v860_v10 = vunpack.c.l.bf16 %v1103_v60  ;;  %v861_v11 = vunpack.c.h.bf16 %v1103_v60 }
  0x1f   :  { %v175_v8 = vmul.f32 %v856_v63, %v1178_v1  ;;  %v176_v9 = vmul.f32 %v857_v0, %v1178_v1  ;;  %1130 = vst [vmem:[%s1505_s3 + $0x50] sm:$0xff] %v983_v3   ;;  %v988_v13 = vpack.c.bf16 %v307_v4, %v306_v62  ;;  %v864_v16 = vunpack.c.l.bf16 %v1104_v2 }
  0x20   :  { %v245_v14 = vadd.f32 %v1192_v7, %v174_v5  ;;  %v308_v15 = vmax.f32 %v244_v6, 0.0  ;;  %v177_v19 = vmul.f32 %v860_v10, %v1178_v1  ;;  %v178_v20 = vmul.f32 %v861_v11, %v1178_v1 }
  0x21   :  { %v246_v17 = vadd.f32 %v1192_v7, %v175_v8  ;;  %v247_v18 = vadd.f32 %v1192_v7, %v176_v9  ;;  %1131 = vst [vmem:[%s1505_s3 + $0x58] sm:$0xff] %v988_v13   ;;  %v865_v22 = vunpack.c.h.bf16 %v1104_v2  ;;  %v179_v23 = vmul.f32 %v864_v16, %v1178_v1  ;;  %v1110_v2 = vld [vmem:[%s1502_s0 + $0xa8] sm:$0xff]   ;;  %v1111_v16 = vld [vmem:[%s1502_s0 + $0xb0] sm:$0xff]  }
  0x22   :  { %v309_v21 = vmax.f32 %v245_v14, 0.0  ;;  %v868_v24 = vunpack.c.l.bf16 %v1105_v12  ;;  %v248_v27 = vadd.f32 %v1192_v7, %v177_v19  ;;  %v249_v28 = vadd.f32 %v1192_v7, %v178_v20 }
  0x23   :  { %v310_v25 = vmax.f32 %v246_v17, 0.0  ;;  %v311_v26 = vmax.f32 %v247_v18, 0.0  ;;  %v180_v31 = vmul.f32 %v865_v22, %v1178_v1  ;;  %v250_v32 = vadd.f32 %v1192_v7, %v179_v23 }
  0x24   :  { %v993_v30 = vpack.c.bf16 %v309_v21, %v308_v15  ;;  %v869_v33 = vunpack.c.h.bf16 %v1105_v12  ;;  %v312_v36 = vmax.f32 %v248_v27, 0.0  ;;  %v313_v37 = vmax.f32 %v249_v28, 0.0  ;;  %v1112_v21 = vld [vmem:[%s1502_s0 + $0xb8] sm:$0xff]  }
  0x25   :  { %v998_v35 = vpack.c.bf16 %v311_v26, %v310_v25  ;;  %v181_v38 = vmul.f32 %v868_v24, %v1178_v1  ;;  %v251_v39 = vadd.f32 %v1192_v7, %v180_v31  ;;  %v314_v40 = vmax.f32 %v250_v32, 0.0 }
  0x26   :  { %1132 = vst [vmem:[%s1505_s3 + $0x60] sm:$0xff] %v993_v30   ;;  %v182_v41 = vmul.f32 %v869_v33, %v1178_v1  ;;  %v872_v42 = vunpack.c.l.bf16 %v1106_v29  ;;  %v1003_v44 = vpack.c.bf16 %v313_v37, %v312_v36  ;;  %v873_v46 = vunpack.c.h.bf16 %v1106_v29 }
  0x27   :  { %1133 = vst [vmem:[%s1505_s3 + $0x68] sm:$0xff] %v998_v35   ;;  %v252_v45 = vadd.f32 %v1192_v7, %v181_v38  ;;  %v876_v47 = vunpack.c.l.bf16 %v1107_v34  ;;  %v315_v48 = vmax.f32 %v251_v39, 0.0  ;;  %v877_v51 = vunpack.c.h.bf16 %v1107_v34  ;;  %v1113_v34 = vld [vmem:[%s1502_s0 + $0xc0] sm:$0xff]  }
  0x28   :  { %v253_v49 = vadd.f32 %v1192_v7, %v182_v41  ;;  %v183_v50 = vmul.f32 %v872_v42, %v1178_v1  ;;  %1134 = vst [vmem:[%s1505_s3 + $0x70] sm:$0xff] %v1003_v44   ;;  %v184_v53 = vmul.f32 %v873_v46, %v1178_v1  ;;  %v880_v55 = vunpack.c.l.bf16 %v1108_v43 }
  0x29   :  { %v316_v52 = vmax.f32 %v252_v45, 0.0  ;;  %v185_v54 = vmul.f32 %v876_v47, %v1178_v1  ;;  %v1008_v57 = vpack.c.bf16 %v315_v48, %v314_v40  ;;  %v186_v60 = vmul.f32 %v877_v51, %v1178_v1  ;;  %v1114_v47 = vld [vmem:[%s1502_s0 + $0xc8] sm:$0xff]  }
  0x2a   :  { %v317_v58 = vmax.f32 %v253_v49, 0.0  ;;  %v254_v59 = vadd.f32 %v1192_v7, %v183_v50  ;;  %v255_v61 = vadd.f32 %v1192_v7, %v184_v53  ;;  %v881_v63 = vunpack.c.h.bf16 %v1108_v43 }
  0x2b   :  { %v256_v62 = vadd.f32 %v1192_v7, %v185_v54  ;;  %v187_v0 = vmul.f32 %v880_v55, %v1178_v1  ;;  %1135 = vst [vmem:[%s1505_s3 + $0x78] sm:$0xff] %v1008_v57   ;;  %v257_v5 = vadd.f32 %v1192_v7, %v186_v60  ;;  %v884_v6 = vunpack.c.l.bf16 %v1109_v56 }
  0x2c   :  { %v1013_v3 = vpack.c.bf16 %v317_v58, %v316_v52  ;;  %v318_v4 = vmax.f32 %v254_v59, 0.0  ;;  %v319_v8 = vmax.f32 %v255_v61, 0.0  ;;  %v188_v10 = vmul.f32 %v881_v63, %v1178_v1  ;;  %v1115_v52 = vld [vmem:[%s1502_s0 + $0xd0] sm:$0xff]   ;;  %v1116_v61 = vld [vmem:[%s1502_s0 + $0xd8] sm:$0xff]  }
  0x2d   :  { %v320_v9 = vmax.f32 %v256_v62, 0.0  ;;  %v258_v11 = vadd.f32 %v1192_v7, %v187_v0  ;;  %v321_v12 = vmax.f32 %v257_v5, 0.0  ;;  %v885_v13 = vunpack.c.h.bf16 %v1109_v56 }
  0x2e   :  { %1136 = vst [vmem:[%s1505_s3 + $0x80] sm:$0xff] %v1013_v3   ;;  %v189_v14 = vmul.f32 %v884_v6, %v1178_v1  ;;  %v888_v15 = vunpack.c.l.bf16 %v1110_v2  ;;  %v1018_v17 = vpack.c.bf16 %v319_v8, %v318_v4  ;;  %v259_v18 = vadd.f32 %v1192_v7, %v188_v10 }
  0x2f   :  { %v322_v19 = vmax.f32 %v258_v11, 0.0  ;;  %v889_v20 = vunpack.c.h.bf16 %v1110_v2  ;;  %v1023_v22 = vpack.c.bf16 %v321_v12, %v320_v9  ;;  %v190_v23 = vmul.f32 %v885_v13, %v1178_v1  ;;  %v1117_v12 = vld [vmem:[%s1502_s0 + $0xe0] sm:$0xff]  }
  0x30   :  { %v260_v24 = vadd.f32 %v1192_v7, %v189_v14  ;;  %v191_v25 = vmul.f32 %v888_v15, %v1178_v1  ;;  %1137 = vst [vmem:[%s1505_s3 + $0x88] sm:$0xff] %v1018_v17   ;;  %v323_v26 = vmax.f32 %v259_v18, 0.0  ;;  %v892_v28 = vunpack.c.l.bf16 %v1111_v16 }
  0x31   :  { %v192_v27 = vmul.f32 %v889_v20, %v1178_v1  ;;  %v893_v29 = vunpack.c.h.bf16 %v1111_v16  ;;  %1138 = vst [vmem:[%s1505_s3 + $0x90] sm:$0xff] %v1023_v22   ;;  %v261_v30 = vadd.f32 %v1192_v7, %v190_v23  ;;  %v896_v33 = vunpack.c.l.bf16 %v1112_v21 }
  0x32   :  { %v324_v31 = vmax.f32 %v260_v24, 0.0  ;;  %v262_v32 = vadd.f32 %v1192_v7, %v191_v25  ;;  %v1028_v35 = vpack.c.bf16 %v323_v26, %v322_v19  ;;  %v193_v37 = vmul.f32 %v892_v28, %v1178_v1 }
  0x33   :  { %v263_v36 = vadd.f32 %v1192_v7, %v192_v27  ;;  %v194_v38 = vmul.f32 %v893_v29, %v1178_v1  ;;  %v325_v39 = vmax.f32 %v261_v30, 0.0  ;;  %v897_v41 = vunpack.c.h.bf16 %v1112_v21  ;;  %v1118_v21 = vld [vmem:[%s1502_s0 + $0xe8] sm:$0xff]  }
  0x34   :  { %v326_v40 = vmax.f32 %v262_v32, 0.0  ;;  %v195_v42 = vmul.f32 %v896_v33, %v1178_v1  ;;  %1139 = vst [vmem:[%s1505_s3 + $0x98] sm:$0xff] %v1028_v35   ;;  %v264_v44 = vadd.f32 %v1192_v7, %v193_v37  ;;  %v900_v46 = vunpack.c.l.bf16 %v1113_v34 }
  0x35   :  { %v327_v43 = vmax.f32 %v263_v36, 0.0  ;;  %v265_v45 = vadd.f32 %v1192_v7, %v194_v38  ;;  %v1033_v48 = vpack.c.bf16 %v325_v39, %v324_v31  ;;  %v196_v49 = vmul.f32 %v897_v41, %v1178_v1  ;;  %v1120_v39 = vld [vmem:[%s1502_s0 + $0xf8] sm:$0xff]  }
  0x36   :  { %v266_v50 = vadd.f32 %v1192_v7, %v195_v42  ;;  %v901_v51 = vunpack.c.h.bf16 %v1113_v34  ;;  %v328_v54 = vmax.f32 %v264_v44, 0.0  ;;  %v197_v56 = vmul.f32 %v900_v46, %v1178_v1  ;;  %v1119_v34 = vld [vmem:[%s1502_s0 + $0xf0] sm:$0xff]  }
  0x37   :  { %v1038_v53 = vpack.c.bf16 %v327_v43, %v326_v40  ;;  %v329_v55 = vmax.f32 %v265_v45, 0.0  ;;  %1140 = vst [vmem:[%s1505_s3 + $0xa0] sm:$0xff] %v1033_v48   ;;  %v267_v57 = vadd.f32 %v1192_v7, %v196_v49  ;;  %v904_v60 = vunpack.c.l.bf16 %v1114_v47 }
  0x38   :  { %v330_v58 = vmax.f32 %v266_v50, 0.0  ;;  %v198_v59 = vmul.f32 %v901_v51, %v1178_v1  ;;  %v268_v63 = vadd.f32 %v1192_v7, %v197_v56  ;;  %v905_v0 = vunpack.c.h.bf16 %v1114_v47 }
  0x39   :  { %1141 = vst [vmem:[%s1505_s3 + $0xa8] sm:$0xff] %v1038_v53   ;;  %v1043_v62 = vpack.c.bf16 %v329_v55, %v328_v54  ;;  %v908_v2 = vunpack.c.l.bf16 %v1115_v52  ;;  %v331_v3 = vmax.f32 %v267_v57, 0.0  ;;  %v199_v5 = vmul.f32 %v904_v60, %v1178_v1 }
  0x3a   :  { %v269_v4 = vadd.f32 %v1192_v7, %v198_v59  ;;  %v909_v6 = vunpack.c.h.bf16 %v1115_v52  ;;  %v332_v8 = vmax.f32 %v268_v63, 0.0  ;;  %v200_v9 = vmul.f32 %v905_v0, %v1178_v1 }
  0x3b   :  { %1142 = vst [vmem:[%s1505_s3 + $0xb0] sm:$0xff] %v1043_v62   ;;  %v201_v10 = vmul.f32 %v908_v2, %v1178_v1  ;;  %v912_v11 = vunpack.c.l.bf16 %v1116_v61  ;;  %v1048_v13 = vpack.c.bf16 %v331_v3, %v330_v58  ;;  %v270_v15 = vadd.f32 %v1192_v7, %v199_v5 }
  0x3c   :  { %v333_v14 = vmax.f32 %v269_v4, 0.0  ;;  %v202_v16 = vmul.f32 %v909_v6, %v1178_v1  ;;  %v271_v17 = vadd.f32 %v1192_v7, %v200_v9  ;;  %v913_v19 = vunpack.c.h.bf16 %v1116_v61 }
  0x3d   :  { %v272_v18 = vadd.f32 %v1192_v7, %v201_v10  ;;  %v203_v20 = vmul.f32 %v912_v11, %v1178_v1  ;;  %1143 = vst [vmem:[%s1505_s3 + $0xb8] sm:$0xff] %v1048_v13   ;;  %v334_v23 = vmax.f32 %v270_v15, 0.0  ;;  %v916_v25 = vunpack.c.l.bf16 %v1117_v12 }
  0x3e   :  { %v1053_v22 = vpack.c.bf16 %v333_v14, %v332_v8  ;;  %v273_v24 = vadd.f32 %v1192_v7, %v202_v16  ;;  %v335_v26 = vmax.f32 %v271_v17, 0.0  ;;  %v204_v28 = vmul.f32 %v913_v19, %v1178_v1 }
  0x3f   :  { %v336_v27 = vmax.f32 %v272_v18, 0.0  ;;  %v274_v29 = vadd.f32 %v1192_v7, %v203_v20  ;;  %v917_v31 = vunpack.c.h.bf16 %v1117_v12  ;;  %v205_v32 = vmul.f32 %v916_v25, %v1178_v1 }
  0x40   :  { %1144 = vst [vmem:[%s1505_s3 + $0xc0] sm:$0xff] %v1053_v22   ;;  %v337_v30 = vmax.f32 %v273_v24, 0.0  ;;  %v920_v33 = vunpack.c.l.bf16 %v1118_v21  ;;  %v1058_v35 = vpack.c.bf16 %v335_v26, %v334_v23  ;;  %v275_v36 = vadd.f32 %v1192_v7, %v204_v28 }
  0x41   :  { %v338_v37 = vmax.f32 %v274_v29, 0.0  ;;  %v921_v38 = vunpack.c.h.bf16 %v1118_v21  ;;  %v206_v41 = vmul.f32 %v917_v31, %v1178_v1  ;;  %v276_v42 = vadd.f32 %v1192_v7, %v205_v32 }
  0x42   :  { %v1063_v40 = vpack.c.bf16 %v337_v30, %v336_v27  ;;  %v207_v43 = vmul.f32 %v920_v33, %v1178_v1  ;;  %1145 = vst [vmem:[%s1505_s3 + $0xc8] sm:$0xff] %v1058_v35   ;;  %v339_v44 = vmax.f32 %v275_v36, 0.0  ;;  %v924_v46 = vunpack.c.l.bf16 %v1119_v34 }
  0x43   :  { %v208_v45 = vmul.f32 %v921_v38, %v1178_v1  ;;  %v925_v47 = vunpack.c.h.bf16 %v1119_v34  ;;  %v277_v48 = vadd.f32 %v1192_v7, %v206_v41  ;;  %v340_v49 = vmax.f32 %v276_v42, 0.0 }
  0x44   :  { %1146 = vst [vmem:[%s1505_s3 + $0xd0] sm:$0xff] %v1063_v40   ;;  %v278_v50 = vadd.f32 %v1192_v7, %v207_v43  ;;  %v928_v51 = vunpack.c.l.bf16 %v1120_v39  ;;  %v1068_v52 = vpack.c.bf16 %v339_v44, %v338_v37  ;;  %v209_v54 = vmul.f32 %v924_v46, %v1178_v1 }
  0x45   :  { %v279_v53 = vadd.f32 %v1192_v7, %v208_v45  ;;  %v210_v55 = vmul.f32 %v925_v47, %v1178_v1  ;;  %v341_v56 = vmax.f32 %v277_v48, 0.0  ;;  %v929_v58 = vunpack.c.h.bf16 %v1120_v39 }
  0x46   :  { %v342_v57 = vmax.f32 %v278_v50, 0.0  ;;  %v211_v59 = vmul.f32 %v928_v51, %v1178_v1  ;;  %1147 = vst [vmem:[%s1505_s3 + $0xd8] sm:$0xff] %v1068_v52   ;;  %v280_v61 = vadd.f32 %v1192_v7, %v209_v54 }
  0x47   :  { %v343_v60 = vmax.f32 %v279_v53, 0.0  ;;  %v281_v62 = vadd.f32 %v1192_v7, %v210_v55  ;;  %v1073_v63 = vpack.c.bf16 %v341_v56, %v340_v49  ;;  %v212_v0 = vmul.f32 %v929_v58, %v1178_v1 }
  0x48   :  { %v282_v2 = vadd.f32 %v1192_v7, %v211_v59  ;;  %v344_v4 = vmax.f32 %v280_v61, 0.0 }
  0x49   :  { %v1078_v3 = vpack.c.bf16 %v343_v60, %v342_v57  ;;  %v345_v5 = vmax.f32 %v281_v62, 0.0  ;;  %1148 = vst [vmem:[%s1505_s3 + $0xe0] sm:$0xff] %v1073_v63   ;;  %v283_v6 = vadd.f32 %v1192_v7, %v212_v0 }
  0x4a   :  { %v346_v8 = vmax.f32 %v282_v2, 0.0 }
  0x4b   :  { %1149 = vst [vmem:[%s1505_s3 + $0xe8] sm:$0xff] %v1078_v3   ;;  %v1083_v9 = vpack.c.bf16 %v345_v5, %v344_v4  ;;  %v347_v10 = vmax.f32 %v283_v6, 0.0 }
  0x4d   :  { %1150 = vst [vmem:[%s1505_s3 + $0xf0] sm:$0xff] %v1083_v9   ;;  %v1088_v1 = vpack.c.bf16 %v347_v10, %v346_v8 }
  0x4f   :  { %1151 = vst [vmem:[%s1505_s3 + $0xf8] sm:$0xff] %v1088_v1  }

// kernel: resunet_fwd.54
= control target key start
LH: loop header
LB: loop body
LE: loop exit
PB: predicated region body
PF: predicated region fallthrough
CT: control target
= control target key end

     0   :  { %s2513_s12 = smov 0   ;;  %s2515_s13 = smov 0   ;;  %s3009_s0 = inlined_call_operand.vmem [shape: bf16[512,1152], index: 0, kind: input, shape index: {}]   ;;  %s3010_s1 = inlined_call_operand.vmem [shape: bf16[1152,128], index: 1, kind: input, shape index: {}]   ;;  %s3011_s2 = inlined_call_operand.vmem [shape: bf16[512,128], index: 2, kind: output, shape index: {0}]   ;;  %s3012_s3 = inlined_call_operand.vmem [shape: f32[16,128], index: 3, kind: output, shape index: {1}]  }
   0x1   :  { %s2517_s14 = smov 0   ;;  %s2519_s15 = smov 0  }
   0x2   :  { %s2521_s16 = smov 0   ;;  %s2523_s17 = smov 0  }
   0x3   :  { %s2525_s18 = smov 0  }
   0x4 LB: > { %s23_s19 = sadd.s32 1, %s2482_s16  ;;  %s26_s20 = sadd.s32 1, %s2486_s17  ;;  %s2490_s18 = sphi %s2525_s18, %s14_s18   ;;  %s2486_s17 = sphi %s2523_s17, %s3018_s17   ;;  %s2482_s16 = sphi %s2521_s16, %s3017_s16   ;;  %s2478_s15 = sphi %s2519_s15, %s3016_s15   ;;  %s2474_s14 = sphi %s2517_s14, %s3015_s14   ;;  %s2470_s13 = sphi %s2515_s13, %s3014_s13   ;;  %s2466_s12 = sphi %s2513_s12, %s3013_s12  }
   0x5   : > { %p24_p0 = scmp.ge.s32.totalorder %s23_s19, 3  ;;  %p42_p1 = scmp.ne.s32.totalorder %s2470_s13, %s2466_s12 }
   0x6   : > { %p43_p2 = scmp.eq.s32.totalorder %s2490_s18, 0  ;;  %s35_s24 = sadd.s32 1, %s2470_s13 }
   0x7   : > { %s3020_s19 = smov (%p24_p0, %s23_s19), 0  ;;  %s3022_s20 = smov (!%p24_p0, %s26_s20), %s2486_s17 }
   0x8   : > { %p44_p3 = por %p43_p2, %p42_p1  ;;  %p28_p4 = scmp.ge.s32.totalorder %s3022_s20, 2 }
   0x9   : > { %s31_s21 = ssub.s32 %s2482_s16, %s3020_s19  ;;  %p1780_p6 = scmp.ge.s32.totalorder %s2490_s18, 6 }
   0xa   : > { %s3024_s20 = smov (%p28_p4, %s3022_s20), 0 }
   0xb   : > { %s30_s22 = ssub.s32 %s2486_s17, %s3024_s20  ;;  %146 = sbr.rel (%p1780_p6) target bundleno = 64 (0x40), region = 16 }
   0xc   : > { %s32_s23 = sor.u32 %s31_s21, %s30_s22 }
   0xd   : > { %p33_p5 = scmp.eq.s32.totalorder %s32_s23, 0 }
   0xf   : > { %s2564_s25 = scalar_select %p33_p5, %s2470_s13, %s35_s24  }
  0x12   : > { %149 = sbr.rel (!%p44_p3) target bundleno = 64 (0x40), region = 20  ;;  %s151_s26 = sand.u32 (%p44_p3), 1, %s2470_s13  }
  0x13   : > { %s155_s27 = smul.u32 (%p44_p3), 3, %s2482_s16 }
  0x14   : > { %s2288_s28 = smul.u32 (%p44_p3), 384, %s151_s26 }
  0x15   : > { %s2289_s29 = smul.u32 (%p44_p3), 288, %s2486_s17 }
  0x16   : > { %s2578_s8 = scalar_lea.vmem (%p44_p3), [#allocation3], %s2288_s28 }
  0x17   : > { %s157_s30 = sadd.s32 (%p44_p3), %s2289_s29, %s155_s27 }
  0x18   : > { %s1783_s4 = sshll.u32 (%p44_p3), %s157_s30, 2 }
  0x19   : > { %s2573_s7 = scalar_lea.vmem %s3009_s0, %s1783_s4 }
  0x1a   : > { %v174_v0 = vld [vmem:[%s2573_s7] sm:$0xff]  ;;  %v178_v2 = vld [vmem:[%s2573_s7 + $0x48] sm:$0xff]  ;;  %v182_v4 = vld [vmem:[%s2573_s7 + $0x90] sm:$0xff] }
  0x1b   : > { %v176_v1 = vld [vmem:[%s2573_s7 + $0x24] sm:$0xff]  ;;  %175 = vst [vmem:[%s2578_s8] sm:$0xff] %v174_v0  ;;  %179 = vst [vmem:[%s2578_s8 + $0x18] sm:$0xff] %v178_v2  ;;  %v180_v3 = vld [vmem:[%s2573_s7 + $0x6c] sm:$0xff] }
  0x1c   : > { %177 = vst [vmem:[%s2578_s8 + $0xc] sm:$0xff] %v176_v1  ;;  %v184_v5 = vld [vmem:[%s2573_s7 + $0xb4] sm:$0xff]  ;;  %181 = vst [vmem:[%s2578_s8 + $0x24] sm:$0xff] %v180_v3  ;;  %v188_v7 = vld [vmem:[%s2573_s7 + $0xfc] sm:$0xff] }
  0x1d   : > { %183 = vst [vmem:[%s2578_s8 + $0x30] sm:$0xff] %v182_v4  ;;  %185 = vst [vmem:[%s2578_s8 + $0x3c] sm:$0xff] %v184_v5  ;;  %v186_v6 = vld [vmem:[%s2573_s7 + $0xd8] sm:$0xff]  ;;  %v190_v8 = vld [vmem:[%s2573_s7 + $0x120] sm:$0xff] }
  0x1e   : > { %187 = vst [vmem:[%s2578_s8 + $0x48] sm:$0xff] %v186_v6  ;;  %189 = vst [vmem:[%s2578_s8 + $0x54] sm:$0xff] %v188_v7  ;;  %v192_v9 = vld [vmem:[%s2573_s7 + $0x144] sm:$0xff]  ;;  %v196_v11 = vld [vmem:[%s2573_s7 + $0x18c] sm:$0xff] }
  0x1f   : > { %191 = vst [vmem:[%s2578_s8 + $0x60] sm:$0xff] %v190_v8  ;;  %v194_v10 = vld [vmem:[%s2573_s7 + $0x168] sm:$0xff]  ;;  %193 = vst [vmem:[%s2578_s8 + $0x6c] sm:$0xff] %v192_v9  ;;  %v198_v12 = vld [vmem:[%s2573_s7 + $0x1b0] sm:$0xff] }
  0x20   : > { %195 = vst [vmem:[%s2578_s8 + $0x78] sm:$0xff] %v194_v10  ;;  %197 = vst [vmem:[%s2578_s8 + $0x84] sm:$0xff] %v196_v11  ;;  %v200_v13 = vld [vmem:[%s2573_s7 + $0x1d4] sm:$0xff]  ;;  %v204_v15 = vld [vmem:[%s2573_s7 + $0x21c] sm:$0xff] }
  0x21   : > { %v202_v14 = vld [vmem:[%s2573_s7 + $0x1f8] sm:$0xff]  ;;  %199 = vst [vmem:[%s2578_s8 + $0x90] sm:$0xff] %v198_v12  ;;  %201 = vst [vmem:[%s2578_s8 + $0x9c] sm:$0xff] %v200_v13  ;;  %v206_v16 = vld [vmem:[%s2573_s7 + $0x240] sm:$0xff] }
  0x22   : > { %203 = vst [vmem:[%s2578_s8 + $0xa8] sm:$0xff] %v202_v14  ;;  %v208_v17 = vld [vmem:[%s2573_s7 + $0x264] sm:$0xff]  ;;  %205 = vst [vmem:[%s2578_s8 + $0xb4] sm:$0xff] %v204_v15  ;;  %v212_v19 = vld [vmem:[%s2573_s7 + $0x2ac] sm:$0xff] }
  0x23   : > { %207 = vst [vmem:[%s2578_s8 + $0xc0] sm:$0xff] %v206_v16  ;;  %209 = vst [vmem:[%s2578_s8 + $0xcc] sm:$0xff] %v208_v17  ;;  %v210_v18 = vld [vmem:[%s2573_s7 + $0x288] sm:$0xff]  ;;  %v214_v20 = vld [vmem:[%s2573_s7 + $0x2d0] sm:$0xff] }
  0x24   : > { %211 = vst [vmem:[%s2578_s8 + $0xd8] sm:$0xff] %v210_v18  ;;  %213 = vst [vmem:[%s2578_s8 + $0xe4] sm:$0xff] %v212_v19  ;;  %v216_v21 = vld [vmem:[%s2573_s7 + $0x2f4] sm:$0xff]  ;;  %v220_v23 = vld [vmem:[%s2573_s7 + $0x33c] sm:$0xff] }
  0x25   : > { %215 = vst [vmem:[%s2578_s8 + $0xf0] sm:$0xff] %v214_v20  ;;  %v218_v22 = vld [vmem:[%s2573_s7 + $0x318] sm:$0xff]  ;;  %217 = vst [vmem:[%s2578_s8 + $0xfc] sm:$0xff] %v216_v21  ;;  %v222_v24 = vld [vmem:[%s2573_s7 + $0x360] sm:$0xff] }
  0x26   : > { %219 = vst [vmem:[%s2578_s8 + $0x108] sm:$0xff] %v218_v22  ;;  %221 = vst [vmem:[%s2578_s8 + $0x114] sm:$0xff] %v220_v23  ;;  %v224_v25 = vld [vmem:[%s2573_s7 + $0x384] sm:$0xff]  ;;  %v228_v27 = vld [vmem:[%s2573_s7 + $0x3cc] sm:$0xff] }
  0x27   : > { %v226_v26 = vld [vmem:[%s2573_s7 + $0x3a8] sm:$0xff]  ;;  %223 = vst [vmem:[%s2578_s8 + $0x120] sm:$0xff] %v222_v24  ;;  %225 = vst [vmem:[%s2578_s8 + $0x12c] sm:$0xff] %v224_v25  ;;  %v230_v28 = vld [vmem:[%s2573_s7 + $0x3f0] sm:$0xff] }
  0x28   : > { %227 = vst [vmem:[%s2578_s8 + $0x138] sm:$0xff] %v226_v26  ;;  %v232_v29 = vld [vmem:[%s2573_s7 + $0x414] sm:$0xff]  ;;  %229 = vst [vmem:[%s2578_s8 + $0x144] sm:$0xff] %v228_v27  ;;  %v236_v31 = vld [vmem:[%s2573_s7 + $0x45c] sm:$0xff] }
  0x29   : > { %231 = vst [vmem:[%s2578_s8 + $0x150] sm:$0xff] %v230_v28  ;;  %233 = vst [vmem:[%s2578_s8 + $0x15c] sm:$0xff] %v232_v29  ;;  %v234_v30 = vld [vmem:[%s2573_s7 + $0x438] sm:$0xff]  ;;  %v1784_v32 = vld [vmem:[%s2573_s7 + $0x8] sm:$0xf] }
  0x2a   : > { %235 = vst [vmem:[%s2578_s8 + $0x168] sm:$0xff] %v234_v30  ;;  %237 = vst [vmem:[%s2578_s8 + $0x174] sm:$0xff] %v236_v31  ;;  %v1786_v33 = vld [vmem:[%s2573_s7 + $0x2c] sm:$0xf]  ;;  %v1788_v34 = vld [vmem:[%s2573_s7 + $0x50] sm:$0xf] }
  0x2b   : > { %1785 = vst [vmem:[%s2578_s8 + $0x8] sm:$0xf] %v1784_v32  ;;  %v1790_v35 = vld [vmem:[%s2573_s7 + $0x74] sm:$0xf]  ;;  %1787 = vst [vmem:[%s2578_s8 + $0x14] sm:$0xf] %v1786_v33 }
  0x2c   : > { %1789 = vst [vmem:[%s2578_s8 + $0x20] sm:$0xf] %v1788_v34  ;;  %1791 = vst [vmem:[%s2578_s8 + $0x2c] sm:$0xf] %v1790_v35  ;;  %v1792_v36 = vld [vmem:[%s2573_s7 + $0x98] sm:$0xf] }
  0x2d   : > { %v1794_v37 = vld [vmem:[%s2573_s7 + $0xbc] sm:$0xf]  ;;  %v1796_v38 = vld [vmem:[%s2573_s7 + $0xe0] sm:$0xf]  ;;  %1793 = vst [vmem:[%s2578_s8 + $0x38] sm:$0xf] %v1792_v36 }
  0x2e   : > { %1795 = vst [vmem:[%s2578_s8 + $0x44] sm:$0xf] %v1794_v37  ;;  %1797 = vst [vmem:[%s2578_s8 + $0x50] sm:$0xf] %v1796_v38  ;;  %v1798_v39 = vld [vmem:[%s2573_s7 + $0x104] sm:$0xf] }
  0x2f   : > { %v1800_v40 = vld [vmem:[%s2573_s7 + $0x128] sm:$0xf]  ;;  %v1802_v41 = vld [vmem:[%s2573_s7 + $0x14c] sm:$0xf]  ;;  %1799 = vst [vmem:[%s2578_s8 + $0x5c] sm:$0xf] %v1798_v39 }
  0x30   : > { %1801 = vst [vmem:[%s2578_s8 + $0x68] sm:$0xf] %v1800_v40  ;;  %1803 = vst [vmem:[%s2578_s8 + $0x74] sm:$0xf] %v1802_v41  ;;  %v1804_v42 = vld [vmem:[%s2573_s7 + $0x170] sm:$0xf] }
  0x31   : > { %v1806_v43 = vld [vmem:[%s2573_s7 + $0x194] sm:$0xf]  ;;  %v1808_v44 = vld [vmem:[%s2573_s7 + $0x1b8] sm:$0xf]  ;;  %1805 = vst [vmem:[%s2578_s8 + $0x80] sm:$0xf] %v1804_v42 }
  0x32   : > { %1807 = vst [vmem:[%s2578_s8 + $0x8c] sm:$0xf] %v1806_v43  ;;  %1809 = vst [vmem:[%s2578_s8 + $0x98] sm:$0xf] %v1808_v44  ;;  %v1810_v45 = vld [vmem:[%s2573_s7 + $0x1dc] sm:$0xf] }
  0x33   : > { %v1812_v46 = vld [vmem:[%s2573_s7 + $0x200] sm:$0xf]  ;;  %v1814_v47 = vld [vmem:[%s2573_s7 + $0x224] sm:$0xf]  ;;  %1811 = vst [vmem:[%s2578_s8 + $0xa4] sm:$0xf] %v1810_v45 }
  0x34   : > { %1813 = vst [vmem:[%s2578_s8 + $0xb0] sm:$0xf] %v1812_v46  ;;  %1815 = vst [vmem:[%s2578_s8 + $0xbc] sm:$0xf] %v1814_v47  ;;  %v1816_v48 = vld [vmem:[%s2573_s7 + $0x248] sm:$0xf] }
  0x35   : > { %v1818_v49 = vld [vmem:[%s2573_s7 + $0x26c] sm:$0xf]  ;;  %v1820_v50 = vld [vmem:[%s2573_s7 + $0x290] sm:$0xf]  ;;  %1817 = vst [vmem:[%s2578_s8 + $0xc8] sm:$0xf] %v1816_v48 }
  0x36   : > { %1819 = vst [vmem:[%s2578_s8 + $0xd4] sm:$0xf] %v1818_v49  ;;  %1821 = vst [vmem:[%s2578_s8 + $0xe0] sm:$0xf] %v1820_v50  ;;  %v1822_v51 = vld [vmem:[%s2573_s7 + $0x2b4] sm:$0xf] }
  0x37   : > { %v1824_v52 = vld [vmem:[%s2573_s7 + $0x2d8] sm:$0xf]  ;;  %v1826_v53 = vld [vmem:[%s2573_s7 + $0x2fc] sm:$0xf]  ;;  %1823 = vst [vmem:[%s2578_s8 + $0xec] sm:$0xf] %v1822_v51 }
  0x38   : > { %1825 = vst [vmem:[%s2578_s8 + $0xf8] sm:$0xf] %v1824_v52  ;;  %1827 = vst [vmem:[%s2578_s8 + $0x104] sm:$0xf] %v1826_v53  ;;  %v1828_v54 = vld [vmem:[%s2573_s7 + $0x320] sm:$0xf] }
  0x39   : > { %v1830_v55 = vld [vmem:[%s2573_s7 + $0x344] sm:$0xf]  ;;  %v1832_v56 = vld [vmem:[%s2573_s7 + $0x368] sm:$0xf]  ;;  %1829 = vst [vmem:[%s2578_s8 + $0x110] sm:$0xf] %v1828_v54 }
  0x3a   : > { %1831 = vst [vmem:[%s2578_s8 + $0x11c] sm:$0xf] %v1830_v55  ;;  %1833 = vst [vmem:[%s2578_s8 + $0x128] sm:$0xf] %v1832_v56  ;;  %v1834_v57 = vld [vmem:[%s2573_s7 + $0x38c] sm:$0xf] }
  0x3b   : > { %v1836_v58 = vld [vmem:[%s2573_s7 + $0x3b0] sm:$0xf]  ;;  %v1838_v59 = vld [vmem:[%s2573_s7 + $0x3d4] sm:$0xf]  ;;  %1835 = vst [vmem:[%s2578_s8 + $0x134] sm:$0xf] %v1834_v57 }
  0x3c   : > { %1837 = vst [vmem:[%s2578_s8 + $0x140] sm:$0xf] %v1836_v58  ;;  %1839 = vst [vmem:[%s2578_s8 + $0x14c] sm:$0xf] %v1838_v59  ;;  %v1840_v60 = vld [vmem:[%s2573_s7 + $0x3f8] sm:$0xf] }
  0x3d   : > { %v1842_v61 = vld [vmem:[%s2573_s7 + $0x41c] sm:$0xf]  ;;  %v1844_v62 = vld [vmem:[%s2573_s7 + $0x440] sm:$0xf]  ;;  %1841 = vst [vmem:[%s2578_s8 + $0x158] sm:$0xf] %v1840_v60 }
  0x3e   : > { %1843 = vst [vmem:[%s2578_s8 + $0x164] sm:$0xf] %v1842_v61  ;;  %1845 = vst [vmem:[%s2578_s8 + $0x170] sm:$0xf] %v1844_v62  ;;  %v1846_v63 = vld [vmem:[%s2573_s7 + $0x464] sm:$0xf] }
  0x3f   : > { %1847 = vst [vmem:[%s2578_s8 + $0x17c] sm:$0xf] %v1846_v63 }
  0x40 PF: > { %p1848_p7 = scmp.ge.s32.totalorder %s2490_s18, 1  ;;  %p322_p8 = scmp.lt.s32.totalorder %s2490_s18, 7 }
  0x42   : > { %p323_p9 = pnand %p1848_p7, %p322_p8 }
  0x43   : > { %s329_s9 = sand.u32 (!%p323_p9), 1, %s2466_s12   ;;  %s363_s10 = smul.u32 (!%p323_p9), 48, %s2474_s14 }
  0x44   : > { %326 = sbr.rel (%p323_p9) target bundleno = 510 (0x1fe), region = 50  ;;  %s1850_s21 = sshll.u32 (!%p323_p9), %s2478_s15, 5 }
  0x45   : > { %s2290_s11 = smul.u32 (!%p323_p9), 384, %s329_s9  ;;  %p364_p10 = scmp.lt.s32.totalorder (!%p323_p9), %s363_s10, 143 }
  0x46   : > { %p370_p11 = scmp.lt.s32.totalorder (!%p323_p9), %s1850_s21, 63  ;;  %p375_p12 = scmp.lt.s32.totalorder (!%p323_p9), %s2478_s15, 1 }
  0x47   : > { %s2727_s7 = scalar_lea.vmem (!%p323_p9), [#allocation3], %s2290_s11  ;;  %p1853_p13 = scmp.ne.s32.totalorder (!%p323_p9), %s2474_s14, 0 }
  0x4b   : > { %s3026_s10 = smov (!%p364_p10, %s363_s10), 143  ;;  %s3028_s21 = smov (!%p370_p11, %s1850_s21), 63 }
  0x4c   : > { %s1849_s22 = sshll.u32 %s3026_s10, 2  ;;  %s1851_s27 = sshll.u32 %s3028_s21, 2  ;;  %v2492_v0 = vmov (!%p1853_p13), 0.0  }
  0x4d   : > { %s2714_s26 = scalar_lea.vmem %s3010_s1, %s1849_s22  ;;  %s2719_s30 = scalar_lea.vmem %s3011_s2, %s1851_s27  ;;  %384 = vst [vmem:[#allocation2] sm:$0xff] (!%p1853_p13), %v2492_v0  ;;  %385 = vst [vmem:[#allocation2 + $0x8] sm:$0xff] (!%p1853_p13), %v2492_v0 }
  0x4e   : > { %s3030_s15 = smov (!%p375_p12, %s2478_s15), 1  ;;  %383 = sbr.rel (%p1853_p13) target bundleno = 94 (0x5e), region = 58 }
  0x4f   : > { %s1852_s12 = sshll.u32 %s3030_s15, 3  ;;  %386 = vst [vmem:[#allocation2 + $0x10] sm:$0xff] (!%p1853_p13), %v2492_v0  ;;  %387 = vst [vmem:[#allocation2 + $0x18] sm:$0xff] (!%p1853_p13), %v2492_v0 }
  0x50   : > { %s2725_s6 = scalar_lea.vmem %s3012_s3, %s1852_s12  ;;  %388 = vst [vmem:[#allocation2 + $0x20] sm:$0xff] (!%p1853_p13), %v2492_v0  ;;  %389 = vst [vmem:[#allocation2 + $0x28] sm:$0xff] (!%p1853_p13), %v2492_v0 }
  0x51   : > { %390 = vst [vmem:[#allocation2 + $0x30] sm:$0xff] (!%p1853_p13), %v2492_v0  ;;  %391 = vst [vmem:[#allocation2 + $0x38] sm:$0xff] (!%p1853_p13), %v2492_v0 }
  0x52   : > { %392 = vst [vmem:[#allocation2 + $0x40] sm:$0xff] (!%p1853_p13), %v2492_v0  ;;  %393 = vst [vmem:[#allocation2 + $0x48] sm:$0xff] (!%p1853_p13), %v2492_v0 }
  0x53   : > { %394 = vst [vmem:[#allocation2 + $0x50] sm:$0xff] (!%p1853_p13), %v2492_v0  ;;  %395 = vst [vmem:[#allocation2 + $0x58] sm:$0xff] (!%p1853_p13), %v2492_v0 }
  0x54   : > { %396 = vst [vmem:[#allocation2 + $0x60] sm:$0xff] (!%p1853_p13), %v2492_v0  ;;  %397 = vst [vmem:[#allocation2 + $0x68] sm:$0xff] (!%p1853_p13), %v2492_v0 }
  0x55   : > { %398 = vst [vmem:[#allocation2 + $0x70] sm:$0xff] %v2492_v0  ;;  %399 = vst [vmem:[#allocation2 + $0x78] sm:$0xff] %v2492_v0 }
  0x56   : > { %400 = vst [vmem:[#allocation2 + $0x80] sm:$0xff] %v2492_v0  ;;  %401 = vst [vmem:[#allocation2 + $0x88] sm:$0xff] %v2492_v0 }
  0x57   : > { %402 = vst [vmem:[#allocation2 + $0x90] sm:$0xff] %v2492_v0  ;;  %403 = vst [vmem:[#allocation2 + $0x98] sm:$0xff] %v2492_v0 }
  0x58   : > { %404 = vst [vmem:[#allocation2 + $0xa0] sm:$0xff] %v2492_v0  ;;  %405 = vst [vmem:[#allocation2 + $0xa8] sm:$0xff] %v2492_v0 }
  0x59   : > { %406 = vst [vmem:[#allocation2 + $0xb0] sm:$0xff] %v2492_v0  ;;  %407 = vst [vmem:[#allocation2 + $0xb8] sm:$0xff] %v2492_v0 }
  0x5a   : > { %408 = vst [vmem:[#allocation2 + $0xc0] sm:$0xff] %v2492_v0  ;;  %409 = vst [vmem:[#allocation2 + $0xc8] sm:$0xff] %v2492_v0 }
  0x5b   : > { %410 = vst [vmem:[#allocation2 + $0xd0] sm:$0xff] %v2492_v0  ;;  %411 = vst [vmem:[#allocation2 + $0xd8] sm:$0xff] %v2492_v0 }
  0x5c   : > { %412 = vst [vmem:[#allocation2 + $0xe0] sm:$0xff] %v2492_v0  ;;  %413 = vst [vmem:[#allocation2 + $0xe8] sm:$0xff] %v2492_v0 }
  0x5d   : > { %414 = vst [vmem:[#allocation2 + $0xf0] sm:$0xff] %v2492_v0  ;;  %415 = vst [vmem:[#allocation2 + $0xf8] sm:$0xff] %v2492_v0 }
  0x5e PF: > { %v2348_v1 = vld [vmem:[%s2714_s26 + $0x40] sm:$0xff]   ;;  %v2350_v3 = vld [vmem:[%s2714_s26 + $0x48] sm:$0xff]   ;;  %v2352_v5 = vld [vmem:[%s2714_s26 + $0x50] sm:$0xff]   ;;  %p1926_p0 = scmp.ne.s32.totalorder %s2474_s14, 2 }
  0x5f   : > { %v2349_v2 = vld [vmem:[%s2714_s26] sm:$0xff]   ;;  %2088 = vmatprep.subr.bf16.mxu0 %v2348_v1  ;;  %2272 = vmatprep.subr.bf16.mxu1 %v2348_v1  ;;  %v2351_v4 = vld [vmem:[%s2714_s26 + $0x8] sm:$0xff]   ;;  %v2353_v6 = vld [vmem:[%s2714_s26 + $0x10] sm:$0xff]   ;;  %vm1648_vm0 = vcmask (!%p1926_p0), 1040384   ;;  %vm1650_vm1 = vcmask (!%p1926_p0), 1041408  }
  0x60   : > { %2089 = vmatpush3.bf16.msra.mxu0 %v2349_v2  ;;  %2280 = vmatpush3.bf16.msra.mxu1 %v2349_v2  ;;  %v2354_v7 = vld [vmem:[%s2714_s26 + $0x58] sm:$0xff]   ;;  %v2356_v9 = vld [vmem:[%s2714_s26 + $0x60] sm:$0xff]   ;;  %v2358_v11 = vld [vmem:[%s2714_s26 + $0x68] sm:$0xff]  }
  0x61   : > { %2090 = vmatprep.subr.bf16.mxu0 %v2350_v3  ;;  %2273 = vmatprep.subr.bf16.mxu1 %v2350_v3  ;;  %v2355_v8 = vld [vmem:[%s2714_s26 + $0x18] sm:$0xff]   ;;  %v2357_v10 = vld [vmem:[%s2714_s26 + $0x20] sm:$0xff]   ;;  %v2359_v14 = vld [vmem:[%s2714_s26 + $0x28] sm:$0xff]  }
  0x62   : > { %v2366_v12 = vld [vmem:[%s2727_s7 + $0x4] ss:$12 sps:$4 sm:$0xff]   ;;  %v2362_v17 = vld [vmem:[%s2714_s26 + $0x78] sm:$0xff]   ;;  %v2364_v20 = vld [vmem:[%s2727_s7] ss:$12 sps:$4 sm:$0xff]  }
  0x63   : > { %v2369_v13 = vld [vmem:[%s2727_s7 + $0x124] ss:$12 sps:$4 sm:$0xff]   ;;  %992 = vmatprep.mubr.bf16.mxu0 %v2366_v12  ;;  %v2363_v18 = vld [vmem:[%s2714_s26 + $0x38] sm:$0xff]   ;;  %v2367_v21 = vld [vmem:[%s2727_s7 + $0x120] ss:$12 sps:$4 sm:$0xff]  }
  0x64   : > { %2091 = vmatpush3.bf16.msra.mxu0 %v2351_v4  ;;  %2281 = vmatpush3.bf16.msra.mxu1 %v2351_v4  ;;  %v2360_v15 = vld [vmem:[%s2714_s26 + $0x70] sm:$0xff]   ;;  %v2370_v19 = vld [vmem:[%s2714_s26 + $0x80] sm:$0xff]   ;;  %v2372_v22 = vld [vmem:[%s2727_s7 + $0x1c] ss:$12 sps:$4 sm:$0xff]  }
  0x65   : > { %2092 = vmatprep.subr.bf16.mxu0 %v2352_v5  ;;  %2274 = vmatprep.subr.bf16.mxu1 %v2352_v5  ;;  %v2361_v16 = vld [vmem:[%s2714_s26 + $0x30] sm:$0xff]   ;;  %v2371_v23 = vld [vmem:[%s2714_s26 + $0x88] sm:$0xff]   ;;  %v2376_v25 = vld [vmem:[%s2727_s7 + $0x18] ss:$12 sps:$4 sm:$0xff]  }
  0x66   : > { %1088 = vmatprep.mubr.bf16.mxu1 %v2369_v13  ;;  %v2374_v24 = vld [vmem:[%s2727_s7 + $0x13c] ss:$12 sps:$4 sm:$0xff]   ;;  %v2378_v26 = vld [vmem:[%s2714_s26 + $0x90] sm:$0xff]   ;;  %v2377_v27 = vld [vmem:[%s2727_s7 + $0x138] ss:$12 sps:$4 sm:$0xff]  }
  0x67   : > { %v2379_v28 = vld [vmem:[%s2714_s26 + $0x98] sm:$0xff]   ;;  %v2380_v29 = vld [vmem:[%s2727_s7 + $0x34] ss:$12 sps:$4 sm:$0xff]   ;;  %v2387_v34 = vld [vmem:[%s2714_s26 + $0xa8] sm:$0xff]  }
  0x68   : > { %2093 = vmatpush3.bf16.msra.mxu0 %v2353_v6  ;;  %2282 = vmatpush3.bf16.msra.mxu1 %v2353_v6  ;;  %v2382_v30 = vld [vmem:[%s2727_s7 + $0x154] ss:$12 sps:$4 sm:$0xff]   ;;  %v2384_v32 = vld [vmem:[%s2727_s7 + $0x30] ss:$12 sps:$4 sm:$0xff]   ;;  %v2388_v35 = vld [vmem:[%s2727_s7 + $0x4c] ss:$12 sps:$4 sm:$0xff]  }
  0x69   : > { %2094 = vmatprep.subr.bf16.mxu0 %v2354_v7  ;;  %2275 = vmatprep.subr.bf16.mxu1 %v2354_v7  ;;  %v2386_v31 = vld [vmem:[%s2714_s26 + $0xa0] sm:$0xff]   ;;  %v2385_v33 = vld [vmem:[%s2727_s7 + $0x150] ss:$12 sps:$4 sm:$0xff]   ;;  %v2390_v36 = vld [vmem:[%s2727_s7 + $0x16c] ss:$12 sps:$4 sm:$0xff]  }
  0x6a   : > { %v2394_v37 = vld [vmem:[%s2714_s26 + $0xb0] sm:$0xff]   ;;  %v2395_v41 = vld [vmem:[%s2714_s26 + $0xb8] sm:$0xff]   ;;  %v2399_v43 = vld [vmem:[%s2727_s7 + $0x60] ss:$12 sps:$4 sm:$0xff]  }
  0x6b   : > { %v2392_v38 = vld [vmem:[%s2727_s7 + $0x48] ss:$12 sps:$4 sm:$0xff]   ;;  %v2396_v40 = vld [vmem:[%s2727_s7 + $0x64] ss:$12 sps:$4 sm:$0xff]   ;;  %v2400_v44 = vld [vmem:[%s2727_s7 + $0x20] ss:$12 sps:$4 sm:$0xff]  }
  0x6c   : > { %2095 = vmatpush3.bf16.msra.mxu0 %v2355_v8  ;;  %2283 = vmatpush3.bf16.msra.mxu1 %v2355_v8  ;;  %v2393_v39 = vld [vmem:[%s2727_s7 + $0x168] ss:$12 sps:$4 sm:$0xff]   ;;  %v2403_v46 = vld [vmem:[%s2727_s7 + $0x38] ss:$12 sps:$4 sm:$0xff]   ;;  %v2405_v48 = vld [vmem:[%s2727_s7 + $0x50] ss:$12 sps:$4 sm:$0xff]  }
  0x6d   : > { %2096 = vmatprep.subr.bf16.mxu0 %v2356_v9  ;;  %2276 = vmatprep.subr.bf16.mxu1 %v2356_v9  ;;  %v2398_v42 = vld [vmem:[%s2727_s7 + $0x8] ss:$12 sps:$4 sm:$0xff]   ;;  %v2404_v47 = vld [vmem:[%s2727_s7 + $0x78] ss:$12 sps:$4 sm:$0xff]   ;;  %v2409_v51 = vld [vmem:[%s2727_s7 + $0x90] ss:$12 sps:$4 sm:$0xff]  }
  0x6e   : > { %v2401_v45 = vld [vmem:[%s2727_s7 + $0x7c] ss:$12 sps:$4 sm:$0xff]   ;;  %v2406_v49 = vld [vmem:[%s2727_s7 + $0x94] ss:$12 sps:$4 sm:$0xff]   ;;  %v2411_v53 = vld [vmem:[%s2727_s7 + $0xac] ss:$12 sps:$4 sm:$0xff]  }
  0x6f   : > { %v2408_v50 = vld [vmem:[%s2727_s7 + $0x68] ss:$12 sps:$4 sm:$0xff]   ;;  %v2410_v52 = vld [vmem:[%s2727_s7 + $0x80] ss:$12 sps:$4 sm:$0xff]   ;;  %v2413_v54 = vld [vmem:[%s2727_s7 + $0x98] ss:$12 sps:$4 sm:$0xff]  }
  0x70   : > { %2097 = vmatpush3.bf16.msra.mxu0 %v2357_v10  ;;  %2284 = vmatpush3.bf16.msra.mxu1 %v2357_v10  ;;  %v2414_v55 = vld [vmem:[%s2727_s7 + $0xa8] ss:$12 sps:$4 sm:$0xff]   ;;  %v2415_v56 = vld [vmem:[%s2727_s7 + $0xb0] ss:$12 sps:$4 sm:$0xff]   ;;  %v2419_v59 = vld [vmem:[%s2727_s7 + $0xc0] ss:$12 sps:$4 sm:$0xff]  }
  0x71   : > { %2098 = vmatprep.subr.bf16.mxu0 %v2358_v11  ;;  %2277 = vmatprep.subr.bf16.mxu1 %v2358_v11  ;;  %v2416_v57 = vld [vmem:[%s2727_s7 + $0xc4] ss:$12 sps:$4 sm:$0xff]   ;;  %v2418_v58 = vld [vmem:[%s2727_s7 + $0xc8] ss:$12 sps:$4 sm:$0xff]   ;;  %v2420_v60 = vld [vmem:[%s2727_s7 + $0xe0] ss:$12 sps:$4 sm:$0xff]  }
  0x72   : > { %v2421_v61 = vld [vmem:[%s2727_s7 + $0xdc] ss:$12 sps:$4 sm:$0xff]   ;;  %v2423_v62 = vld [vmem:[%s2727_s7 + $0xf8] ss:$12 sps:$4 sm:$0xff]   ;;  %v2426_v1 = vld [vmem:[%s2727_s7 + $0xf4] ss:$12 sps:$4 sm:$0xff]  }
  0x73   : > { %v2424_v63 = vld [vmem:[%s2727_s7 + $0xd8] ss:$12 sps:$4 sm:$0xff]   ;;  %v2425_v0 = vld [vmem:[%s2727_s7 + $0x110] ss:$12 sps:$4 sm:$0xff]   ;;  %v2428_v2 = vld [vmem:[%s2727_s7 + $0x128] ss:$12 sps:$4 sm:$0xff]  }
  0x74   : > { %2099 = vmatpush3.bf16.msra.mxu0 %v2359_v14  ;;  %2285 = vmatpush3.bf16.msra.mxu1 %v2359_v14  ;;  %v2429_v3 = vld [vmem:[%s2727_s7 + $0xf0] ss:$12 sps:$4 sm:$0xff]   ;;  %v2430_v4 = vld [vmem:[%s2727_s7 + $0x140] ss:$12 sps:$4 sm:$0xff]   ;;  %v2433_v6 = vld [vmem:[%s2727_s7 + $0x158] ss:$12 sps:$4 sm:$0xff]  }
  0x75   : > { %2100 = vmatprep.subr.bf16.mxu0 %v2360_v15  ;;  %2278 = vmatprep.subr.bf16.mxu1 %v2360_v15  ;;  %v2431_v5 = vld [vmem:[%s2727_s7 + $0x10c] ss:$12 sps:$4 sm:$0xff]   ;;  %v2434_v7 = vld [vmem:[%s2727_s7 + $0x108] ss:$12 sps:$4 sm:$0xff]   ;;  %v2435_v8 = vld [vmem:[%s2727_s7 + $0x170] ss:$12 sps:$4 sm:$0xff]  }
  0x78   : > { %2101 = vmatpush3.bf16.msra.mxu0 %v2361_v16  ;;  %2286 = vmatpush3.bf16.msra.mxu1 %v2361_v16 }
  0x79   : > { %2102 = vmatprep.subr.bf16.mxu0 %v2362_v17  ;;  %2279 = vmatprep.subr.bf16.mxu1 %v2362_v17 }
  0x7c   : > { %2103 = vmatpush3.bf16.msra.mxu0 %v2363_v18  ;;  %2287 = vmatpush3.bf16.msra.mxu1 %v2363_v18 }
  0x7d   : > { %2224 = vmatprep.subr.bf16.mxu1 %v2370_v19 }
  0x7f   : > { %993 = vmatmul.mubr.bf16.vlgmr.msra.gmra.mrb[0].mxu0 %v2364_v20  ;;  %1089 = vmatmul.mubr.bf16.vlgmr.msra.gmra.mrb[0].mxu1 %v2367_v21 }
  0x80   : > { %2225 = vmatpush3.bf16.msra.mxu1 %v2370_v19  ;;  %1000 = vmatprep.mubr.bf16.mxu0 %v2372_v22 }
  0x81   : > { %2226 = vmatprep.subr.bf16.mxu1 %v2371_v23  ;;  %1096 = vmatprep.mubr.bf16.mxu1 %v2374_v24 }
  0x84   : > { %2227 = vmatpush3.bf16.msra.mxu1 %v2371_v23 }
  0x85   : > { %2228 = vmatprep.subr.bf16.mxu1 %v2378_v26 }
  0x87   : > { %1001 = vmatmul.mubr.bf16.gmra.mrb[4].mxu0 %v2376_v25  ;;  %1097 = vmatmul.mubr.bf16.gmra.mrb[4].mxu1 %v2377_v27 }
  0x88   : > { %2229 = vmatpush3.bf16.msra.mxu1 %v2378_v26  ;;  %1008 = vmatprep.mubr.bf16.mxu0 %v2380_v29 }
  0x89   : > { %2230 = vmatprep.subr.bf16.mxu1 %v2379_v28  ;;  %1104 = vmatprep.mubr.bf16.mxu1 %v2382_v30 }
  0x8c   : > { %2231 = vmatpush3.bf16.msra.mxu1 %v2379_v28 }
  0x8d   : > { %2232 = vmatprep.subr.bf16.mxu1 %v2386_v31 }
  0x8f   : > { %1009 = vmatmul.mubr.bf16.gmra.mrb[8].mxu0 %v2384_v32  ;;  %1105 = vmatmul.mubr.bf16.gmra.mrb[8].mxu1 %v2385_v33 }
  0x90   : > { %2233 = vmatpush3.bf16.msra.mxu1 %v2386_v31  ;;  %1016 = vmatprep.mubr.bf16.mxu0 %v2388_v35 }
  0x91   : > { %2234 = vmatprep.subr.bf16.mxu1 %v2387_v34  ;;  %1112 = vmatprep.mubr.bf16.mxu1 %v2390_v36 }
  0x94   : > { %2235 = vmatpush3.bf16.msra.mxu1 %v2387_v34 }
  0x95   : > { %2236 = vmatprep.subr.bf16.mxu1 %v2394_v37 }
  0x97   : > { %1017 = vmatmul.mubr.bf16.gmra.mrb[12].mxu0 %v2392_v38  ;;  %1113 = vmatmul.mubr.bf16.gmra.mrb[12].mxu1 %v2393_v39 }
  0x98   : > { %2237 = vmatpush3.bf16.msra.mxu1 %v2394_v37  ;;  %1024 = vmatprep.mubr.bf16.mxu0 %v2396_v40 }
  0x99   : > { %2238 = vmatprep.subr.bf16.mxu1 %v2395_v41  ;;  %2240 = vmatprep.mubr.bf16.mxu1 %v2398_v42 }
  0x9c   : > { %2239 = vmatpush3.bf16.msra.mxu1 %v2395_v41 }
  0x9f   : > { %1025 = vmatmul.mubr.bf16.gmra.mrb[16].mxu0 %v2399_v43  ;;  %2241 = vmatmul.mubr.bf16.vlgmr.msra.gmra.mrb[16].mxu1 %v2400_v44 }
  0xa0   : > { %1032 = vmatprep.mubr.bf16.mxu0 %v2401_v45  ;;  %2244 = vmatprep.mubr.bf16.mxu1 %v2403_v46 }
  0xa7   : > { %1033 = vmatmul.mubr.bf16.gmra.mrb[20].mxu0 %v2404_v47  ;;  %2245 = vmatmul.mubr.bf16.gmra.mrb[20].mxu1 %v2405_v48 }
  0xa8   : > { %1040 = vmatprep.mubr.bf16.mxu0 %v2406_v49  ;;  %2248 = vmatprep.mubr.bf16.mxu1 %v2408_v50 }
  0xaf   : > { %1041 = vmatmul.mubr.bf16.gmra.mrb[24].mxu0 %v2409_v51  ;;  %2249 = vmatmul.mubr.bf16.gmra.mrb[24].mxu1 %v2410_v52 }
  0xb0   : > { %1048 = vmatprep.mubr.bf16.mxu0 %v2411_v53  ;;  %2252 = vmatprep.mubr.bf16.mxu1 %v2413_v54 }
  0xb7   : > { %1049 = vmatmul.mubr.bf16.gmra.mrb[28].mxu0 %v2414_v55  ;;  %2253 = vmatmul.mubr.bf16.gmra.mrb[28].mxu1 %v2415_v56 }
  0xb8   : > { %1056 = vmatprep.mubr.bf16.mxu0 %v2416_v57  ;;  %2256 = vmatprep.mubr.bf16.mxu1 %v2418_v58  ;;  %v418_v58 = vld [vmem:[#allocation2 + $0x10] sm:$0xff] }
  0xbf   : > { %1057 = vmatmul.mubr.bf16.gmra.mrb[32].mxu0 %v2419_v59  ;;  %2257 = vmatmul.mubr.bf16.gmra.mrb[32].mxu1 %v2420_v60 }
  0xc0   : > { %1064 = vmatprep.mubr.bf16.mxu0 %v2421_v61  ;;  %2260 = vmatprep.mubr.bf16.mxu1 %v2423_v62  ;;  %v416_v62 = vld [vmem:[#allocation2] sm:$0xff] }
  0xc7   : > { %1065 = vmatmul.mubr.bf16.gmra.mrb[36].mxu0 %v2424_v63  ;;  %2261 = vmatmul.mubr.bf16.gmra.mrb[36].mxu1 %v2425_v0 }
  0xc8   : > { %1072 = vmatprep.mubr.bf16.mxu0 %v2426_v1  ;;  %2264 = vmatprep.mubr.bf16.mxu1 %v2428_v2 }
  0xcf   : > { %1073 = vmatmul.mubr.bf16.gmra.mrb[40].mxu0 %v2429_v3  ;;  %2265 = vmatmul.mubr.bf16.gmra.mrb[40].mxu1 %v2430_v4  ;;  %v419_v3 = vld [vmem:[#allocation2 + $0x18] sm:$0xff] }
  0xd0   : > { %1080 = vmatprep.mubr.bf16.mxu0 %v2431_v5  ;;  %2268 = vmatprep.mubr.bf16.mxu1 %v2433_v6 }
  0xd7   : > { %1081 = vmatmul.mubr.bf16.gmra.mrb[44].mxu0 %v2434_v7  ;;  %2269 = vmatmul.mubr.bf16.gmra.mrb[44].mxu1 %v2435_v8  ;;  %v417_v8 = vld [vmem:[#allocation2 + $0x8] sm:$0xff] }
 0x152   : > { %v2104_v9 = vpop.f32.mrb[0].mxu0  ;;  %v2176_v10 = vpop.f32.mrb[0].mxu1 }
 0x153   : > { %v2105_v11 = vpop.f32.mrb[1].mxu0  ;;  %v2177_v12 = vpop.f32.mrb[1].mxu1 }
 0x154   : > { %v2106_v13 = vadd.f32 %v2105_v11, %v2104_v9  ;;  %v2802_v14 = vadd.f32 %v2177_v12, %v2176_v10  ;;  %v2107_v15 = vpop.f32.mrb[2].mxu0  ;;  %v2179_v16 = vpop.f32.mrb[2].mxu1 }
 0x155   : > { %v2108_v17 = vpop.f32.mrb[3].mxu0  ;;  %v2180_v18 = vpop.f32.mrb[3].mxu1 }
 0x156   : > { %v2109_v19 = vadd.f32 %v2108_v17, %v2107_v15  ;;  %v2804_v20 = vadd.f32 %v2180_v18, %v2179_v16  ;;  %v422_v18 = vld [vmem:[#allocation2 + $0x30] sm:$0xff] }
 0x15a   : > { %v2110_v21 = vpop.f32.mrb[4].mxu0  ;;  %v2182_v22 = vpop.f32.mrb[4].mxu1 }
 0x15b   : > { %v2111_v23 = vpop.f32.mrb[5].mxu0  ;;  %v2183_v24 = vpop.f32.mrb[5].mxu1 }
 0x15c   : > { %v2112_v25 = vadd.f32 %v2111_v23, %v2110_v21  ;;  %v2806_v26 = vadd.f32 %v2183_v24, %v2182_v22  ;;  %v2113_v27 = vpop.f32.mrb[6].mxu0  ;;  %v2185_v28 = vpop.f32.mrb[6].mxu1  ;;  %v420_v23 = vld [vmem:[#allocation2 + $0x20] sm:$0xff] }
 0x15d   : > { %v2114_v29 = vpop.f32.mrb[7].mxu0  ;;  %v2186_v30 = vpop.f32.mrb[7].mxu1 }
 0x15e   : > { %v2115_v31 = vadd.f32 %v2114_v29, %v2113_v27  ;;  %v2808_v32 = vadd.f32 %v2186_v30, %v2185_v28  ;;  %v423_v29 = vld [vmem:[#allocation2 + $0x38] sm:$0xff] }
 0x162   : > { %v2116_v33 = vpop.f32.mrb[8].mxu0  ;;  %v2188_v34 = vpop.f32.mrb[8].mxu1 }
 0x163   : > { %v2117_v35 = vpop.f32.mrb[9].mxu0  ;;  %v2189_v36 = vpop.f32.mrb[9].mxu1 }
 0x164   : > { %v2118_v37 = vadd.f32 %v2117_v35, %v2116_v33  ;;  %v2810_v38 = vadd.f32 %v2189_v36, %v2188_v34  ;;  %v2119_v39 = vpop.f32.mrb[10].mxu0  ;;  %v2191_v40 = vpop.f32.mrb[10].mxu1  ;;  %v421_v34 = vld [vmem:[#allocation2 + $0x28] sm:$0xff] }
 0x165   : > { %v2120_v41 = vpop.f32.mrb[11].mxu0  ;;  %v2192_v42 = vpop.f32.mrb[11].mxu1 }
 0x166   : > { %v2121_v43 = vadd.f32 %v2120_v41, %v2119_v39  ;;  %v2812_v44 = vadd.f32 %v2192_v42, %v2191_v40 }
 0x16a   : > { %v2122_v45 = vpop.f32.mrb[12].mxu0  ;;  %v2194_v46 = vpop.f32.mrb[12].mxu1 }
 0x16b   : > { %v2123_v47 = vpop.f32.mrb[13].mxu0  ;;  %v2195_v48 = vpop.f32.mrb[13].mxu1 }
 0x16c   : > { %v2124_v49 = vadd.f32 %v2123_v47, %v2122_v45  ;;  %v2814_v50 = vadd.f32 %v2195_v48, %v2194_v46  ;;  %v2125_v51 = vpop.f32.mrb[14].mxu0  ;;  %v2197_v52 = vpop.f32.mrb[14].mxu1  ;;  %v426_v46 = vld [vmem:[#allocation2 + $0x50] sm:$0xff] }
 0x16d   : > { %v2126_v53 = vpop.f32.mrb[15].mxu0  ;;  %v2198_v54 = vpop.f32.mrb[15].mxu1 }
 0x16e   : > { %v2127_v55 = vadd.f32 %v2126_v53, %v2125_v51  ;;  %v2816_v56 = vadd.f32 %v2198_v54, %v2197_v52 }
 0x172   : > { %v2128_v57 = vpop.f32.mrb[16].mxu0  ;;  %v2242_v59 = vpop.f32.mrb[16].mxu1 }
 0x173   : > { %v1164_v60 = vadd.f32 %v2242_v59, %v2112_v25  ;;  %v2129_v61 = vpop.f32.mrb[17].mxu0  ;;  %v1155_v63 = vpop.f32.mrb[17].mxu1 }
 0x174   : > { %v2130_v0 = vadd.f32 %v2129_v61, %v2128_v57  ;;  %v1156_v1 = vadd.f32 %v2106_v13, %v1155_v63  ;;  %v2131_v2 = vpop.f32.mrb[18].mxu0  ;;  %v2243_v4 = vpop.f32.mrb[18].mxu1 }
 0x175   : > { %v1284_v5 = vadd.f32 %v1164_v60, %v418_v58  ;;  %v1167_v6 = vadd.f32 %v2243_v4, %v2115_v31  ;;  %v2132_v7 = vpop.f32.mrb[19].mxu0  ;;  %v1158_v9 = vpop.f32.mrb[19].mxu1  ;;  %v425_v60 = vld [vmem:[#allocation2 + $0x48] sm:$0xff] }
 0x176   : > { %v1282_v10 = vadd.f32 %v1156_v1, %v416_v62  ;;  %v2133_v11 = vadd.f32 %v2132_v7, %v2131_v2  ;;  %v1159_v12 = vadd.f32 %v2109_v19, %v1158_v9 }
 0x177   : > { %1316 = vst [vmem:[#allocation2 + $0x10] sm:$0xff] %v1284_v5  ;;  %v1285_v15 = vadd.f32 %v1167_v6, %v419_v3  ;;  %v428_v6 = vld [vmem:[#allocation2 + $0x60] sm:$0xff] }
 0x178   : > { %1314 = vst [vmem:[#allocation2] sm:$0xff] %v1282_v10  ;;  %v1283_v16 = vadd.f32 %v1159_v12, %v417_v8 }
 0x179   : > { %1317 = vst [vmem:[#allocation2 + $0x18] sm:$0xff] %v1285_v15  ;;  %v430_v15 = vld [vmem:[#allocation2 + $0x70] sm:$0xff] }
 0x17a   : > { %1315 = vst [vmem:[#allocation2 + $0x8] sm:$0xff] %v1283_v16  ;;  %v2134_v17 = vpop.f32.mrb[20].mxu0  ;;  %v2246_v13 = vpop.f32.mrb[20].mxu1 }
 0x17b   : > { %v1180_v21 = vadd.f32 %v2246_v13, %v2124_v49  ;;  %v2135_v22 = vpop.f32.mrb[21].mxu0  ;;  %v1171_v24 = vpop.f32.mrb[21].mxu1  ;;  %v424_v49 = vld [vmem:[#allocation2 + $0x40] sm:$0xff] }
 0x17c   : > { %v2136_v25 = vadd.f32 %v2135_v22, %v2134_v17  ;;  %v1172_v27 = vadd.f32 %v2118_v37, %v1171_v24  ;;  %v2137_v28 = vpop.f32.mrb[22].mxu0  ;;  %v2247_v30 = vpop.f32.mrb[22].mxu1  ;;  %v429_v17 = vld [vmem:[#allocation2 + $0x68] sm:$0xff] }
 0x17d   : > { %v1288_v31 = vadd.f32 %v1180_v21, %v422_v18  ;;  %v1183_v19 = vadd.f32 %v2247_v30, %v2127_v55  ;;  %v2138_v33 = vpop.f32.mrb[23].mxu0  ;;  %v1174_v35 = vpop.f32.mrb[23].mxu1  ;;  %v427_v55 = vld [vmem:[#allocation2 + $0x58] sm:$0xff] }
 0x17e   : > { %v1286_v36 = vadd.f32 %v1172_v27, %v420_v23  ;;  %v2139_v39 = vadd.f32 %v2138_v33, %v2137_v28  ;;  %v1175_v40 = vadd.f32 %v2121_v43, %v1174_v35  ;;  %v431_v23 = vld [vmem:[#allocation2 + $0x78] sm:$0xff] }
 0x17f   : > { %1320 = vst [vmem:[#allocation2 + $0x30] sm:$0xff] %v1288_v31  ;;  %v1289_v41 = vadd.f32 %v1183_v19, %v423_v29 }
 0x180   : > { %1318 = vst [vmem:[#allocation2 + $0x20] sm:$0xff] %v1286_v36  ;;  %v1287_v42 = vadd.f32 %v1175_v40, %v421_v34  ;;  %v432_v36 = vld [vmem:[#allocation2 + $0x80] sm:$0xff] }
 0x181   : > { %1321 = vst [vmem:[#allocation2 + $0x38] sm:$0xff] %v1289_v41 }
 0x182   : > { %1319 = vst [vmem:[#allocation2 + $0x28] sm:$0xff] %v1287_v42  ;;  %v2140_v45 = vpop.f32.mrb[24].mxu0  ;;  %v2250_v37 = vpop.f32.mrb[24].mxu1 }
 0x183   : > { %v1196_v47 = vadd.f32 %v2250_v37, %v2136_v25  ;;  %v2141_v48 = vpop.f32.mrb[25].mxu0  ;;  %v1187_v51 = vpop.f32.mrb[25].mxu1 }
 0x184   : > { %v2142_v52 = vadd.f32 %v2141_v48, %v2140_v45  ;;  %v1188_v53 = vadd.f32 %v2130_v0, %v1187_v51  ;;  %v2143_v54 = vpop.f32.mrb[26].mxu0  ;;  %v2251_v57 = vpop.f32.mrb[26].mxu1  ;;  %v433_v45 = vld [vmem:[#allocation2 + $0x88] sm:$0xff] }
 0x185   : > { %v1292_v58 = vadd.f32 %v1196_v47, %v426_v46  ;;  %v1199_v43 = vadd.f32 %v2251_v57, %v2139_v39  ;;  %v2144_v59 = vpop.f32.mrb[27].mxu0  ;;  %v1190_v61 = vpop.f32.mrb[27].mxu1  ;;  %v434_v57 = vld [vmem:[#allocation2 + $0x90] sm:$0xff] }
 0x186   : > { %v1290_v62 = vadd.f32 %v1188_v53, %v424_v49  ;;  %v2145_v63 = vadd.f32 %v2144_v59, %v2143_v54  ;;  %v1191_v1 = vadd.f32 %v2133_v11, %v1190_v61  ;;  %v435_v61 = vld [vmem:[#allocation2 + $0x98] sm:$0xff] }
 0x187   : > { %1324 = vst [vmem:[#allocation2 + $0x50] sm:$0xff] %v1292_v58  ;;  %v1293_v2 = vadd.f32 %v1199_v43, %v427_v55 }
 0x188   : > { %1322 = vst [vmem:[#allocation2 + $0x40] sm:$0xff] %v1290_v62  ;;  %v1291_v3 = vadd.f32 %v1191_v1, %v425_v60 }
 0x189   : > { %1325 = vst [vmem:[#allocation2 + $0x58] sm:$0xff] %v1293_v2 }
 0x18a   : > { %1323 = vst [vmem:[#allocation2 + $0x48] sm:$0xff] %v1291_v3  ;;  %v2146_v4 = vpop.f32.mrb[28].mxu0  ;;  %v2254_v5 = vpop.f32.mrb[28].mxu1  ;;  %v442_v3 = vld [vmem:[#allocation2 + $0xd0] sm:$0xff] }
 0x18b   : > { %v2147_v0 = vpop.f32.mrb[29].mxu0  ;;  %v1203_v7 = vpop.f32.mrb[29].mxu1 }
 0x18c   : > { %v2148_v8 = vadd.f32 %v2147_v0, %v2146_v4  ;;  %v1204_v9 = vadd.f32 %v2142_v52, %v1203_v7  ;;  %v2149_v10 = vpop.f32.mrb[30].mxu0  ;;  %v2255_v12 = vpop.f32.mrb[30].mxu1 }
 0x18d   : > { %v2150_v16 = vpop.f32.mrb[31].mxu0  ;;  %v1206_v18 = vpop.f32.mrb[31].mxu1 }
 0x18e   : > { %v1212_v11 = vadd.f32 %v2254_v5, %v2148_v8  ;;  %v1294_v13 = vadd.f32 %v1204_v9, %v428_v6  ;;  %v2151_v21 = vadd.f32 %v2150_v16, %v2149_v10  ;;  %v1207_v22 = vadd.f32 %v2145_v63, %v1206_v18  ;;  %v440_v6 = vld [vmem:[#allocation2 + $0xc0] sm:$0xff] }
 0x190   : > { %v1296_v24 = vadd.f32 %v1212_v11, %v430_v15  ;;  %1326 = vst [vmem:[#allocation2 + $0x60] sm:$0xff] %v1294_v13  ;;  %v1215_v25 = vadd.f32 %v2255_v12, %v2151_v21  ;;  %v1295_v27 = vadd.f32 %v1207_v22, %v429_v17  ;;  %v443_v12 = vld [vmem:[#allocation2 + $0xd8] sm:$0xff]  ;;  %v436_v17 = vld [vmem:[#allocation2 + $0xa0] sm:$0xff]  ;;  %v441_v13 = vld [vmem:[#allocation2 + $0xc8] sm:$0xff] }
 0x192   : > { %1328 = vst [vmem:[#allocation2 + $0x70] sm:$0xff] %v1296_v24  ;;  %v1297_v28 = vadd.f32 %v1215_v25, %v431_v23  ;;  %1327 = vst [vmem:[#allocation2 + $0x68] sm:$0xff] %v1295_v27  ;;  %v2152_v29 = vpop.f32.mrb[32].mxu0  ;;  %v2258_v30 = vpop.f32.mrb[32].mxu1  ;;  %v437_v27 = vld [vmem:[#allocation2 + $0xa8] sm:$0xff] }
 0x193   : > { %v2153_v31 = vpop.f32.mrb[33].mxu0  ;;  %v1219_v19 = vpop.f32.mrb[33].mxu1 }
 0x194   : > { %1329 = vst [vmem:[#allocation2 + $0x78] sm:$0xff] %v1297_v28  ;;  %v2154_v33 = vadd.f32 %v2153_v31, %v2152_v29  ;;  %v2155_v34 = vpop.f32.mrb[34].mxu0  ;;  %v2259_v35 = vpop.f32.mrb[34].mxu1  ;;  %v446_v31 = vld [vmem:[#allocation2 + $0xf0] sm:$0xff] }
 0x195   : > { %v2156_v39 = vpop.f32.mrb[35].mxu0  ;;  %v1222_v40 = vpop.f32.mrb[35].mxu1 }
 0x196   : > { %v1220_v41 = vadd.f32 %v2154_v33, %v1219_v19  ;;  %v2157_v42 = vadd.f32 %v2156_v39, %v2155_v34 }
 0x198   : > { %v1298_v46 = vadd.f32 %v1220_v41, %v432_v36  ;;  %v1223_v37 = vadd.f32 %v2157_v42, %v1222_v40  ;;  %v447_v41 = vld [vmem:[#allocation2 + $0xf8] sm:$0xff] }
 0x19a   : > { %1330 = vst [vmem:[#allocation2 + $0x80] sm:$0xff] %v1298_v46  ;;  %v1299_v47 = vadd.f32 %v1223_v37, %v433_v45  ;;  %v2158_v48 = vpop.f32.mrb[36].mxu0  ;;  %v2818_v49 = vpop.f32.mrb[36].mxu1  ;;  %v438_v46 = vld [vmem:[#allocation2 + $0xb0] sm:$0xff] }
 0x19b   : > { %v2159_v51 = vpop.f32.mrb[37].mxu0  ;;  %v1235_v52 = vpop.f32.mrb[37].mxu1 }
 0x19c   : > { %1331 = vst [vmem:[#allocation2 + $0x88] sm:$0xff] %v1299_v47  ;;  %v2160_v53 = vadd.f32 %v2159_v51, %v2158_v48  ;;  %v2161_v54 = vpop.f32.mrb[38].mxu0  ;;  %v2820_v55 = vpop.f32.mrb[38].mxu1  ;;  %v445_v48 = vld [vmem:[#allocation2 + $0xe8] sm:$0xff] }
 0x19d   : > { %v2162_v58 = vpop.f32.mrb[39].mxu0  ;;  %v1238_v43 = vpop.f32.mrb[39].mxu1 }
 0x19e   : > { %v1228_v59 = vadd.f32 %v2258_v30, %v2160_v53  ;;  %v2163_v60 = vadd.f32 %v2162_v58, %v2161_v54  ;;  %v439_v58 = vld [vmem:[#allocation2 + $0xb8] sm:$0xff] }
 0x1a0   : > { %v1300_v62 = vadd.f32 %v1228_v59, %v434_v57  ;;  %v1231_v63 = vadd.f32 %v2259_v35, %v2163_v60  ;;  %v444_v35 = vld [vmem:[#allocation2 + $0xe0] sm:$0xff]  ;;  %v1351_v60 = vld [vmem:[#allocation2 + $0x8] sm:$0xff] (!%p1926_p0) }
 0x1a2   : > { %1332 = vst [vmem:[#allocation2 + $0x90] sm:$0xff] %v1300_v62  ;;  %v1301_v1 = vadd.f32 %v1231_v63, %v435_v61  ;;  %v2164_v2 = vpop.f32.mrb[40].mxu0  ;;  %v2266_v4 = vpop.f32.mrb[40].mxu1 }
 0x1a3   : > { %v1260_v5 = vadd.f32 %v2266_v4, %v2806_v26  ;;  %v2165_v0 = vpop.f32.mrb[41].mxu0  ;;  %v1251_v7 = vpop.f32.mrb[41].mxu1 }
 0x1a4   : > { %1333 = vst [vmem:[#allocation2 + $0x98] sm:$0xff] %v1301_v1  ;;  %v2166_v8 = vadd.f32 %v2165_v0, %v2164_v2  ;;  %v1252_v9 = vadd.f32 %v2802_v14, %v1251_v7  ;;  %v2167_v10 = vpop.f32.mrb[42].mxu0  ;;  %v2267_v15 = vpop.f32.mrb[42].mxu1  ;;  %v1580_v1 = vmul.f32 (!%p1926_p0), %v1351_v60, %v1351_v60  ;;  %v1354_v2 = vld [vmem:[#allocation2 + $0x20] sm:$0xff] (!%p1926_p0) }
 0x1a5   : > { %v1308_v16 = vadd.f32 %v1260_v5, %v442_v3  ;;  %v1263_v18 = vadd.f32 %v2267_v15, %v2808_v32  ;;  %v2168_v11 = vpop.f32.mrb[43].mxu0  ;;  %v1254_v21 = vpop.f32.mrb[43].mxu1  ;;  %v1355_v3 = vld [vmem:[#allocation2 + $0x28] sm:$0xff] (!%p1926_p0) }
 0x1a6   : > { %v1236_v22 = vadd.f32 %v2166_v8, %v1235_v52  ;;  %v1306_v23 = vadd.f32 %v1252_v9, %v440_v6  ;;  %v2169_v26 = vadd.f32 %v2168_v11, %v2167_v10  ;;  %v1255_v24 = vadd.f32 %v2804_v20, %v1254_v21  ;;  %v1356_v6 = vld [vmem:[#allocation2 + $0x30] sm:$0xff] (!%p1926_p0)  ;;  %v1357_v10 = vld [vmem:[#allocation2 + $0x38] sm:$0xff] (!%p1926_p0)  ;;  %v2834_v15 = vld [vmem:[#allocation2 + $0x48] sm:$0xff] (!%p1926_p0) }
 0x1a7   : > { %1340 = vst [vmem:[#allocation2 + $0xd0] sm:$0xff] %v1308_v16  ;;  %v1309_v25 = vadd.f32 %v1263_v18, %v443_v12  ;;  %v2006_v0 = vpack.c.bf16 (!%p1926_p0), %v1355_v3, %v1354_v2  ;;  %v1358_v12 = vld [vmem:[#allocation2 + $0x40] sm:$0xff] (!%p1926_p0)  ;;  %v2011_v16 = vpack.c.bf16 (!%p1926_p0), %v1357_v10, %v1356_v6  ;;  %v2839_v18 = vld [vmem:[#allocation2 + $0x50] sm:$0xff] (!%p1926_p0)  ;;  %v1583_v21 = vmul.f32 (!%p1926_p0), %v1354_v2, %v1354_v2 }
 0x1a8   : > { %v1302_v28 = vadd.f32 %v1236_v22, %v436_v17  ;;  %1338 = vst [vmem:[#allocation2 + $0xc0] sm:$0xff] %v1306_v23  ;;  %v1239_v14 = vadd.f32 %v2169_v26, %v1238_v43  ;;  %v1307_v29 = vadd.f32 %v1255_v24, %v441_v13  ;;  %v2016_v17 = vpack.c.bf16 (!%p1926_p0), %v2834_v15, %v1358_v12  ;;  %v2841_v22 = vld [vmem:[#allocation2 + $0x58] sm:$0xff] (!%p1926_p0)  ;;  %v2843_v23 = vld [vmem:[#allocation2 + $0x60] sm:$0xff] (!%p1926_p0)  ;;  %v2845_v26 = vld [vmem:[#allocation2 + $0x68] sm:$0xff] (!%p1926_p0) }
 0x1a9   : > { %1341 = vst [vmem:[#allocation2 + $0xd8] sm:$0xff] %v1309_v25  ;;  %2074 = vst [vmem:[%s2719_s30 + $0x10] sm:$0xff] (!%p1926_p0), %v2006_v0   ;;  %v2021_v24 = vpack.c.bf16 (!%p1926_p0), %v2841_v22, %v2839_v18  ;;  %v2026_v25 = vpack.c.bf16 (!%p1926_p0), %v2845_v26, %v2843_v23 }
 0x1aa   : > { %1334 = vst [vmem:[#allocation2 + $0xa0] sm:$0xff] %v1302_v28  ;;  %v1303_v30 = vadd.f32 %v1239_v14, %v437_v27  ;;  %1339 = vst [vmem:[#allocation2 + $0xc8] sm:$0xff] %v1307_v29  ;;  %v2170_v32 = vpop.f32.mrb[44].mxu0  ;;  %v2270_v19 = vpop.f32.mrb[44].mxu1  ;;  %v2853_v27 = vld [vmem:[#allocation2 + $0x70] sm:$0xff] (!%p1926_p0)  ;;  %v1584_v29 = vmul.f32 (!%p1926_p0), %v1355_v3, %v1355_v3 }
 0x1ab   : > { %v1276_v33 = vadd.f32 %v2270_v19, %v2814_v50  ;;  %v2171_v34 = vpop.f32.mrb[45].mxu0  ;;  %v1267_v36 = vpop.f32.mrb[45].mxu1  ;;  %2075 = vst [vmem:[%s2719_s30 + $0x18] sm:$0xff] (!%p1926_p0), %v2011_v16   ;;  %2076 = vst [vmem:[%s2719_s30 + $0x20] sm:$0xff] (!%p1926_p0), %v2016_v17   ;;  %v1592_v16 = vmul.f32 (!%p1926_p0), %v2845_v26, %v2845_v26 }
 0x1ac   : > { %1335 = vst [vmem:[#allocation2 + $0xa8] sm:$0xff] %v1303_v30  ;;  %v2172_v20 = vadd.f32 %v2171_v34, %v2170_v32  ;;  %v1268_v39 = vadd.f32 %v2810_v38, %v1267_v36  ;;  %v2173_v40 = vpop.f32.mrb[46].mxu0  ;;  %v2271_v42 = vpop.f32.mrb[46].mxu1  ;;  %v2855_v30 = vld [vmem:[#allocation2 + $0x78] sm:$0xff] (!%p1926_p0)  ;;  %v2857_v32 = vld [vmem:[#allocation2 + $0x80] sm:$0xff] (!%p1926_p0)  ;;  %2077 = vst [vmem:[%s2719_s30 + $0x28] sm:$0xff] (!%p1926_p0), %v2021_v24  }
 0x1ad   : > { %v1312_v45 = vadd.f32 %v1276_v33, %v446_v31  ;;  %v1279_v37 = vadd.f32 %v2271_v42, %v2816_v56  ;;  %v2174_v47 = vpop.f32.mrb[47].mxu0  ;;  %v1270_v51 = vpop.f32.mrb[47].mxu1  ;;  %v2859_v31 = vld [vmem:[#allocation2 + $0x88] sm:$0xff] (!%p1926_p0)  ;;  %2078 = vst [vmem:[%s2719_s30 + $0x30] sm:$0xff] (!%p1926_p0), %v2026_v25   ;;  %v2031_v19 = vpack.c.bf16 (!%p1926_p0), %v2855_v30, %v2853_v27  ;;  %v2867_v34 = vld [vmem:[#allocation2 + $0x90] sm:$0xff] (!%p1926_p0) }
 0x1ae   : > { %v1244_v52 = vadd.f32 %v2818_v49, %v2172_v20  ;;  %v1310_v50 = vadd.f32 %v1268_v39, %v444_v35  ;;  %v2175_v53 = vadd.f32 %v2174_v47, %v2173_v40  ;;  %v1271_v54 = vadd.f32 %v2812_v44, %v1270_v51  ;;  %1349 = sbr.rel (%p1926_p0) target bundleno = 510 (0x1fe), region = 62  ;;  %v1350_v49 = vld [vmem:[#allocation2] sm:$0xff] (!%p1926_p0)  ;;  %v1352_v44 = vld [vmem:[#allocation2 + $0x10] sm:$0xff] (!%p1926_p0)  ;;  %v2869_v39 = vld [vmem:[#allocation2 + $0x98] sm:$0xff] (!%p1926_p0) }
 0x1af   : > { %1344 = vst [vmem:[#allocation2 + $0xf0] sm:$0xff] %v1312_v45  ;;  %v1313_v57 = vadd.f32 %v1279_v37, %v447_v41  ;;  %v1996_v61 = vpack.c.bf16 (!%p1926_p0), %v1351_v60, %v1350_v49  ;;  %v1542_v62 = vadd.f32 (!%p1926_p0), %v1351_v60, %v1350_v49  ;;  %v1579_v63 = vmul.f32 (!%p1926_p0), %v1350_v49, %v1350_v49 }
 0x1b0   : > { %v1304_v38 = vadd.f32 %v1244_v52, %v438_v46  ;;  %1342 = vst [vmem:[#allocation2 + $0xe0] sm:$0xff] %v1310_v50  ;;  %v1247_v43 = vadd.f32 %v2820_v55, %v2175_v53  ;;  %v1311_v59 = vadd.f32 %v1271_v54, %v445_v48  ;;  %v1353_v55 = vld [vmem:[#allocation2 + $0x18] sm:$0xff] (!%p1926_p0)  ;;  %v1581_v5 = vmul.f32 (!%p1926_p0), %v1352_v44, %v1352_v44  ;;  %v2885_v52 = vld [vmem:[#allocation2 + $0xc0] sm:$0xff] (!%p1926_p0) }
 0x1b1   : > { %1345 = vst [vmem:[#allocation2 + $0xf8] sm:$0xff] %v1313_v57  ;;  %v2001_v4 = vpack.c.bf16 (!%p1926_p0), %v1353_v55, %v1352_v44  ;;  %1997 = vst [vmem:[%s2719_s30] sm:$0xff] (!%p1926_p0), %v1996_v61   ;;  %v1611_v7 = vadd.f32 (!%p1926_p0), %v1580_v1, %v1579_v63  ;;  %v1543_v8 = vadd.f32 (!%p1926_p0), %v1542_v62, %v1352_v44  ;;  %v2871_v40 = vld [vmem:[#allocation2 + $0xa0] sm:$0xff] (!%p1926_p0)  ;;  %v2887_v50 = vld [vmem:[#allocation2 + $0xc8] sm:$0xff] (!%p1926_p0) }
 0x1b2   : > { %1336 = vst [vmem:[#allocation2 + $0xb0] sm:$0xff] %v1304_v38  ;;  %v1305_v56 = vadd.f32 %v1247_v43, %v439_v58  ;;  %1343 = vst [vmem:[#allocation2 + $0xe8] sm:$0xff] %v1311_v59  ;;  %v1582_v9 = vmul.f32 (!%p1926_p0), %v1353_v55, %v1353_v55  ;;  %v2036_v33 = vpack.c.bf16 (!%p1926_p0), %v2859_v31, %v2857_v32  ;;  %v2895_v57 = vld [vmem:[#allocation2 + $0xd0] sm:$0xff] (!%p1926_p0)  ;;  %v2897_v59 = vld [vmem:[#allocation2 + $0xd8] sm:$0xff] (!%p1926_p0) }
 0x1b3   : > { %2073 = vst [vmem:[%s2719_s30 + $0x8] sm:$0xff] (!%p1926_p0), %v2001_v4   ;;  %v1544_v11 = vadd.f32 (!%p1926_p0), %v1543_v8, %v1353_v55  ;;  %v1612_v13 = vadd.f32 (!%p1926_p0), %v1611_v7, %v1581_v5  ;;  %v1585_v20 = vmul.f32 (!%p1926_p0), %v1356_v6, %v1356_v6  ;;  %v2873_v41 = vld [vmem:[#allocation2 + $0xa8] sm:$0xff] (!%p1926_p0)  ;;  %2079 = vst [vmem:[%s2719_s30 + $0x38] sm:$0xff] (!%p1926_p0), %v2031_v19  }
 0x1b4   : > { %1337 = vst [vmem:[#allocation2 + $0xb8] sm:$0xff] %v1305_v56  ;;  %2080 = vst [vmem:[%s2719_s30 + $0x40] sm:$0xff] (!%p1926_p0), %v2036_v33   ;;  %v2041_v42 = vpack.c.bf16 (!%p1926_p0), %v2869_v39, %v2867_v34  ;;  %v2046_v45 = vpack.c.bf16 (!%p1926_p0), %v2873_v41, %v2871_v40  ;;  %v1586_v48 = vmul.f32 (!%p1926_p0), %v1357_v10, %v1357_v10 }
 0x1b5   : > { %v1613_v28 = vadd.f32 %v1612_v13, %v1582_v9  ;;  %v1545_v14 = vadd.f32 %v1544_v11, %v1354_v2  ;;  %v2056_v54 = vpack.c.bf16 %v2887_v50, %v2885_v52  ;;  %v1587_v43 = vmul.f32 %v1358_v12, %v1358_v12 }
 0x1b6   : > { %2081 = vst [vmem:[%s2719_s30 + $0x48] sm:$0xff] %v2041_v42   ;;  %2082 = vst [vmem:[%s2719_s30 + $0x50] sm:$0xff] %v2046_v45   ;;  %v2061_v60 = vpack.c.bf16 %v2897_v59, %v2895_v57  ;;  %v1588_v63 = vmul.f32 %v2834_v15, %v2834_v15  ;;  %v2911_v1 = vld [vmem:[#allocation2 + $0xf0] sm:$0xff]  ;;  %v1589_v5 = vmul.f32 %v2839_v18, %v2839_v18 }
 0x1b7   : > { %v1546_v35 = vadd.f32 %v1545_v14, %v1355_v3  ;;  %v1614_v36 = vadd.f32 %v1613_v28, %v1583_v21  ;;  %v2899_v56 = vld [vmem:[#allocation2 + $0xe0] sm:$0xff]  ;;  %2084 = vst [vmem:[%s2719_s30 + $0x60] sm:$0xff] %v2056_v54   ;;  %v1590_v7 = vmul.f32 %v2841_v22, %v2841_v22 }
 0x1b8   : > { %v2913_v55 = vld [vmem:[#allocation2 + $0xf8] sm:$0xff]  ;;  %2085 = vst [vmem:[%s2719_s30 + $0x68] sm:$0xff] %v2061_v60  }
 0x1b9   : > { %v2881_v46 = vld [vmem:[#allocation2 + $0xb0] sm:$0xff]  ;;  %v1615_v37 = vadd.f32 %v1614_v36, %v1584_v29  ;;  %v1547_v47 = vadd.f32 %v1546_v35, %v1356_v6  ;;  %v2901_v49 = vld [vmem:[#allocation2 + $0xe8] sm:$0xff]  ;;  %v2071_v2 = vpack.c.bf16 %v2913_v55, %v2911_v1 }
 0x1ba   : > { %v2066_v44 = vpack.c.bf16 %v2901_v49, %v2899_v56 }
 0x1bb   : > { %v2883_v51 = vld [vmem:[#allocation2 + $0xb8] sm:$0xff]  ;;  %v1548_v58 = vadd.f32 %v1547_v47, %v1357_v10  ;;  %v1616_v38 = vadd.f32 %v1615_v37, %v1585_v20  ;;  %2087 = vst [vmem:[%s2719_s30 + $0x78] sm:$0xff] %v2071_v2   ;;  %v1591_v10 = vmul.f32 %v2843_v23, %v2843_v23 }
 0x1bc   : > { %v2051_v53 = vpack.c.bf16 %v2883_v51, %v2881_v46  ;;  %2086 = vst [vmem:[%s2719_s30 + $0x70] sm:$0xff] %v2066_v44  }
 0x1bd   : > { %v1617_v61 = vadd.f32 %v1616_v38, %v1586_v48  ;;  %v1549_v62 = vadd.f32 %v1548_v58, %v1358_v12 }
 0x1be   : > { %2083 = vst [vmem:[%s2719_s30 + $0x58] sm:$0xff] %v2051_v53  }
 0x1bf   : > { %v1550_v3 = vadd.f32 %v1549_v62, %v2834_v15  ;;  %v1618_v4 = vadd.f32 %v1617_v61, %v1587_v43 }
 0x1c1   : > { %v1619_v0 = vadd.f32 %v1618_v4, %v1588_v63  ;;  %v1551_v6 = vadd.f32 %v1550_v3, %v2839_v18  ;;  %v1593_v18 = vmul.f32 %v2853_v27, %v2853_v27 }
 0x1c3   : > { %v1552_v8 = vadd.f32 %v1551_v6, %v2841_v22  ;;  %v1620_v9 = vadd.f32 %v1619_v0, %v1589_v5  ;;  %v1594_v22 = vmul.f32 %v2855_v30, %v2855_v30 }
 0x1c5   : > { %v1621_v12 = vadd.f32 %v1620_v9, %v1590_v7  ;;  %v1553_v15 = vadd.f32 %v1552_v8, %v2843_v23  ;;  %v1595_v23 = vmul.f32 %v2857_v32, %v2857_v32 }
 0x1c7   : > { %v1554_v17 = vadd.f32 %v1553_v15, %v2845_v26  ;;  %v1622_v11 = vadd.f32 %v1621_v12, %v1591_v10  ;;  %v1596_v26 = vmul.f32 %v2859_v31, %v2859_v31 }
 0x1c9   : > { %v1623_v13 = vadd.f32 %v1622_v11, %v1592_v16  ;;  %v1555_v21 = vadd.f32 %v1554_v17, %v2853_v27  ;;  %v1597_v27 = vmul.f32 %v2867_v34, %v2867_v34 }
 0x1cb   : > { %v1556_v24 = vadd.f32 %v1555_v21, %v2855_v30  ;;  %v1624_v25 = vadd.f32 %v1623_v13, %v1593_v18  ;;  %v1598_v30 = vmul.f32 %v2869_v39, %v2869_v39 }
 0x1cd   : > { %v1625_v28 = vadd.f32 %v1624_v25, %v1594_v22  ;;  %v1557_v14 = vadd.f32 %v1556_v24, %v2857_v32  ;;  %v1599_v32 = vmul.f32 %v2871_v40, %v2871_v40 }
 0x1cf   : > { %v1558_v29 = vadd.f32 %v1557_v14, %v2859_v31  ;;  %v1626_v19 = vadd.f32 %v1625_v28, %v1595_v23  ;;  %v1600_v31 = vmul.f32 %v2873_v41, %v2873_v41 }
 0x1d1   : > { %v1627_v33 = vadd.f32 %v1626_v19, %v1596_v26  ;;  %v1559_v35 = vadd.f32 %v1558_v29, %v2867_v34  ;;  %v1601_v34 = vmul.f32 %v2881_v46, %v2881_v46 }
 0x1d3   : > { %v1560_v36 = vadd.f32 %v1559_v35, %v2869_v39  ;;  %v1628_v20 = vadd.f32 %v1627_v33, %v1597_v27  ;;  %v1602_v39 = vmul.f32 %v2883_v51, %v2883_v51 }
 0x1d5   : > { %v1629_v42 = vadd.f32 %v1628_v20, %v1598_v30  ;;  %v1561_v45 = vadd.f32 %v1560_v36, %v2871_v40  ;;  %v1603_v40 = vmul.f32 %v2885_v52, %v2885_v52 }
 0x1d7   : > { %v1562_v37 = vadd.f32 %v1561_v45, %v2873_v41  ;;  %v1630_v47 = vadd.f32 %v1629_v42, %v1599_v32  ;;  %v1604_v41 = vmul.f32 %v2887_v50, %v2887_v50 }
 0x1d9   : > { %v1631_v48 = vadd.f32 %v1630_v47, %v1600_v31  ;;  %v1563_v53 = vadd.f32 %v1562_v37, %v2881_v46  ;;  %v1605_v46 = vmul.f32 %v2895_v57, %v2895_v57 }
 0x1db   : > { %v1564_v54 = vadd.f32 %v1563_v53, %v2883_v51  ;;  %v1632_v58 = vadd.f32 %v1631_v48, %v1601_v34  ;;  %v1606_v51 = vmul.f32 %v2897_v59, %v2897_v59 }
 0x1dd   : > { %v1633_v38 = vadd.f32 %v1632_v58, %v1602_v39  ;;  %v1565_v43 = vadd.f32 %v1564_v54, %v2885_v52  ;;  %v1607_v52 = vmul.f32 %v2899_v56, %v2899_v56 }
 0x1df   : > { %v1566_v60 = vadd.f32 %v1565_v43, %v2887_v50  ;;  %v1634_v44 = vadd.f32 %v1633_v38, %v1603_v40  ;;  %v1608_v50 = vmul.f32 %v2901_v49, %v2901_v49 }
 0x1e1   : > { %v1635_v61 = vadd.f32 %v1634_v44, %v1604_v41  ;;  %v1567_v62 = vadd.f32 %v1566_v60, %v2895_v57  ;;  %v1609_v57 = vmul.f32 %v2911_v1, %v2911_v1 }
 0x1e3   : > { %v1568_v63 = vadd.f32 %v1567_v62, %v2897_v59  ;;  %v1636_v2 = vadd.f32 %v1635_v61, %v1605_v46  ;;  %v1610_v59 = vmul.f32 %v2913_v55, %v2913_v55 }
 0x1e5   : > { %v1637_v3 = vadd.f32 %v1636_v2, %v1606_v51  ;;  %v1569_v4 = vadd.f32 %v1568_v63, %v2899_v56 }
 0x1e7   : > { %v1570_v5 = vadd.f32 %v1569_v4, %v2901_v49  ;;  %v1638_v0 = vadd.f32 %v1637_v3, %v1607_v52 }
 0x1e9   : > { %v1639_v6 = vadd.f32 %v1638_v0, %v1608_v50  ;;  %v1571_v7 = vadd.f32 %v1570_v5, %v2911_v1 }
 0x1eb   : > { %v1572_v8 = vadd.f32 %v1571_v7, %v2913_v55  ;;  %v1640_v9 = vadd.f32 %v1639_v6, %v1609_v57 }
 0x1ed   : > { %v1573_v10 = vrot.slane %v1572_v8, 4  ;;  %v1641_v56 = vadd.f32 %v1640_v9, %v1610_v59 }
 0x1ef   : > { %v1574_v12 = vadd.f32 %v1573_v10, %v1572_v8  ;;  %v1642_v15 = vrot.slane %v1641_v56, 4 }
 0x1f1   : > { %v1575_v16 = vrot.slane %v1574_v12, 2  ;;  %v1643_v49 = vadd.f32 %v1642_v15, %v1641_v56 }
 0x1f3   : > { %v1576_v17 = vadd.f32 %v1575_v16, %v1574_v12  ;;  %v1644_v11 = vrot.slane %v1643_v49, 2 }
 0x1f5   : > { %v1577_v18 = vrot.slane %v1576_v17, 1  ;;  %v1645_v13 = vadd.f32 %v1644_v11, %v1643_v49 }
 0x1f7   : > { %v1578_v21 = vadd.f32 %v1577_v18, %v1576_v17  ;;  %v1646_v22 = vrot.slane %v1645_v13, 1 }
 0x1f9   : > { %v1647_v1 = vadd.f32 %v1646_v22, %v1645_v13 }
 0x1fb   : > { %v1649_v24 = vsel %vm1648_vm0, %v1578_v21, %v1647_v1 }
 0x1fc   : > { %v1651_v25 = vsel %vm1650_vm1, %v1649_v24, 0.0 }
 0x1fd   : > { %1652 = vst [vmem:[%s2725_s6] sm:$0xff] %v1651_v25 }
 0x1fe PF: > { %s14_s18 = sadd.s32 1, %s2490_s18   ;;  %s3013_s12 = smov %s2470_s13 }
 0x1ff   : > { %p11_p1 = scmp.ge.s32.totalorder %s14_s18, 8   ;;  %s3014_s13 = smov %s2564_s25 }
 0x200   : > { %s3015_s14 = smov %s2482_s16  ;;  %s3016_s15 = smov %s2486_s17 }
 0x201   : > { %s3017_s16 = smov %s3020_s19  ;;  %s3018_s17 = smov %s3024_s20 }
 0x202   :  { %13 = sbr.rel (!%p11_p1) target bundleno = 4 (0x4), region = 118 }

// kernel: resunet_fwd.59
= control target key start
LH: loop header
LB: loop body
LE: loop exit
PB: predicated region body
PF: predicated region fallthrough
CT: control target
= control target key end

     0   :  { %s1957_s0 = inlined_call_operand.vmem [shape: bf16[512,128], index: 0, kind: input, shape index: {}]   ;;  %s1958_s1 = inlined_call_operand.vmem [shape: f32[1,128], index: 1, kind: input, shape index: {}]   ;;  %s1959_s2 = inlined_call_operand.vmem [shape: f32[1,128], index: 2, kind: input, shape index: {}]   ;;  %s1960_s3 = inlined_call_operand.vmem [shape: bf16[512,128], index: 3, kind: input, shape index: {}]   ;;  %s1961_s4 = inlined_call_operand.vmem [shape: bf16[512,128], index: 4, kind: output, shape index: {}]  }
   0x1   :  { %v998_v0 = vld [vmem:[%s1957_s0] sm:$0xff]   ;;  %v1413_v5 = vld [vmem:[%s1957_s0 + $0x8] sm:$0xff]   ;;  %v1414_v12 = vld [vmem:[%s1957_s0 + $0x10] sm:$0xff]  }
   0x2   :  { %v1537_v1 = vld [vmem:[%s1958_s1] ss:$0 sm:$0xff]  ;;  %v999_v2 = vunpack.c.l.bf16 %v998_v0  ;;  %v1000_v3 = vunpack.c.h.bf16 %v998_v0  ;;  %v1444_v6 = vld [vmem:[%s1960_s3 + $0x8] sm:$0xff]   ;;  %v1003_v10 = vunpack.c.l.bf16 %v1413_v5  ;;  %v1004_v11 = vunpack.c.h.bf16 %v1413_v5  ;;  %v1445_v13 = vld [vmem:[%s1960_s3 + $0x10] sm:$0xff]  }
   0x3   :  { %v1126_v4 = vld [vmem:[%s1960_s3] sm:$0xff]   ;;  %v1131_v16 = vunpack.c.l.bf16 %v1444_v6  ;;  %v1132_v17 = vunpack.c.h.bf16 %v1444_v6  ;;  %v1007_v20 = vunpack.c.l.bf16 %v1414_v12  ;;  %v1008_v21 = vunpack.c.h.bf16 %v1414_v12  ;;  %v1415_v22 = vld [vmem:[%s1957_s0 + $0x18] sm:$0xff]   ;;  %v1417_v54 = vld [vmem:[%s1957_s0 + $0x28] sm:$0xff]  }
   0x4   :  { %v1551_v7 = vld [vmem:[%s1959_s2] ss:$0 sm:$0xff]  ;;  %v1127_v8 = vunpack.c.l.bf16 %v1126_v4  ;;  %v1128_v9 = vunpack.c.h.bf16 %v1126_v4  ;;  %v152_v14 = vmul.f32 %v999_v2, %v1537_v1  ;;  %v153_v15 = vmul.f32 %v1000_v3, %v1537_v1  ;;  %v1446_v39 = vld [vmem:[%s1960_s3 + $0x18] sm:$0xff]   ;;  %v1448_v63 = vld [vmem:[%s1960_s3 + $0x28] sm:$0xff]  }
   0x5   :  { %v154_v18 = vmul.f32 %v1003_v10, %v1537_v1  ;;  %v155_v19 = vmul.f32 %v1004_v11, %v1537_v1  ;;  %v1135_v25 = vunpack.c.l.bf16 %v1445_v13  ;;  %v1136_v26 = vunpack.c.h.bf16 %v1445_v13  ;;  %v1416_v48 = vld [vmem:[%s1957_s0 + $0x20] sm:$0xff]   ;;  %v1418_v5 = vld [vmem:[%s1957_s0 + $0x30] sm:$0xff]  }
   0x6   :  { %v223_v23 = vadd.f32 %v1551_v7, %v152_v14  ;;  %v224_v24 = vadd.f32 %v1551_v7, %v153_v15  ;;  %v156_v29 = vmul.f32 %v1007_v20, %v1537_v1  ;;  %v157_v30 = vmul.f32 %v1008_v21, %v1537_v1  ;;  %v1447_v49 = vld [vmem:[%s1960_s3 + $0x20] sm:$0xff]   ;;  %v1449_v11 = vld [vmem:[%s1960_s3 + $0x30] sm:$0xff]   ;;  %v1419_v20 = vld [vmem:[%s1957_s0 + $0x38] sm:$0xff]  }
   0x7   :  { %v225_v27 = vadd.f32 %v1551_v7, %v154_v18  ;;  %v226_v28 = vadd.f32 %v1551_v7, %v155_v19  ;;  %v1011_v33 = vunpack.c.l.bf16 %v1415_v22  ;;  %v1012_v34 = vunpack.c.h.bf16 %v1415_v22 }
   0x8   :  { %v415_v31 = vadd.f32 %v1127_v8, %v223_v23  ;;  %v416_v32 = vadd.f32 %v1128_v9, %v224_v24  ;;  %v227_v37 = vadd.f32 %v1551_v7, %v156_v29  ;;  %v228_v38 = vadd.f32 %v1551_v7, %v157_v30 }
   0x9   :  { %v417_v35 = vadd.f32 %v1131_v16, %v225_v27  ;;  %v418_v36 = vadd.f32 %v1132_v17, %v226_v28  ;;  %v158_v42 = vmul.f32 %v1011_v33, %v1537_v1  ;;  %v159_v43 = vmul.f32 %v1012_v34, %v1537_v1  ;;  %v1450_v33 = vld [vmem:[%s1960_s3 + $0x38] sm:$0xff]  }
   0xa   :  { %v479_v40 = vmax.f32 %v415_v31, 0.0  ;;  %v480_v41 = vmax.f32 %v416_v32, 0.0  ;;  %v419_v46 = vadd.f32 %v1135_v25, %v227_v37  ;;  %v420_v47 = vadd.f32 %v1136_v26, %v228_v38 }
   0xb   :  { %v481_v44 = vmax.f32 %v417_v35, 0.0  ;;  %v482_v45 = vmax.f32 %v418_v36, 0.0  ;;  %v229_v51 = vadd.f32 %v1551_v7, %v158_v42  ;;  %v230_v52 = vadd.f32 %v1551_v7, %v159_v43  ;;  %v1420_v42 = vld [vmem:[%s1957_s0 + $0x40] sm:$0xff]  }
   0xc   :  { %v1256_v50 = vpack.c.bf16 %v480_v41, %v479_v40  ;;  %v1139_v53 = vunpack.c.l.bf16 %v1446_v39  ;;  %v483_v56 = vmax.f32 %v419_v46, 0.0  ;;  %v484_v57 = vmax.f32 %v420_v47, 0.0  ;;  %v1451_v47 = vld [vmem:[%s1960_s3 + $0x40] sm:$0xff]  }
   0xd   :  { %v1261_v55 = vpack.c.bf16 %v482_v45, %v481_v44  ;;  %v1140_v58 = vunpack.c.h.bf16 %v1446_v39  ;;  %v1015_v60 = vunpack.c.l.bf16 %v1416_v48  ;;  %v1016_v61 = vunpack.c.h.bf16 %v1416_v48 }
   0xe   :  { %1257 = vst [vmem:[%s1961_s4] sm:$0xff] %v1256_v50   ;;  %v421_v59 = vadd.f32 %v1139_v53, %v229_v51  ;;  %v1143_v62 = vunpack.c.l.bf16 %v1447_v49  ;;  %v1266_v0 = vpack.c.bf16 %v484_v57, %v483_v56  ;;  %v1144_v3 = vunpack.c.h.bf16 %v1447_v49 }
   0xf   :  { %1475 = vst [vmem:[%s1961_s4 + $0x8] sm:$0xff] %v1261_v55   ;;  %v422_v2 = vadd.f32 %v1140_v58, %v230_v52  ;;  %v1019_v4 = vunpack.c.l.bf16 %v1417_v54  ;;  %v160_v8 = vmul.f32 %v1015_v60, %v1537_v1  ;;  %v161_v9 = vmul.f32 %v1016_v61, %v1537_v1  ;;  %v1421_v52 = vld [vmem:[%s1957_s0 + $0x48] sm:$0xff]  }
  0x10   :  { %v485_v6 = vmax.f32 %v421_v59, 0.0  ;;  %v1020_v10 = vunpack.c.h.bf16 %v1417_v54  ;;  %1476 = vst [vmem:[%s1961_s4 + $0x10] sm:$0xff] %v1266_v0   ;;  %v1147_v14 = vunpack.c.l.bf16 %v1448_v63  ;;  %v1148_v15 = vunpack.c.h.bf16 %v1448_v63  ;;  %v1452_v61 = vld [vmem:[%s1960_s3 + $0x48] sm:$0xff]  }
  0x11   :  { %v486_v12 = vmax.f32 %v422_v2, 0.0  ;;  %v162_v13 = vmul.f32 %v1019_v4, %v1537_v1  ;;  %v231_v16 = vadd.f32 %v1551_v7, %v160_v8  ;;  %v232_v17 = vadd.f32 %v1551_v7, %v161_v9 }
  0x12   :  { %v163_v18 = vmul.f32 %v1020_v10, %v1537_v1  ;;  %v1023_v19 = vunpack.c.l.bf16 %v1418_v5  ;;  %v1024_v23 = vunpack.c.h.bf16 %v1418_v5  ;;  %v1151_v24 = vunpack.c.l.bf16 %v1449_v11 }
  0x13   :  { %v1271_v21 = vpack.c.bf16 %v486_v12, %v485_v6  ;;  %v233_v22 = vadd.f32 %v1551_v7, %v162_v13  ;;  %v423_v25 = vadd.f32 %v1143_v62, %v231_v16  ;;  %v424_v26 = vadd.f32 %v1144_v3, %v232_v17  ;;  %v1422_v3 = vld [vmem:[%s1957_s0 + $0x50] sm:$0xff]  }
  0x14   :  { %v234_v27 = vadd.f32 %v1551_v7, %v163_v18  ;;  %v164_v28 = vmul.f32 %v1023_v19, %v1537_v1  ;;  %v165_v30 = vmul.f32 %v1024_v23, %v1537_v1  ;;  %v1152_v31 = vunpack.c.h.bf16 %v1449_v11  ;;  %v1453_v13 = vld [vmem:[%s1960_s3 + $0x50] sm:$0xff]  }
  0x15   :  { %1477 = vst [vmem:[%s1961_s4 + $0x18] sm:$0xff] %v1271_v21   ;;  %v425_v29 = vadd.f32 %v1147_v14, %v233_v22  ;;  %v1027_v32 = vunpack.c.l.bf16 %v1419_v20  ;;  %v487_v34 = vmax.f32 %v423_v25, 0.0  ;;  %v488_v35 = vmax.f32 %v424_v26, 0.0  ;;  %v1423_v22 = vld [vmem:[%s1957_s0 + $0x58] sm:$0xff]  }
  0x16   :  { %v426_v36 = vadd.f32 %v1148_v15, %v234_v27  ;;  %v235_v37 = vadd.f32 %v1551_v7, %v164_v28  ;;  %v236_v39 = vadd.f32 %v1551_v7, %v165_v30  ;;  %v1028_v40 = vunpack.c.h.bf16 %v1419_v20 }
  0x17   :  { %v489_v38 = vmax.f32 %v425_v29, 0.0  ;;  %v166_v41 = vmul.f32 %v1027_v32, %v1537_v1  ;;  %v1276_v43 = vpack.c.bf16 %v488_v35, %v487_v34  ;;  %v1155_v46 = vunpack.c.l.bf16 %v1450_v33 }
  0x18   :  { %v490_v44 = vmax.f32 %v426_v36, 0.0  ;;  %v427_v45 = vadd.f32 %v1151_v24, %v235_v37  ;;  %v428_v48 = vadd.f32 %v1152_v31, %v236_v39  ;;  %v167_v49 = vmul.f32 %v1028_v40, %v1537_v1  ;;  %v1454_v31 = vld [vmem:[%s1960_s3 + $0x58] sm:$0xff]   ;;  %v1424_v36 = vld [vmem:[%s1957_s0 + $0x60] sm:$0xff]  }
  0x19   :  { %v237_v50 = vadd.f32 %v1551_v7, %v166_v41  ;;  %v1156_v51 = vunpack.c.h.bf16 %v1450_v33  ;;  %1478 = vst [vmem:[%s1961_s4 + $0x20] sm:$0xff] %v1276_v43   ;;  %v1031_v55 = vunpack.c.l.bf16 %v1420_v42  ;;  %v1032_v56 = vunpack.c.h.bf16 %v1420_v42 }
  0x1a   :  { %v1281_v53 = vpack.c.bf16 %v490_v44, %v489_v38  ;;  %v491_v54 = vmax.f32 %v427_v45, 0.0  ;;  %v492_v57 = vmax.f32 %v428_v48, 0.0  ;;  %v238_v58 = vadd.f32 %v1551_v7, %v167_v49  ;;  %v1455_v45 = vld [vmem:[%s1960_s3 + $0x60] sm:$0xff]  }
  0x1b   :  { %v429_v59 = vadd.f32 %v1155_v46, %v237_v50  ;;  %v1159_v60 = vunpack.c.l.bf16 %v1451_v47  ;;  %v168_v62 = vmul.f32 %v1031_v55, %v1537_v1  ;;  %v169_v63 = vmul.f32 %v1032_v56, %v1537_v1  ;;  %v1425_v50 = vld [vmem:[%s1957_s0 + $0x68] sm:$0xff]  }
  0x1c   :  { %1479 = vst [vmem:[%s1961_s4 + $0x28] sm:$0xff] %v1281_v53   ;;  %v1160_v0 = vunpack.c.h.bf16 %v1451_v47  ;;  %v1035_v2 = vunpack.c.l.bf16 %v1421_v52  ;;  %v1286_v4 = vpack.c.bf16 %v492_v57, %v491_v54  ;;  %v430_v5 = vadd.f32 %v1156_v51, %v238_v58 }
  0x1d   :  { %v493_v6 = vmax.f32 %v429_v59, 0.0  ;;  %v1036_v8 = vunpack.c.h.bf16 %v1421_v52  ;;  %v239_v9 = vadd.f32 %v1551_v7, %v168_v62  ;;  %v240_v10 = vadd.f32 %v1551_v7, %v169_v63  ;;  %v1456_v59 = vld [vmem:[%s1960_s3 + $0x68] sm:$0xff]  }
  0x1e   :  { %v170_v11 = vmul.f32 %v1035_v2, %v1537_v1  ;;  %v1163_v12 = vunpack.c.l.bf16 %v1452_v61  ;;  %1480 = vst [vmem:[%s1961_s4 + $0x30] sm:$0xff] %v1286_v4   ;;  %v494_v14 = vmax.f32 %v430_v5, 0.0  ;;  %v1164_v16 = vunpack.c.h.bf16 %v1452_v61  ;;  %v1426_v5 = vld [vmem:[%s1957_s0 + $0x70] sm:$0xff]  }
  0x1f   :  { %v171_v15 = vmul.f32 %v1036_v8, %v1537_v1  ;;  %v1039_v17 = vunpack.c.l.bf16 %v1422_v3  ;;  %v431_v18 = vadd.f32 %v1159_v60, %v239_v9  ;;  %v432_v19 = vadd.f32 %v1160_v0, %v240_v10 }
  0x20   :  { %v241_v20 = vadd.f32 %v1551_v7, %v170_v11  ;;  %v1040_v21 = vunpack.c.h.bf16 %v1422_v3  ;;  %v1291_v23 = vpack.c.bf16 %v494_v14, %v493_v6  ;;  %v1167_v26 = vunpack.c.l.bf16 %v1453_v13  ;;  %v1457_v11 = vld [vmem:[%s1960_s3 + $0x70] sm:$0xff]  }
  0x21   :  { %v242_v24 = vadd.f32 %v1551_v7, %v171_v15  ;;  %v172_v25 = vmul.f32 %v1039_v17, %v1537_v1  ;;  %v495_v27 = vmax.f32 %v431_v18, 0.0  ;;  %v496_v28 = vmax.f32 %v432_v19, 0.0 }
  0x22   :  { %v433_v29 = vadd.f32 %v1163_v12, %v241_v20  ;;  %v173_v30 = vmul.f32 %v1040_v21, %v1537_v1  ;;  %1481 = vst [vmem:[%s1961_s4 + $0x38] sm:$0xff] %v1291_v23   ;;  %v1168_v34 = vunpack.c.h.bf16 %v1453_v13  ;;  %v1043_v35 = vunpack.c.l.bf16 %v1423_v22  ;;  %v1427_v20 = vld [vmem:[%s1957_s0 + $0x78] sm:$0xff]  }
  0x23   :  { %v434_v32 = vadd.f32 %v1164_v16, %v242_v24  ;;  %v243_v33 = vadd.f32 %v1551_v7, %v172_v25  ;;  %v1296_v37 = vpack.c.bf16 %v496_v28, %v495_v27  ;;  %v1044_v40 = vunpack.c.h.bf16 %v1423_v22 }
  0x24   :  { %v497_v38 = vmax.f32 %v433_v29, 0.0  ;;  %v244_v39 = vadd.f32 %v1551_v7, %v173_v30  ;;  %v174_v43 = vmul.f32 %v1043_v35, %v1537_v1  ;;  %v1171_v44 = vunpack.c.l.bf16 %v1454_v31  ;;  %v1458_v29 = vld [vmem:[%s1960_s3 + $0x78] sm:$0xff]  }
  0x25   :  { %v498_v41 = vmax.f32 %v434_v32, 0.0  ;;  %v435_v42 = vadd.f32 %v1167_v26, %v243_v33  ;;  %1482 = vst [vmem:[%s1961_s4 + $0x40] sm:$0xff] %v1296_v37   ;;  %v175_v47 = vmul.f32 %v1044_v40, %v1537_v1  ;;  %v1172_v48 = vunpack.c.h.bf16 %v1454_v31 }
  0x26   :  { %v436_v46 = vadd.f32 %v1168_v34, %v244_v39  ;;  %v1047_v49 = vunpack.c.l.bf16 %v1424_v36  ;;  %v245_v53 = vadd.f32 %v1551_v7, %v174_v43  ;;  %v1048_v54 = vunpack.c.h.bf16 %v1424_v36  ;;  %v1428_v34 = vld [vmem:[%s1957_s0 + $0x80] sm:$0xff]  }
  0x27   :  { %v1301_v51 = vpack.c.bf16 %v498_v41, %v497_v38  ;;  %v499_v52 = vmax.f32 %v435_v42, 0.0  ;;  %v246_v56 = vadd.f32 %v1551_v7, %v175_v47  ;;  %v1175_v58 = vunpack.c.l.bf16 %v1455_v45  ;;  %v1459_v43 = vld [vmem:[%s1960_s3 + $0x80] sm:$0xff]  }
  0x28   :  { %v500_v55 = vmax.f32 %v436_v46, 0.0  ;;  %v176_v57 = vmul.f32 %v1047_v49, %v1537_v1  ;;  %v437_v60 = vadd.f32 %v1171_v44, %v245_v53  ;;  %v177_v61 = vmul.f32 %v1048_v54, %v1537_v1 }
  0x29   :  { %1483 = vst [vmem:[%s1961_s4 + $0x48] sm:$0xff] %v1301_v51   ;;  %v1176_v62 = vunpack.c.h.bf16 %v1455_v45  ;;  %v1051_v63 = vunpack.c.l.bf16 %v1425_v50  ;;  %v438_v2 = vadd.f32 %v1172_v48, %v246_v56  ;;  %v1052_v4 = vunpack.c.h.bf16 %v1425_v50 }
  0x2a   :  { %v1306_v0 = vpack.c.bf16 %v500_v55, %v499_v52  ;;  %v247_v3 = vadd.f32 %v1551_v7, %v176_v57  ;;  %v501_v6 = vmax.f32 %v437_v60, 0.0  ;;  %v248_v8 = vadd.f32 %v1551_v7, %v177_v61  ;;  %v1429_v52 = vld [vmem:[%s1957_s0 + $0x88] sm:$0xff]  }
  0x2b   :  { %v178_v9 = vmul.f32 %v1051_v63, %v1537_v1  ;;  %v1179_v10 = vunpack.c.l.bf16 %v1456_v59  ;;  %v502_v12 = vmax.f32 %v438_v2, 0.0  ;;  %v179_v14 = vmul.f32 %v1052_v4, %v1537_v1  ;;  %v1460_v57 = vld [vmem:[%s1960_s3 + $0x88] sm:$0xff]  }
  0x2c   :  { %1484 = vst [vmem:[%s1961_s4 + $0x50] sm:$0xff] %v1306_v0   ;;  %v439_v13 = vadd.f32 %v1175_v58, %v247_v3  ;;  %v1180_v15 = vunpack.c.h.bf16 %v1456_v59  ;;  %v440_v16 = vadd.f32 %v1176_v62, %v248_v8  ;;  %v1055_v18 = vunpack.c.l.bf16 %v1426_v5  ;;  %v1430_v3 = vld [vmem:[%s1957_s0 + $0x90] sm:$0xff]  }
  0x2d   :  { %v249_v17 = vadd.f32 %v1551_v7, %v178_v9  ;;  %v1056_v19 = vunpack.c.h.bf16 %v1426_v5  ;;  %v1311_v21 = vpack.c.bf16 %v502_v12, %v501_v6  ;;  %v250_v23 = vadd.f32 %v1551_v7, %v179_v14  ;;  %v1461_v9 = vld [vmem:[%s1960_s3 + $0x90] sm:$0xff]  }
  0x2e   :  { %v503_v22 = vmax.f32 %v439_v13, 0.0  ;;  %v1183_v24 = vunpack.c.l.bf16 %v1457_v11  ;;  %v504_v25 = vmax.f32 %v440_v16, 0.0  ;;  %v180_v27 = vmul.f32 %v1055_v18, %v1537_v1  ;;  %v1431_v18 = vld [vmem:[%s1957_s0 + $0x98] sm:$0xff]  }
  0x2f   :  { %v441_v26 = vadd.f32 %v1179_v10, %v249_v17  ;;  %v181_v28 = vmul.f32 %v1056_v19, %v1537_v1  ;;  %1485 = vst [vmem:[%s1961_s4 + $0x58] sm:$0xff] %v1311_v21   ;;  %v442_v30 = vadd.f32 %v1180_v15, %v250_v23  ;;  %v1184_v31 = vunpack.c.h.bf16 %v1457_v11  ;;  %v1462_v23 = vld [vmem:[%s1960_s3 + $0x98] sm:$0xff]  }
  0x30   :  { %v1059_v32 = vunpack.c.l.bf16 %v1427_v20  ;;  %v1060_v33 = vunpack.c.h.bf16 %v1427_v20  ;;  %v1316_v35 = vpack.c.bf16 %v504_v25, %v503_v22  ;;  %v251_v37 = vadd.f32 %v1551_v7, %v180_v27 }
  0x31   :  { %v505_v36 = vmax.f32 %v441_v26, 0.0  ;;  %v252_v38 = vadd.f32 %v1551_v7, %v181_v28  ;;  %v506_v39 = vmax.f32 %v442_v30, 0.0  ;;  %v1187_v42 = vunpack.c.l.bf16 %v1458_v29 }
  0x32   :  { %v182_v40 = vmul.f32 %v1059_v32, %v1537_v1  ;;  %v183_v41 = vmul.f32 %v1060_v33, %v1537_v1  ;;  %1486 = vst [vmem:[%s1961_s4 + $0x60] sm:$0xff] %v1316_v35   ;;  %v443_v44 = vadd.f32 %v1183_v24, %v251_v37  ;;  %v1188_v46 = vunpack.c.h.bf16 %v1458_v29  ;;  %v1432_v32 = vld [vmem:[%s1957_s0 + $0xa0] sm:$0xff]  }
  0x33   :  { %v444_v45 = vadd.f32 %v1184_v31, %v252_v38  ;;  %v1063_v47 = vunpack.c.l.bf16 %v1428_v34  ;;  %v1321_v48 = vpack.c.bf16 %v506_v39, %v505_v36  ;;  %v1064_v51 = vunpack.c.h.bf16 %v1428_v34 }
  0x34   :  { %v253_v49 = vadd.f32 %v1551_v7, %v182_v40  ;;  %v254_v50 = vadd.f32 %v1551_v7, %v183_v41  ;;  %v507_v53 = vmax.f32 %v443_v44, 0.0  ;;  %v1191_v56 = vunpack.c.l.bf16 %v1459_v43  ;;  %v1463_v41 = vld [vmem:[%s1960_s3 + $0xa0] sm:$0xff]  }
  0x35   :  { %v508_v54 = vmax.f32 %v444_v45, 0.0  ;;  %v184_v55 = vmul.f32 %v1063_v47, %v1537_v1  ;;  %1487 = vst [vmem:[%s1961_s4 + $0x68] sm:$0xff] %v1321_v48   ;;  %v185_v60 = vmul.f32 %v1064_v51, %v1537_v1  ;;  %v1192_v61 = vunpack.c.h.bf16 %v1459_v43 }
  0x36   :  { %v445_v58 = vadd.f32 %v1187_v42, %v253_v49  ;;  %v446_v59 = vadd.f32 %v1188_v46, %v254_v50  ;;  %v1067_v0 = vunpack.c.l.bf16 %v1429_v52  ;;  %v1068_v2 = vunpack.c.h.bf16 %v1429_v52  ;;  %v1433_v50 = vld [vmem:[%s1957_s0 + $0xa8] sm:$0xff]  }
  0x37   :  { %v1326_v62 = vpack.c.bf16 %v508_v54, %v507_v53  ;;  %v255_v63 = vadd.f32 %v1551_v7, %v184_v55  ;;  %v256_v6 = vadd.f32 %v1551_v7, %v185_v60  ;;  %v1195_v8 = vunpack.c.l.bf16 %v1460_v57  ;;  %v1464_v55 = vld [vmem:[%s1960_s3 + $0xa8] sm:$0xff]  }
  0x38   :  { %v509_v4 = vmax.f32 %v445_v58, 0.0  ;;  %v510_v5 = vmax.f32 %v446_v59, 0.0  ;;  %v186_v11 = vmul.f32 %v1067_v0, %v1537_v1  ;;  %v187_v12 = vmul.f32 %v1068_v2, %v1537_v1  ;;  %v1434_v0 = vld [vmem:[%s1957_s0 + $0xb0] sm:$0xff]  }
  0x39   :  { %1488 = vst [vmem:[%s1961_s4 + $0x70] sm:$0xff] %v1326_v62   ;;  %v447_v10 = vadd.f32 %v1191_v56, %v255_v63  ;;  %v1196_v13 = vunpack.c.h.bf16 %v1460_v57  ;;  %v448_v15 = vadd.f32 %v1192_v61, %v256_v6  ;;  %v1071_v16 = vunpack.c.l.bf16 %v1430_v3  ;;  %v1465_v6 = vld [vmem:[%s1960_s3 + $0xb0] sm:$0xff]  }
  0x3a   :  { %v1331_v14 = vpack.c.bf16 %v510_v5, %v509_v4  ;;  %v1072_v17 = vunpack.c.h.bf16 %v1430_v3  ;;  %v257_v20 = vadd.f32 %v1551_v7, %v186_v11  ;;  %v258_v21 = vadd.f32 %v1551_v7, %v187_v12 }
  0x3b   :  { %v511_v19 = vmax.f32 %v447_v10, 0.0  ;;  %v1199_v22 = vunpack.c.l.bf16 %v1461_v9  ;;  %v512_v24 = vmax.f32 %v448_v15, 0.0  ;;  %v188_v25 = vmul.f32 %v1071_v16, %v1537_v1  ;;  %v1435_v16 = vld [vmem:[%s1957_s0 + $0xb8] sm:$0xff]  }
  0x3c   :  { %1489 = vst [vmem:[%s1961_s4 + $0x78] sm:$0xff] %v1331_v14   ;;  %v189_v26 = vmul.f32 %v1072_v17, %v1537_v1  ;;  %v1200_v27 = vunpack.c.h.bf16 %v1461_v9  ;;  %v449_v28 = vadd.f32 %v1195_v8, %v257_v20  ;;  %v450_v29 = vadd.f32 %v1196_v13, %v258_v21  ;;  %v1466_v21 = vld [vmem:[%s1960_s3 + $0xb8] sm:$0xff]  }
  0x3d   :  { %v1075_v30 = vunpack.c.l.bf16 %v1431_v18  ;;  %v1076_v31 = vunpack.c.h.bf16 %v1431_v18  ;;  %v1336_v33 = vpack.c.bf16 %v512_v24, %v511_v19  ;;  %v259_v34 = vadd.f32 %v1551_v7, %v188_v25 }
  0x3e   :  { %v260_v35 = vadd.f32 %v1551_v7, %v189_v26  ;;  %v1203_v36 = vunpack.c.l.bf16 %v1462_v23  ;;  %v513_v37 = vmax.f32 %v449_v28, 0.0  ;;  %v514_v38 = vmax.f32 %v450_v29, 0.0 }
  0x3f   :  { %v190_v39 = vmul.f32 %v1075_v30, %v1537_v1  ;;  %v191_v40 = vmul.f32 %v1076_v31, %v1537_v1  ;;  %1490 = vst [vmem:[%s1961_s4 + $0x80] sm:$0xff] %v1336_v33   ;;  %v451_v42 = vadd.f32 %v1199_v22, %v259_v34  ;;  %v1204_v44 = vunpack.c.h.bf16 %v1462_v23  ;;  %v1436_v30 = vld [vmem:[%s1957_s0 + $0xc0] sm:$0xff]  }
  0x40   :  { %v452_v43 = vadd.f32 %v1200_v27, %v260_v35  ;;  %v1079_v45 = vunpack.c.l.bf16 %v1432_v32  ;;  %v1341_v46 = vpack.c.bf16 %v514_v38, %v513_v37  ;;  %v1080_v49 = vunpack.c.h.bf16 %v1432_v32 }
  0x41   :  { %v261_v47 = vadd.f32 %v1551_v7, %v190_v39  ;;  %v262_v48 = vadd.f32 %v1551_v7, %v191_v40  ;;  %v515_v51 = vmax.f32 %v451_v42, 0.0  ;;  %v1207_v54 = vunpack.c.l.bf16 %v1463_v41  ;;  %v1467_v39 = vld [vmem:[%s1960_s3 + $0xc0] sm:$0xff]  }
  0x42   :  { %v516_v52 = vmax.f32 %v452_v43, 0.0  ;;  %v192_v53 = vmul.f32 %v1079_v45, %v1537_v1  ;;  %1491 = vst [vmem:[%s1961_s4 + $0x88] sm:$0xff] %v1341_v46   ;;  %v193_v58 = vmul.f32 %v1080_v49, %v1537_v1  ;;  %v1208_v59 = vunpack.c.h.bf16 %v1463_v41 }
  0x43   :  { %v453_v56 = vadd.f32 %v1203_v36, %v261_v47  ;;  %v454_v57 = vadd.f32 %v1204_v44, %v262_v48  ;;  %v1083_v62 = vunpack.c.l.bf16 %v1433_v50  ;;  %v1084_v63 = vunpack.c.h.bf16 %v1433_v50  ;;  %v1437_v48 = vld [vmem:[%s1957_s0 + $0xc8] sm:$0xff]  }
  0x44   :  { %v1346_v60 = vpack.c.bf16 %v516_v52, %v515_v51  ;;  %v263_v61 = vadd.f32 %v1551_v7, %v192_v53  ;;  %v264_v4 = vadd.f32 %v1551_v7, %v193_v58  ;;  %v1211_v5 = vunpack.c.l.bf16 %v1464_v55  ;;  %v1468_v53 = vld [vmem:[%s1960_s3 + $0xc8] sm:$0xff]  }
  0x45   :  { %v517_v2 = vmax.f32 %v453_v56, 0.0  ;;  %v518_v3 = vmax.f32 %v454_v57, 0.0  ;;  %v194_v9 = vmul.f32 %v1083_v62, %v1537_v1  ;;  %v195_v10 = vmul.f32 %v1084_v63, %v1537_v1  ;;  %v1438_v62 = vld [vmem:[%s1957_s0 + $0xd0] sm:$0xff]  }
  0x46   :  { %1492 = vst [vmem:[%s1961_s4 + $0x90] sm:$0xff] %v1346_v60   ;;  %v455_v8 = vadd.f32 %v1207_v54, %v263_v61  ;;  %v1212_v11 = vunpack.c.h.bf16 %v1464_v55  ;;  %v456_v13 = vadd.f32 %v1208_v59, %v264_v4  ;;  %v1087_v14 = vunpack.c.l.bf16 %v1434_v0  ;;  %v1469_v4 = vld [vmem:[%s1960_s3 + $0xd0] sm:$0xff]  }
  0x47   :  { %v1351_v12 = vpack.c.bf16 %v518_v3, %v517_v2  ;;  %v1088_v15 = vunpack.c.h.bf16 %v1434_v0  ;;  %v265_v18 = vadd.f32 %v1551_v7, %v194_v9  ;;  %v266_v19 = vadd.f32 %v1551_v7, %v195_v10 }
  0x48   :  { %v519_v17 = vmax.f32 %v455_v8, 0.0  ;;  %v1215_v20 = vunpack.c.l.bf16 %v1465_v6  ;;  %v520_v22 = vmax.f32 %v456_v13, 0.0  ;;  %v196_v23 = vmul.f32 %v1087_v14, %v1537_v1  ;;  %v1439_v14 = vld [vmem:[%s1957_s0 + $0xd8] sm:$0xff]  }
  0x49   :  { %1493 = vst [vmem:[%s1961_s4 + $0x98] sm:$0xff] %v1351_v12   ;;  %v197_v24 = vmul.f32 %v1088_v15, %v1537_v1  ;;  %v1216_v25 = vunpack.c.h.bf16 %v1465_v6  ;;  %v457_v26 = vadd.f32 %v1211_v5, %v265_v18  ;;  %v458_v27 = vadd.f32 %v1212_v11, %v266_v19  ;;  %v1470_v19 = vld [vmem:[%s1960_s3 + $0xd8] sm:$0xff]  }
  0x4a   :  { %v1091_v28 = vunpack.c.l.bf16 %v1435_v16  ;;  %v1092_v29 = vunpack.c.h.bf16 %v1435_v16  ;;  %v1356_v31 = vpack.c.bf16 %v520_v22, %v519_v17  ;;  %v267_v32 = vadd.f32 %v1551_v7, %v196_v23 }
  0x4b   :  { %v268_v33 = vadd.f32 %v1551_v7, %v197_v24  ;;  %v1219_v34 = vunpack.c.l.bf16 %v1466_v21  ;;  %v521_v35 = vmax.f32 %v457_v26, 0.0  ;;  %v522_v36 = vmax.f32 %v458_v27, 0.0 }
  0x4c   :  { %v198_v37 = vmul.f32 %v1091_v28, %v1537_v1  ;;  %v199_v38 = vmul.f32 %v1092_v29, %v1537_v1  ;;  %1494 = vst [vmem:[%s1961_s4 + $0xa0] sm:$0xff] %v1356_v31   ;;  %v459_v40 = vadd.f32 %v1215_v20, %v267_v32  ;;  %v1220_v42 = vunpack.c.h.bf16 %v1466_v21  ;;  %v1440_v28 = vld [vmem:[%s1957_s0 + $0xe0] sm:$0xff]  }
  0x4d   :  { %v460_v41 = vadd.f32 %v1216_v25, %v268_v33  ;;  %v1095_v43 = vunpack.c.l.bf16 %v1436_v30  ;;  %v1361_v44 = vpack.c.bf16 %v522_v36, %v521_v35  ;;  %v1096_v47 = vunpack.c.h.bf16 %v1436_v30 }
  0x4e   :  { %v269_v45 = vadd.f32 %v1551_v7, %v198_v37  ;;  %v270_v46 = vadd.f32 %v1551_v7, %v199_v38  ;;  %v523_v49 = vmax.f32 %v459_v40, 0.0  ;;  %v1223_v52 = vunpack.c.l.bf16 %v1467_v39  ;;  %v1471_v37 = vld [vmem:[%s1960_s3 + $0xe0] sm:$0xff]  }
  0x4f   :  { %v524_v50 = vmax.f32 %v460_v41, 0.0  ;;  %v200_v51 = vmul.f32 %v1095_v43, %v1537_v1  ;;  %1495 = vst [vmem:[%s1961_s4 + $0xa8] sm:$0xff] %v1361_v44   ;;  %v201_v56 = vmul.f32 %v1096_v47, %v1537_v1  ;;  %v1224_v57 = vunpack.c.h.bf16 %v1467_v39 }
  0x50   :  { %v461_v54 = vadd.f32 %v1219_v34, %v269_v45  ;;  %v462_v55 = vadd.f32 %v1220_v42, %v270_v46  ;;  %v1099_v60 = vunpack.c.l.bf16 %v1437_v48  ;;  %v1100_v61 = vunpack.c.h.bf16 %v1437_v48  ;;  %v1441_v46 = vld [vmem:[%s1957_s0 + $0xe8] sm:$0xff]  }
  0x51   :  { %v1366_v58 = vpack.c.bf16 %v524_v50, %v523_v49  ;;  %v271_v59 = vadd.f32 %v1551_v7, %v200_v51  ;;  %v272_v2 = vadd.f32 %v1551_v7, %v201_v56  ;;  %v1227_v3 = vunpack.c.l.bf16 %v1468_v53  ;;  %v1472_v51 = vld [vmem:[%s1960_s3 + $0xe8] sm:$0xff]  }
  0x52   :  { %v525_v63 = vmax.f32 %v461_v54, 0.0  ;;  %v526_v0 = vmax.f32 %v462_v55, 0.0  ;;  %v202_v6 = vmul.f32 %v1099_v60, %v1537_v1  ;;  %v203_v8 = vmul.f32 %v1100_v61, %v1537_v1  ;;  %v1442_v60 = vld [vmem:[%s1957_s0 + $0xf0] sm:$0xff]  }
  0x53   :  { %1496 = vst [vmem:[%s1961_s4 + $0xb0] sm:$0xff] %v1366_v58   ;;  %v463_v5 = vadd.f32 %v1223_v52, %v271_v59  ;;  %v1228_v9 = vunpack.c.h.bf16 %v1468_v53  ;;  %v464_v11 = vadd.f32 %v1224_v57, %v272_v2  ;;  %v1103_v12 = vunpack.c.l.bf16 %v1438_v62  ;;  %v1473_v2 = vld [vmem:[%s1960_s3 + $0xf0] sm:$0xff]  }
  0x54   :  { %v1371_v10 = vpack.c.bf16 %v526_v0, %v525_v63  ;;  %v1104_v13 = vunpack.c.h.bf16 %v1438_v62  ;;  %v273_v16 = vadd.f32 %v1551_v7, %v202_v6  ;;  %v274_v17 = vadd.f32 %v1551_v7, %v203_v8 }
  0x55   :  { %v527_v15 = vmax.f32 %v463_v5, 0.0  ;;  %v1231_v18 = vunpack.c.l.bf16 %v1469_v4  ;;  %v528_v20 = vmax.f32 %v464_v11, 0.0  ;;  %v204_v21 = vmul.f32 %v1103_v12, %v1537_v1  ;;  %v1443_v12 = vld [vmem:[%s1957_s0 + $0xf8] sm:$0xff]  }
  0x56   :  { %1497 = vst [vmem:[%s1961_s4 + $0xb8] sm:$0xff] %v1371_v10   ;;  %v205_v22 = vmul.f32 %v1104_v13, %v1537_v1  ;;  %v1232_v23 = vunpack.c.h.bf16 %v1469_v4  ;;  %v465_v24 = vadd.f32 %v1227_v3, %v273_v16  ;;  %v466_v25 = vadd.f32 %v1228_v9, %v274_v17  ;;  %v1474_v17 = vld [vmem:[%s1960_s3 + $0xf8] sm:$0xff]  }
  0x57   :  { %v1107_v26 = vunpack.c.l.bf16 %v1439_v14  ;;  %v1108_v27 = vunpack.c.h.bf16 %v1439_v14  ;;  %v1376_v29 = vpack.c.bf16 %v528_v20, %v527_v15  ;;  %v275_v30 = vadd.f32 %v1551_v7, %v204_v21 }
  0x58   :  { %v276_v31 = vadd.f32 %v1551_v7, %v205_v22  ;;  %v1235_v32 = vunpack.c.l.bf16 %v1470_v19  ;;  %v529_v33 = vmax.f32 %v465_v24, 0.0  ;;  %v530_v34 = vmax.f32 %v466_v25, 0.0 }
  0x59   :  { %v206_v35 = vmul.f32 %v1107_v26, %v1537_v1  ;;  %v207_v36 = vmul.f32 %v1108_v27, %v1537_v1  ;;  %1498 = vst [vmem:[%s1961_s4 + $0xc0] sm:$0xff] %v1376_v29   ;;  %v467_v38 = vadd.f32 %v1231_v18, %v275_v30  ;;  %v1236_v40 = vunpack.c.h.bf16 %v1470_v19 }
  0x5a   :  { %v468_v39 = vadd.f32 %v1232_v23, %v276_v31  ;;  %v1111_v41 = vunpack.c.l.bf16 %v1440_v28  ;;  %v1381_v42 = vpack.c.bf16 %v530_v34, %v529_v33  ;;  %v1112_v45 = vunpack.c.h.bf16 %v1440_v28 }
  0x5b   :  { %v277_v43 = vadd.f32 %v1551_v7, %v206_v35  ;;  %v278_v44 = vadd.f32 %v1551_v7, %v207_v36  ;;  %v531_v47 = vmax.f32 %v467_v38, 0.0  ;;  %v1239_v50 = vunpack.c.l.bf16 %v1471_v37 }
  0x5c   :  { %v532_v48 = vmax.f32 %v468_v39, 0.0  ;;  %v208_v49 = vmul.f32 %v1111_v41, %v1537_v1  ;;  %1499 = vst [vmem:[%s1961_s4 + $0xc8] sm:$0xff] %v1381_v42   ;;  %v209_v54 = vmul.f32 %v1112_v45, %v1537_v1  ;;  %v1240_v55 = vunpack.c.h.bf16 %v1471_v37 }
  0x5d   :  { %v469_v52 = vadd.f32 %v1235_v32, %v277_v43  ;;  %v470_v53 = vadd.f32 %v1236_v40, %v278_v44  ;;  %v1115_v58 = vunpack.c.l.bf16 %v1441_v46  ;;  %v1116_v59 = vunpack.c.h.bf16 %v1441_v46 }
  0x5e   :  { %v1386_v56 = vpack.c.bf16 %v532_v48, %v531_v47  ;;  %v279_v57 = vadd.f32 %v1551_v7, %v208_v49  ;;  %v280_v63 = vadd.f32 %v1551_v7, %v209_v54  ;;  %v1243_v0 = vunpack.c.l.bf16 %v1472_v51 }
  0x5f   :  { %v533_v61 = vmax.f32 %v469_v52, 0.0  ;;  %v534_v62 = vmax.f32 %v470_v53, 0.0  ;;  %v210_v4 = vmul.f32 %v1115_v58, %v1537_v1  ;;  %v211_v5 = vmul.f32 %v1116_v59, %v1537_v1 }
  0x60   :  { %1500 = vst [vmem:[%s1961_s4 + $0xd0] sm:$0xff] %v1386_v56   ;;  %v471_v3 = vadd.f32 %v1239_v50, %v279_v57  ;;  %v1244_v6 = vunpack.c.h.bf16 %v1472_v51  ;;  %v472_v9 = vadd.f32 %v1240_v55, %v280_v63  ;;  %v1119_v10 = vunpack.c.l.bf16 %v1442_v60 }
  0x61   :  { %v1391_v8 = vpack.c.bf16 %v534_v62, %v533_v61  ;;  %v1120_v11 = vunpack.c.h.bf16 %v1442_v60  ;;  %v281_v14 = vadd.f32 %v1551_v7, %v210_v4  ;;  %v282_v15 = vadd.f32 %v1551_v7, %v211_v5 }
  0x62   :  { %v535_v13 = vmax.f32 %v471_v3, 0.0  ;;  %v1247_v16 = vunpack.c.l.bf16 %v1473_v2  ;;  %v536_v18 = vmax.f32 %v472_v9, 0.0  ;;  %v212_v19 = vmul.f32 %v1119_v10, %v1537_v1 }
  0x63   :  { %1501 = vst [vmem:[%s1961_s4 + $0xd8] sm:$0xff] %v1391_v8   ;;  %v213_v20 = vmul.f32 %v1120_v11, %v1537_v1  ;;  %v1248_v21 = vunpack.c.h.bf16 %v1473_v2  ;;  %v473_v22 = vadd.f32 %v1243_v0, %v281_v14  ;;  %v474_v23 = vadd.f32 %v1244_v6, %v282_v15 }
  0x64   :  { %v1123_v24 = vunpack.c.l.bf16 %v1443_v12  ;;  %v1124_v25 = vunpack.c.h.bf16 %v1443_v12  ;;  %v1396_v26 = vpack.c.bf16 %v536_v18, %v535_v13  ;;  %v283_v27 = vadd.f32 %v1551_v7, %v212_v19 }
  0x65   :  { %v284_v28 = vadd.f32 %v1551_v7, %v213_v20  ;;  %v1251_v29 = vunpack.c.l.bf16 %v1474_v17  ;;  %v537_v30 = vmax.f32 %v473_v22, 0.0  ;;  %v538_v31 = vmax.f32 %v474_v23, 0.0 }
  0x66   :  { %v214_v32 = vmul.f32 %v1123_v24, %v1537_v1  ;;  %v215_v33 = vmul.f32 %v1124_v25, %v1537_v1  ;;  %1502 = vst [vmem:[%s1961_s4 + $0xe0] sm:$0xff] %v1396_v26   ;;  %v475_v34 = vadd.f32 %v1247_v16, %v283_v27  ;;  %v1252_v36 = vunpack.c.h.bf16 %v1474_v17 }
  0x67   :  { %v476_v35 = vadd.f32 %v1248_v21, %v284_v28  ;;  %v1401_v37 = vpack.c.bf16 %v538_v31, %v537_v30 }
  0x68   :  { %v285_v38 = vadd.f32 %v1551_v7, %v214_v32  ;;  %v286_v39 = vadd.f32 %v1551_v7, %v215_v33  ;;  %v539_v40 = vmax.f32 %v475_v34, 0.0 }
  0x69   :  { %v540_v41 = vmax.f32 %v476_v35, 0.0  ;;  %1503 = vst [vmem:[%s1961_s4 + $0xe8] sm:$0xff] %v1401_v37  }
  0x6a   :  { %v477_v42 = vadd.f32 %v1251_v29, %v285_v38  ;;  %v478_v1 = vadd.f32 %v1252_v36, %v286_v39 }
  0x6b   :  { %v1406_v43 = vpack.c.bf16 %v540_v41, %v539_v40 }
  0x6c   :  { %v541_v44 = vmax.f32 %v477_v42, 0.0  ;;  %v542_v45 = vmax.f32 %v478_v1, 0.0 }
  0x6d   :  { %1504 = vst [vmem:[%s1961_s4 + $0xf0] sm:$0xff] %v1406_v43  }
  0x6e   :  { %v1411_v46 = vpack.c.bf16 %v542_v45, %v541_v44 }
  0x70   :  { %1505 = vst [vmem:[%s1961_s4 + $0xf8] sm:$0xff] %v1411_v46  }

// kernel: resunet_fwd.60
= control target key start
LH: loop header
LB: loop body
LE: loop exit
PB: predicated region body
PF: predicated region fallthrough
CT: control target
= control target key end

     0   :  { %vm464_vm0 = vcmask 1040384   ;;  %vm466_vm1 = vcmask 1041408   ;;  %s747_s1 = inlined_call_operand.vmem [shape: bf16[128,128], index: 1, kind: input, shape index: {}]   ;;  %s748_s0 = inlined_call_operand.vmem [shape: bf16[128,128], index: 0, kind: input, shape index: {}]   ;;  %s749_s2 = inlined_call_operand.vmem [shape: bf16[128,128], index: 2, kind: output, shape index: {0}]   ;;  %s750_s3 = inlined_call_operand.vmem [shape: f32[8,128], index: 3, kind: output, shape index: {1}]  }
   0x1   :  { %v636_v0 = vld [vmem:[%s747_s1] sm:$0xff]   ;;  %v637_v1 = vld [vmem:[%s747_s1 + $0x8] sm:$0xff]   ;;  %v638_v2 = vld [vmem:[%s747_s1 + $0x10] sm:$0xff]  }
   0x2   :  { %588 = vmatprep.subr.bf16.mxu0 %v636_v0  ;;  %620 = vmatprep.subr.bf16.mxu1 %v636_v0  ;;  %v639_v3 = vld [vmem:[%s747_s1 + $0x18] sm:$0xff]   ;;  %v644_v4 = vld [vmem:[%s748_s0] sm:$0xff]   ;;  %v641_v7 = vld [vmem:[%s747_s1 + $0x28] sm:$0xff]  }
   0x3   :  { %589 = vmatpush3.bf16.msra.mxu0 %v636_v0  ;;  %628 = vmatpush3.bf16.msra.mxu1 %v636_v0  ;;  %v640_v5 = vld [vmem:[%s747_s1 + $0x20] sm:$0xff]   ;;  %v642_v8 = vld [vmem:[%s747_s1 + $0x30] sm:$0xff]   ;;  %v643_v9 = vld [vmem:[%s747_s1 + $0x38] sm:$0xff]  }
   0x4   :  { %590 = vmatprep.subr.bf16.mxu0 %v637_v1  ;;  %621 = vmatprep.subr.bf16.mxu1 %v637_v1  ;;  %v648_v6 = vld [vmem:[%s748_s0 + $0x20] sm:$0xff]   ;;  %v645_v10 = vld [vmem:[%s748_s0 + $0x8] sm:$0xff]   ;;  %v646_v12 = vld [vmem:[%s748_s0 + $0x10] sm:$0xff]  }
   0x5   :  { %604 = vmatprep.mubr.bf16.mxu0 %v644_v4  ;;  %612 = vmatprep.mubr.bf16.mxu1 %v648_v6  ;;  %v649_v11 = vld [vmem:[%s748_s0 + $0x28] sm:$0xff]   ;;  %v650_v13 = vld [vmem:[%s748_s0 + $0x30] sm:$0xff]   ;;  %v647_v14 = vld [vmem:[%s748_s0 + $0x18] sm:$0xff]  }
   0x6   :  { %v651_v15 = vld [vmem:[%s748_s0 + $0x38] sm:$0xff]  }
   0x7   :  { %591 = vmatpush3.bf16.msra.mxu0 %v637_v1  ;;  %629 = vmatpush3.bf16.msra.mxu1 %v637_v1 }
   0x8   :  { %592 = vmatprep.subr.bf16.mxu0 %v638_v2  ;;  %622 = vmatprep.subr.bf16.mxu1 %v638_v2 }
   0xb   :  { %593 = vmatpush3.bf16.msra.mxu0 %v638_v2  ;;  %630 = vmatpush3.bf16.msra.mxu1 %v638_v2 }
   0xc   :  { %594 = vmatprep.subr.bf16.mxu0 %v639_v3  ;;  %623 = vmatprep.subr.bf16.mxu1 %v639_v3 }
   0xf   :  { %595 = vmatpush3.bf16.msra.mxu0 %v639_v3  ;;  %631 = vmatpush3.bf16.msra.mxu1 %v639_v3 }
  0x10   :  { %596 = vmatprep.subr.bf16.mxu0 %v640_v5  ;;  %624 = vmatprep.subr.bf16.mxu1 %v640_v5 }
  0x13   :  { %597 = vmatpush3.bf16.msra.mxu0 %v640_v5  ;;  %632 = vmatpush3.bf16.msra.mxu1 %v640_v5 }
  0x14   :  { %598 = vmatprep.subr.bf16.mxu0 %v641_v7  ;;  %625 = vmatprep.subr.bf16.mxu1 %v641_v7 }
  0x17   :  { %599 = vmatpush3.bf16.msra.mxu0 %v641_v7  ;;  %633 = vmatpush3.bf16.msra.mxu1 %v641_v7 }
  0x18   :  { %600 = vmatprep.subr.bf16.mxu0 %v642_v8  ;;  %626 = vmatprep.subr.bf16.mxu1 %v642_v8 }
  0x1b   :  { %601 = vmatpush3.bf16.msra.mxu0 %v642_v8  ;;  %634 = vmatpush3.bf16.msra.mxu1 %v642_v8 }
  0x1c   :  { %602 = vmatprep.subr.bf16.mxu0 %v643_v9  ;;  %627 = vmatprep.subr.bf16.mxu1 %v643_v9 }
  0x1f   :  { %603 = vmatpush3.bf16.msra.mxu0 %v643_v9  ;;  %635 = vmatpush3.bf16.msra.mxu1 %v643_v9 }
  0x22   :  { %605 = vmatmul.mubr.bf16.vlgmr.msra.gmra.mrb[0].mxu0 %v645_v10  ;;  %613 = vmatmul.mubr.bf16.vlgmr.msra.gmra.mrb[0].mxu1 %v649_v11 }
  0x23   :  { %608 = vmatprep.mubr.bf16.mxu0 %v646_v12  ;;  %616 = vmatprep.mubr.bf16.mxu1 %v650_v13 }
  0x2a   :  { %609 = vmatmul.mubr.bf16.gmra.mrb[4].mxu0 %v647_v14  ;;  %617 = vmatmul.mubr.bf16.gmra.mrb[4].mxu1 %v651_v15 }
  0xf5   :  { %v606_v16 = vpop.f32.mrb[0].mxu0  ;;  %v614_v17 = vpop.f32.mrb[0].mxu1 }
  0xf6   :  { %v212_v18 = vpop.f32.mrb[1].mxu0  ;;  %v244_v19 = vpop.f32.mrb[1].mxu1  ;;  %v429_v31 = vmul.f32 %v606_v16, %v606_v16  ;;  %v437_v3 = vmul.f32 %v614_v17, %v614_v17 }
  0xf7   :  { %v607_v20 = vpop.f32.mrb[2].mxu0  ;;  %v615_v21 = vpop.f32.mrb[2].mxu1  ;;  %v427_v22 = vmul.f32 %v212_v18, %v212_v18  ;;  %v435_v61 = vmul.f32 %v244_v19, %v244_v19 }
  0xf8   :  { %v533_v23 = vpack.c.bf16 %v607_v20, %v606_v16  ;;  %v215_v24 = vpop.f32.mrb[3].mxu0  ;;  %v553_v25 = vpack.c.bf16 %v615_v21, %v614_v17  ;;  %v247_v26 = vpop.f32.mrb[3].mxu1  ;;  %v430_v34 = vmul.f32 %v607_v20, %v607_v20  ;;  %v438_v6 = vmul.f32 %v615_v21, %v615_v21 }
  0xf9   :  { %v528_v27 = vpack.c.bf16 %v215_v24, %v212_v18  ;;  %v406_v28 = vadd.f32 %v215_v24, %v212_v18  ;;  %v428_v29 = vmul.f32 %v215_v24, %v215_v24  ;;  %v548_v30 = vpack.c.bf16 %v247_v26, %v244_v19 }
  0xfa   :  { %565 = vst [vmem:[%s749_s2 + $0x8] sm:$0xff] %v533_v23   ;;  %569 = vst [vmem:[%s749_s2 + $0x28] sm:$0xff] %v553_v25   ;;  %v436_v2 = vmul.f32 %v247_v26, %v247_v26 }
  0xfb   :  { %529 = vst [vmem:[%s749_s2] sm:$0xff] %v528_v27   ;;  %v407_v32 = vadd.f32 %v606_v16, %v406_v28  ;;  %v443_v33 = vadd.f32 %v428_v29, %v427_v22  ;;  %568 = vst [vmem:[%s749_s2 + $0x20] sm:$0xff] %v548_v30  }
  0xfd   :  { %v444_v35 = vadd.f32 %v443_v33, %v429_v31  ;;  %v610_v36 = vpop.f32.mrb[4].mxu0  ;;  %v408_v37 = vadd.f32 %v607_v20, %v407_v32  ;;  %v618_v38 = vpop.f32.mrb[4].mxu1 }
  0xfe   :  { %v228_v39 = vpop.f32.mrb[5].mxu0  ;;  %v260_v40 = vpop.f32.mrb[5].mxu1  ;;  %v433_v55 = vmul.f32 %v610_v36, %v610_v36  ;;  %v441_v15 = vmul.f32 %v618_v38, %v618_v38 }
  0xff   :  { %v409_v41 = vadd.f32 %v408_v37, %v228_v39  ;;  %v431_v42 = vmul.f32 %v228_v39, %v228_v39  ;;  %v445_v43 = vadd.f32 %v444_v35, %v430_v34  ;;  %v611_v44 = vpop.f32.mrb[6].mxu0  ;;  %v619_v45 = vpop.f32.mrb[6].mxu1  ;;  %v439_v9 = vmul.f32 %v260_v40, %v260_v40 }
 0x100   :  { %v543_v46 = vpack.c.bf16 %v611_v44, %v610_v36  ;;  %v231_v47 = vpop.f32.mrb[7].mxu0  ;;  %v563_v48 = vpack.c.bf16 %v619_v45, %v618_v38  ;;  %v263_v49 = vpop.f32.mrb[7].mxu1  ;;  %v434_v58 = vmul.f32 %v611_v44, %v611_v44 }
 0x101   :  { %v446_v50 = vadd.f32 %v445_v43, %v431_v42  ;;  %v538_v51 = vpack.c.bf16 %v231_v47, %v228_v39  ;;  %v410_v52 = vadd.f32 %v409_v41, %v231_v47  ;;  %v432_v53 = vmul.f32 %v231_v47, %v231_v47 }
 0x102   :  { %567 = vst [vmem:[%s749_s2 + $0x18] sm:$0xff] %v543_v46   ;;  %571 = vst [vmem:[%s749_s2 + $0x38] sm:$0xff] %v563_v48   ;;  %v558_v54 = vpack.c.bf16 %v263_v49, %v260_v40  ;;  %v440_v14 = vmul.f32 %v263_v49, %v263_v49 }
 0x103   :  { %566 = vst [vmem:[%s749_s2 + $0x10] sm:$0xff] %v538_v51   ;;  %v411_v56 = vadd.f32 %v610_v36, %v410_v52  ;;  %v447_v57 = vadd.f32 %v446_v50, %v432_v53 }
 0x104   :  { %570 = vst [vmem:[%s749_s2 + $0x30] sm:$0xff] %v558_v54  }
 0x105   :  { %v448_v59 = vadd.f32 %v447_v57, %v433_v55  ;;  %v412_v60 = vadd.f32 %v611_v44, %v411_v56 }
 0x107   :  { %v413_v62 = vadd.f32 %v412_v60, %v244_v19  ;;  %v449_v63 = vadd.f32 %v448_v59, %v434_v58  ;;  %v442_v19 = vmul.f32 %v619_v45, %v619_v45 }
 0x109   :  { %v450_v0 = vadd.f32 %v449_v63, %v435_v61  ;;  %v414_v1 = vadd.f32 %v413_v62, %v247_v26 }
 0x10b   :  { %v415_v4 = vadd.f32 %v614_v17, %v414_v1  ;;  %v451_v5 = vadd.f32 %v450_v0, %v436_v2 }
 0x10d   :  { %v452_v7 = vadd.f32 %v451_v5, %v437_v3  ;;  %v416_v8 = vadd.f32 %v615_v21, %v415_v4 }
 0x10f   :  { %v417_v10 = vadd.f32 %v416_v8, %v260_v40  ;;  %v453_v11 = vadd.f32 %v452_v7, %v438_v6 }
 0x111   :  { %v454_v12 = vadd.f32 %v453_v11, %v439_v9  ;;  %v418_v13 = vadd.f32 %v417_v10, %v263_v49 }
 0x113   :  { %v419_v16 = vadd.f32 %v618_v38, %v418_v13  ;;  %v455_v18 = vadd.f32 %v454_v12, %v440_v14 }
 0x115   :  { %v420_v20 = vadd.f32 %v619_v45, %v419_v16  ;;  %v456_v22 = vadd.f32 %v455_v18, %v441_v15 }
 0x117   :  { %v421_v23 = vrot.slane %v420_v20, 4  ;;  %v457_v24 = vadd.f32 %v456_v22, %v442_v19 }
 0x119   :  { %v422_v25 = vadd.f32 %v421_v23, %v420_v20  ;;  %v458_v17 = vrot.slane %v457_v24, 4 }
 0x11b   :  { %v423_v26 = vrot.slane %v422_v25, 2  ;;  %v459_v27 = vadd.f32 %v458_v17, %v457_v24 }
 0x11d   :  { %v424_v28 = vadd.f32 %v423_v26, %v422_v25  ;;  %v460_v21 = vrot.slane %v459_v27, 2 }
 0x11f   :  { %v425_v29 = vrot.slane %v424_v28, 1  ;;  %v461_v30 = vadd.f32 %v460_v21, %v459_v27 }
 0x121   :  { %v462_v31 = vrot.slane %v461_v30, 1  ;;  %v426_v32 = vadd.f32 %v425_v29, %v424_v28 }
 0x123   :  { %v463_v33 = vadd.f32 %v462_v31, %v461_v30 }
 0x125   :  { %v465_v34 = vsel %vm464_vm0, %v426_v32, %v463_v33 }
 0x126   :  { %v467_v35 = vsel %vm466_vm1, %v465_v34, 0.0 }
 0x127   :  { %468 = vst [vmem:[%s750_s3] sm:$0xff] %v467_v35 }

// kernel: resunet_fwd.61
= control target key start
LH: loop header
LB: loop body
LE: loop exit
PB: predicated region body
PF: predicated region fallthrough
CT: control target
= control target key end

     0   :  { %s370_s0 = inlined_call_operand.vmem [shape: bf16[128,128], index: 0, kind: input, shape index: {}]   ;;  %s371_s1 = inlined_call_operand.vmem [shape: f32[1,128], index: 1, kind: input, shape index: {}]   ;;  %s372_s2 = inlined_call_operand.vmem [shape: f32[1,128], index: 2, kind: input, shape index: {}]   ;;  %s373_s3 = inlined_call_operand.vmem [shape: bf16[128,128], index: 3, kind: output, shape index: {}]  }
   0x1   :  { %v211_v0 = vld [vmem:[%s370_s0] sm:$0xff]   ;;  %v282_v4 = vld [vmem:[%s370_s0 + $0x8] sm:$0xff]   ;;  %v283_v5 = vld [vmem:[%s370_s0 + $0x10] sm:$0xff]  }
   0x2   :  { %v176_v1 = vld [vmem:[%s371_s1] ss:$0 sm:$0xff]  ;;  %v212_v2 = vunpack.c.l.bf16 %v211_v0  ;;  %v213_v3 = vunpack.c.h.bf16 %v211_v0  ;;  %v284_v6 = vld [vmem:[%s370_s0 + $0x18] sm:$0xff]   ;;  %v216_v8 = vunpack.c.l.bf16 %v282_v4  ;;  %v217_v9 = vunpack.c.h.bf16 %v282_v4  ;;  %v286_v25 = vld [vmem:[%s370_s0 + $0x28] sm:$0xff]  }
   0x3   :  { %v177_v7 = vld [vmem:[%s372_s2] ss:$0 sm:$0xff]  ;;  %v220_v10 = vunpack.c.l.bf16 %v283_v5  ;;  %v221_v11 = vunpack.c.h.bf16 %v283_v5  ;;  %v224_v14 = vunpack.c.l.bf16 %v284_v6  ;;  %v225_v15 = vunpack.c.h.bf16 %v284_v6  ;;  %v287_v30 = vld [vmem:[%s370_s0 + $0x30] sm:$0xff]   ;;  %v288_v35 = vld [vmem:[%s370_s0 + $0x38] sm:$0xff]  }
   0x4   :  { %v53_v12 = vmul.f32 %v212_v2, %v176_v1  ;;  %v54_v13 = vmul.f32 %v213_v3, %v176_v1  ;;  %v55_v16 = vmul.f32 %v216_v8, %v176_v1  ;;  %v56_v17 = vmul.f32 %v217_v9, %v176_v1  ;;  %v285_v20 = vld [vmem:[%s370_s0 + $0x20] sm:$0xff]  }
   0x5   :  { %v57_v18 = vmul.f32 %v220_v10, %v176_v1  ;;  %v58_v19 = vmul.f32 %v221_v11, %v176_v1  ;;  %v59_v23 = vmul.f32 %v224_v14, %v176_v1  ;;  %v60_v24 = vmul.f32 %v225_v15, %v176_v1 }
   0x6   :  { %v76_v21 = vadd.f32 %v177_v7, %v53_v12  ;;  %v77_v22 = vadd.f32 %v177_v7, %v54_v13  ;;  %v78_v26 = vadd.f32 %v177_v7, %v55_v16  ;;  %v79_v27 = vadd.f32 %v177_v7, %v56_v17 }
   0x7   :  { %v80_v28 = vadd.f32 %v177_v7, %v57_v18  ;;  %v81_v29 = vadd.f32 %v177_v7, %v58_v19  ;;  %v82_v32 = vadd.f32 %v177_v7, %v59_v23  ;;  %v83_v33 = vadd.f32 %v177_v7, %v60_v24 }
   0x8   :  { %v245_v31 = vpack.c.bf16 %v77_v22, %v76_v21  ;;  %v228_v34 = vunpack.c.l.bf16 %v285_v20  ;;  %v250_v36 = vpack.c.bf16 %v79_v27, %v78_v26  ;;  %v229_v38 = vunpack.c.h.bf16 %v285_v20 }
   0x9   :  { %v255_v37 = vpack.c.bf16 %v81_v29, %v80_v28  ;;  %v232_v39 = vunpack.c.l.bf16 %v286_v25  ;;  %v260_v40 = vpack.c.bf16 %v83_v33, %v82_v32  ;;  %v233_v42 = vunpack.c.h.bf16 %v286_v25 }
   0xa   :  { %246 = vst [vmem:[%s373_s3] sm:$0xff] %v245_v31   ;;  %v61_v41 = vmul.f32 %v228_v34, %v176_v1  ;;  %v236_v43 = vunpack.c.l.bf16 %v287_v30  ;;  %289 = vst [vmem:[%s373_s3 + $0x8] sm:$0xff] %v250_v36   ;;  %v62_v44 = vmul.f32 %v229_v38, %v176_v1  ;;  %v237_v46 = vunpack.c.h.bf16 %v287_v30 }
   0xb   :  { %290 = vst [vmem:[%s373_s3 + $0x10] sm:$0xff] %v255_v37   ;;  %v63_v45 = vmul.f32 %v232_v39, %v176_v1  ;;  %v240_v47 = vunpack.c.l.bf16 %v288_v35  ;;  %291 = vst [vmem:[%s373_s3 + $0x18] sm:$0xff] %v260_v40   ;;  %v64_v49 = vmul.f32 %v233_v42, %v176_v1  ;;  %v241_v51 = vunpack.c.h.bf16 %v288_v35 }
   0xc   :  { %v84_v48 = vadd.f32 %v177_v7, %v61_v41  ;;  %v65_v50 = vmul.f32 %v236_v43, %v176_v1  ;;  %v85_v52 = vadd.f32 %v177_v7, %v62_v44  ;;  %v66_v54 = vmul.f32 %v237_v46, %v176_v1 }
   0xd   :  { %v86_v53 = vadd.f32 %v177_v7, %v63_v45  ;;  %v67_v55 = vmul.f32 %v240_v47, %v176_v1  ;;  %v87_v56 = vadd.f32 %v177_v7, %v64_v49  ;;  %v68_v58 = vmul.f32 %v241_v51, %v176_v1 }
   0xe   :  { %v88_v57 = vadd.f32 %v177_v7, %v65_v50  ;;  %v265_v59 = vpack.c.bf16 %v85_v52, %v84_v48  ;;  %v89_v60 = vadd.f32 %v177_v7, %v66_v54 }
   0xf   :  { %v90_v61 = vadd.f32 %v177_v7, %v67_v55  ;;  %v270_v62 = vpack.c.bf16 %v87_v56, %v86_v53  ;;  %v91_v63 = vadd.f32 %v177_v7, %v68_v58 }
  0x10   :  { %292 = vst [vmem:[%s373_s3 + $0x20] sm:$0xff] %v265_v59   ;;  %v275_v0 = vpack.c.bf16 %v89_v60, %v88_v57 }
  0x11   :  { %293 = vst [vmem:[%s373_s3 + $0x28] sm:$0xff] %v270_v62   ;;  %v280_v2 = vpack.c.bf16 %v91_v63, %v90_v61 }
  0x12   :  { %294 = vst [vmem:[%s373_s3 + $0x30] sm:$0xff] %v275_v0  }
  0x13   :  { %295 = vst [vmem:[%s373_s3 + $0x38] sm:$0xff] %v280_v2  }

// kernel: resunet_fwd.63
= control target key start
LH: loop header
LB: loop body
LE: loop exit
PB: predicated region body
PF: predicated region fallthrough
CT: control target
= control target key end

     0   :  { %s422_s0 = inlined_call_operand.vmem [shape: bf16[128,128], index: 0, kind: input, shape index: {}]   ;;  %s423_s1 = inlined_call_operand.vmem [shape: f32[1,128], index: 1, kind: input, shape index: {}]   ;;  %s424_s2 = inlined_call_operand.vmem [shape: f32[1,128], index: 2, kind: input, shape index: {}]   ;;  %s425_s3 = inlined_call_operand.vmem [shape: bf16[128,128], index: 3, kind: output, shape index: {}]  }
   0x1   :  { %v227_v0 = vld [vmem:[%s422_s0] sm:$0xff]   ;;  %v298_v4 = vld [vmem:[%s422_s0 + $0x8] sm:$0xff]   ;;  %v299_v5 = vld [vmem:[%s422_s0 + $0x10] sm:$0xff]  }
   0x2   :  { %v338_v1 = vld [vmem:[%s423_s1] ss:$0 sm:$0xff]  ;;  %v228_v2 = vunpack.c.l.bf16 %v227_v0  ;;  %v229_v3 = vunpack.c.h.bf16 %v227_v0  ;;  %v300_v6 = vld [vmem:[%s422_s0 + $0x18] sm:$0xff]   ;;  %v232_v8 = vunpack.c.l.bf16 %v298_v4  ;;  %v233_v9 = vunpack.c.h.bf16 %v298_v4  ;;  %v302_v33 = vld [vmem:[%s422_s0 + $0x28] sm:$0xff]  }
   0x3   :  { %v352_v7 = vld [vmem:[%s424_s2] ss:$0 sm:$0xff]  ;;  %v236_v10 = vunpack.c.l.bf16 %v299_v5  ;;  %v237_v11 = vunpack.c.h.bf16 %v299_v5  ;;  %v240_v14 = vunpack.c.l.bf16 %v300_v6  ;;  %v241_v15 = vunpack.c.h.bf16 %v300_v6  ;;  %v303_v38 = vld [vmem:[%s422_s0 + $0x30] sm:$0xff]   ;;  %v304_v43 = vld [vmem:[%s422_s0 + $0x38] sm:$0xff]  }
   0x4   :  { %v53_v12 = vmul.f32 %v228_v2, %v338_v1  ;;  %v54_v13 = vmul.f32 %v229_v3, %v338_v1  ;;  %v55_v16 = vmul.f32 %v232_v8, %v338_v1  ;;  %v56_v17 = vmul.f32 %v233_v9, %v338_v1  ;;  %v301_v28 = vld [vmem:[%s422_s0 + $0x20] sm:$0xff]  }
   0x5   :  { %v57_v18 = vmul.f32 %v236_v10, %v338_v1  ;;  %v58_v19 = vmul.f32 %v237_v11, %v338_v1  ;;  %v59_v22 = vmul.f32 %v240_v14, %v338_v1  ;;  %v60_v23 = vmul.f32 %v241_v15, %v338_v1 }
   0x6   :  { %v76_v20 = vadd.f32 %v352_v7, %v53_v12  ;;  %v77_v21 = vadd.f32 %v352_v7, %v54_v13  ;;  %v78_v24 = vadd.f32 %v352_v7, %v55_v16  ;;  %v79_v25 = vadd.f32 %v352_v7, %v56_v17 }
   0x7   :  { %v80_v26 = vadd.f32 %v352_v7, %v57_v18  ;;  %v81_v27 = vadd.f32 %v352_v7, %v58_v19  ;;  %v82_v31 = vadd.f32 %v352_v7, %v59_v22  ;;  %v83_v32 = vadd.f32 %v352_v7, %v60_v23 }
   0x8   :  { %v92_v29 = vmax.f32 %v76_v20, 0.0  ;;  %v93_v30 = vmax.f32 %v77_v21, 0.0  ;;  %v94_v34 = vmax.f32 %v78_v24, 0.0  ;;  %v95_v35 = vmax.f32 %v79_v25, 0.0 }
   0x9   :  { %v96_v36 = vmax.f32 %v80_v26, 0.0  ;;  %v97_v37 = vmax.f32 %v81_v27, 0.0  ;;  %v98_v40 = vmax.f32 %v82_v31, 0.0  ;;  %v99_v41 = vmax.f32 %v83_v32, 0.0 }
   0xa   :  { %v261_v39 = vpack.c.bf16 %v93_v30, %v92_v29  ;;  %v244_v42 = vunpack.c.l.bf16 %v301_v28  ;;  %v266_v44 = vpack.c.bf16 %v95_v35, %v94_v34  ;;  %v245_v46 = vunpack.c.h.bf16 %v301_v28 }
   0xb   :  { %v271_v45 = vpack.c.bf16 %v97_v37, %v96_v36  ;;  %v248_v47 = vunpack.c.l.bf16 %v302_v33  ;;  %v276_v48 = vpack.c.bf16 %v99_v41, %v98_v40  ;;  %v249_v50 = vunpack.c.h.bf16 %v302_v33 }
   0xc   :  { %262 = vst [vmem:[%s425_s3] sm:$0xff] %v261_v39   ;;  %v61_v49 = vmul.f32 %v244_v42, %v338_v1  ;;  %v252_v51 = vunpack.c.l.bf16 %v303_v38  ;;  %305 = vst [vmem:[%s425_s3 + $0x8] sm:$0xff] %v266_v44   ;;  %v62_v52 = vmul.f32 %v245_v46, %v338_v1  ;;  %v253_v54 = vunpack.c.h.bf16 %v303_v38 }
   0xd   :  { %306 = vst [vmem:[%s425_s3 + $0x10] sm:$0xff] %v271_v45   ;;  %v63_v53 = vmul.f32 %v248_v47, %v338_v1  ;;  %v256_v55 = vunpack.c.l.bf16 %v304_v43  ;;  %307 = vst [vmem:[%s425_s3 + $0x18] sm:$0xff] %v276_v48   ;;  %v64_v57 = vmul.f32 %v249_v50, %v338_v1  ;;  %v257_v59 = vunpack.c.h.bf16 %v304_v43 }
   0xe   :  { %v84_v56 = vadd.f32 %v352_v7, %v61_v49  ;;  %v65_v58 = vmul.f32 %v252_v51, %v338_v1  ;;  %v85_v60 = vadd.f32 %v352_v7, %v62_v52  ;;  %v66_v62 = vmul.f32 %v253_v54, %v338_v1 }
   0xf   :  { %v86_v61 = vadd.f32 %v352_v7, %v63_v53  ;;  %v67_v63 = vmul.f32 %v256_v55, %v338_v1  ;;  %v87_v2 = vadd.f32 %v352_v7, %v64_v57  ;;  %v68_v4 = vmul.f32 %v257_v59, %v338_v1 }
  0x10   :  { %v100_v0 = vmax.f32 %v84_v56, 0.0  ;;  %v88_v3 = vadd.f32 %v352_v7, %v65_v58  ;;  %v101_v5 = vmax.f32 %v85_v60, 0.0  ;;  %v89_v8 = vadd.f32 %v352_v7, %v66_v62 }
  0x11   :  { %v102_v6 = vmax.f32 %v86_v61, 0.0  ;;  %v90_v9 = vadd.f32 %v352_v7, %v67_v63  ;;  %v103_v10 = vmax.f32 %v87_v2, 0.0  ;;  %v91_v12 = vadd.f32 %v352_v7, %v68_v4 }
  0x12   :  { %v104_v11 = vmax.f32 %v88_v3, 0.0  ;;  %v281_v13 = vpack.c.bf16 %v101_v5, %v100_v0  ;;  %v105_v14 = vmax.f32 %v89_v8, 0.0 }
  0x13   :  { %v106_v15 = vmax.f32 %v90_v9, 0.0  ;;  %v286_v16 = vpack.c.bf16 %v103_v10, %v102_v6  ;;  %v107_v17 = vmax.f32 %v91_v12, 0.0 }
  0x14   :  { %308 = vst [vmem:[%s425_s3 + $0x20] sm:$0xff] %v281_v13   ;;  %v291_v1 = vpack.c.bf16 %v105_v14, %v104_v11 }
  0x15   :  { %309 = vst [vmem:[%s425_s3 + $0x28] sm:$0xff] %v286_v16   ;;  %v296_v18 = vpack.c.bf16 %v107_v17, %v106_v15 }
  0x16   :  { %310 = vst [vmem:[%s425_s3 + $0x30] sm:$0xff] %v291_v1  }
  0x17   :  { %311 = vst [vmem:[%s425_s3 + $0x38] sm:$0xff] %v296_v18  }

// kernel: resunet_fwd.62
= control target key start
LH: loop header
LB: loop body
LE: loop exit
PB: predicated region body
PF: predicated region fallthrough
CT: control target
= control target key end

     0   :  { %s1653_s12 = smov 0   ;;  %s1655_s13 = smov 0   ;;  %s1867_s0 = inlined_call_operand.vmem [shape: bf16[128,1152], index: 0, kind: input, shape index: {}]   ;;  %s1868_s1 = inlined_call_operand.vmem [shape: bf16[1152,128], index: 1, kind: input, shape index: {}]   ;;  %s1869_s2 = inlined_call_operand.vmem [shape: bf16[128,128], index: 2, kind: output, shape index: {0}]   ;;  %s1870_s3 = inlined_call_operand.vmem [shape: f32[8,128], index: 3, kind: output, shape index: {1}]  }
   0x1   :  { %s1657_s14 = smov 0   ;;  %s1659_s15 = smov 0  }
   0x2   :  { %s1661_s16 = smov 0  }
   0x3 LB: > { %s23_s17 = sadd.s32 1, %s1626_s15  ;;  %p42_p1 = scmp.ne.s32.totalorder %s1618_s13, %s1614_s12  ;;  %s1630_s16 = sphi %s1661_s16, %s14_s16   ;;  %s1626_s15 = sphi %s1659_s15, %s1874_s15   ;;  %s1622_s14 = sphi %s1657_s14, %s1873_s14   ;;  %s1618_s13 = sphi %s1655_s13, %s1872_s13   ;;  %s1614_s12 = sphi %s1653_s12, %s1871_s12  }
   0x4   : > { %p24_p0 = scmp.ge.s32.totalorder %s23_s17, 3  ;;  %p43_p2 = scmp.eq.s32.totalorder %s1630_s16, 0 }
   0x5   : > { %s35_s19 = sadd.s32 1, %s1618_s13  ;;  %p1210_p5 = scmp.ge.s32.totalorder %s1630_s16, 3 }
   0x6   : > { %s1876_s17 = smov (%p24_p0, %s23_s17), 0  ;;  %p44_p3 = por %p43_p2, %p42_p1 }
   0x7   : > { %s31_s18 = ssub.s32 %s1626_s15, %s1876_s17  ;;  %146 = sbr.rel (%p1210_p5) target bundleno = 37 (0x25), region = 16 }
   0x8   : > { %p33_p4 = scmp.eq.s32.totalorder %s31_s18, 0 }
   0xa   : > { %s1688_s20 = scalar_select %p33_p4, %s1618_s13, %s35_s19  }
   0xe   : > { %149 = sbr.rel (!%p44_p3) target bundleno = 37 (0x25), region = 20  ;;  %s151_s21 = sand.u32 (%p44_p3), 1, %s1618_s13  }
   0xf   : > { %s1317_s22 = smul.u32 (%p44_p3), 12, %s1626_s15 }
  0x10   : > { %s1493_s23 = smul.u32 (%p44_p3), 192, %s151_s21 }
  0x11   : > { %s1696_s26 = scalar_lea.vmem (%p44_p3), %s1867_s0, %s1317_s22 }
  0x12   : > { %v174_v0 = vld [vmem:[%s1696_s26] sm:$0xff] (%p44_p3)  ;;  %v178_v2 = vld [vmem:[%s1696_s26 + $0x48] sm:$0xff] (%p44_p3)  ;;  %s1701_s27 = scalar_lea.vmem (%p44_p3), [#allocation3], %s1493_s23  ;;  %v182_v4 = vld [vmem:[%s1696_s26 + $0x90] sm:$0xff] (%p44_p3) }
  0x13   : > { %v176_v1 = vld [vmem:[%s1696_s26 + $0x24] sm:$0xff] (%p44_p3)  ;;  %175 = vst [vmem:[%s1701_s27] sm:$0xff] (%p44_p3), %v174_v0  ;;  %179 = vst [vmem:[%s1701_s27 + $0x18] sm:$0xff] (%p44_p3), %v178_v2  ;;  %v180_v3 = vld [vmem:[%s1696_s26 + $0x6c] sm:$0xff] (%p44_p3) }
  0x14   : > { %177 = vst [vmem:[%s1701_s27 + $0xc] sm:$0xff] (%p44_p3), %v176_v1  ;;  %v184_v5 = vld [vmem:[%s1696_s26 + $0xb4] sm:$0xff] (%p44_p3)  ;;  %181 = vst [vmem:[%s1701_s27 + $0x24] sm:$0xff] (%p44_p3), %v180_v3  ;;  %v188_v7 = vld [vmem:[%s1696_s26 + $0xfc] sm:$0xff] (%p44_p3) }
  0x15   : > { %183 = vst [vmem:[%s1701_s27 + $0x30] sm:$0xff] %v182_v4  ;;  %185 = vst [vmem:[%s1701_s27 + $0x3c] sm:$0xff] %v184_v5  ;;  %v186_v6 = vld [vmem:[%s1696_s26 + $0xd8] sm:$0xff]  ;;  %v190_v8 = vld [vmem:[%s1696_s26 + $0x120] sm:$0xff] }
  0x16   : > { %187 = vst [vmem:[%s1701_s27 + $0x48] sm:$0xff] %v186_v6  ;;  %189 = vst [vmem:[%s1701_s27 + $0x54] sm:$0xff] %v188_v7  ;;  %v192_v9 = vld [vmem:[%s1696_s26 + $0x144] sm:$0xff]  ;;  %v196_v11 = vld [vmem:[%s1696_s26 + $0x18c] sm:$0xff] }
  0x17   : > { %191 = vst [vmem:[%s1701_s27 + $0x60] sm:$0xff] %v190_v8  ;;  %v194_v10 = vld [vmem:[%s1696_s26 + $0x168] sm:$0xff]  ;;  %193 = vst [vmem:[%s1701_s27 + $0x6c] sm:$0xff] %v192_v9  ;;  %v198_v12 = vld [vmem:[%s1696_s26 + $0x1b0] sm:$0xff] }
  0x18   : > { %195 = vst [vmem:[%s1701_s27 + $0x78] sm:$0xff] %v194_v10  ;;  %197 = vst [vmem:[%s1701_s27 + $0x84] sm:$0xff] %v196_v11  ;;  %v200_v13 = vld [vmem:[%s1696_s26 + $0x1d4] sm:$0xff]  ;;  %v204_v15 = vld [vmem:[%s1696_s26 + $0x21c] sm:$0xff] }
  0x19   : > { %v202_v14 = vld [vmem:[%s1696_s26 + $0x1f8] sm:$0xff]  ;;  %199 = vst [vmem:[%s1701_s27 + $0x90] sm:$0xff] %v198_v12  ;;  %201 = vst [vmem:[%s1701_s27 + $0x9c] sm:$0xff] %v200_v13  ;;  %v1212_v16 = vld [vmem:[%s1696_s26 + $0x8] sm:$0xf] }
  0x1a   : > { %203 = vst [vmem:[%s1701_s27 + $0xa8] sm:$0xff] %v202_v14  ;;  %v1214_v17 = vld [vmem:[%s1696_s26 + $0x2c] sm:$0xf]  ;;  %205 = vst [vmem:[%s1701_s27 + $0xb4] sm:$0xff] %v204_v15  ;;  %v1216_v18 = vld [vmem:[%s1696_s26 + $0x50] sm:$0xf] }
  0x1b   : > { %1213 = vst [vmem:[%s1701_s27 + $0x8] sm:$0xf] %v1212_v16  ;;  %1215 = vst [vmem:[%s1701_s27 + $0x14] sm:$0xf] %v1214_v17  ;;  %v1218_v19 = vld [vmem:[%s1696_s26 + $0x74] sm:$0xf] }
  0x1c   : > { %v1220_v20 = vld [vmem:[%s1696_s26 + $0x98] sm:$0xf]  ;;  %1217 = vst [vmem:[%s1701_s27 + $0x20] sm:$0xf] %v1216_v18  ;;  %1219 = vst [vmem:[%s1701_s27 + $0x2c] sm:$0xf] %v1218_v19 }
  0x1d   : > { %1221 = vst [vmem:[%s1701_s27 + $0x38] sm:$0xf] %v1220_v20  ;;  %v1222_v21 = vld [vmem:[%s1696_s26 + $0xbc] sm:$0xf]  ;;  %v1224_v22 = vld [vmem:[%s1696_s26 + $0xe0] sm:$0xf] }
  0x1e   : > { %v1226_v23 = vld [vmem:[%s1696_s26 + $0x104] sm:$0xf]  ;;  %1223 = vst [vmem:[%s1701_s27 + $0x44] sm:$0xf] %v1222_v21  ;;  %1225 = vst [vmem:[%s1701_s27 + $0x50] sm:$0xf] %v1224_v22 }
  0x1f   : > { %1227 = vst [vmem:[%s1701_s27 + $0x5c] sm:$0xf] %v1226_v23  ;;  %v1228_v24 = vld [vmem:[%s1696_s26 + $0x128] sm:$0xf]  ;;  %v1230_v25 = vld [vmem:[%s1696_s26 + $0x14c] sm:$0xf] }
  0x20   : > { %v1232_v26 = vld [vmem:[%s1696_s26 + $0x170] sm:$0xf]  ;;  %1229 = vst [vmem:[%s1701_s27 + $0x68] sm:$0xf] %v1228_v24  ;;  %1231 = vst [vmem:[%s1701_s27 + $0x74] sm:$0xf] %v1230_v25 }
  0x21   : > { %1233 = vst [vmem:[%s1701_s27 + $0x80] sm:$0xf] %v1232_v26  ;;  %v1234_v27 = vld [vmem:[%s1696_s26 + $0x194] sm:$0xf]  ;;  %v1236_v28 = vld [vmem:[%s1696_s26 + $0x1b8] sm:$0xf] }
  0x22   : > { %v1238_v29 = vld [vmem:[%s1696_s26 + $0x1dc] sm:$0xf]  ;;  %1235 = vst [vmem:[%s1701_s27 + $0x8c] sm:$0xf] %v1234_v27  ;;  %1237 = vst [vmem:[%s1701_s27 + $0x98] sm:$0xf] %v1236_v28 }
  0x23   : > { %1239 = vst [vmem:[%s1701_s27 + $0xa4] sm:$0xf] %v1238_v29  ;;  %v1240_v30 = vld [vmem:[%s1696_s26 + $0x200] sm:$0xf]  ;;  %v1242_v31 = vld [vmem:[%s1696_s26 + $0x224] sm:$0xf] }
  0x24   : > { %1241 = vst [vmem:[%s1701_s27 + $0xb0] sm:$0xf] %v1240_v30  ;;  %1243 = vst [vmem:[%s1701_s27 + $0xbc] sm:$0xf] %v1242_v31 }
  0x25 PF: > { %p1244_p6 = scmp.ge.s32.totalorder %s1630_s16, 1  ;;  %p258_p7 = scmp.lt.s32.totalorder %s1630_s16, 4 }
  0x27   : > { %p259_p8 = pnand %p1244_p6, %p258_p7 }
  0x28   : > { %s265_s28 = sand.u32 (!%p259_p8), 1, %s1614_s12   ;;  %s299_s29 = smul.u32 (!%p259_p8), 48, %s1622_s14 }
  0x29   : > { %262 = sbr.rel (%p259_p8) target bundleno = 402 (0x192), region = 50  ;;  %p1246_p10 = scmp.ne.s32.totalorder (!%p259_p8), %s1622_s14, 0 }
  0x2a   : > { %s1494_s30 = smul.u32 (!%p259_p8), 192, %s265_s28  ;;  %p300_p9 = scmp.lt.s32.totalorder (!%p259_p8), %s299_s29, 143 }
  0x2c   : > { %s1773_s8 = scalar_lea.vmem (!%p259_p8), [#allocation3], %s1494_s30 }
  0x30   : > { %s1878_s29 = smov (!%p300_p9, %s299_s29), 143  ;;  %319 = sbr.rel (%p1246_p10) target bundleno = 58 (0x3a), region = 58 }
  0x31   : > { %s1245_s4 = sshll.u32 %s1878_s29, 2  ;;  %v1632_v32 = vmov (!%p1246_p10), 0.0  }
  0x32   : > { %s1771_s7 = scalar_lea.vmem %s1868_s1, %s1245_s4  ;;  %320 = vst [vmem:[#allocation2] sm:$0xff] (!%p1246_p10), %v1632_v32  ;;  %321 = vst [vmem:[#allocation2 + $0x8] sm:$0xff] (!%p1246_p10), %v1632_v32 }
  0x33   : > { %322 = vst [vmem:[#allocation2 + $0x10] sm:$0xff] (!%p1246_p10), %v1632_v32  ;;  %323 = vst [vmem:[#allocation2 + $0x18] sm:$0xff] (!%p1246_p10), %v1632_v32 }
  0x34   : > { %324 = vst [vmem:[#allocation2 + $0x20] sm:$0xff] (!%p1246_p10), %v1632_v32  ;;  %325 = vst [vmem:[#allocation2 + $0x28] sm:$0xff] (!%p1246_p10), %v1632_v32 }
  0x35   : > { %326 = vst [vmem:[#allocation2 + $0x30] sm:$0xff] (!%p1246_p10), %v1632_v32  ;;  %327 = vst [vmem:[#allocation2 + $0x38] sm:$0xff] (!%p1246_p10), %v1632_v32 }
  0x36   : > { %328 = vst [vmem:[#allocation2 + $0x40] sm:$0xff] (!%p1246_p10), %v1632_v32  ;;  %329 = vst [vmem:[#allocation2 + $0x48] sm:$0xff] (!%p1246_p10), %v1632_v32 }
  0x37   : > { %330 = vst [vmem:[#allocation2 + $0x50] sm:$0xff] %v1632_v32  ;;  %331 = vst [vmem:[#allocation2 + $0x58] sm:$0xff] %v1632_v32 }
  0x38   : > { %332 = vst [vmem:[#allocation2 + $0x60] sm:$0xff] %v1632_v32  ;;  %333 = vst [vmem:[#allocation2 + $0x68] sm:$0xff] %v1632_v32 }
  0x39   : > { %334 = vst [vmem:[#allocation2 + $0x70] sm:$0xff] %v1632_v32  ;;  %335 = vst [vmem:[#allocation2 + $0x78] sm:$0xff] %v1632_v32 }
  0x3a PF: > { %v1536_v33 = vld [vmem:[%s1771_s7 + $0x40] sm:$0xff]   ;;  %v1539_v36 = vld [vmem:[%s1771_s7 + $0x48] sm:$0xff]   ;;  %v1542_v39 = vld [vmem:[%s1771_s7 + $0x50] sm:$0xff]   ;;  %p1295_p11 = scmp.ne.s32.totalorder %s1622_s14, 2 }
  0x3b   : > { %v1537_v34 = vld [vmem:[%s1771_s7] sm:$0xff]   ;;  %1381 = vmatprep.subr.bf16.mxu0 %v1536_v33  ;;  %v1540_v37 = vld [vmem:[%s1771_s7 + $0x8] sm:$0xff]   ;;  %v1543_v40 = vld [vmem:[%s1771_s7 + $0x10] sm:$0xff]   ;;  %vm1088_vm0 = vcmask (!%p1295_p11), 1040384   ;;  %vm1090_vm1 = vcmask (!%p1295_p11), 1041408  }
  0x3c   : > { %v1538_v35 = vld [vmem:[%s1771_s7 + $0x80] sm:$0xff]   ;;  %1382 = vmatpush3.bf16.msra.mxu0 %v1537_v34  ;;  %v1541_v38 = vld [vmem:[%s1771_s7 + $0x88] sm:$0xff]   ;;  %v1544_v41 = vld [vmem:[%s1771_s7 + $0x90] sm:$0xff]  }
  0x3d   : > { %1461 = vmatprep.subr.bf16.mxu1 %v1538_v35  ;;  %1383 = vmatprep.subr.bf16.mxu0 %v1539_v36  ;;  %v1545_v42 = vld [vmem:[%s1771_s7 + $0x58] sm:$0xff]   ;;  %v1548_v45 = vld [vmem:[%s1771_s7 + $0x60] sm:$0xff]   ;;  %v1551_v48 = vld [vmem:[%s1771_s7 + $0x68] sm:$0xff]  }
  0x3e   : > { %1462 = vmatpush3.bf16.msra.mxu1 %v1538_v35  ;;  %v1546_v43 = vld [vmem:[%s1771_s7 + $0x18] sm:$0xff]   ;;  %v1550_v46 = vld [vmem:[%s1771_s7 + $0xa0] sm:$0xff]   ;;  %v1553_v49 = vld [vmem:[%s1771_s7 + $0xa8] sm:$0xff]  }
  0x3f   : > { %1463 = vmatprep.subr.bf16.mxu1 %v1541_v38  ;;  %v1547_v44 = vld [vmem:[%s1771_s7 + $0x98] sm:$0xff]   ;;  %v1549_v47 = vld [vmem:[%s1771_s7 + $0x20] sm:$0xff]   ;;  %v1552_v50 = vld [vmem:[%s1771_s7 + $0x28] sm:$0xff]  }
  0x40   : > { %1384 = vmatpush3.bf16.msra.mxu0 %v1540_v37  ;;  %v1554_v51 = vld [vmem:[%s1771_s7 + $0x70] sm:$0xff]   ;;  %v1557_v54 = vld [vmem:[%s1771_s7 + $0x78] sm:$0xff]   ;;  %v1560_v59 = vld [vmem:[%s1773_s8] ss:$12 sps:$4 sm:$0xff]  }
  0x41   : > { %1385 = vmatprep.subr.bf16.mxu0 %v1542_v39  ;;  %v1555_v52 = vld [vmem:[%s1771_s7 + $0x30] sm:$0xff]   ;;  %v1559_v55 = vld [vmem:[%s1771_s7 + $0xb8] sm:$0xff]   ;;  %v1564_v61 = vld [vmem:[%s1773_s8 + $0x20] ss:$12 sps:$4 sm:$0xff]  }
  0x42   : > { %1464 = vmatpush3.bf16.msra.mxu1 %v1541_v38  ;;  %v1556_v53 = vld [vmem:[%s1771_s7 + $0xb0] sm:$0xff]   ;;  %v1558_v58 = vld [vmem:[%s1771_s7 + $0x38] sm:$0xff]   ;;  %v1580_v5 = vld [vmem:[%s1773_s8 + $0x80] ss:$12 sps:$4 sm:$0xff]  }
  0x43   : > { %1465 = vmatprep.subr.bf16.mxu1 %v1544_v41  ;;  %v1562_v56 = vld [vmem:[%s1773_s8 + $0x4] ss:$12 sps:$4 sm:$0xff]   ;;  %v1563_v57 = vld [vmem:[%s1773_s8 + $0x8] ss:$12 sps:$4 sm:$0xff]   ;;  %v1573_v4 = vld [vmem:[%s1773_s8 + $0x4c] ss:$12 sps:$4 sm:$0xff]  }
  0x44   : > { %1386 = vmatpush3.bf16.msra.mxu0 %v1543_v40  ;;  %736 = vmatprep.mubr.bf16.mxu0 %v1562_v56  ;;  %v1565_v60 = vld [vmem:[%s1773_s8 + $0x1c] ss:$12 sps:$4 sm:$0xff]   ;;  %v1571_v62 = vld [vmem:[%s1773_s8 + $0x38] ss:$12 sps:$4 sm:$0xff]   ;;  %v1568_v0 = vld [vmem:[%s1773_s8 + $0x34] ss:$12 sps:$4 sm:$0xff]  }
  0x45   : > { %1387 = vmatprep.subr.bf16.mxu0 %v1545_v42  ;;  %1477 = vmatprep.mubr.bf16.mxu1 %v1563_v57  ;;  %v1567_v63 = vld [vmem:[%s1773_s8 + $0x18] ss:$12 sps:$4 sm:$0xff]   ;;  %v1572_v1 = vld [vmem:[%s1773_s8 + $0x50] ss:$12 sps:$4 sm:$0xff]   ;;  %v1579_v2 = vld [vmem:[%s1773_s8 + $0x68] ss:$12 sps:$4 sm:$0xff]  }
  0x46   : > { %1466 = vmatpush3.bf16.msra.mxu1 %v1544_v41  ;;  %v1570_v3 = vld [vmem:[%s1773_s8 + $0x30] ss:$12 sps:$4 sm:$0xff]   ;;  %v1587_v6 = vld [vmem:[%s1773_s8 + $0x98] ss:$12 sps:$4 sm:$0xff]   ;;  %v1575_v7 = vld [vmem:[%s1773_s8 + $0x48] ss:$12 sps:$4 sm:$0xff]  }
  0x47   : > { %1467 = vmatprep.subr.bf16.mxu1 %v1547_v44  ;;  %v1576_v8 = vld [vmem:[%s1773_s8 + $0x64] ss:$12 sps:$4 sm:$0xff]   ;;  %v1578_v10 = vld [vmem:[%s1773_s8 + $0x60] ss:$12 sps:$4 sm:$0xff]   ;;  %v1581_v11 = vld [vmem:[%s1773_s8 + $0x7c] ss:$12 sps:$4 sm:$0xff]  }
  0x48   : > { %1388 = vmatpush3.bf16.msra.mxu0 %v1546_v43  ;;  %v1588_v9 = vld [vmem:[%s1773_s8 + $0xb0] ss:$12 sps:$4 sm:$0xff]   ;;  %v1583_v12 = vld [vmem:[%s1773_s8 + $0x78] ss:$12 sps:$4 sm:$0xff]   ;;  %v1584_v13 = vld [vmem:[%s1773_s8 + $0x94] ss:$12 sps:$4 sm:$0xff]  }
  0x49   : > { %1389 = vmatprep.subr.bf16.mxu0 %v1548_v45  ;;  %v1586_v14 = vld [vmem:[%s1773_s8 + $0x90] ss:$12 sps:$4 sm:$0xff]   ;;  %v1589_v15 = vld [vmem:[%s1773_s8 + $0xac] ss:$12 sps:$4 sm:$0xff]   ;;  %v1591_v16 = vld [vmem:[%s1773_s8 + $0xa8] ss:$12 sps:$4 sm:$0xff]  }
  0x4a   : > { %1468 = vmatpush3.bf16.msra.mxu1 %v1547_v44  ;;  %v336_v23 = vld [vmem:[#allocation2] sm:$0xff]  ;;  %v337_v28 = vld [vmem:[#allocation2 + $0x8] sm:$0xff]  ;;  %v338_v38 = vld [vmem:[#allocation2 + $0x10] sm:$0xff] }
  0x4b   : > { %1469 = vmatprep.subr.bf16.mxu1 %v1550_v46  ;;  %v339_v44 = vld [vmem:[#allocation2 + $0x18] sm:$0xff] }
  0x4c   : > { %1390 = vmatpush3.bf16.msra.mxu0 %v1549_v47 }
  0x4d   : > { %1391 = vmatprep.subr.bf16.mxu0 %v1551_v48 }
  0x4e   : > { %1470 = vmatpush3.bf16.msra.mxu1 %v1550_v46 }
  0x4f   : > { %1471 = vmatprep.subr.bf16.mxu1 %v1553_v49 }
  0x50   : > { %1392 = vmatpush3.bf16.msra.mxu0 %v1552_v50 }
  0x51   : > { %1393 = vmatprep.subr.bf16.mxu0 %v1554_v51 }
  0x52   : > { %1472 = vmatpush3.bf16.msra.mxu1 %v1553_v49 }
  0x53   : > { %1473 = vmatprep.subr.bf16.mxu1 %v1556_v53 }
  0x54   : > { %1394 = vmatpush3.bf16.msra.mxu0 %v1555_v52 }
  0x55   : > { %1395 = vmatprep.subr.bf16.mxu0 %v1557_v54 }
  0x56   : > { %1474 = vmatpush3.bf16.msra.mxu1 %v1556_v53 }
  0x57   : > { %1475 = vmatprep.subr.bf16.mxu1 %v1559_v55 }
  0x58   : > { %1396 = vmatpush3.bf16.msra.mxu0 %v1558_v58 }
  0x5a   : > { %1476 = vmatpush3.bf16.msra.mxu1 %v1559_v55  ;;  %v340_v55 = vld [vmem:[#allocation2 + $0x20] sm:$0xff] }
  0x5b   : > { %737 = vmatmul.mubr.bf16.vlgmr.msra.gmra.mrb[0].mxu0 %v1560_v59 }
  0x5c   : > { %744 = vmatprep.mubr.bf16.mxu0 %v1565_v60  ;;  %v341_v60 = vld [vmem:[#allocation2 + $0x28] sm:$0xff] }
  0x5d   : > { %1478 = vmatmul.mubr.bf16.vlgmr.msra.gmra.mrb[0].mxu1 %v1564_v61 }
  0x5e   : > { %1481 = vmatprep.mubr.bf16.mxu1 %v1571_v62 }
  0x63   : > { %745 = vmatmul.mubr.bf16.gmra.mrb[4].mxu0 %v1567_v63 }
  0x64   : > { %752 = vmatprep.mubr.bf16.mxu0 %v1568_v0 }
  0x65   : > { %1482 = vmatmul.mubr.bf16.gmra.mrb[4].mxu1 %v1572_v1 }
  0x66   : > { %1485 = vmatprep.mubr.bf16.mxu1 %v1579_v2 }
  0x6b   : > { %753 = vmatmul.mubr.bf16.gmra.mrb[8].mxu0 %v1570_v3 }
  0x6c   : > { %760 = vmatprep.mubr.bf16.mxu0 %v1573_v4 }
  0x6d   : > { %1486 = vmatmul.mubr.bf16.gmra.mrb[8].mxu1 %v1580_v5 }
  0x6e   : > { %1489 = vmatprep.mubr.bf16.mxu1 %v1587_v6  ;;  %v342_v6 = vld [vmem:[#allocation2 + $0x30] sm:$0xff] }
  0x73   : > { %761 = vmatmul.mubr.bf16.gmra.mrb[12].mxu0 %v1575_v7 }
  0x74   : > { %768 = vmatprep.mubr.bf16.mxu0 %v1576_v8 }
  0x75   : > { %1490 = vmatmul.mubr.bf16.gmra.mrb[12].mxu1 %v1588_v9 }
  0x7b   : > { %769 = vmatmul.mubr.bf16.gmra.mrb[16].mxu0 %v1578_v10 }
  0x7c   : > { %776 = vmatprep.mubr.bf16.mxu0 %v1581_v11 }
  0x83   : > { %777 = vmatmul.mubr.bf16.gmra.mrb[20].mxu0 %v1583_v12  ;;  %v343_v12 = vld [vmem:[#allocation2 + $0x38] sm:$0xff] }
  0x84   : > { %784 = vmatprep.mubr.bf16.mxu0 %v1584_v13 }
  0x8b   : > { %785 = vmatmul.mubr.bf16.gmra.mrb[24].mxu0 %v1586_v14 }
  0x8c   : > { %792 = vmatprep.mubr.bf16.mxu0 %v1589_v15 }
  0x93   : > { %793 = vmatmul.mubr.bf16.gmra.mrb[28].mxu0 %v1591_v16 }
 0x12e   : > { %v1397_v17 = vpop.f32.mrb[0].mxu0 }
 0x12f   : > { %v1398_v18 = vpop.f32.mrb[1].mxu0 }
 0x130   : > { %v1399_v19 = vadd.f32 %v1398_v18, %v1397_v17  ;;  %v1400_v20 = vpop.f32.mrb[2].mxu0  ;;  %v1479_v21 = vpop.f32.mrb[0].mxu1 }
 0x131   : > { %v1401_v22 = vpop.f32.mrb[3].mxu0  ;;  %v835_v24 = vpop.f32.mrb[1].mxu1 }
 0x132   : > { %v1402_v25 = vadd.f32 %v1401_v22, %v1400_v20  ;;  %v836_v26 = vadd.f32 %v1399_v19, %v835_v24  ;;  %v1480_v27 = vpop.f32.mrb[2].mxu1  ;;  %v344_v22 = vld [vmem:[#allocation2 + $0x40] sm:$0xff] }
 0x133   : > { %v838_v29 = vpop.f32.mrb[3].mxu1 }
 0x134   : > { %v898_v30 = vadd.f32 %v836_v26, %v336_v23  ;;  %v839_v31 = vadd.f32 %v1402_v25, %v838_v29  ;;  %v345_v25 = vld [vmem:[#allocation2 + $0x48] sm:$0xff] }
 0x136   : > { %914 = vst [vmem:[#allocation2] sm:$0xff] %v898_v30  ;;  %v899_v32 = vadd.f32 %v839_v31, %v337_v28  ;;  %v1403_v33 = vpop.f32.mrb[4].mxu0 }
 0x137   : > { %v1404_v34 = vpop.f32.mrb[5].mxu0 }
 0x138   : > { %915 = vst [vmem:[#allocation2 + $0x8] sm:$0xff] %v899_v32  ;;  %v1405_v35 = vadd.f32 %v1404_v34, %v1403_v33  ;;  %v1406_v36 = vpop.f32.mrb[6].mxu0  ;;  %v1483_v37 = vpop.f32.mrb[4].mxu1  ;;  %v346_v33 = vld [vmem:[#allocation2 + $0x50] sm:$0xff] }
 0x139   : > { %v1407_v39 = vpop.f32.mrb[7].mxu0  ;;  %v851_v40 = vpop.f32.mrb[5].mxu1 }
 0x13a   : > { %v844_v41 = vadd.f32 %v1479_v21, %v1405_v35  ;;  %v1408_v42 = vadd.f32 %v1407_v39, %v1406_v36  ;;  %v1484_v43 = vpop.f32.mrb[6].mxu1 }
 0x13b   : > { %v854_v45 = vpop.f32.mrb[7].mxu1 }
 0x13c   : > { %v900_v46 = vadd.f32 %v844_v41, %v338_v38  ;;  %v847_v47 = vadd.f32 %v1480_v27, %v1408_v42 }
 0x13e   : > { %916 = vst [vmem:[#allocation2 + $0x10] sm:$0xff] %v900_v46  ;;  %v901_v48 = vadd.f32 %v847_v47, %v339_v44  ;;  %v1409_v49 = vpop.f32.mrb[8].mxu0  ;;  %v348_v46 = vld [vmem:[#allocation2 + $0x60] sm:$0xff] }
 0x13f   : > { %v1410_v50 = vpop.f32.mrb[9].mxu0 }
 0x140   : > { %917 = vst [vmem:[#allocation2 + $0x18] sm:$0xff] %v901_v48  ;;  %v1411_v51 = vadd.f32 %v1410_v50, %v1409_v49  ;;  %v1412_v52 = vpop.f32.mrb[10].mxu0  ;;  %v1487_v53 = vpop.f32.mrb[8].mxu1  ;;  %v349_v49 = vld [vmem:[#allocation2 + $0x68] sm:$0xff] }
 0x141   : > { %v1413_v54 = vpop.f32.mrb[11].mxu0  ;;  %v867_v56 = vpop.f32.mrb[9].mxu1 }
 0x142   : > { %v1414_v57 = vadd.f32 %v1413_v54, %v1412_v52  ;;  %v852_v58 = vadd.f32 %v1411_v51, %v851_v40  ;;  %v1488_v59 = vpop.f32.mrb[10].mxu1 }
 0x143   : > { %v870_v61 = vpop.f32.mrb[11].mxu1 }
 0x144   : > { %v902_v62 = vadd.f32 %v852_v58, %v340_v55  ;;  %v855_v63 = vadd.f32 %v1414_v57, %v854_v45  ;;  %v350_v57 = vld [vmem:[#allocation2 + $0x70] sm:$0xff] }
 0x146   : > { %918 = vst [vmem:[#allocation2 + $0x20] sm:$0xff] %v902_v62  ;;  %v903_v0 = vadd.f32 %v855_v63, %v341_v60  ;;  %v1415_v1 = vpop.f32.mrb[12].mxu0 }
 0x147   : > { %v1416_v2 = vpop.f32.mrb[13].mxu0 }
 0x148   : > { %919 = vst [vmem:[#allocation2 + $0x28] sm:$0xff] %v903_v0  ;;  %v1417_v3 = vadd.f32 %v1416_v2, %v1415_v1  ;;  %v1418_v4 = vpop.f32.mrb[14].mxu0  ;;  %v1491_v5 = vpop.f32.mrb[12].mxu1  ;;  %v934_v1 = vld [vmem:[#allocation2] sm:$0xff] (!%p1295_p11)  ;;  %v935_v2 = vld [vmem:[#allocation2 + $0x8] sm:$0xff] (!%p1295_p11) }
 0x149   : > { %v1419_v7 = vpop.f32.mrb[15].mxu0  ;;  %v883_v8 = vpop.f32.mrb[13].mxu1 }
 0x14a   : > { %v860_v9 = vadd.f32 %v1483_v37, %v1417_v3  ;;  %v1420_v10 = vadd.f32 %v1419_v7, %v1418_v4  ;;  %v1492_v11 = vpop.f32.mrb[14].mxu1  ;;  %v347_v37 = vld [vmem:[#allocation2 + $0x58] sm:$0xff]  ;;  %v936_v3 = vld [vmem:[#allocation2 + $0x10] sm:$0xff] (!%p1295_p11)  ;;  %v1337_v4 = vpack.c.bf16 (!%p1295_p11), %v935_v2, %v934_v1  ;;  %v1051_v7 = vmul.f32 (!%p1295_p11), %v934_v1, %v934_v1 }
 0x14b   : > { %v886_v13 = vpop.f32.mrb[15].mxu1 }
 0x14c   : > { %v904_v14 = vadd.f32 %v860_v9, %v342_v6  ;;  %v863_v15 = vadd.f32 %v1484_v43, %v1420_v10  ;;  %v1030_v6 = vadd.f32 (!%p1295_p11), %v935_v2, %v934_v1  ;;  %v937_v9 = vld [vmem:[#allocation2 + $0x18] sm:$0xff] (!%p1295_p11)  ;;  %1338 = vst [vmem:[%s1869_s2] sm:$0xff] (!%p1295_p11), %v1337_v4  }
 0x14d   : > { %v938_v10 = vld [vmem:[#allocation2 + $0x20] sm:$0xff] (!%p1295_p11) }
 0x14e   : > { %920 = vst [vmem:[#allocation2 + $0x30] sm:$0xff] %v904_v14  ;;  %v905_v16 = vadd.f32 %v863_v15, %v343_v12  ;;  %v1421_v17 = vpop.f32.mrb[16].mxu0  ;;  %v1342_v12 = vpack.c.bf16 (!%p1295_p11), %v937_v9, %v936_v3 }
 0x14f   : > { %v1422_v18 = vpop.f32.mrb[17].mxu0 }
 0x150   : > { %921 = vst [vmem:[#allocation2 + $0x38] sm:$0xff] %v905_v16  ;;  %v1423_v19 = vadd.f32 %v1422_v18, %v1421_v17  ;;  %v1424_v20 = vpop.f32.mrb[18].mxu0  ;;  %v1031_v16 = vadd.f32 (!%p1295_p11), %v1030_v6, %v936_v3  ;;  %v1054_v17 = vmul.f32 (!%p1295_p11), %v937_v9, %v937_v9  ;;  %1374 = vst [vmem:[%s1869_s2 + $0x8] sm:$0xff] (!%p1295_p11), %v1342_v12  }
 0x151   : > { %v1425_v21 = vpop.f32.mrb[19].mxu0 }
 0x152   : > { %v1426_v23 = vadd.f32 %v1425_v21, %v1424_v20  ;;  %v868_v24 = vadd.f32 %v1423_v19, %v867_v56 }
 0x154   : > { %v906_v26 = vadd.f32 %v868_v24, %v344_v22  ;;  %v871_v27 = vadd.f32 %v1426_v23, %v870_v61  ;;  %v351_v61 = vld [vmem:[#allocation2 + $0x78] sm:$0xff]  ;;  %v1032_v24 = vadd.f32 (!%p1295_p11), %v1031_v16, %v937_v9 }
 0x156   : > { %922 = vst [vmem:[#allocation2 + $0x40] sm:$0xff] %v906_v26  ;;  %v907_v28 = vadd.f32 %v871_v27, %v345_v25  ;;  %v1427_v29 = vpop.f32.mrb[20].mxu0  ;;  %v1055_v26 = vmul.f32 (!%p1295_p11), %v938_v10, %v938_v10 }
 0x157   : > { %v1428_v30 = vpop.f32.mrb[21].mxu0  ;;  %v941_v18 = vld [vmem:[#allocation2 + $0x38] sm:$0xff] (!%p1295_p11) }
 0x158   : > { %923 = vst [vmem:[#allocation2 + $0x48] sm:$0xff] %v907_v28  ;;  %v1429_v31 = vadd.f32 %v1428_v30, %v1427_v29  ;;  %v1430_v32 = vpop.f32.mrb[22].mxu0 }
 0x159   : > { %v1431_v34 = vpop.f32.mrb[23].mxu0 }
 0x15a   : > { %v876_v35 = vadd.f32 %v1487_v53, %v1429_v31  ;;  %v1432_v36 = vadd.f32 %v1431_v34, %v1430_v32 }
 0x15c   : > { %v908_v38 = vadd.f32 %v876_v35, %v346_v33  ;;  %v879_v39 = vadd.f32 %v1488_v59, %v1432_v36  ;;  %v1033_v33 = vadd.f32 (!%p1295_p11), %v1032_v24, %v938_v10 }
 0x15d   : > { %v942_v19 = vld [vmem:[#allocation2 + $0x40] sm:$0xff] (!%p1295_p11) }
 0x15e   : > { %924 = vst [vmem:[#allocation2 + $0x50] sm:$0xff] %v908_v38  ;;  %v909_v40 = vadd.f32 %v879_v39, %v347_v37  ;;  %v1433_v41 = vpop.f32.mrb[24].mxu0 }
 0x15f   : > { %v1434_v42 = vpop.f32.mrb[25].mxu0  ;;  %v943_v20 = vld [vmem:[#allocation2 + $0x48] sm:$0xff] (!%p1295_p11) }
 0x160   : > { %925 = vst [vmem:[#allocation2 + $0x58] sm:$0xff] %v909_v40  ;;  %v1435_v43 = vadd.f32 %v1434_v42, %v1433_v41  ;;  %v1436_v44 = vpop.f32.mrb[26].mxu0  ;;  %v1357_v22 = vpack.c.bf16 (!%p1295_p11), %v943_v20, %v942_v19 }
 0x161   : > { %v1437_v45 = vpop.f32.mrb[27].mxu0 }
 0x162   : > { %v1438_v47 = vadd.f32 %v1437_v45, %v1436_v44  ;;  %v884_v48 = vadd.f32 %v1435_v43, %v883_v8  ;;  %v1052_v8 = vmul.f32 (!%p1295_p11), %v935_v2, %v935_v2  ;;  %1377 = vst [vmem:[%s1869_s2 + $0x20] sm:$0xff] (!%p1295_p11), %v1357_v22   ;;  %v1058_v43 = vmul.f32 (!%p1295_p11), %v941_v18, %v941_v18 }
 0x164   : > { %v910_v50 = vadd.f32 %v884_v48, %v348_v46  ;;  %v887_v51 = vadd.f32 %v1438_v47, %v886_v13  ;;  %v1053_v13 = vmul.f32 (!%p1295_p11), %v936_v3, %v936_v3  ;;  %v1067_v15 = vadd.f32 (!%p1295_p11), %v1052_v8, %v1051_v7 }
 0x165   : > { %v944_v23 = vld [vmem:[#allocation2 + $0x50] sm:$0xff] (!%p1295_p11)  ;;  %v1059_v46 = vmul.f32 (!%p1295_p11), %v942_v19, %v942_v19 }
 0x166   : > { %926 = vst [vmem:[#allocation2 + $0x60] sm:$0xff] %v910_v50  ;;  %v911_v52 = vadd.f32 %v887_v51, %v349_v49  ;;  %v1439_v53 = vpop.f32.mrb[28].mxu0  ;;  %v1068_v25 = vadd.f32 (!%p1295_p11), %v1067_v15, %v1053_v13  ;;  %v1060_v49 = vmul.f32 (!%p1295_p11), %v943_v20, %v943_v20 }
 0x167   : > { %v1440_v54 = vpop.f32.mrb[29].mxu0  ;;  %v945_v27 = vld [vmem:[#allocation2 + $0x58] sm:$0xff] (!%p1295_p11) }
 0x168   : > { %927 = vst [vmem:[#allocation2 + $0x68] sm:$0xff] %v911_v52  ;;  %v1441_v55 = vadd.f32 %v1440_v54, %v1439_v53  ;;  %v1442_v56 = vpop.f32.mrb[30].mxu0  ;;  %v1362_v30 = vpack.c.bf16 (!%p1295_p11), %v945_v27, %v944_v23  ;;  %v1069_v32 = vadd.f32 (!%p1295_p11), %v1068_v25, %v1054_v17  ;;  %v1061_v52 = vmul.f32 (!%p1295_p11), %v944_v23, %v944_v23 }
 0x169   : > { %v1443_v58 = vpop.f32.mrb[31].mxu0 }
 0x16a   : > { %v892_v59 = vadd.f32 %v1491_v5, %v1441_v55  ;;  %v1444_v60 = vadd.f32 %v1443_v58, %v1442_v56  ;;  %933 = sbr.rel (%p1295_p11) target bundleno = 402 (0x192), region = 62  ;;  %v939_v5 = vld [vmem:[#allocation2 + $0x28] sm:$0xff] (!%p1295_p11)  ;;  %1378 = vst [vmem:[%s1869_s2 + $0x28] sm:$0xff] (!%p1295_p11), %v1362_v30   ;;  %v1070_v39 = vadd.f32 (!%p1295_p11), %v1069_v32, %v1055_v26  ;;  %v1062_v55 = vmul.f32 (!%p1295_p11), %v945_v27, %v945_v27 }
 0x16b   : > { %v1347_v14 = vpack.c.bf16 (!%p1295_p11), %v939_v5, %v938_v10  ;;  %v1056_v34 = vmul.f32 (!%p1295_p11), %v939_v5, %v939_v5  ;;  %v1034_v38 = vadd.f32 (!%p1295_p11), %v1033_v33, %v939_v5 }
 0x16c   : > { %v912_v62 = vadd.f32 %v892_v59, %v350_v57  ;;  %v895_v63 = vadd.f32 %v1492_v11, %v1444_v60  ;;  %v940_v11 = vld [vmem:[#allocation2 + $0x30] sm:$0xff] (!%p1295_p11) }
 0x16d   : > { %1375 = vst [vmem:[%s1869_s2 + $0x10] sm:$0xff] (!%p1295_p11), %v1347_v14   ;;  %v1352_v21 = vpack.c.bf16 (!%p1295_p11), %v941_v18, %v940_v11  ;;  %v946_v28 = vld [vmem:[#allocation2 + $0x60] sm:$0xff] (!%p1295_p11)  ;;  %v1057_v40 = vmul.f32 (!%p1295_p11), %v940_v11, %v940_v11  ;;  %v1071_v41 = vadd.f32 (!%p1295_p11), %v1070_v39, %v1056_v34  ;;  %v1035_v42 = vadd.f32 (!%p1295_p11), %v1034_v38, %v940_v11 }
 0x16e   : > { %928 = vst [vmem:[#allocation2 + $0x70] sm:$0xff] %v912_v62  ;;  %v913_v0 = vadd.f32 %v895_v63, %v351_v61  ;;  %v1063_v58 = vmul.f32 (!%p1295_p11), %v946_v28, %v946_v28 }
 0x16f   : > { %v947_v29 = vld [vmem:[#allocation2 + $0x68] sm:$0xff] (!%p1295_p11)  ;;  %1376 = vst [vmem:[%s1869_s2 + $0x18] sm:$0xff] (!%p1295_p11), %v1352_v21   ;;  %v1036_v44 = vadd.f32 (!%p1295_p11), %v1035_v42, %v941_v18  ;;  %v1072_v45 = vadd.f32 (!%p1295_p11), %v1071_v41, %v1057_v40 }
 0x170   : > { %929 = vst [vmem:[#allocation2 + $0x78] sm:$0xff] %v913_v0  ;;  %v1367_v31 = vpack.c.bf16 (!%p1295_p11), %v947_v29, %v946_v28  ;;  %v1064_v61 = vmul.f32 (!%p1295_p11), %v947_v29, %v947_v29 }
 0x171   : > { %v1073_v47 = vadd.f32 %v1072_v45, %v1058_v43  ;;  %v1037_v48 = vadd.f32 %v1036_v44, %v942_v19 }
 0x172   : > { %1379 = vst [vmem:[%s1869_s2 + $0x30] sm:$0xff] %v1367_v31  }
 0x173   : > { %v1038_v50 = vadd.f32 %v1037_v48, %v943_v20  ;;  %v1074_v51 = vadd.f32 %v1073_v47, %v1059_v46 }
 0x175   : > { %v948_v35 = vld [vmem:[#allocation2 + $0x70] sm:$0xff]  ;;  %v1075_v53 = vadd.f32 %v1074_v51, %v1060_v49  ;;  %v1039_v54 = vadd.f32 %v1038_v50, %v944_v23 }
 0x176   : > { %v1065_v0 = vmul.f32 %v948_v35, %v948_v35 }
 0x177   : > { %v949_v36 = vld [vmem:[#allocation2 + $0x78] sm:$0xff]  ;;  %v1040_v56 = vadd.f32 %v1039_v54, %v945_v27  ;;  %v1076_v57 = vadd.f32 %v1075_v53, %v1061_v52 }
 0x178   : > { %v1372_v37 = vpack.c.bf16 %v949_v36, %v948_v35  ;;  %v1066_v3 = vmul.f32 %v949_v36, %v949_v36 }
 0x179   : > { %v1077_v59 = vadd.f32 %v1076_v57, %v1062_v55  ;;  %v1041_v60 = vadd.f32 %v1040_v56, %v946_v28 }
 0x17a   : > { %1380 = vst [vmem:[%s1869_s2 + $0x38] sm:$0xff] %v1372_v37  }
 0x17b   : > { %v1042_v62 = vadd.f32 %v1041_v60, %v947_v29  ;;  %v1078_v63 = vadd.f32 %v1077_v59, %v1063_v58 }
 0x17d   : > { %v1079_v1 = vadd.f32 %v1078_v63, %v1064_v61  ;;  %v1043_v2 = vadd.f32 %v1042_v62, %v948_v35 }
 0x17f   : > { %v1044_v4 = vadd.f32 %v1043_v2, %v949_v36  ;;  %v1080_v6 = vadd.f32 %v1079_v1, %v1065_v0 }
 0x181   : > { %v1045_v7 = vrot.slane %v1044_v4, 4  ;;  %v1081_v8 = vadd.f32 %v1080_v6, %v1066_v3 }
 0x183   : > { %v1046_v9 = vadd.f32 %v1045_v7, %v1044_v4  ;;  %v1082_v10 = vrot.slane %v1081_v8, 4 }
 0x185   : > { %v1047_v5 = vrot.slane %v1046_v9, 2  ;;  %v1083_v12 = vadd.f32 %v1082_v10, %v1081_v8 }
 0x187   : > { %v1048_v13 = vadd.f32 %v1047_v5, %v1046_v9  ;;  %v1084_v14 = vrot.slane %v1083_v12, 2 }
 0x189   : > { %v1049_v11 = vrot.slane %v1048_v13, 1  ;;  %v1085_v15 = vadd.f32 %v1084_v14, %v1083_v12 }
 0x18b   : > { %v1050_v16 = vadd.f32 %v1049_v11, %v1048_v13  ;;  %v1086_v17 = vrot.slane %v1085_v15, 1 }
 0x18d   : > { %v1087_v18 = vadd.f32 %v1086_v17, %v1085_v15 }
 0x18f   : > { %v1089_v19 = vsel %vm1088_vm0, %v1050_v16, %v1087_v18 }
 0x190   : > { %v1091_v20 = vsel %vm1090_vm1, %v1089_v19, 0.0 }
 0x191   : > { %1092 = vst [vmem:[%s1870_s3] sm:$0xff] %v1091_v20 }
 0x192 PF: > { %s14_s16 = sadd.s32 1, %s1630_s16   ;;  %s1871_s12 = smov %s1618_s13 }
 0x193   : > { %p11_p12 = scmp.ge.s32.totalorder %s14_s16, 5   ;;  %s1872_s13 = smov %s1688_s20 }
 0x194   : > { %s1873_s14 = smov %s1626_s15  ;;  %s1874_s15 = smov %s1876_s17 }
 0x195   :  { %13 = sbr.rel (!%p11_p12) target bundleno = 3 (0x3), region = 118 }

// kernel: resunet_fwd.65
= control target key start
LH: loop header
LB: loop body
LE: loop exit
PB: predicated region body
PF: predicated region fallthrough
CT: control target
= control target key end

     0   :  { %s541_s0 = inlined_call_operand.vmem [shape: bf16[128,128], index: 0, kind: input, shape index: {}]   ;;  %s542_s1 = inlined_call_operand.vmem [shape: f32[1,128], index: 1, kind: input, shape index: {}]   ;;  %s543_s2 = inlined_call_operand.vmem [shape: f32[1,128], index: 2, kind: input, shape index: {}]   ;;  %s544_s3 = inlined_call_operand.vmem [shape: bf16[128,128], index: 3, kind: input, shape index: {}]   ;;  %s545_s4 = inlined_call_operand.vmem [shape: bf16[128,128], index: 4, kind: output, shape index: {}]  }
   0x1   :  { %v278_v0 = vld [vmem:[%s541_s0] sm:$0xff]   ;;  %v381_v5 = vld [vmem:[%s541_s0 + $0x8] sm:$0xff]   ;;  %v382_v12 = vld [vmem:[%s541_s0 + $0x10] sm:$0xff]  }
   0x2   :  { %v433_v1 = vld [vmem:[%s542_s1] ss:$0 sm:$0xff]  ;;  %v279_v2 = vunpack.c.l.bf16 %v278_v0  ;;  %v280_v3 = vunpack.c.h.bf16 %v278_v0  ;;  %v388_v6 = vld [vmem:[%s544_s3 + $0x8] sm:$0xff]   ;;  %v283_v10 = vunpack.c.l.bf16 %v381_v5  ;;  %v284_v11 = vunpack.c.h.bf16 %v381_v5  ;;  %v389_v13 = vld [vmem:[%s544_s3 + $0x10] sm:$0xff]  }
   0x3   :  { %v310_v4 = vld [vmem:[%s544_s3] sm:$0xff]   ;;  %v315_v16 = vunpack.c.l.bf16 %v388_v6  ;;  %v316_v17 = vunpack.c.h.bf16 %v388_v6  ;;  %v287_v20 = vunpack.c.l.bf16 %v382_v12  ;;  %v288_v21 = vunpack.c.h.bf16 %v382_v12  ;;  %v383_v22 = vld [vmem:[%s541_s0 + $0x18] sm:$0xff]   ;;  %v385_v54 = vld [vmem:[%s541_s0 + $0x28] sm:$0xff]  }
   0x4   :  { %v447_v7 = vld [vmem:[%s543_s2] ss:$0 sm:$0xff]  ;;  %v311_v8 = vunpack.c.l.bf16 %v310_v4  ;;  %v312_v9 = vunpack.c.h.bf16 %v310_v4  ;;  %v56_v14 = vmul.f32 %v279_v2, %v433_v1  ;;  %v57_v15 = vmul.f32 %v280_v3, %v433_v1  ;;  %v390_v39 = vld [vmem:[%s544_s3 + $0x18] sm:$0xff]   ;;  %v392_v63 = vld [vmem:[%s544_s3 + $0x28] sm:$0xff]  }
   0x5   :  { %v58_v18 = vmul.f32 %v283_v10, %v433_v1  ;;  %v59_v19 = vmul.f32 %v284_v11, %v433_v1  ;;  %v319_v25 = vunpack.c.l.bf16 %v389_v13  ;;  %v320_v26 = vunpack.c.h.bf16 %v389_v13  ;;  %v384_v48 = vld [vmem:[%s541_s0 + $0x20] sm:$0xff]   ;;  %v386_v5 = vld [vmem:[%s541_s0 + $0x30] sm:$0xff]  }
   0x6   :  { %v79_v23 = vadd.f32 %v447_v7, %v56_v14  ;;  %v80_v24 = vadd.f32 %v447_v7, %v57_v15  ;;  %v60_v29 = vmul.f32 %v287_v20, %v433_v1  ;;  %v61_v30 = vmul.f32 %v288_v21, %v433_v1  ;;  %v391_v49 = vld [vmem:[%s544_s3 + $0x20] sm:$0xff]   ;;  %v393_v11 = vld [vmem:[%s544_s3 + $0x30] sm:$0xff]   ;;  %v387_v20 = vld [vmem:[%s541_s0 + $0x38] sm:$0xff]  }
   0x7   :  { %v81_v27 = vadd.f32 %v447_v7, %v58_v18  ;;  %v82_v28 = vadd.f32 %v447_v7, %v59_v19  ;;  %v291_v33 = vunpack.c.l.bf16 %v383_v22  ;;  %v292_v34 = vunpack.c.h.bf16 %v383_v22 }
   0x8   :  { %v127_v31 = vadd.f32 %v311_v8, %v79_v23  ;;  %v128_v32 = vadd.f32 %v312_v9, %v80_v24  ;;  %v83_v37 = vadd.f32 %v447_v7, %v60_v29  ;;  %v84_v38 = vadd.f32 %v447_v7, %v61_v30 }
   0x9   :  { %v129_v35 = vadd.f32 %v315_v16, %v81_v27  ;;  %v130_v36 = vadd.f32 %v316_v17, %v82_v28  ;;  %v62_v42 = vmul.f32 %v291_v33, %v433_v1  ;;  %v63_v43 = vmul.f32 %v292_v34, %v433_v1  ;;  %v394_v33 = vld [vmem:[%s544_s3 + $0x38] sm:$0xff]  }
   0xa   :  { %v143_v40 = vmax.f32 %v127_v31, 0.0  ;;  %v144_v41 = vmax.f32 %v128_v32, 0.0  ;;  %v131_v46 = vadd.f32 %v319_v25, %v83_v37  ;;  %v132_v47 = vadd.f32 %v320_v26, %v84_v38 }
   0xb   :  { %v145_v44 = vmax.f32 %v129_v35, 0.0  ;;  %v146_v45 = vmax.f32 %v130_v36, 0.0  ;;  %v85_v51 = vadd.f32 %v447_v7, %v62_v42  ;;  %v86_v52 = vadd.f32 %v447_v7, %v63_v43 }
   0xc   :  { %v344_v50 = vpack.c.bf16 %v144_v41, %v143_v40  ;;  %v323_v53 = vunpack.c.l.bf16 %v390_v39  ;;  %v147_v56 = vmax.f32 %v131_v46, 0.0  ;;  %v148_v57 = vmax.f32 %v132_v47, 0.0 }
   0xd   :  { %v349_v55 = vpack.c.bf16 %v146_v45, %v145_v44  ;;  %v324_v58 = vunpack.c.h.bf16 %v390_v39  ;;  %v295_v60 = vunpack.c.l.bf16 %v384_v48  ;;  %v296_v61 = vunpack.c.h.bf16 %v384_v48 }
   0xe   :  { %345 = vst [vmem:[%s545_s4] sm:$0xff] %v344_v50   ;;  %v133_v59 = vadd.f32 %v323_v53, %v85_v51  ;;  %v327_v62 = vunpack.c.l.bf16 %v391_v49  ;;  %v354_v0 = vpack.c.bf16 %v148_v57, %v147_v56  ;;  %v328_v3 = vunpack.c.h.bf16 %v391_v49 }
   0xf   :  { %395 = vst [vmem:[%s545_s4 + $0x8] sm:$0xff] %v349_v55   ;;  %v134_v2 = vadd.f32 %v324_v58, %v86_v52  ;;  %v299_v4 = vunpack.c.l.bf16 %v385_v54  ;;  %v64_v8 = vmul.f32 %v295_v60, %v433_v1  ;;  %v65_v9 = vmul.f32 %v296_v61, %v433_v1 }
  0x10   :  { %v149_v6 = vmax.f32 %v133_v59, 0.0  ;;  %v300_v10 = vunpack.c.h.bf16 %v385_v54  ;;  %396 = vst [vmem:[%s545_s4 + $0x10] sm:$0xff] %v354_v0   ;;  %v331_v14 = vunpack.c.l.bf16 %v392_v63  ;;  %v332_v15 = vunpack.c.h.bf16 %v392_v63 }
  0x11   :  { %v150_v12 = vmax.f32 %v134_v2, 0.0  ;;  %v66_v13 = vmul.f32 %v299_v4, %v433_v1  ;;  %v87_v16 = vadd.f32 %v447_v7, %v64_v8  ;;  %v88_v17 = vadd.f32 %v447_v7, %v65_v9 }
  0x12   :  { %v67_v18 = vmul.f32 %v300_v10, %v433_v1  ;;  %v303_v19 = vunpack.c.l.bf16 %v386_v5  ;;  %v304_v23 = vunpack.c.h.bf16 %v386_v5  ;;  %v335_v24 = vunpack.c.l.bf16 %v393_v11 }
  0x13   :  { %v359_v21 = vpack.c.bf16 %v150_v12, %v149_v6  ;;  %v89_v22 = vadd.f32 %v447_v7, %v66_v13  ;;  %v135_v25 = vadd.f32 %v327_v62, %v87_v16  ;;  %v136_v26 = vadd.f32 %v328_v3, %v88_v17 }
  0x14   :  { %v90_v27 = vadd.f32 %v447_v7, %v67_v18  ;;  %v68_v28 = vmul.f32 %v303_v19, %v433_v1  ;;  %v69_v30 = vmul.f32 %v304_v23, %v433_v1  ;;  %v336_v31 = vunpack.c.h.bf16 %v393_v11 }
  0x15   :  { %397 = vst [vmem:[%s545_s4 + $0x18] sm:$0xff] %v359_v21   ;;  %v137_v29 = vadd.f32 %v331_v14, %v89_v22  ;;  %v307_v32 = vunpack.c.l.bf16 %v387_v20  ;;  %v151_v34 = vmax.f32 %v135_v25, 0.0  ;;  %v152_v35 = vmax.f32 %v136_v26, 0.0 }
  0x16   :  { %v138_v36 = vadd.f32 %v332_v15, %v90_v27  ;;  %v91_v37 = vadd.f32 %v447_v7, %v68_v28  ;;  %v92_v39 = vadd.f32 %v447_v7, %v69_v30  ;;  %v308_v40 = vunpack.c.h.bf16 %v387_v20 }
  0x17   :  { %v153_v38 = vmax.f32 %v137_v29, 0.0  ;;  %v70_v41 = vmul.f32 %v307_v32, %v433_v1  ;;  %v364_v42 = vpack.c.bf16 %v152_v35, %v151_v34  ;;  %v339_v45 = vunpack.c.l.bf16 %v394_v33 }
  0x18   :  { %v154_v43 = vmax.f32 %v138_v36, 0.0  ;;  %v139_v44 = vadd.f32 %v335_v24, %v91_v37  ;;  %v140_v46 = vadd.f32 %v336_v31, %v92_v39  ;;  %v71_v47 = vmul.f32 %v308_v40, %v433_v1 }
  0x19   :  { %v93_v48 = vadd.f32 %v447_v7, %v70_v41  ;;  %v340_v49 = vunpack.c.h.bf16 %v394_v33  ;;  %398 = vst [vmem:[%s545_s4 + $0x20] sm:$0xff] %v364_v42  }
  0x1a   :  { %v369_v50 = vpack.c.bf16 %v154_v43, %v153_v38  ;;  %v155_v51 = vmax.f32 %v139_v44, 0.0  ;;  %v156_v52 = vmax.f32 %v140_v46, 0.0  ;;  %v94_v53 = vadd.f32 %v447_v7, %v71_v47 }
  0x1b   :  { %v141_v54 = vadd.f32 %v339_v45, %v93_v48 }
  0x1c   :  { %399 = vst [vmem:[%s545_s4 + $0x28] sm:$0xff] %v369_v50   ;;  %v374_v55 = vpack.c.bf16 %v156_v52, %v155_v51  ;;  %v142_v56 = vadd.f32 %v340_v49, %v94_v53 }
  0x1d   :  { %v157_v1 = vmax.f32 %v141_v54, 0.0 }
  0x1e   :  { %400 = vst [vmem:[%s545_s4 + $0x30] sm:$0xff] %v374_v55   ;;  %v158_v57 = vmax.f32 %v142_v56, 0.0 }
  0x20   :  { %v379_v58 = vpack.c.bf16 %v158_v57, %v157_v1 }
  0x22   :  { %401 = vst [vmem:[%s545_s4 + $0x38] sm:$0xff] %v379_v58  }

// kernel: resunet_fwd.67
= control target key start
LH: loop header
LB: loop body
LE: loop exit
PB: predicated region body
PF: predicated region fallthrough
CT: control target
= control target key end

     0   :  { %s136_s0 = inlined_call_operand.vmem [shape: bf16[32,128], index: 0, kind: input, shape index: {}]   ;;  %s137_s1 = inlined_call_operand.vmem [shape: f32[1,128], index: 1, kind: input, shape index: {}]   ;;  %s138_s2 = inlined_call_operand.vmem [shape: f32[1,128], index: 2, kind: input, shape index: {}]   ;;  %s139_s3 = inlined_call_operand.vmem [shape: bf16[32,128], index: 3, kind: output, shape index: {}]  }
   0x1   :  { %v79_v0 = vld [vmem:[%s136_s0] sm:$0xff]   ;;  %v96_v4 = vld [vmem:[%s136_s0 + $0x8] sm:$0xff]  }
   0x2   :  { %v68_v1 = vld [vmem:[%s137_s1] ss:$0 sm:$0xff]  ;;  %v80_v2 = vunpack.c.l.bf16 %v79_v0  ;;  %v81_v3 = vunpack.c.h.bf16 %v79_v0  ;;  %v84_v6 = vunpack.c.l.bf16 %v96_v4  ;;  %v85_v7 = vunpack.c.h.bf16 %v96_v4 }
   0x3   :  { %v69_v5 = vld [vmem:[%s138_s2] ss:$0 sm:$0xff] }
   0x4   :  { %v29_v8 = vmul.f32 %v80_v2, %v68_v1  ;;  %v30_v9 = vmul.f32 %v81_v3, %v68_v1  ;;  %v31_v10 = vmul.f32 %v84_v6, %v68_v1  ;;  %v32_v11 = vmul.f32 %v85_v7, %v68_v1 }
   0x6   :  { %v40_v12 = vadd.f32 %v69_v5, %v29_v8  ;;  %v41_v13 = vadd.f32 %v69_v5, %v30_v9  ;;  %v42_v14 = vadd.f32 %v69_v5, %v31_v10  ;;  %v43_v15 = vadd.f32 %v69_v5, %v32_v11 }
   0x8   :  { %v89_v16 = vpack.c.bf16 %v41_v13, %v40_v12  ;;  %v94_v17 = vpack.c.bf16 %v43_v15, %v42_v14 }
   0xa   :  { %90 = vst [vmem:[%s139_s3] sm:$0xff] %v89_v16   ;;  %97 = vst [vmem:[%s139_s3 + $0x8] sm:$0xff] %v94_v17  }

// kernel: resunet_fwd.66
= control target key start
LH: loop header
LB: loop body
LE: loop exit
PB: predicated region body
PF: predicated region fallthrough
CT: control target
= control target key end

     0   :  { %vm212_vm0 = vcmask 1040384   ;;  %vm214_vm1 = vcmask 1041408   ;;  %s353_s1 = inlined_call_operand.vmem [shape: bf16[128,128], index: 1, kind: input, shape index: {}]   ;;  %s354_s0 = inlined_call_operand.vmem [shape: bf16[32,128], index: 0, kind: input, shape index: {}]   ;;  %s355_s2 = inlined_call_operand.vmem [shape: bf16[32,128], index: 2, kind: output, shape index: {0}]   ;;  %s356_s3 = inlined_call_operand.vmem [shape: f32[8,128], index: 3, kind: output, shape index: {1}]  }
   0x1   :  { %v284_v0 = vld [vmem:[%s353_s1] sm:$0xff]   ;;  %v285_v1 = vld [vmem:[%s353_s1 + $0x8] sm:$0xff]   ;;  %v286_v2 = vld [vmem:[%s353_s1 + $0x10] sm:$0xff]  }
   0x2   :  { %264 = vmatprep.subr.bf16.mxu0 %v284_v0  ;;  %v287_v3 = vld [vmem:[%s353_s1 + $0x18] sm:$0xff]   ;;  %v292_v4 = vld [vmem:[%s354_s0] sm:$0xff]   ;;  %v289_v6 = vld [vmem:[%s353_s1 + $0x28] sm:$0xff]  }
   0x3   :  { %265 = vmatpush3.bf16.msra.mxu0 %v284_v0  ;;  %280 = vmatprep.mubr.bf16.mxu0 %v292_v4  ;;  %v288_v5 = vld [vmem:[%s353_s1 + $0x20] sm:$0xff]   ;;  %v290_v7 = vld [vmem:[%s353_s1 + $0x30] sm:$0xff]   ;;  %v291_v8 = vld [vmem:[%s353_s1 + $0x38] sm:$0xff]  }
   0x4   :  { %266 = vmatprep.subr.bf16.mxu0 %v285_v1  ;;  %v293_v9 = vld [vmem:[%s354_s0 + $0x8] sm:$0xff]  }
   0x7   :  { %267 = vmatpush3.bf16.msra.mxu0 %v285_v1 }
   0x8   :  { %268 = vmatprep.subr.bf16.mxu0 %v286_v2 }
   0xb   :  { %269 = vmatpush3.bf16.msra.mxu0 %v286_v2 }
   0xc   :  { %270 = vmatprep.subr.bf16.mxu0 %v287_v3 }
   0xf   :  { %271 = vmatpush3.bf16.msra.mxu0 %v287_v3 }
  0x10   :  { %272 = vmatprep.subr.bf16.mxu0 %v288_v5 }
  0x13   :  { %273 = vmatpush3.bf16.msra.mxu0 %v288_v5 }
  0x14   :  { %274 = vmatprep.subr.bf16.mxu0 %v289_v6 }
  0x17   :  { %275 = vmatpush3.bf16.msra.mxu0 %v289_v6 }
  0x18   :  { %276 = vmatprep.subr.bf16.mxu0 %v290_v7 }
  0x1b   :  { %277 = vmatpush3.bf16.msra.mxu0 %v290_v7 }
  0x1c   :  { %278 = vmatprep.subr.bf16.mxu0 %v291_v8 }
  0x1f   :  { %279 = vmatpush3.bf16.msra.mxu0 %v291_v8 }
  0x22   :  { %281 = vmatmul.mubr.bf16.vlgmr.msra.gmra.mrb[0].mxu0 %v293_v9 }
  0xf5   :  { %v282_v10 = vpop.f32.mrb[0].mxu0 }
  0xf6   :  { %v140_v11 = vpop.f32.mrb[1].mxu0  ;;  %v201_v19 = vmul.f32 %v282_v10, %v282_v10 }
  0xf7   :  { %v283_v12 = vpop.f32.mrb[2].mxu0  ;;  %v199_v15 = vmul.f32 %v140_v11, %v140_v11 }
  0xf8   :  { %v251_v13 = vpack.c.bf16 %v283_v12, %v282_v10  ;;  %v143_v14 = vpop.f32.mrb[3].mxu0  ;;  %v202_v22 = vmul.f32 %v283_v12, %v283_v12 }
  0xf9   :  { %v246_v16 = vpack.c.bf16 %v143_v14, %v140_v11  ;;  %v190_v17 = vadd.f32 %v143_v14, %v140_v11  ;;  %v200_v18 = vmul.f32 %v143_v14, %v143_v14 }
  0xfa   :  { %253 = vst [vmem:[%s355_s2 + $0x8] sm:$0xff] %v251_v13  }
  0xfb   :  { %247 = vst [vmem:[%s355_s2] sm:$0xff] %v246_v16   ;;  %v191_v20 = vadd.f32 %v282_v10, %v190_v17  ;;  %v203_v21 = vadd.f32 %v200_v18, %v199_v15 }
  0xfd   :  { %v192_v23 = vadd.f32 %v283_v12, %v191_v20  ;;  %v204_v24 = vadd.f32 %v203_v21, %v201_v19 }
  0xff   :  { %v193_v25 = vrot.slane %v192_v23, 4  ;;  %v205_v26 = vadd.f32 %v204_v24, %v202_v22 }
 0x101   :  { %v194_v27 = vadd.f32 %v193_v25, %v192_v23  ;;  %v206_v28 = vrot.slane %v205_v26, 4 }
 0x103   :  { %v195_v29 = vrot.slane %v194_v27, 2  ;;  %v207_v30 = vadd.f32 %v206_v28, %v205_v26 }
 0x105   :  { %v196_v31 = vadd.f32 %v195_v29, %v194_v27  ;;  %v208_v32 = vrot.slane %v207_v30, 2 }
 0x107   :  { %v197_v33 = vrot.slane %v196_v31, 1  ;;  %v209_v34 = vadd.f32 %v208_v32, %v207_v30 }
 0x109   :  { %v210_v35 = vrot.slane %v209_v34, 1  ;;  %v198_v36 = vadd.f32 %v197_v33, %v196_v31 }
 0x10b   :  { %v211_v37 = vadd.f32 %v210_v35, %v209_v34 }
 0x10d   :  { %v213_v38 = vsel %vm212_vm0, %v198_v36, %v211_v37 }
 0x10e   :  { %v215_v39 = vsel %vm214_vm1, %v213_v38, 0.0 }
 0x10f   :  { %216 = vst [vmem:[%s356_s3] sm:$0xff] %v215_v39 }

// kernel: resunet_fwd.69
= control target key start
LH: loop header
LB: loop body
LE: loop exit
PB: predicated region body
PF: predicated region fallthrough
CT: control target
= control target key end

     0   :  { %s140_s0 = inlined_call_operand.vmem [shape: bf16[32,128], index: 0, kind: input, shape index: {}]   ;;  %s141_s1 = inlined_call_operand.vmem [shape: f32[1,128], index: 1, kind: input, shape index: {}]   ;;  %s142_s2 = inlined_call_operand.vmem [shape: f32[1,128], index: 2, kind: input, shape index: {}]   ;;  %s143_s3 = inlined_call_operand.vmem [shape: bf16[32,128], index: 3, kind: output, shape index: {}]  }
   0x1   :  { %v83_v0 = vld [vmem:[%s140_s0] sm:$0xff]   ;;  %v100_v4 = vld [vmem:[%s140_s0 + $0x8] sm:$0xff]  }
   0x2   :  { %v72_v1 = vld [vmem:[%s141_s1] ss:$0 sm:$0xff]  ;;  %v84_v2 = vunpack.c.l.bf16 %v83_v0  ;;  %v85_v3 = vunpack.c.h.bf16 %v83_v0  ;;  %v88_v6 = vunpack.c.l.bf16 %v100_v4  ;;  %v89_v7 = vunpack.c.h.bf16 %v100_v4 }
   0x3   :  { %v73_v5 = vld [vmem:[%s142_s2] ss:$0 sm:$0xff] }
   0x4   :  { %v29_v8 = vmul.f32 %v84_v2, %v72_v1  ;;  %v30_v9 = vmul.f32 %v85_v3, %v72_v1  ;;  %v31_v10 = vmul.f32 %v88_v6, %v72_v1  ;;  %v32_v11 = vmul.f32 %v89_v7, %v72_v1 }
   0x6   :  { %v40_v12 = vadd.f32 %v73_v5, %v29_v8  ;;  %v41_v13 = vadd.f32 %v73_v5, %v30_v9  ;;  %v42_v14 = vadd.f32 %v73_v5, %v31_v10  ;;  %v43_v15 = vadd.f32 %v73_v5, %v32_v11 }
   0x8   :  { %v44_v16 = vmax.f32 %v40_v12, 0.0  ;;  %v45_v17 = vmax.f32 %v41_v13, 0.0  ;;  %v46_v18 = vmax.f32 %v42_v14, 0.0  ;;  %v47_v19 = vmax.f32 %v43_v15, 0.0 }
   0xa   :  { %v93_v20 = vpack.c.bf16 %v45_v17, %v44_v16  ;;  %v98_v21 = vpack.c.bf16 %v47_v19, %v46_v18 }
   0xc   :  { %94 = vst [vmem:[%s143_s3] sm:$0xff] %v93_v20   ;;  %101 = vst [vmem:[%s143_s3 + $0x8] sm:$0xff] %v98_v21  }

// kernel: resunet_fwd.68
= control target key start
LH: loop header
LB: loop body
LE: loop exit
PB: predicated region body
PF: predicated region fallthrough
CT: control target
= control target key end

     0   :  { %s1053_s12 = smov 0   ;;  %s1055_s13 = smov 0   ;;  %s1163_s0 = inlined_call_operand.vmem [shape: bf16[32,1152], index: 0, kind: input, shape index: {}]   ;;  %s1164_s1 = inlined_call_operand.vmem [shape: bf16[1152,128], index: 1, kind: input, shape index: {}]   ;;  %s1165_s2 = inlined_call_operand.vmem [shape: bf16[32,128], index: 2, kind: output, shape index: {0}]   ;;  %s1166_s3 = inlined_call_operand.vmem [shape: f32[8,128], index: 3, kind: output, shape index: {1}]  }
   0x1   :  { %s1057_s14 = smov 0   ;;  %s1059_s15 = smov 0  }
   0x2   :  { %s1061_s16 = smov 0  }
   0x3 LB: > { %s23_s17 = sadd.s32 1, %s1026_s15  ;;  %p42_p1 = scmp.ne.s32.totalorder %s1018_s13, %s1014_s12  ;;  %s1030_s16 = sphi %s1061_s16, %s14_s16   ;;  %s1026_s15 = sphi %s1059_s15, %s1170_s15   ;;  %s1022_s14 = sphi %s1057_s14, %s1169_s14   ;;  %s1018_s13 = sphi %s1055_s13, %s1168_s13   ;;  %s1014_s12 = sphi %s1053_s12, %s1167_s12  }
   0x4   : > { %p24_p0 = scmp.ge.s32.totalorder %s23_s17, 3  ;;  %p43_p2 = scmp.eq.s32.totalorder %s1030_s16, 0 }
   0x5   : > { %s35_s19 = sadd.s32 1, %s1018_s13  ;;  %p790_p5 = scmp.ge.s32.totalorder %s1030_s16, 3 }
   0x6   : > { %s1172_s17 = smov (%p24_p0, %s23_s17), 0  ;;  %p44_p3 = por %p43_p2, %p42_p1 }
   0x7   : > { %s31_s18 = ssub.s32 %s1026_s15, %s1172_s17  ;;  %146 = sbr.rel (%p790_p5) target bundleno = 23 (0x17), region = 16 }
   0x8   : > { %p33_p4 = scmp.eq.s32.totalorder %s31_s18, 0 }
   0xa   : > { %s1088_s20 = scalar_select %p33_p4, %s1018_s13, %s35_s19  }
   0xe   : > { %149 = sbr.rel (!%p44_p3) target bundleno = 23 (0x17), region = 20  ;;  %s151_s21 = sand.u32 (%p44_p3), 1, %s1018_s13  }
   0xf   : > { %s843_s22 = smul.u32 (%p44_p3), 12, %s1026_s15 }
  0x10   : > { %s917_s23 = smul.u32 (%p44_p3), 48, %s151_s21 }
  0x11   : > { %s159_s26 = scalar_lea.vmem (%p44_p3), %s1163_s0, %s843_s22 }
  0x12   : > { %v174_v0 = vld [vmem:[%s159_s26] sm:$0xff] (%p44_p3)  ;;  %v178_v2 = vld [vmem:[%s159_s26 + $0x48] sm:$0xff] (%p44_p3)  ;;  %s153_s27 = scalar_lea.vmem (%p44_p3), [#allocation3], %s917_s23  ;;  %v796_v6 = vld [vmem:[%s159_s26 + $0x50] sm:$0xf] (%p44_p3) }
  0x13   : > { %v176_v1 = vld [vmem:[%s159_s26 + $0x24] sm:$0xff] (%p44_p3)  ;;  %175 = vst [vmem:[%s153_s27] sm:$0xff] (%p44_p3), %v174_v0  ;;  %179 = vst [vmem:[%s153_s27 + $0x18] sm:$0xff] (%p44_p3), %v178_v2  ;;  %v180_v3 = vld [vmem:[%s159_s26 + $0x6c] sm:$0xff] (%p44_p3) }
  0x14   : > { %177 = vst [vmem:[%s153_s27 + $0xc] sm:$0xff] (%p44_p3), %v176_v1  ;;  %v792_v4 = vld [vmem:[%s159_s26 + $0x8] sm:$0xf] (%p44_p3)  ;;  %v794_v5 = vld [vmem:[%s159_s26 + $0x2c] sm:$0xf] (%p44_p3)  ;;  %181 = vst [vmem:[%s153_s27 + $0x24] sm:$0xff] (%p44_p3), %v180_v3 }
  0x15   : > { %793 = vst [vmem:[%s153_s27 + $0x8] sm:$0xf] %v792_v4  ;;  %795 = vst [vmem:[%s153_s27 + $0x14] sm:$0xf] %v794_v5  ;;  %v798_v7 = vld [vmem:[%s159_s26 + $0x74] sm:$0xf] }
  0x16   : > { %797 = vst [vmem:[%s153_s27 + $0x20] sm:$0xf] %v796_v6  ;;  %799 = vst [vmem:[%s153_s27 + $0x2c] sm:$0xf] %v798_v7 }
  0x17 PF: > { %p800_p6 = scmp.ge.s32.totalorder %s1030_s16, 1  ;;  %p210_p7 = scmp.lt.s32.totalorder %s1030_s16, 4 }
  0x19   : > { %p211_p8 = pnand %p800_p6, %p210_p7 }
  0x1a   : > { %s217_s28 = sand.u32 (!%p211_p8), 1, %s1014_s12   ;;  %s251_s29 = smul.u32 (!%p211_p8), 48, %s1022_s14 }
  0x1b   : > { %214 = sbr.rel (%p211_p8) target bundleno = 330 (0x14a), region = 50  ;;  %p802_p10 = scmp.ne.s32.totalorder (!%p211_p8), %s1022_s14, 0 }
  0x1c   : > { %s918_s30 = smul.u32 (!%p211_p8), 48, %s217_s28  ;;  %p252_p9 = scmp.lt.s32.totalorder (!%p211_p8), %s251_s29, 143 }
  0x1e   : > { %s1105_s8 = scalar_lea.vmem (!%p211_p8), [#allocation3], %s918_s30 }
  0x22   : > { %s1174_s29 = smov (!%p252_p9, %s251_s29), 143  ;;  %271 = sbr.rel (%p802_p10) target bundleno = 41 (0x29), region = 58 }
  0x23   : > { %s801_s4 = sshll.u32 %s1174_s29, 2  ;;  %v1032_v8 = vmov (!%p802_p10), 0.0  }
  0x24   : > { %s1103_s7 = scalar_lea.vmem %s1164_s1, %s801_s4  ;;  %272 = vst [vmem:[#allocation2] sm:$0xff] (!%p802_p10), %v1032_v8  ;;  %273 = vst [vmem:[#allocation2 + $0x8] sm:$0xff] (!%p802_p10), %v1032_v8 }
  0x25   : > { %274 = vst [vmem:[#allocation2 + $0x10] sm:$0xff] (!%p802_p10), %v1032_v8  ;;  %275 = vst [vmem:[#allocation2 + $0x18] sm:$0xff] (!%p802_p10), %v1032_v8 }
  0x29 PF: > { %v960_v9 = vld [vmem:[%s1103_s7 + $0x40] sm:$0xff]   ;;  %v963_v12 = vld [vmem:[%s1103_s7 + $0x48] sm:$0xff]   ;;  %v966_v15 = vld [vmem:[%s1103_s7 + $0x50] sm:$0xff]   ;;  %p833_p11 = scmp.ne.s32.totalorder %s1022_s14, 2 }
  0x2a   : > { %v961_v10 = vld [vmem:[%s1103_s7] sm:$0xff]   ;;  %859 = vmatprep.subr.bf16.mxu0 %v960_v9  ;;  %v964_v13 = vld [vmem:[%s1103_s7 + $0x8] sm:$0xff]   ;;  %v967_v16 = vld [vmem:[%s1103_s7 + $0x10] sm:$0xff]   ;;  %vm668_vm0 = vcmask (!%p833_p11), 1040384   ;;  %vm670_vm1 = vcmask (!%p833_p11), 1041408  }
  0x2b   : > { %v962_v11 = vld [vmem:[%s1103_s7 + $0x80] sm:$0xff]   ;;  %860 = vmatpush3.bf16.msra.mxu0 %v961_v10  ;;  %v965_v14 = vld [vmem:[%s1103_s7 + $0x88] sm:$0xff]   ;;  %v968_v17 = vld [vmem:[%s1103_s7 + $0x90] sm:$0xff]  }
  0x2c   : > { %897 = vmatprep.subr.bf16.mxu1 %v962_v11  ;;  %861 = vmatprep.subr.bf16.mxu0 %v963_v12  ;;  %v969_v18 = vld [vmem:[%s1103_s7 + $0x58] sm:$0xff]   ;;  %v972_v21 = vld [vmem:[%s1103_s7 + $0x60] sm:$0xff]   ;;  %v975_v24 = vld [vmem:[%s1103_s7 + $0x68] sm:$0xff]  }
  0x2d   : > { %898 = vmatpush3.bf16.msra.mxu1 %v962_v11  ;;  %v970_v19 = vld [vmem:[%s1103_s7 + $0x18] sm:$0xff]   ;;  %v974_v22 = vld [vmem:[%s1103_s7 + $0xa0] sm:$0xff]   ;;  %v977_v25 = vld [vmem:[%s1103_s7 + $0xa8] sm:$0xff]  }
  0x2e   : > { %899 = vmatprep.subr.bf16.mxu1 %v965_v14  ;;  %v971_v20 = vld [vmem:[%s1103_s7 + $0x98] sm:$0xff]   ;;  %v973_v23 = vld [vmem:[%s1103_s7 + $0x20] sm:$0xff]   ;;  %v976_v26 = vld [vmem:[%s1103_s7 + $0x28] sm:$0xff]  }
  0x2f   : > { %862 = vmatpush3.bf16.msra.mxu0 %v964_v13  ;;  %v978_v27 = vld [vmem:[%s1103_s7 + $0x70] sm:$0xff]   ;;  %v981_v30 = vld [vmem:[%s1103_s7 + $0x78] sm:$0xff]   ;;  %v276_v45 = vld [vmem:[#allocation2] sm:$0xff] }
  0x30   : > { %863 = vmatprep.subr.bf16.mxu0 %v966_v15  ;;  %v979_v28 = vld [vmem:[%s1103_s7 + $0x30] sm:$0xff]   ;;  %v983_v31 = vld [vmem:[%s1103_s7 + $0xb8] sm:$0xff]   ;;  %v277_v50 = vld [vmem:[#allocation2 + $0x8] sm:$0xff] }
  0x31   : > { %900 = vmatpush3.bf16.msra.mxu1 %v965_v14  ;;  %v980_v29 = vld [vmem:[%s1103_s7 + $0xb0] sm:$0xff]   ;;  %v982_v34 = vld [vmem:[%s1103_s7 + $0x38] sm:$0xff]  }
  0x32   : > { %901 = vmatprep.subr.bf16.mxu1 %v968_v17  ;;  %v986_v32 = vld [vmem:[%s1105_s8 + $0x4] ss:$12 sps:$4 sm:$0xff]   ;;  %v987_v33 = vld [vmem:[%s1105_s8 + $0x8] ss:$12 sps:$4 sm:$0xff]   ;;  %v984_v35 = vld [vmem:[%s1105_s8] ss:$12 sps:$4 sm:$0xff]  }
  0x33   : > { %864 = vmatpush3.bf16.msra.mxu0 %v967_v16  ;;  %544 = vmatprep.mubr.bf16.mxu0 %v986_v32  ;;  %v989_v36 = vld [vmem:[%s1105_s8 + $0x1c] ss:$12 sps:$4 sm:$0xff]   ;;  %v988_v37 = vld [vmem:[%s1105_s8 + $0x20] ss:$12 sps:$4 sm:$0xff]   ;;  %v991_v38 = vld [vmem:[%s1105_s8 + $0x18] ss:$12 sps:$4 sm:$0xff]  }
  0x34   : > { %865 = vmatprep.subr.bf16.mxu0 %v969_v18  ;;  %913 = vmatprep.mubr.bf16.mxu1 %v987_v33  ;;  %v278_v59 = vld [vmem:[#allocation2 + $0x10] sm:$0xff]  ;;  %v279_v63 = vld [vmem:[#allocation2 + $0x18] sm:$0xff] }
  0x35   : > { %902 = vmatpush3.bf16.msra.mxu1 %v968_v17 }
  0x36   : > { %903 = vmatprep.subr.bf16.mxu1 %v971_v20 }
  0x37   : > { %866 = vmatpush3.bf16.msra.mxu0 %v970_v19 }
  0x38   : > { %867 = vmatprep.subr.bf16.mxu0 %v972_v21 }
  0x39   : > { %904 = vmatpush3.bf16.msra.mxu1 %v971_v20 }
  0x3a   : > { %905 = vmatprep.subr.bf16.mxu1 %v974_v22 }
  0x3b   : > { %868 = vmatpush3.bf16.msra.mxu0 %v973_v23 }
  0x3c   : > { %869 = vmatprep.subr.bf16.mxu0 %v975_v24 }
  0x3d   : > { %906 = vmatpush3.bf16.msra.mxu1 %v974_v22 }
  0x3e   : > { %907 = vmatprep.subr.bf16.mxu1 %v977_v25 }
  0x3f   : > { %870 = vmatpush3.bf16.msra.mxu0 %v976_v26 }
  0x40   : > { %871 = vmatprep.subr.bf16.mxu0 %v978_v27 }
  0x41   : > { %908 = vmatpush3.bf16.msra.mxu1 %v977_v25 }
  0x42   : > { %909 = vmatprep.subr.bf16.mxu1 %v980_v29 }
  0x43   : > { %872 = vmatpush3.bf16.msra.mxu0 %v979_v28 }
  0x44   : > { %873 = vmatprep.subr.bf16.mxu0 %v981_v30 }
  0x45   : > { %910 = vmatpush3.bf16.msra.mxu1 %v980_v29 }
  0x46   : > { %911 = vmatprep.subr.bf16.mxu1 %v983_v31 }
  0x47   : > { %874 = vmatpush3.bf16.msra.mxu0 %v982_v34 }
  0x49   : > { %912 = vmatpush3.bf16.msra.mxu1 %v983_v31 }
  0x4a   : > { %545 = vmatmul.mubr.bf16.vlgmr.msra.gmra.mrb[0].mxu0 %v984_v35 }
  0x4b   : > { %552 = vmatprep.mubr.bf16.mxu0 %v989_v36 }
  0x4c   : > { %914 = vmatmul.mubr.bf16.vlgmr.msra.gmra.mrb[0].mxu1 %v988_v37 }
  0x52   : > { %553 = vmatmul.mubr.bf16.gmra.mrb[4].mxu0 %v991_v38 }
 0x11d   : > { %v875_v39 = vpop.f32.mrb[0].mxu0 }
 0x11e   : > { %v876_v40 = vpop.f32.mrb[1].mxu0 }
 0x11f   : > { %v877_v41 = vadd.f32 %v876_v40, %v875_v39  ;;  %v878_v42 = vpop.f32.mrb[2].mxu0  ;;  %v915_v43 = vpop.f32.mrb[0].mxu1 }
 0x120   : > { %v879_v44 = vpop.f32.mrb[3].mxu0  ;;  %v595_v46 = vpop.f32.mrb[1].mxu1 }
 0x121   : > { %v880_v47 = vadd.f32 %v879_v44, %v878_v42  ;;  %v596_v48 = vadd.f32 %v877_v41, %v595_v46  ;;  %v916_v49 = vpop.f32.mrb[2].mxu1 }
 0x122   : > { %v598_v51 = vpop.f32.mrb[3].mxu1 }
 0x123   : > { %v610_v52 = vadd.f32 %v596_v48, %v276_v45  ;;  %v599_v53 = vadd.f32 %v880_v47, %v598_v51 }
 0x125   : > { %614 = vst [vmem:[#allocation2] sm:$0xff] %v610_v52  ;;  %v611_v54 = vadd.f32 %v599_v53, %v277_v50  ;;  %v881_v55 = vpop.f32.mrb[4].mxu0 }
 0x126   : > { %v882_v56 = vpop.f32.mrb[5].mxu0 }
 0x127   : > { %615 = vst [vmem:[#allocation2 + $0x8] sm:$0xff] %v611_v54  ;;  %v883_v57 = vadd.f32 %v882_v56, %v881_v55  ;;  %v884_v58 = vpop.f32.mrb[6].mxu0 }
 0x128   : > { %v885_v60 = vpop.f32.mrb[7].mxu0 }
 0x129   : > { %v604_v61 = vadd.f32 %v915_v43, %v883_v57  ;;  %v886_v62 = vadd.f32 %v885_v60, %v884_v58  ;;  %621 = sbr.rel (%p833_p11) target bundleno = 330 (0x14a), region = 62 }
 0x12b   : > { %v612_v0 = vadd.f32 %v604_v61, %v278_v59  ;;  %v607_v1 = vadd.f32 %v916_v49, %v886_v62 }
 0x12c   : > { %v622_v3 = vld [vmem:[#allocation2] sm:$0xff] (!%p833_p11) }
 0x12d   : > { %616 = vst [vmem:[#allocation2 + $0x10] sm:$0xff] %v612_v0  ;;  %v613_v2 = vadd.f32 %v607_v1, %v279_v63  ;;  %v655_v8 = vmul.f32 (!%p833_p11), %v622_v3, %v622_v3 }
 0x12e   : > { %v623_v4 = vld [vmem:[#allocation2 + $0x8] sm:$0xff] (!%p833_p11) }
 0x12f   : > { %617 = vst [vmem:[#allocation2 + $0x18] sm:$0xff] %v613_v2  ;;  %v851_v6 = vpack.c.bf16 (!%p833_p11), %v623_v4, %v622_v3  ;;  %v646_v7 = vadd.f32 (!%p833_p11), %v623_v4, %v622_v3  ;;  %v656_v9 = vmul.f32 (!%p833_p11), %v623_v4, %v623_v4 }
 0x131   : > { %852 = vst [vmem:[%s1165_s2] sm:$0xff] %v851_v6   ;;  %v659_v13 = vadd.f32 %v656_v9, %v655_v8 }
 0x134   : > { %v624_v5 = vld [vmem:[#allocation2 + $0x10] sm:$0xff] }
 0x135   : > { %v657_v12 = vmul.f32 %v624_v5, %v624_v5  ;;  %v647_v14 = vadd.f32 %v646_v7, %v624_v5 }
 0x136   : > { %v625_v10 = vld [vmem:[#allocation2 + $0x18] sm:$0xff] }
 0x137   : > { %v856_v11 = vpack.c.bf16 %v625_v10, %v624_v5  ;;  %v658_v15 = vmul.f32 %v625_v10, %v625_v10  ;;  %v648_v16 = vadd.f32 %v647_v14, %v625_v10  ;;  %v660_v17 = vadd.f32 %v659_v13, %v657_v12 }
 0x139   : > { %858 = vst [vmem:[%s1165_s2 + $0x8] sm:$0xff] %v856_v11   ;;  %v649_v18 = vrot.slane %v648_v16, 4  ;;  %v661_v19 = vadd.f32 %v660_v17, %v658_v15 }
 0x13b   : > { %v650_v20 = vadd.f32 %v649_v18, %v648_v16  ;;  %v662_v21 = vrot.slane %v661_v19, 4 }
 0x13d   : > { %v651_v22 = vrot.slane %v650_v20, 2  ;;  %v663_v23 = vadd.f32 %v662_v21, %v661_v19 }
 0x13f   : > { %v652_v24 = vadd.f32 %v651_v22, %v650_v20  ;;  %v664_v25 = vrot.slane %v663_v23, 2 }
 0x141   : > { %v653_v26 = vrot.slane %v652_v24, 1  ;;  %v665_v27 = vadd.f32 %v664_v25, %v663_v23 }
 0x143   : > { %v654_v28 = vadd.f32 %v653_v26, %v652_v24  ;;  %v666_v29 = vrot.slane %v665_v27, 1 }
 0x145   : > { %v667_v30 = vadd.f32 %v666_v29, %v665_v27 }
 0x147   : > { %v669_v31 = vsel %vm668_vm0, %v654_v28, %v667_v30 }
 0x148   : > { %v671_v32 = vsel %vm670_vm1, %v669_v31, 0.0 }
 0x149   : > { %672 = vst [vmem:[%s1166_s3] sm:$0xff] %v671_v32 }
 0x14a PF: > { %s14_s16 = sadd.s32 1, %s1030_s16   ;;  %s1167_s12 = smov %s1018_s13 }
 0x14b   : > { %p11_p12 = scmp.ge.s32.totalorder %s14_s16, 5   ;;  %s1168_s13 = smov %s1088_s20 }
 0x14c   : > { %s1169_s14 = smov %s1026_s15  ;;  %s1170_s15 = smov %s1172_s17 }
 0x14d   :  { %13 = sbr.rel (!%p11_p12) target bundleno = 3 (0x3), region = 118 }

// kernel: resunet_fwd.71
= control target key start
LH: loop header
LB: loop body
LE: loop exit
PB: predicated region body
PF: predicated region fallthrough
CT: control target
= control target key end

     0   :  { %s175_s0 = inlined_call_operand.vmem [shape: bf16[32,128], index: 0, kind: input, shape index: {}]   ;;  %s176_s1 = inlined_call_operand.vmem [shape: f32[1,128], index: 1, kind: input, shape index: {}]   ;;  %s177_s2 = inlined_call_operand.vmem [shape: f32[1,128], index: 2, kind: input, shape index: {}]   ;;  %s178_s3 = inlined_call_operand.vmem [shape: bf16[32,128], index: 3, kind: input, shape index: {}]   ;;  %s179_s4 = inlined_call_operand.vmem [shape: bf16[32,128], index: 4, kind: output, shape index: {}]  }
   0x1   :  { %v98_v0 = vld [vmem:[%s175_s0] sm:$0xff]   ;;  %v123_v5 = vld [vmem:[%s175_s0 + $0x8] sm:$0xff]  }
   0x2   :  { %v87_v1 = vld [vmem:[%s176_s1] ss:$0 sm:$0xff]  ;;  %v99_v2 = vunpack.c.l.bf16 %v98_v0  ;;  %v100_v3 = vunpack.c.h.bf16 %v98_v0  ;;  %v124_v6 = vld [vmem:[%s178_s3 + $0x8] sm:$0xff]   ;;  %v103_v8 = vunpack.c.l.bf16 %v123_v5  ;;  %v104_v9 = vunpack.c.h.bf16 %v123_v5 }
   0x3   :  { %v106_v4 = vld [vmem:[%s178_s3] sm:$0xff]   ;;  %v111_v16 = vunpack.c.l.bf16 %v124_v6  ;;  %v112_v17 = vunpack.c.h.bf16 %v124_v6 }
   0x4   :  { %v88_v7 = vld [vmem:[%s177_s2] ss:$0 sm:$0xff]  ;;  %v32_v10 = vmul.f32 %v99_v2, %v87_v1  ;;  %v33_v11 = vmul.f32 %v100_v3, %v87_v1  ;;  %v107_v12 = vunpack.c.l.bf16 %v106_v4  ;;  %v108_v13 = vunpack.c.h.bf16 %v106_v4 }
   0x5   :  { %v34_v14 = vmul.f32 %v103_v8, %v87_v1  ;;  %v35_v15 = vmul.f32 %v104_v9, %v87_v1 }
   0x6   :  { %v43_v18 = vadd.f32 %v88_v7, %v32_v10  ;;  %v44_v19 = vadd.f32 %v88_v7, %v33_v11 }
   0x7   :  { %v45_v20 = vadd.f32 %v88_v7, %v34_v14  ;;  %v46_v21 = vadd.f32 %v88_v7, %v35_v15 }
   0x8   :  { %v55_v22 = vadd.f32 %v107_v12, %v43_v18  ;;  %v56_v23 = vadd.f32 %v108_v13, %v44_v19 }
   0x9   :  { %v57_v24 = vadd.f32 %v111_v16, %v45_v20  ;;  %v58_v25 = vadd.f32 %v112_v17, %v46_v21 }
   0xa   :  { %v59_v26 = vmax.f32 %v55_v22, 0.0  ;;  %v60_v27 = vmax.f32 %v56_v23, 0.0 }
   0xb   :  { %v61_v28 = vmax.f32 %v57_v24, 0.0  ;;  %v62_v29 = vmax.f32 %v58_v25, 0.0 }
   0xc   :  { %v116_v30 = vpack.c.bf16 %v60_v27, %v59_v26 }
   0xd   :  { %v121_v31 = vpack.c.bf16 %v62_v29, %v61_v28 }
   0xe   :  { %117 = vst [vmem:[%s179_s4] sm:$0xff] %v116_v30  }
   0xf   :  { %125 = vst [vmem:[%s179_s4 + $0x8] sm:$0xff] %v121_v31  }

// kernel: resunet_fwd.72
= control target key start
LH: loop header
LB: loop body
LE: loop exit
PB: predicated region body
PF: predicated region fallthrough
CT: control target
= control target key end

     0   :  { %v206_v0 = vmov 0.0   ;;  %vm207_vm0 = vmmov 0   ;;  %vm146_vm1 = vcmask 1040384   ;;  %vm148_vm2 = vcmask 1041408   ;;  %s261_s1 = inlined_call_operand.vmem [shape: bf16[128,128], index: 1, kind: input, shape index: {}]   ;;  %s262_s0 = inlined_call_operand.vmem [shape: bf16[8,128], index: 0, kind: input, shape index: {}]   ;;  %s263_s2 = inlined_call_operand.vmem [shape: bf16[8,128], index: 2, kind: output, shape index: {0}]   ;;  %s264_s3 = inlined_call_operand.vmem [shape: f32[8,128], index: 3, kind: output, shape index: {1}]  }
   0x1   :  { %176 = vmatprep.subr.bf16.mxu0 %v206_v0  ;;  %v198_v1 = vld [vmem:[%s261_s1] sm:$0xff]   ;;  %192 = vmatprep.mubr.msk.bf16.mxu0 %vm207_vm0, %v206_v0  ;;  %v199_v2 = vld [vmem:[%s261_s1 + $0x8] sm:$0xff]   ;;  %v200_v3 = vld [vmem:[%s261_s1 + $0x10] sm:$0xff]  }
   0x2   :  { %177 = vmatpush3.bf16.msra.mxu0 %v198_v1  ;;  %v201_v4 = vld [vmem:[%s261_s1 + $0x18] sm:$0xff]   ;;  %v202_v5 = vld [vmem:[%s261_s1 + $0x20] sm:$0xff]   ;;  %v203_v6 = vld [vmem:[%s261_s1 + $0x28] sm:$0xff]  }
   0x3   :  { %178 = vmatprep.subr.bf16.mxu0 %v206_v0  ;;  %v204_v7 = vld [vmem:[%s261_s1 + $0x30] sm:$0xff]   ;;  %v205_v8 = vld [vmem:[%s261_s1 + $0x38] sm:$0xff]   ;;  %v20_v9 = vld [vmem:[%s262_s0] sm:$0xf] }
   0x6   :  { %179 = vmatpush3.bf16.msra.mxu0 %v199_v2 }
   0x7   :  { %180 = vmatprep.subr.bf16.mxu0 %v206_v0 }
   0xa   :  { %181 = vmatpush3.bf16.msra.mxu0 %v200_v3 }
   0xb   :  { %182 = vmatprep.subr.bf16.mxu0 %v206_v0 }
   0xe   :  { %183 = vmatpush3.bf16.msra.mxu0 %v201_v4 }
   0xf   :  { %184 = vmatprep.subr.bf16.mxu0 %v206_v0 }
  0x12   :  { %185 = vmatpush3.bf16.msra.mxu0 %v202_v5 }
  0x13   :  { %186 = vmatprep.subr.bf16.mxu0 %v206_v0 }
  0x16   :  { %187 = vmatpush3.bf16.msra.mxu0 %v203_v6 }
  0x17   :  { %188 = vmatprep.subr.bf16.mxu0 %v206_v0 }
  0x1a   :  { %189 = vmatpush3.bf16.msra.mxu0 %v204_v7 }
  0x1b   :  { %190 = vmatprep.subr.bf16.mxu0 %v206_v0 }
  0x1e   :  { %191 = vmatpush3.bf16.msra.mxu0 %v205_v8 }
  0x21   :  { %193 = vmatmul.mubr.bf16.vlgmr.msra.gmra.mrb[0].mxu0 %v20_v9 }
  0xf4   :  { %v119_v10 = vpop.f32.mrb[0].mxu0 }
  0xf5   :  { %v131_v11 = vpack.c.bf16 %v119_v10, %v119_v10  ;;  %v133_v12 = vrot.slane %v119_v10, 4  ;;  %v139_v13 = vmul.f32 %v119_v10, %v119_v10  ;;  %v194_v14 = vpop.f32.mrb[1].mxu0 }
  0xf6   :  { %v122_v15 = vpop.f32.mrb[2].mxu0 }
  0xf7   :  { %132 = vst [vmem:[%s263_s2] sm:$0xf] %v131_v11  ;;  %v134_v16 = vadd.f32 %v133_v12, %v119_v10  ;;  %v140_v17 = vrot.slane %v139_v13, 4  ;;  %v195_v18 = vpop.f32.mrb[3].mxu0 }
  0xf9   :  { %v135_v19 = vrot.slane %v134_v16, 2  ;;  %v141_v20 = vadd.f32 %v140_v17, %v139_v13 }
  0xfb   :  { %v136_v21 = vadd.f32 %v135_v19, %v134_v16  ;;  %v142_v22 = vrot.slane %v141_v20, 2 }
  0xfd   :  { %v137_v23 = vrot.slane %v136_v21, 1  ;;  %v143_v24 = vadd.f32 %v142_v22, %v141_v20 }
  0xff   :  { %v144_v25 = vrot.slane %v143_v24, 1  ;;  %v138_v26 = vadd.f32 %v137_v23, %v136_v21 }
 0x101   :  { %v145_v27 = vadd.f32 %v144_v25, %v143_v24 }
 0x103   :  { %v147_v28 = vsel %vm146_vm1, %v138_v26, %v145_v27 }
 0x104   :  { %v149_v29 = vsel %vm148_vm2, %v147_v28, 0.0 }
 0x105   :  { %150 = vst [vmem:[%s264_s3] sm:$0xff] %v149_v29 }

// kernel: resunet_fwd.73
= control target key start
LH: loop header
LB: loop body
LE: loop exit
PB: predicated region body
PF: predicated region fallthrough
CT: control target
= control target key end

     0   :  { %s72_s0 = inlined_call_operand.vmem [shape: bf16[8,128], index: 0, kind: input, shape index: {}]   ;;  %s73_s1 = inlined_call_operand.vmem [shape: f32[1,128], index: 1, kind: input, shape index: {}]   ;;  %s74_s2 = inlined_call_operand.vmem [shape: f32[1,128], index: 2, kind: input, shape index: {}]   ;;  %s75_s3 = inlined_call_operand.vmem [shape: bf16[8,128], index: 3, kind: output, shape index: {}]  }
   0x1   :  { %v14_v0 = vld [vmem:[%s72_s0] sm:$0xf] }
   0x2   :  { %v38_v1 = vld [vmem:[%s73_s1] ss:$0 sm:$0xff]  ;;  %v15_v2 = vunpack.c.l.bf16 %v14_v0 }
   0x3   :  { %v39_v3 = vld [vmem:[%s74_s2] ss:$0 sm:$0xff] }
   0x4   :  { %v23_v4 = vmul.f32 %v38_v1, %v15_v2 }
   0x6   :  { %v31_v5 = vadd.f32 %v39_v3, %v23_v4 }
   0x8   :  { %v32_v6 = vpack.c.bf16 %v31_v5, %v31_v5 }
   0xa   :  { %33 = vst [vmem:[%s75_s3] sm:$0xf] %v32_v6 }

// kernel: resunet_fwd.75
= control target key start
LH: loop header
LB: loop body
LE: loop exit
PB: predicated region body
PF: predicated region fallthrough
CT: control target
= control target key end

     0   :  { %s73_s0 = inlined_call_operand.vmem [shape: bf16[8,128], index: 0, kind: input, shape index: {}]   ;;  %s74_s1 = inlined_call_operand.vmem [shape: f32[1,128], index: 1, kind: input, shape index: {}]   ;;  %s75_s2 = inlined_call_operand.vmem [shape: f32[1,128], index: 2, kind: input, shape index: {}]   ;;  %s76_s3 = inlined_call_operand.vmem [shape: bf16[8,128], index: 3, kind: output, shape index: {}]  }
   0x1   :  { %v14_v0 = vld [vmem:[%s73_s0] sm:$0xf] }
   0x2   :  { %v39_v1 = vld [vmem:[%s74_s1] ss:$0 sm:$0xff]  ;;  %v15_v2 = vunpack.c.l.bf16 %v14_v0 }
   0x3   :  { %v40_v3 = vld [vmem:[%s75_s2] ss:$0 sm:$0xff] }
   0x4   :  { %v23_v4 = vmul.f32 %v39_v1, %v15_v2 }
   0x6   :  { %v31_v5 = vadd.f32 %v40_v3, %v23_v4 }
   0x8   :  { %v32_v6 = vmax.f32 %v31_v5, 0.0 }
   0xa   :  { %v33_v7 = vpack.c.bf16 %v32_v6, %v32_v6 }
   0xc   :  { %34 = vst [vmem:[%s76_s3] sm:$0xf] %v33_v7 }

// kernel: resunet_fwd.74
= control target key start
LH: loop header
LB: loop body
LE: loop exit
PB: predicated region body
PF: predicated region fallthrough
CT: control target
= control target key end

     0   :  { %s845_s12 = smov 0   ;;  %s847_s13 = smov 0   ;;  %s920_s0 = inlined_call_operand.vmem [shape: bf16[8,1152], index: 0, kind: input, shape index: {}]   ;;  %s921_s1 = inlined_call_operand.vmem [shape: bf16[1152,128], index: 1, kind: input, shape index: {}]   ;;  %s922_s2 = inlined_call_operand.vmem [shape: bf16[8,128], index: 2, kind: output, shape index: {0}]   ;;  %s923_s3 = inlined_call_operand.vmem [shape: f32[8,128], index: 3, kind: output, shape index: {1}]  }
   0x1   :  { %s849_s14 = smov 0  }
   0x2 LB: > { %s23_s15 = sadd.s32 1, %s816_s13  ;;  %p657_p0 = scmp.ge.s32.totalorder %s820_s14, 1  ;;  %s820_s14 = sphi %s849_s14, %s14_s14   ;;  %s816_s13 = sphi %s847_s13, %s925_s13   ;;  %s812_s12 = sphi %s845_s12, %s924_s12  }
   0x3   : > { %p24_p1 = scmp.ge.s32.totalorder %s23_s15, 3  ;;  %p170_p2 = scmp.lt.s32.totalorder %s820_s14, 4 }
   0x5   : > { %s927_s15 = smov (%p24_p1, %s23_s15), 0  ;;  %p171_p3 = pnand %p657_p0, %p170_p2 }
   0x6   : > { %s206_s16 = smul.u32 (!%p171_p3), 3, %s812_s12  ;;  %p660_p6 = scmp.ne.s32.totalorder (!%p171_p3), %s812_s12, 0 }
   0x7   : > { %174 = sbr.rel (%p171_p3) target bundleno = 301 (0x12d), region = 28 }
   0x8   : > { %s216_s17 = smul.u32 (!%p171_p3), 48, %s812_s12  ;;  %p209_p4 = scmp.lt.s32.totalorder (!%p171_p3), %s206_s16, 8 }
   0xa   : > { %p217_p5 = scmp.lt.s32.totalorder (!%p171_p3), %s216_s17, 143 }
   0xe   : > { %s929_s16 = smov (!%p209_p4, %s206_s16), 8  ;;  %s931_s17 = smov (!%p217_p5, %s216_s17), 143 }
   0xf   : > { %s658_s18 = sshll.u32 %s929_s16, 2  ;;  %s659_s22 = sshll.u32 %s931_s17, 2  ;;  %v822_v0 = vmov (!%p660_p6), 0.0  }
  0x10   : > { %s870_s21 = scalar_lea.vmem %s920_s0, %s658_s18  ;;  %s875_s25 = scalar_lea.vmem %s921_s1, %s659_s22  ;;  %235 = vst [vmem:[#allocation2] sm:$0xff] (!%p660_p6), %v822_v0 }
  0x11   : > { %234 = sbr.rel (%p660_p6) target bundleno = 24 (0x18), region = 32 }
  0x18 PF: > { %v771_v1 = vld [vmem:[%s875_s25 + $0x40] sm:$0xff]   ;;  %v823_v2 = vmov 0.0   ;;  %vm824_vm0 = vmmov 0   ;;  %v774_v5 = vld [vmem:[%s875_s25 + $0x48] sm:$0xff]   ;;  %v777_v8 = vld [vmem:[%s875_s25 + $0x50] sm:$0xff]   ;;  %p688_p7 = scmp.ne.s32.totalorder %s812_s12, 2 }
  0x19   : > { %724 = vmatprep.subr.bf16.mxu1 %v823_v2  ;;  %v772_v3 = vld [vmem:[%s875_s25] sm:$0xff]   ;;  %693 = vmatprep.subr.bf16.mxu0 %v771_v1  ;;  %v775_v6 = vld [vmem:[%s875_s25 + $0x8] sm:$0xff]   ;;  %v778_v9 = vld [vmem:[%s875_s25 + $0x10] sm:$0xff]   ;;  %vm544_vm1 = vcmask (!%p688_p7), 1040384   ;;  %vm546_vm2 = vcmask (!%p688_p7), 1041408  }
  0x1a   : > { %v773_v4 = vld [vmem:[%s875_s25 + $0x80] sm:$0xff]   ;;  %740 = vmatprep.mubr.msk.bf16.mxu1 %vm824_vm0, %v823_v2  ;;  %694 = vmatpush3.bf16.msra.mxu0 %v772_v3  ;;  %v776_v7 = vld [vmem:[%s875_s25 + $0x88] sm:$0xff]   ;;  %v779_v10 = vld [vmem:[%s875_s25 + $0x90] sm:$0xff]  }
  0x1b   : > { %725 = vmatpush3.bf16.msra.mxu1 %v773_v4  ;;  %695 = vmatprep.subr.bf16.mxu0 %v774_v5  ;;  %v780_v11 = vld [vmem:[%s875_s25 + $0x58] sm:$0xff]   ;;  %v783_v14 = vld [vmem:[%s875_s25 + $0x60] sm:$0xff]   ;;  %v786_v17 = vld [vmem:[%s875_s25 + $0x68] sm:$0xff]  }
  0x1c   : > { %726 = vmatprep.subr.bf16.mxu1 %v823_v2  ;;  %v781_v12 = vld [vmem:[%s875_s25 + $0x18] sm:$0xff]   ;;  %v784_v15 = vld [vmem:[%s875_s25 + $0x20] sm:$0xff]   ;;  %v787_v18 = vld [vmem:[%s875_s25 + $0x28] sm:$0xff]  }
  0x1d   : > { %v782_v13 = vld [vmem:[%s875_s25 + $0x98] sm:$0xff]   ;;  %v785_v16 = vld [vmem:[%s875_s25 + $0xa0] sm:$0xff]   ;;  %v788_v19 = vld [vmem:[%s875_s25 + $0xa8] sm:$0xff]  }
  0x1e   : > { %696 = vmatpush3.bf16.msra.mxu0 %v775_v6  ;;  %v789_v20 = vld [vmem:[%s875_s25 + $0x70] sm:$0xff]   ;;  %v792_v23 = vld [vmem:[%s875_s25 + $0x78] sm:$0xff]   ;;  %v237_v24 = vld [vmem:[%s870_s21] sm:$0xff] }
  0x1f   : > { %727 = vmatpush3.bf16.msra.mxu1 %v776_v7  ;;  %697 = vmatprep.subr.bf16.mxu0 %v777_v8  ;;  %v790_v21 = vld [vmem:[%s875_s25 + $0x30] sm:$0xff]   ;;  %v662_v25 = vcombine.high %v237_v24, %v237_v24  ;;  %v793_v26 = vld [vmem:[%s875_s25 + $0x38] sm:$0xff]   ;;  %v661_v28 = vcombine.low %v237_v24, %v237_v24  ;;  %v797_v29 = vld [vmem:[%s870_s21 + $0x8] ss:$0 sps:$4 sm:$0xff]  }
  0x20   : > { %728 = vmatprep.subr.bf16.mxu1 %v823_v2  ;;  %v791_v22 = vld [vmem:[%s875_s25 + $0xb0] sm:$0xff]   ;;  %v794_v27 = vld [vmem:[%s875_s25 + $0xb8] sm:$0xff]   ;;  %v236_v36 = vld [vmem:[#allocation2] sm:$0xff] }
  0x21   : > { %474 = vmatprep.mubr.bf16.mxu0 %v662_v25 }
  0x22   : > { %698 = vmatpush3.bf16.msra.mxu0 %v778_v9 }
  0x23   : > { %729 = vmatpush3.bf16.msra.mxu1 %v779_v10  ;;  %699 = vmatprep.subr.bf16.mxu0 %v780_v11 }
  0x24   : > { %730 = vmatprep.subr.bf16.mxu1 %v823_v2 }
  0x26   : > { %700 = vmatpush3.bf16.msra.mxu0 %v781_v12 }
  0x27   : > { %731 = vmatpush3.bf16.msra.mxu1 %v782_v13  ;;  %701 = vmatprep.subr.bf16.mxu0 %v783_v14 }
  0x28   : > { %732 = vmatprep.subr.bf16.mxu1 %v823_v2 }
  0x2a   : > { %702 = vmatpush3.bf16.msra.mxu0 %v784_v15 }
  0x2b   : > { %733 = vmatpush3.bf16.msra.mxu1 %v785_v16  ;;  %703 = vmatprep.subr.bf16.mxu0 %v786_v17 }
  0x2c   : > { %734 = vmatprep.subr.bf16.mxu1 %v823_v2 }
  0x2e   : > { %704 = vmatpush3.bf16.msra.mxu0 %v787_v18 }
  0x2f   : > { %735 = vmatpush3.bf16.msra.mxu1 %v788_v19  ;;  %705 = vmatprep.subr.bf16.mxu0 %v789_v20 }
  0x30   : > { %736 = vmatprep.subr.bf16.mxu1 %v823_v2 }
  0x32   : > { %706 = vmatpush3.bf16.msra.mxu0 %v790_v21 }
  0x33   : > { %737 = vmatpush3.bf16.msra.mxu1 %v791_v22  ;;  %707 = vmatprep.subr.bf16.mxu0 %v792_v23 }
  0x34   : > { %738 = vmatprep.subr.bf16.mxu1 %v823_v2 }
  0x36   : > { %708 = vmatpush3.bf16.msra.mxu0 %v793_v26 }
  0x37   : > { %739 = vmatpush3.bf16.msra.mxu1 %v794_v27 }
  0x39   : > { %475 = vmatmul.mubr.bf16.vlgmr.msra.gmra.mrb[0].mxu0 %v661_v28 }
  0x3a   : > { %741 = vmatmul.mubr.bf16.vlgmr.msra.gmra.mrb[0].mxu1 %v797_v29 }
 0x10c   : > { %v709_v30 = vpop.f32.mrb[0].mxu0 }
 0x10d   : > { %v516_v31 = vpop.f32.mrb[0].mxu1  ;;  %v710_v32 = vpop.f32.mrb[1].mxu0 }
 0x10e   : > { %v711_v33 = vadd.f32 %v710_v32, %v709_v30  ;;  %v742_v34 = vpop.f32.mrb[1].mxu1  ;;  %v712_v35 = vpop.f32.mrb[2].mxu0  ;;  %527 = sbr.rel (%p688_p7) target bundleno = 301 (0x12d), region = 36 }
 0x10f   : > { %v519_v37 = vpop.f32.mrb[2].mxu1  ;;  %v713_v38 = vpop.f32.mrb[3].mxu0 }
 0x110   : > { %v517_v39 = vadd.f32 %v711_v33, %v516_v31  ;;  %v743_v40 = vpop.f32.mrb[3].mxu1 }
 0x112   : > { %v522_v41 = vadd.f32 %v517_v39, %v236_v36 }
 0x114   : > { %523 = vst [vmem:[#allocation2] sm:$0xff] %v522_v41 }
 0x11b   : > { %v528_v42 = vld [vmem:[#allocation2] sm:$0xff] }
 0x11c   : > { %v529_v43 = vpack.c.bf16 %v528_v42, %v528_v42  ;;  %v531_v44 = vrot.slane %v528_v42, 4  ;;  %v537_v45 = vmul.f32 %v528_v42, %v528_v42 }
 0x11e   : > { %530 = vst [vmem:[%s922_s2] sm:$0xf] %v529_v43  ;;  %v532_v46 = vadd.f32 %v531_v44, %v528_v42  ;;  %v538_v47 = vrot.slane %v537_v45, 4 }
 0x120   : > { %v533_v48 = vrot.slane %v532_v46, 2  ;;  %v539_v49 = vadd.f32 %v538_v47, %v537_v45 }
 0x122   : > { %v534_v50 = vadd.f32 %v533_v48, %v532_v46  ;;  %v540_v51 = vrot.slane %v539_v49, 2 }
 0x124   : > { %v535_v52 = vrot.slane %v534_v50, 1  ;;  %v541_v53 = vadd.f32 %v540_v51, %v539_v49 }
 0x126   : > { %v536_v54 = vadd.f32 %v535_v52, %v534_v50  ;;  %v542_v55 = vrot.slane %v541_v53, 1 }
 0x128   : > { %v543_v56 = vadd.f32 %v542_v55, %v541_v53 }
 0x12a   : > { %v545_v57 = vsel %vm544_vm1, %v536_v54, %v543_v56 }
 0x12b   : > { %v547_v58 = vsel %vm546_vm2, %v545_v57, 0.0 }
 0x12c   : > { %548 = vst [vmem:[%s923_s3] sm:$0xff] %v547_v58 }
 0x12d PF: > { %s14_s14 = sadd.s32 1, %s820_s14   ;;  %s924_s12 = smov %s816_s13 }
 0x12e   : > { %p11_p8 = scmp.ge.s32.totalorder %s14_s14, 5   ;;  %s925_s13 = smov %s927_s15 }
 0x130   :  { %13 = sbr.rel (!%p11_p8) target bundleno = 2 (0x2), region = 81 }

// kernel: resunet_fwd.77
= control target key start
LH: loop header
LB: loop body
LE: loop exit
PB: predicated region body
PF: predicated region fallthrough
CT: control target
= control target key end

     0   :  { %s87_s0 = inlined_call_operand.vmem [shape: bf16[8,128], index: 0, kind: input, shape index: {}]   ;;  %s88_s1 = inlined_call_operand.vmem [shape: f32[1,128], index: 1, kind: input, shape index: {}]   ;;  %s89_s2 = inlined_call_operand.vmem [shape: f32[1,128], index: 2, kind: input, shape index: {}]   ;;  %s90_s3 = inlined_call_operand.vmem [shape: bf16[8,128], index: 3, kind: input, shape index: {}]   ;;  %s91_s4 = inlined_call_operand.vmem [shape: bf16[8,128], index: 4, kind: output, shape index: {}]  }
   0x1   :  { %v17_v0 = vld [vmem:[%s87_s0] sm:$0xf] }
   0x2   :  { %v45_v1 = vld [vmem:[%s88_s1] ss:$0 sm:$0xff]  ;;  %v18_v2 = vunpack.c.l.bf16 %v17_v0 }
   0x3   :  { %v35_v3 = vld [vmem:[%s90_s3] sm:$0xf] }
   0x4   :  { %v46_v4 = vld [vmem:[%s89_s2] ss:$0 sm:$0xff]  ;;  %v26_v5 = vmul.f32 %v45_v1, %v18_v2  ;;  %v36_v6 = vunpack.c.l.bf16 %v35_v3 }
   0x6   :  { %v34_v7 = vadd.f32 %v46_v4, %v26_v5 }
   0x8   :  { %v37_v8 = vadd.f32 %v36_v6, %v34_v7 }
   0xa   :  { %v38_v9 = vmax.f32 %v37_v8, 0.0 }
   0xc   :  { %v39_v10 = vpack.c.bf16 %v38_v9, %v38_v9 }
   0xe   :  { %40 = vst [vmem:[%s91_s4] sm:$0xf] %v39_v10 }

// kernel: tile.18
= control target key start
LH: loop header
LB: loop body
LE: loop exit
PB: predicated region body
PF: predicated region fallthrough
CT: control target
= control target key end

     0   :  { %s22_s0 = inlined_call_operand.vmem [shape: f32[128], index: 0, kind: input, shape index: {}]   ;;  %s23_s1 = inlined_call_operand.vmem [shape: f32[4,128], index: 1, kind: output, shape index: {}]  }
   0x1   :  { %v4_v0 = vld [vmem:[%s22_s0] ss:$0 sm:$0xff] }
   0x2   :  { %5 = vst [vmem:[%s23_s1] sm:$0xf] %v4_v0 }

// kernel: resunet_fwd.82
= control target key start
LH: loop header
LB: loop body
LE: loop exit
PB: predicated region body
PF: predicated region fallthrough
CT: control target
= control target key end

     0   :  { %v450_v1 = vmov 0   ;;  %v319_v34 = vlaneseq  ;;  %s579_s1 = inlined_call_operand.vmem [shape: bf16[128,512], index: 1, kind: input, shape index: {}]   ;;  %s580_s0 = inlined_call_operand.vmem [shape: bf16[8,128], index: 0, kind: input, shape index: {}]   ;;  %s581_s2 = inlined_call_operand.vmem [shape: f32[1,512], index: 2, kind: input, shape index: {}]   ;;  %s582_s3 = inlined_call_operand.vmem [shape: bf16[8,512], index: 3, kind: output, shape index: {}]  }
   0x1   :  { %v402_v0 = vld [vmem:[%s579_s1 + $0x4] ss:$16 sps:$4 sm:$0xff]   ;;  %252 = vmatprep.mubr.bf16.mxu0 %v450_v1  ;;  %293 = vmatprep.mubr.bf16.mxu1 %v450_v1  ;;  %v404_v2 = vld [vmem:[%s579_s1 + $0xc] ss:$16 sps:$4 sm:$0xff]   ;;  %v406_v3 = vld [vmem:[%s579_s1] ss:$16 sps:$4 sm:$0xff]  }
   0x2   :  { %220 = vmatprep.subr.bf16.mxu0 %v402_v0  ;;  %v407_v4 = vld [vmem:[%s579_s1 + $0x8] ss:$16 sps:$4 sm:$0xff]   ;;  %261 = vmatprep.subr.bf16.mxu1 %v404_v2  ;;  %v408_v5 = vld [vmem:[%s579_s1 + $0x24] ss:$16 sps:$4 sm:$0xff]   ;;  %v410_v6 = vld [vmem:[%s579_s1 + $0x2c] ss:$16 sps:$4 sm:$0xff]  }
   0x3   :  { %221 = vmatpush1.bf16.msra.mxu0 %v406_v3  ;;  %262 = vmatpush1.bf16.msra.mxu1 %v407_v4  ;;  %v412_v7 = vld [vmem:[%s579_s1 + $0x20] ss:$16 sps:$4 sm:$0xff]   ;;  %v413_v8 = vld [vmem:[%s579_s1 + $0x28] ss:$16 sps:$4 sm:$0xff]   ;;  %v414_v9 = vld [vmem:[%s579_s1 + $0x44] ss:$16 sps:$4 sm:$0xff]  }
   0x4   :  { %222 = vmatprep.subr.bf16.mxu0 %v408_v5  ;;  %263 = vmatprep.subr.bf16.mxu1 %v410_v6  ;;  %v416_v10 = vld [vmem:[%s579_s1 + $0x4c] ss:$16 sps:$4 sm:$0xff]   ;;  %v418_v11 = vld [vmem:[%s579_s1 + $0x40] ss:$16 sps:$4 sm:$0xff]   ;;  %v419_v12 = vld [vmem:[%s579_s1 + $0x48] ss:$16 sps:$4 sm:$0xff]  }
   0x5   :  { %v420_v13 = vld [vmem:[%s579_s1 + $0x64] ss:$16 sps:$4 sm:$0xff]   ;;  %v422_v14 = vld [vmem:[%s579_s1 + $0x6c] ss:$16 sps:$4 sm:$0xff]   ;;  %v424_v15 = vld [vmem:[%s579_s1 + $0x60] ss:$16 sps:$4 sm:$0xff]  }
   0x6   :  { %v425_v16 = vld [vmem:[%s579_s1 + $0x68] ss:$16 sps:$4 sm:$0xff]   ;;  %v426_v17 = vld [vmem:[%s579_s1 + $0x84] ss:$16 sps:$4 sm:$0xff]   ;;  %v428_v18 = vld [vmem:[%s579_s1 + $0x8c] ss:$16 sps:$4 sm:$0xff]  }
   0x7   :  { %223 = vmatpush1.bf16.msra.mxu0 %v412_v7  ;;  %264 = vmatpush1.bf16.msra.mxu1 %v413_v8  ;;  %v430_v19 = vld [vmem:[%s579_s1 + $0x80] ss:$16 sps:$4 sm:$0xff]   ;;  %v431_v20 = vld [vmem:[%s579_s1 + $0x88] ss:$16 sps:$4 sm:$0xff]   ;;  %v432_v21 = vld [vmem:[%s579_s1 + $0xa4] ss:$16 sps:$4 sm:$0xff]  }
   0x8   :  { %224 = vmatprep.subr.bf16.mxu0 %v414_v9  ;;  %265 = vmatprep.subr.bf16.mxu1 %v416_v10  ;;  %v434_v22 = vld [vmem:[%s579_s1 + $0xac] ss:$16 sps:$4 sm:$0xff]   ;;  %v436_v23 = vld [vmem:[%s579_s1 + $0xa0] ss:$16 sps:$4 sm:$0xff]   ;;  %v437_v24 = vld [vmem:[%s579_s1 + $0xa8] ss:$16 sps:$4 sm:$0xff]  }
   0x9   :  { %v438_v25 = vld [vmem:[%s579_s1 + $0xc4] ss:$16 sps:$4 sm:$0xff]   ;;  %v440_v26 = vld [vmem:[%s579_s1 + $0xcc] ss:$16 sps:$4 sm:$0xff]   ;;  %v442_v27 = vld [vmem:[%s579_s1 + $0xc0] ss:$16 sps:$4 sm:$0xff]  }
   0xa   :  { %v443_v28 = vld [vmem:[%s579_s1 + $0xc8] ss:$16 sps:$4 sm:$0xff]   ;;  %v444_v29 = vld [vmem:[%s579_s1 + $0xe4] ss:$16 sps:$4 sm:$0xff]   ;;  %v446_v30 = vld [vmem:[%s579_s1 + $0xec] ss:$16 sps:$4 sm:$0xff]  }
   0xb   :  { %225 = vmatpush1.bf16.msra.mxu0 %v418_v11  ;;  %266 = vmatpush1.bf16.msra.mxu1 %v419_v12  ;;  %v448_v31 = vld [vmem:[%s579_s1 + $0xe0] ss:$16 sps:$4 sm:$0xff]   ;;  %v449_v32 = vld [vmem:[%s579_s1 + $0xe8] ss:$16 sps:$4 sm:$0xff]   ;;  %v320_v35 = vshrl.u32 %v319_v34, 7 }
   0xc   :  { %226 = vmatprep.subr.bf16.mxu0 %v420_v13  ;;  %267 = vmatprep.subr.bf16.mxu1 %v422_v14  ;;  %v27_v33 = vld [vmem:[%s580_s0] sm:$0xf] }
   0xd   :  { %v321_v36 = vsub.s32 0, %v320_v35  ;;  %v329_v37 = vsub.s32 2, %v320_v35  ;;  %v317_v38 = vld [vmem:[%s581_s2] sm:$0xf]  ;;  %v325_v39 = vsub.s32 1, %v320_v35  ;;  %v333_v40 = vsub.s32 3, %v320_v35 }
   0xf   :  { %227 = vmatpush1.bf16.msra.mxu0 %v424_v15  ;;  %268 = vmatpush1.bf16.msra.mxu1 %v425_v16  ;;  %v322_v41 = vrot.slane %v317_v38, %v321_v36  ;;  %v330_v42 = vrot.slane %v317_v38, %v329_v37  ;;  %v326_v43 = vrot.slane %v317_v38, %v325_v39 }
  0x10   :  { %228 = vmatprep.subr.bf16.mxu0 %v426_v17  ;;  %269 = vmatprep.subr.bf16.mxu1 %v428_v18  ;;  %v334_v44 = vrot.slane %v317_v38, %v333_v40 }
  0x13   :  { %229 = vmatpush1.bf16.msra.mxu0 %v430_v19  ;;  %270 = vmatpush1.bf16.msra.mxu1 %v431_v20 }
  0x14   :  { %230 = vmatprep.subr.bf16.mxu0 %v432_v21  ;;  %271 = vmatprep.subr.bf16.mxu1 %v434_v22 }
  0x17   :  { %231 = vmatpush1.bf16.msra.mxu0 %v436_v23  ;;  %272 = vmatpush1.bf16.msra.mxu1 %v437_v24 }
  0x18   :  { %232 = vmatprep.subr.bf16.mxu0 %v438_v25  ;;  %273 = vmatprep.subr.bf16.mxu1 %v440_v26 }
  0x1b   :  { %233 = vmatpush1.bf16.msra.mxu0 %v442_v27  ;;  %274 = vmatpush1.bf16.msra.mxu1 %v443_v28 }
  0x1c   :  { %234 = vmatprep.subr.bf16.mxu0 %v444_v29  ;;  %275 = vmatprep.subr.bf16.mxu1 %v446_v30 }
  0x1f   :  { %235 = vmatpush1.bf16.msra.mxu0 %v448_v31  ;;  %276 = vmatpush1.bf16.msra.mxu1 %v449_v32 }
  0x22   :  { %253 = vmatmul.mubr.bf16.vlgmr.msra.gmra.mrb[0].mxu0 %v27_v33  ;;  %294 = vmatmul.mubr.bf16.vlgmr.msra.gmra.mrb[0].mxu1 %v27_v33 }
  0xf5   :  { %v254_v45 = vpop.f32.mrb[0].mxu0  ;;  %v295_v46 = vpop.f32.mrb[0].mxu1 }
  0xf6   :  { %v339_v47 = vadd.f32 %v322_v41, %v254_v45  ;;  %v341_v48 = vadd.f32 %v330_v42, %v295_v46  ;;  %v256_v49 = vpop.f32.mrb[1].mxu0  ;;  %v297_v50 = vpop.f32.mrb[1].mxu1 }
  0xf7   :  { %v340_v51 = vadd.f32 %v326_v43, %v256_v49  ;;  %v342_v52 = vadd.f32 %v334_v44, %v297_v50  ;;  %v258_v53 = vpop.f32.mrb[2].mxu0  ;;  %v299_v54 = vpop.f32.mrb[2].mxu1 }
  0xf8   :  { %v259_v55 = vpop.f32.mrb[3].mxu0  ;;  %v300_v56 = vpop.f32.mrb[3].mxu1 }
  0xf9   :  { %v399_v57 = vpack.c.bf16 %v340_v51, %v339_v47  ;;  %v400_v58 = vpack.c.bf16 %v342_v52, %v341_v48 }
  0xfb   :  { %359 = vst [vmem:[%s582_s3] sm:$0xff] %v399_v57  ;;  %360 = vst [vmem:[%s582_s3 + $0x8] sm:$0xff] %v400_v58 }

// kernel: resunet_fwd.89
= control target key start
LH: loop header
LB: loop body
LE: loop exit
PB: predicated region body
PF: predicated region fallthrough
CT: control target
= control target key end

     0   :  { %v615_v1 = vmov 0   ;;  %v418_v35 = vlaneseq  ;;  %s769_s1 = inlined_call_operand.vmem [shape: bf16[128,512], index: 1, kind: input, shape index: {}]   ;;  %s770_s0 = inlined_call_operand.vmem [shape: bf16[32,128], index: 0, kind: input, shape index: {}]   ;;  %s771_s2 = inlined_call_operand.vmem [shape: f32[1,512], index: 2, kind: input, shape index: {}]   ;;  %s772_s3 = inlined_call_operand.vmem [shape: bf16[32,512], index: 3, kind: output, shape index: {}]  }
   0x1   :  { %v565_v0 = vld [vmem:[%s769_s1 + $0x4] ss:$16 sps:$4 sm:$0xff]   ;;  %291 = vmatprep.mubr.bf16.mxu0 %v615_v1  ;;  %344 = vmatprep.mubr.bf16.mxu1 %v615_v1  ;;  %v567_v2 = vld [vmem:[%s769_s1 + $0xc] ss:$16 sps:$4 sm:$0xff]   ;;  %v569_v3 = vld [vmem:[%s769_s1] ss:$16 sps:$4 sm:$0xff]  }
   0x2   :  { %259 = vmatprep.subr.bf16.mxu0 %v565_v0  ;;  %v570_v4 = vld [vmem:[%s769_s1 + $0x8] ss:$16 sps:$4 sm:$0xff]   ;;  %312 = vmatprep.subr.bf16.mxu1 %v567_v2  ;;  %v571_v5 = vld [vmem:[%s769_s1 + $0x24] ss:$16 sps:$4 sm:$0xff]   ;;  %v573_v6 = vld [vmem:[%s769_s1 + $0x2c] ss:$16 sps:$4 sm:$0xff]  }
   0x3   :  { %260 = vmatpush1.bf16.msra.mxu0 %v569_v3  ;;  %313 = vmatpush1.bf16.msra.mxu1 %v570_v4  ;;  %v575_v7 = vld [vmem:[%s769_s1 + $0x20] ss:$16 sps:$4 sm:$0xff]   ;;  %v576_v8 = vld [vmem:[%s769_s1 + $0x28] ss:$16 sps:$4 sm:$0xff]   ;;  %v577_v9 = vld [vmem:[%s769_s1 + $0x44] ss:$16 sps:$4 sm:$0xff]  }
   0x4   :  { %261 = vmatprep.subr.bf16.mxu0 %v571_v5  ;;  %314 = vmatprep.subr.bf16.mxu1 %v573_v6  ;;  %v579_v10 = vld [vmem:[%s769_s1 + $0x4c] ss:$16 sps:$4 sm:$0xff]   ;;  %v581_v11 = vld [vmem:[%s769_s1 + $0x40] ss:$16 sps:$4 sm:$0xff]   ;;  %v582_v12 = vld [vmem:[%s769_s1 + $0x48] ss:$16 sps:$4 sm:$0xff]  }
   0x5   :  { %v583_v13 = vld [vmem:[%s769_s1 + $0x64] ss:$16 sps:$4 sm:$0xff]   ;;  %v585_v14 = vld [vmem:[%s769_s1 + $0x6c] ss:$16 sps:$4 sm:$0xff]   ;;  %v587_v15 = vld [vmem:[%s769_s1 + $0x60] ss:$16 sps:$4 sm:$0xff]  }
   0x6   :  { %v588_v16 = vld [vmem:[%s769_s1 + $0x68] ss:$16 sps:$4 sm:$0xff]   ;;  %v589_v17 = vld [vmem:[%s769_s1 + $0x84] ss:$16 sps:$4 sm:$0xff]   ;;  %v591_v18 = vld [vmem:[%s769_s1 + $0x8c] ss:$16 sps:$4 sm:$0xff]  }
   0x7   :  { %262 = vmatpush1.bf16.msra.mxu0 %v575_v7  ;;  %315 = vmatpush1.bf16.msra.mxu1 %v576_v8  ;;  %v593_v19 = vld [vmem:[%s769_s1 + $0x80] ss:$16 sps:$4 sm:$0xff]   ;;  %v594_v20 = vld [vmem:[%s769_s1 + $0x88] ss:$16 sps:$4 sm:$0xff]   ;;  %v595_v21 = vld [vmem:[%s769_s1 + $0xa4] ss:$16 sps:$4 sm:$0xff]  }
   0x8   :  { %263 = vmatprep.subr.bf16.mxu0 %v577_v9  ;;  %316 = vmatprep.subr.bf16.mxu1 %v579_v10  ;;  %v597_v22 = vld [vmem:[%s769_s1 + $0xac] ss:$16 sps:$4 sm:$0xff]   ;;  %v599_v23 = vld [vmem:[%s769_s1 + $0xa0] ss:$16 sps:$4 sm:$0xff]   ;;  %v600_v24 = vld [vmem:[%s769_s1 + $0xa8] ss:$16 sps:$4 sm:$0xff]  }
   0x9   :  { %v601_v25 = vld [vmem:[%s769_s1 + $0xc4] ss:$16 sps:$4 sm:$0xff]   ;;  %v603_v26 = vld [vmem:[%s769_s1 + $0xcc] ss:$16 sps:$4 sm:$0xff]   ;;  %v605_v27 = vld [vmem:[%s769_s1 + $0xc0] ss:$16 sps:$4 sm:$0xff]  }
   0xa   :  { %v606_v28 = vld [vmem:[%s769_s1 + $0xc8] ss:$16 sps:$4 sm:$0xff]   ;;  %v607_v29 = vld [vmem:[%s769_s1 + $0xe4] ss:$16 sps:$4 sm:$0xff]   ;;  %v609_v30 = vld [vmem:[%s769_s1 + $0xec] ss:$16 sps:$4 sm:$0xff]  }
   0xb   :  { %264 = vmatpush1.bf16.msra.mxu0 %v581_v11  ;;  %317 = vmatpush1.bf16.msra.mxu1 %v582_v12  ;;  %v611_v31 = vld [vmem:[%s769_s1 + $0xe0] ss:$16 sps:$4 sm:$0xff]   ;;  %v612_v32 = vld [vmem:[%s769_s1 + $0xe8] ss:$16 sps:$4 sm:$0xff]   ;;  %v419_v36 = vshrl.u32 %v418_v35, 7 }
   0xc   :  { %265 = vmatprep.subr.bf16.mxu0 %v583_v13  ;;  %318 = vmatprep.subr.bf16.mxu1 %v585_v14  ;;  %v613_v33 = vld [vmem:[%s770_s0] sm:$0xff]   ;;  %v614_v34 = vld [vmem:[%s770_s0 + $0x8] sm:$0xff]  }
   0xd   :  { %v420_v37 = vsub.s32 0, %v419_v36  ;;  %v428_v38 = vsub.s32 2, %v419_v36  ;;  %v416_v39 = vld [vmem:[%s771_s2] sm:$0xf]  ;;  %v424_v40 = vsub.s32 1, %v419_v36  ;;  %v432_v41 = vsub.s32 3, %v419_v36 }
   0xf   :  { %266 = vmatpush1.bf16.msra.mxu0 %v587_v15  ;;  %319 = vmatpush1.bf16.msra.mxu1 %v588_v16  ;;  %v421_v42 = vrot.slane %v416_v39, %v420_v37  ;;  %v429_v43 = vrot.slane %v416_v39, %v428_v38  ;;  %v425_v44 = vrot.slane %v416_v39, %v424_v40 }
  0x10   :  { %267 = vmatprep.subr.bf16.mxu0 %v589_v17  ;;  %320 = vmatprep.subr.bf16.mxu1 %v591_v18  ;;  %v433_v45 = vrot.slane %v416_v39, %v432_v41 }
  0x13   :  { %268 = vmatpush1.bf16.msra.mxu0 %v593_v19  ;;  %321 = vmatpush1.bf16.msra.mxu1 %v594_v20 }
  0x14   :  { %269 = vmatprep.subr.bf16.mxu0 %v595_v21  ;;  %322 = vmatprep.subr.bf16.mxu1 %v597_v22 }
  0x17   :  { %270 = vmatpush1.bf16.msra.mxu0 %v599_v23  ;;  %323 = vmatpush1.bf16.msra.mxu1 %v600_v24 }
  0x18   :  { %271 = vmatprep.subr.bf16.mxu0 %v601_v25  ;;  %324 = vmatprep.subr.bf16.mxu1 %v603_v26 }
  0x1b   :  { %272 = vmatpush1.bf16.msra.mxu0 %v605_v27  ;;  %325 = vmatpush1.bf16.msra.mxu1 %v606_v28 }
  0x1c   :  { %273 = vmatprep.subr.bf16.mxu0 %v607_v29  ;;  %326 = vmatprep.subr.bf16.mxu1 %v609_v30 }
  0x1f   :  { %274 = vmatpush1.bf16.msra.mxu0 %v611_v31  ;;  %327 = vmatpush1.bf16.msra.mxu1 %v612_v32 }
  0x22   :  { %292 = vmatmul.mubr.bf16.vlgmr.msra.gmra.mrb[0].mxu0 %v613_v33  ;;  %345 = vmatmul.mubr.bf16.vlgmr.msra.gmra.mrb[0].mxu1 %v613_v33 }
  0x23   :  { %301 = vmatprep.mubr.bf16.mxu0 %v615_v1  ;;  %354 = vmatprep.mubr.bf16.mxu1 %v615_v1 }
  0x2a   :  { %302 = vmatmul.mubr.bf16.gmra.mrb[4].mxu0 %v614_v34  ;;  %355 = vmatmul.mubr.bf16.gmra.mrb[4].mxu1 %v614_v34 }
  0xf5   :  { %v293_v46 = vpop.f32.mrb[0].mxu0  ;;  %v346_v47 = vpop.f32.mrb[0].mxu1 }
  0xf6   :  { %v438_v48 = vadd.f32 %v421_v42, %v293_v46  ;;  %v440_v49 = vadd.f32 %v429_v43, %v346_v47  ;;  %v295_v50 = vpop.f32.mrb[1].mxu0  ;;  %v348_v51 = vpop.f32.mrb[1].mxu1 }
  0xf7   :  { %v439_v52 = vadd.f32 %v425_v44, %v295_v50  ;;  %v441_v53 = vadd.f32 %v433_v45, %v348_v51  ;;  %v297_v54 = vpop.f32.mrb[2].mxu0  ;;  %v350_v55 = vpop.f32.mrb[2].mxu1 }
  0xf8   :  { %v442_v56 = vadd.f32 %v421_v42, %v297_v54  ;;  %v444_v57 = vadd.f32 %v429_v43, %v350_v55  ;;  %v299_v58 = vpop.f32.mrb[3].mxu0  ;;  %v352_v59 = vpop.f32.mrb[3].mxu1 }
  0xf9   :  { %v556_v60 = vpack.c.bf16 %v439_v52, %v438_v48  ;;  %v557_v61 = vpack.c.bf16 %v441_v53, %v440_v49  ;;  %v443_v62 = vadd.f32 %v425_v44, %v299_v58  ;;  %v445_v63 = vadd.f32 %v433_v45, %v352_v59 }
  0xfb   :  { %502 = vst [vmem:[%s772_s3] sm:$0xff] %v556_v60  ;;  %503 = vst [vmem:[%s772_s3 + $0x8] sm:$0xff] %v557_v61  ;;  %v558_v0 = vpack.c.bf16 %v443_v62, %v442_v56  ;;  %v559_v1 = vpack.c.bf16 %v445_v63, %v444_v57 }
  0xfd   :  { %504 = vst [vmem:[%s772_s3 + $0x10] sm:$0xff] %v558_v0  ;;  %505 = vst [vmem:[%s772_s3 + $0x18] sm:$0xff] %v559_v1  ;;  %v303_v2 = vpop.f32.mrb[4].mxu0  ;;  %v356_v3 = vpop.f32.mrb[4].mxu1 }
  0xfe   :  { %v446_v4 = vadd.f32 %v421_v42, %v303_v2  ;;  %v448_v5 = vadd.f32 %v429_v43, %v356_v3  ;;  %v305_v6 = vpop.f32.mrb[5].mxu0  ;;  %v358_v7 = vpop.f32.mrb[5].mxu1 }
  0xff   :  { %v447_v8 = vadd.f32 %v425_v44, %v305_v6  ;;  %v449_v9 = vadd.f32 %v433_v45, %v358_v7  ;;  %v307_v10 = vpop.f32.mrb[6].mxu0  ;;  %v360_v11 = vpop.f32.mrb[6].mxu1 }
 0x100   :  { %v450_v12 = vadd.f32 %v421_v42, %v307_v10  ;;  %v452_v13 = vadd.f32 %v429_v43, %v360_v11  ;;  %v309_v14 = vpop.f32.mrb[7].mxu0  ;;  %v362_v15 = vpop.f32.mrb[7].mxu1 }
 0x101   :  { %v560_v16 = vpack.c.bf16 %v447_v8, %v446_v4  ;;  %v561_v17 = vpack.c.bf16 %v449_v9, %v448_v5  ;;  %v451_v18 = vadd.f32 %v425_v44, %v309_v14  ;;  %v453_v19 = vadd.f32 %v433_v45, %v362_v15 }
 0x103   :  { %506 = vst [vmem:[%s772_s3 + $0x20] sm:$0xff] %v560_v16  ;;  %507 = vst [vmem:[%s772_s3 + $0x28] sm:$0xff] %v561_v17  ;;  %v562_v20 = vpack.c.bf16 %v451_v18, %v450_v12  ;;  %v563_v21 = vpack.c.bf16 %v453_v19, %v452_v13 }
 0x105   :  { %508 = vst [vmem:[%s772_s3 + $0x30] sm:$0xff] %v562_v20  ;;  %509 = vst [vmem:[%s772_s3 + $0x38] sm:$0xff] %v563_v21 }

// kernel: resunet_fwd.96
= control target key start
LH: loop header
LB: loop body
LE: loop exit
PB: predicated region body
PF: predicated region fallthrough
CT: control target
= control target key end

     0   :  { %v1299_v1 = vmov 0   ;;  %v826_v41 = vlaneseq  ;;  %s1627_s1 = inlined_call_operand.vmem [shape: bf16[128,512], index: 1, kind: input, shape index: {}]   ;;  %s1628_s0 = inlined_call_operand.vmem [shape: bf16[128,128], index: 0, kind: input, shape index: {}]   ;;  %s1629_s2 = inlined_call_operand.vmem [shape: f32[1,512], index: 2, kind: input, shape index: {}]   ;;  %s1630_s3 = inlined_call_operand.vmem [shape: bf16[128,512], index: 3, kind: output, shape index: {}]  }
   0x1   :  { %v1243_v0 = vld [vmem:[%s1627_s1 + $0x4] ss:$16 sps:$4 sm:$0xff]   ;;  %435 = vmatprep.mubr.bf16.mxu0 %v1299_v1  ;;  %548 = vmatprep.mubr.bf16.mxu1 %v1299_v1  ;;  %v1245_v2 = vld [vmem:[%s1627_s1 + $0xc] ss:$16 sps:$4 sm:$0xff]   ;;  %v1247_v3 = vld [vmem:[%s1627_s1] ss:$16 sps:$4 sm:$0xff]  }
   0x2   :  { %403 = vmatprep.subr.bf16.mxu0 %v1243_v0  ;;  %v1248_v4 = vld [vmem:[%s1627_s1 + $0x8] ss:$16 sps:$4 sm:$0xff]   ;;  %516 = vmatprep.subr.bf16.mxu1 %v1245_v2  ;;  %v1249_v5 = vld [vmem:[%s1627_s1 + $0x24] ss:$16 sps:$4 sm:$0xff]   ;;  %v1251_v6 = vld [vmem:[%s1627_s1 + $0x2c] ss:$16 sps:$4 sm:$0xff]  }
   0x3   :  { %404 = vmatpush1.bf16.msra.mxu0 %v1247_v3  ;;  %517 = vmatpush1.bf16.msra.mxu1 %v1248_v4  ;;  %v1253_v7 = vld [vmem:[%s1627_s1 + $0x20] ss:$16 sps:$4 sm:$0xff]   ;;  %v1254_v8 = vld [vmem:[%s1627_s1 + $0x28] ss:$16 sps:$4 sm:$0xff]   ;;  %v1255_v9 = vld [vmem:[%s1627_s1 + $0x44] ss:$16 sps:$4 sm:$0xff]  }
   0x4   :  { %405 = vmatprep.subr.bf16.mxu0 %v1249_v5  ;;  %518 = vmatprep.subr.bf16.mxu1 %v1251_v6  ;;  %v1257_v10 = vld [vmem:[%s1627_s1 + $0x4c] ss:$16 sps:$4 sm:$0xff]   ;;  %v1259_v11 = vld [vmem:[%s1627_s1 + $0x40] ss:$16 sps:$4 sm:$0xff]   ;;  %v1260_v12 = vld [vmem:[%s1627_s1 + $0x48] ss:$16 sps:$4 sm:$0xff]  }
   0x5   :  { %v1261_v13 = vld [vmem:[%s1627_s1 + $0x64] ss:$16 sps:$4 sm:$0xff]   ;;  %v1263_v14 = vld [vmem:[%s1627_s1 + $0x6c] ss:$16 sps:$4 sm:$0xff]   ;;  %v1265_v15 = vld [vmem:[%s1627_s1 + $0x60] ss:$16 sps:$4 sm:$0xff]  }
   0x6   :  { %v1266_v16 = vld [vmem:[%s1627_s1 + $0x68] ss:$16 sps:$4 sm:$0xff]   ;;  %v1267_v17 = vld [vmem:[%s1627_s1 + $0x84] ss:$16 sps:$4 sm:$0xff]   ;;  %v1269_v18 = vld [vmem:[%s1627_s1 + $0x8c] ss:$16 sps:$4 sm:$0xff]  }
   0x7   :  { %406 = vmatpush1.bf16.msra.mxu0 %v1253_v7  ;;  %519 = vmatpush1.bf16.msra.mxu1 %v1254_v8  ;;  %v1271_v19 = vld [vmem:[%s1627_s1 + $0x80] ss:$16 sps:$4 sm:$0xff]   ;;  %v1272_v20 = vld [vmem:[%s1627_s1 + $0x88] ss:$16 sps:$4 sm:$0xff]   ;;  %v1273_v21 = vld [vmem:[%s1627_s1 + $0xa4] ss:$16 sps:$4 sm:$0xff]  }
   0x8   :  { %407 = vmatprep.subr.bf16.mxu0 %v1255_v9  ;;  %520 = vmatprep.subr.bf16.mxu1 %v1257_v10  ;;  %v1275_v22 = vld [vmem:[%s1627_s1 + $0xac] ss:$16 sps:$4 sm:$0xff]   ;;  %v1277_v23 = vld [vmem:[%s1627_s1 + $0xa0] ss:$16 sps:$4 sm:$0xff]   ;;  %v1278_v24 = vld [vmem:[%s1627_s1 + $0xa8] ss:$16 sps:$4 sm:$0xff]  }
   0x9   :  { %v1279_v25 = vld [vmem:[%s1627_s1 + $0xc4] ss:$16 sps:$4 sm:$0xff]   ;;  %v1281_v26 = vld [vmem:[%s1627_s1 + $0xcc] ss:$16 sps:$4 sm:$0xff]   ;;  %v1283_v27 = vld [vmem:[%s1627_s1 + $0xc0] ss:$16 sps:$4 sm:$0xff]  }
   0xa   :  { %v1284_v28 = vld [vmem:[%s1627_s1 + $0xc8] ss:$16 sps:$4 sm:$0xff]   ;;  %v1285_v29 = vld [vmem:[%s1627_s1 + $0xe4] ss:$16 sps:$4 sm:$0xff]   ;;  %v1287_v30 = vld [vmem:[%s1627_s1 + $0xec] ss:$16 sps:$4 sm:$0xff]  }
   0xb   :  { %408 = vmatpush1.bf16.msra.mxu0 %v1259_v11  ;;  %521 = vmatpush1.bf16.msra.mxu1 %v1260_v12  ;;  %v1289_v31 = vld [vmem:[%s1627_s1 + $0xe0] ss:$16 sps:$4 sm:$0xff]   ;;  %v1290_v32 = vld [vmem:[%s1627_s1 + $0xe8] ss:$16 sps:$4 sm:$0xff]   ;;  %v827_v42 = vshrl.u32 %v826_v41, 7 }
   0xc   :  { %409 = vmatprep.subr.bf16.mxu0 %v1261_v13  ;;  %522 = vmatprep.subr.bf16.mxu1 %v1263_v14  ;;  %v1291_v33 = vld [vmem:[%s1628_s0] sm:$0xff]   ;;  %v1292_v34 = vld [vmem:[%s1628_s0 + $0x8] sm:$0xff]   ;;  %v1293_v35 = vld [vmem:[%s1628_s0 + $0x10] sm:$0xff]  }
   0xd   :  { %v1294_v36 = vld [vmem:[%s1628_s0 + $0x18] sm:$0xff]   ;;  %v1295_v37 = vld [vmem:[%s1628_s0 + $0x20] sm:$0xff]   ;;  %v1296_v38 = vld [vmem:[%s1628_s0 + $0x28] sm:$0xff]   ;;  %v828_v43 = vsub.s32 0, %v827_v42  ;;  %v836_v44 = vsub.s32 2, %v827_v42  ;;  %v832_v46 = vsub.s32 1, %v827_v42 }
   0xe   :  { %v1297_v39 = vld [vmem:[%s1628_s0 + $0x30] sm:$0xff]   ;;  %v1298_v40 = vld [vmem:[%s1628_s0 + $0x38] sm:$0xff]   ;;  %v824_v45 = vld [vmem:[%s1629_s2] sm:$0xf]  ;;  %v840_v47 = vsub.s32 3, %v827_v42 }
   0xf   :  { %410 = vmatpush1.bf16.msra.mxu0 %v1265_v15  ;;  %523 = vmatpush1.bf16.msra.mxu1 %v1266_v16  ;;  %v1459_v48 = vrot.slane %v824_v45, %v828_v43  ;;  %v1461_v49 = vrot.slane %v824_v45, %v836_v44  ;;  %v1463_v50 = vrot.slane %v824_v45, %v832_v46 }
  0x10   :  { %411 = vmatprep.subr.bf16.mxu0 %v1267_v17  ;;  %524 = vmatprep.subr.bf16.mxu1 %v1269_v18  ;;  %v1465_v51 = vrot.slane %v824_v45, %v840_v47 }
  0x13   :  { %412 = vmatpush1.bf16.msra.mxu0 %v1271_v19  ;;  %525 = vmatpush1.bf16.msra.mxu1 %v1272_v20 }
  0x14   :  { %413 = vmatprep.subr.bf16.mxu0 %v1273_v21  ;;  %526 = vmatprep.subr.bf16.mxu1 %v1275_v22 }
  0x17   :  { %414 = vmatpush1.bf16.msra.mxu0 %v1277_v23  ;;  %527 = vmatpush1.bf16.msra.mxu1 %v1278_v24 }
  0x18   :  { %415 = vmatprep.subr.bf16.mxu0 %v1279_v25  ;;  %528 = vmatprep.subr.bf16.mxu1 %v1281_v26 }
  0x1b   :  { %416 = vmatpush1.bf16.msra.mxu0 %v1283_v27  ;;  %529 = vmatpush1.bf16.msra.mxu1 %v1284_v28 }
  0x1c   :  { %417 = vmatprep.subr.bf16.mxu0 %v1285_v29  ;;  %530 = vmatprep.subr.bf16.mxu1 %v1287_v30 }
  0x1f   :  { %418 = vmatpush1.bf16.msra.mxu0 %v1289_v31  ;;  %531 = vmatpush1.bf16.msra.mxu1 %v1290_v32 }
  0x22   :  { %436 = vmatmul.mubr.bf16.vlgmr.msra.gmra.mrb[0].mxu0 %v1291_v33  ;;  %549 = vmatmul.mubr.bf16.vlgmr.msra.gmra.mrb[0].mxu1 %v1291_v33 }
  0x23   :  { %445 = vmatprep.mubr.bf16.mxu0 %v1299_v1  ;;  %558 = vmatprep.mubr.bf16.mxu1 %v1299_v1 }
  0x2a   :  { %446 = vmatmul.mubr.bf16.gmra.mrb[4].mxu0 %v1292_v34  ;;  %559 = vmatmul.mubr.bf16.gmra.mrb[4].mxu1 %v1292_v34 }
  0x2b   :  { %455 = vmatprep.mubr.bf16.mxu0 %v1299_v1  ;;  %568 = vmatprep.mubr.bf16.mxu1 %v1299_v1 }
  0x32   :  { %456 = vmatmul.mubr.bf16.gmra.mrb[8].mxu0 %v1293_v35  ;;  %569 = vmatmul.mubr.bf16.gmra.mrb[8].mxu1 %v1293_v35 }
  0x33   :  { %465 = vmatprep.mubr.bf16.mxu0 %v1299_v1  ;;  %578 = vmatprep.mubr.bf16.mxu1 %v1299_v1 }
  0x3a   :  { %466 = vmatmul.mubr.bf16.gmra.mrb[12].mxu0 %v1294_v36  ;;  %579 = vmatmul.mubr.bf16.gmra.mrb[12].mxu1 %v1294_v36 }
  0x3b   :  { %475 = vmatprep.mubr.bf16.mxu0 %v1299_v1  ;;  %588 = vmatprep.mubr.bf16.mxu1 %v1299_v1 }
  0x42   :  { %476 = vmatmul.mubr.bf16.gmra.mrb[16].mxu0 %v1295_v37  ;;  %589 = vmatmul.mubr.bf16.gmra.mrb[16].mxu1 %v1295_v37 }
  0x43   :  { %485 = vmatprep.mubr.bf16.mxu0 %v1299_v1  ;;  %598 = vmatprep.mubr.bf16.mxu1 %v1299_v1 }
  0x4a   :  { %486 = vmatmul.mubr.bf16.gmra.mrb[20].mxu0 %v1296_v38  ;;  %599 = vmatmul.mubr.bf16.gmra.mrb[20].mxu1 %v1296_v38 }
  0x4b   :  { %495 = vmatprep.mubr.bf16.mxu0 %v1299_v1  ;;  %608 = vmatprep.mubr.bf16.mxu1 %v1299_v1 }
  0x52   :  { %496 = vmatmul.mubr.bf16.gmra.mrb[24].mxu0 %v1297_v39  ;;  %609 = vmatmul.mubr.bf16.gmra.mrb[24].mxu1 %v1297_v39 }
  0x53   :  { %505 = vmatprep.mubr.bf16.mxu0 %v1299_v1  ;;  %618 = vmatprep.mubr.bf16.mxu1 %v1299_v1 }
  0x5a   :  { %506 = vmatmul.mubr.bf16.gmra.mrb[28].mxu0 %v1298_v40  ;;  %619 = vmatmul.mubr.bf16.gmra.mrb[28].mxu1 %v1298_v40 }
  0xf5   :  { %v437_v52 = vpop.f32.mrb[0].mxu0  ;;  %v550_v53 = vpop.f32.mrb[0].mxu1 }
  0xf6   :  { %v846_v54 = vadd.f32 %v1459_v48, %v437_v52  ;;  %v848_v55 = vadd.f32 %v1461_v49, %v550_v53  ;;  %v439_v56 = vpop.f32.mrb[1].mxu0  ;;  %v552_v57 = vpop.f32.mrb[1].mxu1 }
  0xf7   :  { %v847_v58 = vadd.f32 %v1463_v50, %v439_v56  ;;  %v849_v59 = vadd.f32 %v1465_v51, %v552_v57  ;;  %v441_v60 = vpop.f32.mrb[2].mxu0  ;;  %v554_v61 = vpop.f32.mrb[2].mxu1 }
  0xf8   :  { %v850_v62 = vadd.f32 %v1459_v48, %v441_v60  ;;  %v852_v63 = vadd.f32 %v1461_v49, %v554_v61  ;;  %v443_v0 = vpop.f32.mrb[3].mxu0  ;;  %v556_v1 = vpop.f32.mrb[3].mxu1 }
  0xf9   :  { %v1210_v2 = vpack.c.bf16 %v847_v58, %v846_v54  ;;  %v1211_v3 = vpack.c.bf16 %v849_v59, %v848_v55  ;;  %v851_v4 = vadd.f32 %v1463_v50, %v443_v0  ;;  %v853_v5 = vadd.f32 %v1465_v51, %v556_v1 }
  0xfb   :  { %1102 = vst [vmem:[%s1630_s3] sm:$0xff] %v1210_v2  ;;  %1103 = vst [vmem:[%s1630_s3 + $0x8] sm:$0xff] %v1211_v3  ;;  %v1212_v6 = vpack.c.bf16 %v851_v4, %v850_v62  ;;  %v1213_v7 = vpack.c.bf16 %v853_v5, %v852_v63 }
  0xfd   :  { %1104 = vst [vmem:[%s1630_s3 + $0x10] sm:$0xff] %v1212_v6  ;;  %1105 = vst [vmem:[%s1630_s3 + $0x18] sm:$0xff] %v1213_v7  ;;  %v447_v8 = vpop.f32.mrb[4].mxu0  ;;  %v560_v9 = vpop.f32.mrb[4].mxu1 }
  0xfe   :  { %v854_v10 = vadd.f32 %v1459_v48, %v447_v8  ;;  %v856_v11 = vadd.f32 %v1461_v49, %v560_v9  ;;  %v449_v12 = vpop.f32.mrb[5].mxu0  ;;  %v562_v13 = vpop.f32.mrb[5].mxu1 }
  0xff   :  { %v855_v14 = vadd.f32 %v1463_v50, %v449_v12  ;;  %v857_v15 = vadd.f32 %v1465_v51, %v562_v13  ;;  %v451_v16 = vpop.f32.mrb[6].mxu0  ;;  %v564_v17 = vpop.f32.mrb[6].mxu1 }
 0x100   :  { %v858_v18 = vadd.f32 %v1459_v48, %v451_v16  ;;  %v860_v19 = vadd.f32 %v1461_v49, %v564_v17  ;;  %v453_v20 = vpop.f32.mrb[7].mxu0  ;;  %v566_v21 = vpop.f32.mrb[7].mxu1 }
 0x101   :  { %v1214_v22 = vpack.c.bf16 %v855_v14, %v854_v10  ;;  %v1215_v23 = vpack.c.bf16 %v857_v15, %v856_v11  ;;  %v859_v24 = vadd.f32 %v1463_v50, %v453_v20  ;;  %v861_v25 = vadd.f32 %v1465_v51, %v566_v21 }
 0x103   :  { %1106 = vst [vmem:[%s1630_s3 + $0x20] sm:$0xff] %v1214_v22  ;;  %1107 = vst [vmem:[%s1630_s3 + $0x28] sm:$0xff] %v1215_v23  ;;  %v1216_v26 = vpack.c.bf16 %v859_v24, %v858_v18  ;;  %v1217_v27 = vpack.c.bf16 %v861_v25, %v860_v19 }
 0x105   :  { %1108 = vst [vmem:[%s1630_s3 + $0x30] sm:$0xff] %v1216_v26  ;;  %1109 = vst [vmem:[%s1630_s3 + $0x38] sm:$0xff] %v1217_v27  ;;  %v457_v28 = vpop.f32.mrb[8].mxu0  ;;  %v570_v29 = vpop.f32.mrb[8].mxu1 }
 0x106   :  { %v862_v30 = vadd.f32 %v1459_v48, %v457_v28  ;;  %v864_v31 = vadd.f32 %v1461_v49, %v570_v29  ;;  %v459_v32 = vpop.f32.mrb[9].mxu0  ;;  %v572_v33 = vpop.f32.mrb[9].mxu1 }
 0x107   :  { %v863_v34 = vadd.f32 %v1463_v50, %v459_v32  ;;  %v865_v35 = vadd.f32 %v1465_v51, %v572_v33  ;;  %v461_v36 = vpop.f32.mrb[10].mxu0  ;;  %v574_v37 = vpop.f32.mrb[10].mxu1 }
 0x108   :  { %v866_v38 = vadd.f32 %v1459_v48, %v461_v36  ;;  %v868_v39 = vadd.f32 %v1461_v49, %v574_v37  ;;  %v463_v40 = vpop.f32.mrb[11].mxu0  ;;  %v576_v41 = vpop.f32.mrb[11].mxu1 }
 0x109   :  { %v1218_v42 = vpack.c.bf16 %v863_v34, %v862_v30  ;;  %v1219_v43 = vpack.c.bf16 %v865_v35, %v864_v31  ;;  %v867_v44 = vadd.f32 %v1463_v50, %v463_v40  ;;  %v869_v45 = vadd.f32 %v1465_v51, %v576_v41 }
 0x10b   :  { %1110 = vst [vmem:[%s1630_s3 + $0x40] sm:$0xff] %v1218_v42  ;;  %1111 = vst [vmem:[%s1630_s3 + $0x48] sm:$0xff] %v1219_v43  ;;  %v1220_v46 = vpack.c.bf16 %v867_v44, %v866_v38  ;;  %v1221_v47 = vpack.c.bf16 %v869_v45, %v868_v39 }
 0x10d   :  { %1112 = vst [vmem:[%s1630_s3 + $0x50] sm:$0xff] %v1220_v46  ;;  %1113 = vst [vmem:[%s1630_s3 + $0x58] sm:$0xff] %v1221_v47  ;;  %v467_v52 = vpop.f32.mrb[12].mxu0  ;;  %v580_v53 = vpop.f32.mrb[12].mxu1 }
 0x10e   :  { %v870_v54 = vadd.f32 %v1459_v48, %v467_v52  ;;  %v872_v55 = vadd.f32 %v1461_v49, %v580_v53  ;;  %v469_v56 = vpop.f32.mrb[13].mxu0  ;;  %v582_v57 = vpop.f32.mrb[13].mxu1 }
 0x10f   :  { %v871_v58 = vadd.f32 %v1463_v50, %v469_v56  ;;  %v873_v59 = vadd.f32 %v1465_v51, %v582_v57  ;;  %v471_v60 = vpop.f32.mrb[14].mxu0  ;;  %v584_v61 = vpop.f32.mrb[14].mxu1 }
 0x110   :  { %v874_v62 = vadd.f32 %v1459_v48, %v471_v60  ;;  %v876_v63 = vadd.f32 %v1461_v49, %v584_v61  ;;  %v473_v0 = vpop.f32.mrb[15].mxu0  ;;  %v586_v1 = vpop.f32.mrb[15].mxu1 }
 0x111   :  { %v1222_v2 = vpack.c.bf16 %v871_v58, %v870_v54  ;;  %v1223_v3 = vpack.c.bf16 %v873_v59, %v872_v55  ;;  %v875_v4 = vadd.f32 %v1463_v50, %v473_v0  ;;  %v877_v5 = vadd.f32 %v1465_v51, %v586_v1 }
 0x113   :  { %1114 = vst [vmem:[%s1630_s3 + $0x60] sm:$0xff] %v1222_v2  ;;  %1115 = vst [vmem:[%s1630_s3 + $0x68] sm:$0xff] %v1223_v3  ;;  %v1224_v6 = vpack.c.bf16 %v875_v4, %v874_v62  ;;  %v1225_v7 = vpack.c.bf16 %v877_v5, %v876_v63 }
 0x115   :  { %1116 = vst [vmem:[%s1630_s3 + $0x70] sm:$0xff] %v1224_v6  ;;  %1117 = vst [vmem:[%s1630_s3 + $0x78] sm:$0xff] %v1225_v7  ;;  %v477_v8 = vpop.f32.mrb[16].mxu0  ;;  %v590_v9 = vpop.f32.mrb[16].mxu1 }
 0x116   :  { %v878_v10 = vadd.f32 %v1459_v48, %v477_v8  ;;  %v880_v11 = vadd.f32 %v1461_v49, %v590_v9  ;;  %v479_v12 = vpop.f32.mrb[17].mxu0  ;;  %v592_v13 = vpop.f32.mrb[17].mxu1 }
 0x117   :  { %v879_v14 = vadd.f32 %v1463_v50, %v479_v12  ;;  %v881_v15 = vadd.f32 %v1465_v51, %v592_v13  ;;  %v481_v16 = vpop.f32.mrb[18].mxu0  ;;  %v594_v17 = vpop.f32.mrb[18].mxu1 }
 0x118   :  { %v882_v18 = vadd.f32 %v1459_v48, %v481_v16  ;;  %v884_v19 = vadd.f32 %v1461_v49, %v594_v17  ;;  %v483_v20 = vpop.f32.mrb[19].mxu0  ;;  %v596_v21 = vpop.f32.mrb[19].mxu1 }
 0x119   :  { %v1226_v22 = vpack.c.bf16 %v879_v14, %v878_v10  ;;  %v1227_v23 = vpack.c.bf16 %v881_v15, %v880_v11  ;;  %v883_v24 = vadd.f32 %v1463_v50, %v483_v20  ;;  %v885_v25 = vadd.f32 %v1465_v51, %v596_v21 }
 0x11b   :  { %1118 = vst [vmem:[%s1630_s3 + $0x80] sm:$0xff] %v1226_v22  ;;  %1119 = vst [vmem:[%s1630_s3 + $0x88] sm:$0xff] %v1227_v23  ;;  %v1228_v26 = vpack.c.bf16 %v883_v24, %v882_v18  ;;  %v1229_v27 = vpack.c.bf16 %v885_v25, %v884_v19 }
 0x11d   :  { %1120 = vst [vmem:[%s1630_s3 + $0x90] sm:$0xff] %v1228_v26  ;;  %1121 = vst [vmem:[%s1630_s3 + $0x98] sm:$0xff] %v1229_v27  ;;  %v487_v28 = vpop.f32.mrb[20].mxu0  ;;  %v600_v29 = vpop.f32.mrb[20].mxu1 }
 0x11e   :  { %v886_v30 = vadd.f32 %v1459_v48, %v487_v28  ;;  %v888_v31 = vadd.f32 %v1461_v49, %v600_v29  ;;  %v489_v32 = vpop.f32.mrb[21].mxu0  ;;  %v602_v33 = vpop.f32.mrb[21].mxu1 }
 0x11f   :  { %v887_v34 = vadd.f32 %v1463_v50, %v489_v32  ;;  %v889_v35 = vadd.f32 %v1465_v51, %v602_v33  ;;  %v491_v36 = vpop.f32.mrb[22].mxu0  ;;  %v604_v37 = vpop.f32.mrb[22].mxu1 }
 0x120   :  { %v890_v38 = vadd.f32 %v1459_v48, %v491_v36  ;;  %v892_v39 = vadd.f32 %v1461_v49, %v604_v37  ;;  %v493_v40 = vpop.f32.mrb[23].mxu0  ;;  %v606_v41 = vpop.f32.mrb[23].mxu1 }
 0x121   :  { %v1230_v42 = vpack.c.bf16 %v887_v34, %v886_v30  ;;  %v1231_v43 = vpack.c.bf16 %v889_v35, %v888_v31  ;;  %v891_v44 = vadd.f32 %v1463_v50, %v493_v40  ;;  %v893_v45 = vadd.f32 %v1465_v51, %v606_v41 }
 0x123   :  { %1122 = vst [vmem:[%s1630_s3 + $0xa0] sm:$0xff] %v1230_v42  ;;  %1123 = vst [vmem:[%s1630_s3 + $0xa8] sm:$0xff] %v1231_v43  ;;  %v1232_v46 = vpack.c.bf16 %v891_v44, %v890_v38  ;;  %v1233_v47 = vpack.c.bf16 %v893_v45, %v892_v39 }
 0x125   :  { %1124 = vst [vmem:[%s1630_s3 + $0xb0] sm:$0xff] %v1232_v46  ;;  %1125 = vst [vmem:[%s1630_s3 + $0xb8] sm:$0xff] %v1233_v47  ;;  %v497_v52 = vpop.f32.mrb[24].mxu0  ;;  %v610_v53 = vpop.f32.mrb[24].mxu1 }
 0x126   :  { %v894_v54 = vadd.f32 %v1459_v48, %v497_v52  ;;  %v896_v55 = vadd.f32 %v1461_v49, %v610_v53  ;;  %v499_v56 = vpop.f32.mrb[25].mxu0  ;;  %v612_v57 = vpop.f32.mrb[25].mxu1 }
 0x127   :  { %v895_v58 = vadd.f32 %v1463_v50, %v499_v56  ;;  %v897_v59 = vadd.f32 %v1465_v51, %v612_v57  ;;  %v501_v60 = vpop.f32.mrb[26].mxu0  ;;  %v614_v61 = vpop.f32.mrb[26].mxu1 }
 0x128   :  { %v898_v62 = vadd.f32 %v1459_v48, %v501_v60  ;;  %v900_v63 = vadd.f32 %v1461_v49, %v614_v61  ;;  %v503_v0 = vpop.f32.mrb[27].mxu0  ;;  %v616_v1 = vpop.f32.mrb[27].mxu1 }
 0x129   :  { %v1234_v2 = vpack.c.bf16 %v895_v58, %v894_v54  ;;  %v1235_v3 = vpack.c.bf16 %v897_v59, %v896_v55  ;;  %v899_v4 = vadd.f32 %v1463_v50, %v503_v0  ;;  %v901_v5 = vadd.f32 %v1465_v51, %v616_v1 }
 0x12b   :  { %1126 = vst [vmem:[%s1630_s3 + $0xc0] sm:$0xff] %v1234_v2  ;;  %1127 = vst [vmem:[%s1630_s3 + $0xc8] sm:$0xff] %v1235_v3  ;;  %v1236_v6 = vpack.c.bf16 %v899_v4, %v898_v62  ;;  %v1237_v7 = vpack.c.bf16 %v901_v5, %v900_v63 }
 0x12d   :  { %1128 = vst [vmem:[%s1630_s3 + $0xd0] sm:$0xff] %v1236_v6  ;;  %1129 = vst [vmem:[%s1630_s3 + $0xd8] sm:$0xff] %v1237_v7  ;;  %v507_v8 = vpop.f32.mrb[28].mxu0  ;;  %v620_v9 = vpop.f32.mrb[28].mxu1 }
 0x12e   :  { %v902_v10 = vadd.f32 %v1459_v48, %v507_v8  ;;  %v904_v11 = vadd.f32 %v1461_v49, %v620_v9  ;;  %v509_v12 = vpop.f32.mrb[29].mxu0  ;;  %v622_v13 = vpop.f32.mrb[29].mxu1 }
 0x12f   :  { %v903_v14 = vadd.f32 %v1463_v50, %v509_v12  ;;  %v905_v15 = vadd.f32 %v1465_v51, %v622_v13  ;;  %v511_v16 = vpop.f32.mrb[30].mxu0  ;;  %v624_v17 = vpop.f32.mrb[30].mxu1 }
 0x130   :  { %v906_v18 = vadd.f32 %v1459_v48, %v511_v16  ;;  %v908_v19 = vadd.f32 %v1461_v49, %v624_v17  ;;  %v513_v20 = vpop.f32.mrb[31].mxu0  ;;  %v626_v21 = vpop.f32.mrb[31].mxu1 }
 0x131   :  { %v1238_v22 = vpack.c.bf16 %v903_v14, %v902_v10  ;;  %v1239_v23 = vpack.c.bf16 %v905_v15, %v904_v11  ;;  %v907_v24 = vadd.f32 %v1463_v50, %v513_v20  ;;  %v909_v25 = vadd.f32 %v1465_v51, %v626_v21 }
 0x133   :  { %1130 = vst [vmem:[%s1630_s3 + $0xe0] sm:$0xff] %v1238_v22  ;;  %1131 = vst [vmem:[%s1630_s3 + $0xe8] sm:$0xff] %v1239_v23  ;;  %v1240_v26 = vpack.c.bf16 %v907_v24, %v906_v18  ;;  %v1241_v48 = vpack.c.bf16 %v909_v25, %v908_v19 }
 0x135   :  { %1132 = vst [vmem:[%s1630_s3 + $0xf0] sm:$0xff] %v1240_v26  ;;  %1133 = vst [vmem:[%s1630_s3 + $0xf8] sm:$0xff] %v1241_v48 }

// kernel: resunet_fwd.97
= control target key start
LH: loop header
LB: loop body
LE: loop exit
PB: predicated region body
PF: predicated region fallthrough
CT: control target
= control target key end

     0   :  { %s1512_s12 = smov 0   ;;  %s1514_s13 = smov 0   ;;  %s1704_s0 = inlined_call_operand.vmem [shape: bf16[512,128], index: 0, kind: input, shape index: {}]   ;;  %s1705_s1 = inlined_call_operand.vmem [shape: bf16[128,128], index: 1, kind: input, shape index: {}]   ;;  %s1706_s2 = inlined_call_operand.vmem [shape: bf16[512,128], index: 2, kind: output, shape index: {0}]   ;;  %s1707_s3 = inlined_call_operand.vmem [shape: f32[16,128], index: 3, kind: output, shape index: {1}]  }
   0x1   :  { %s1516_s14 = smov 0  }
   0x2 LB: > { %s26_s15 = sadd.s32 1, %s1486_s13  ;;  %p1141_p0 = scmp.ge.s32.totalorder %s1490_s14, 1  ;;  %s1490_s14 = sphi %s1516_s14, %s14_s14   ;;  %s1486_s13 = sphi %s1514_s13, %s1709_s13   ;;  %s1482_s12 = sphi %s1512_s12, %s1708_s12  }
   0x3   : > { %p28_p1 = scmp.ge.s32.totalorder %s26_s15, 2  ;;  %p169_p2 = scmp.lt.s32.totalorder %s1490_s14, 3 }
   0x5   : > { %s1711_s15 = smov (%p28_p1, %s26_s15), 0  ;;  %p170_p3 = pnand %p1141_p0, %p169_p2 }
   0x6   : > { %v1444_v0 = vld [vmem:[%s1705_s1] sm:$0xff] (!%p170_p3)   ;;  %s1142_s18 = sshll.u32 (!%p170_p3), %s1482_s12, 5  ;;  %v1445_v1 = vld [vmem:[%s1705_s1 + $0x8] sm:$0xff] (!%p170_p3)   ;;  %v1446_v2 = vld [vmem:[%s1705_s1 + $0x10] sm:$0xff] (!%p170_p3)   ;;  %p226_p5 = scmp.lt.s32.totalorder (!%p170_p3), %s1482_s12, 1  ;;  %vm1017_vm0 = vcmask (!%p170_p3), 1040384  }
   0x7   : > { %173 = sbr.rel (%p170_p3) target bundleno = 333 (0x14d), region = 28  ;;  %p206_p4 = scmp.lt.s32.totalorder (!%p170_p3), %s1142_s18, 63  ;;  %1356 = vmatprep.subr.bf16.mxu0 (!%p170_p3), %v1444_v0  ;;  %1404 = vmatprep.subr.bf16.mxu1 (!%p170_p3), %v1444_v0  ;;  %v1447_v3 = vld [vmem:[%s1705_s1 + $0x18] sm:$0xff] (!%p170_p3)   ;;  %v1448_v5 = vld [vmem:[%s1705_s1 + $0x20] sm:$0xff] (!%p170_p3)   ;;  %v1449_v6 = vld [vmem:[%s1705_s1 + $0x28] sm:$0xff] (!%p170_p3)   ;;  %vm1019_vm1 = vcmask (!%p170_p3), 1041408  }
   0x8   : > { %1357 = vmatpush3.bf16.msra.mxu0 (!%p170_p3), %v1444_v0  ;;  %1412 = vmatpush3.bf16.msra.mxu1 (!%p170_p3), %v1444_v0  ;;  %v1450_v8 = vld [vmem:[%s1705_s1 + $0x30] sm:$0xff] (!%p170_p3)   ;;  %v1451_v9 = vld [vmem:[%s1705_s1 + $0x38] sm:$0xff] (!%p170_p3)  }
   0x9   : > { %1358 = vmatprep.subr.bf16.mxu0 (!%p170_p3), %v1445_v1  ;;  %1405 = vmatprep.subr.bf16.mxu1 (!%p170_p3), %v1445_v1 }
   0xc   : > { %1359 = vmatpush3.bf16.msra.mxu0 (!%p170_p3), %v1445_v1  ;;  %1413 = vmatpush3.bf16.msra.mxu1 (!%p170_p3), %v1445_v1 }
   0xd   : > { %1360 = vmatprep.subr.bf16.mxu0 (!%p170_p3), %v1446_v2  ;;  %1406 = vmatprep.subr.bf16.mxu1 (!%p170_p3), %v1446_v2 }
   0xe   : > { %s1713_s18 = smov (!%p206_p4, %s1142_s18), 63  ;;  %s1715_s12 = smov (!%p226_p5, %s1482_s12), 1 }
   0xf   : > { %s1143_s23 = sshll.u32 %s1713_s18, 2  ;;  %s1146_s17 = sshll.u32 %s1715_s12, 3 }
  0x10   : > { %s1550_s26 = scalar_lea.vmem %s1704_s0, %s1143_s23  ;;  %1361 = vmatpush3.bf16.msra.mxu0 %v1446_v2  ;;  %1414 = vmatpush3.bf16.msra.mxu1 %v1446_v2  ;;  %s1592_s16 = scalar_lea.vmem %s1706_s2, %s1143_s23 }
  0x11   : > { %v1452_v4 = vld [vmem:[%s1550_s26] sm:$0xff]   ;;  %1362 = vmatprep.subr.bf16.mxu0 %v1447_v3  ;;  %1407 = vmatprep.subr.bf16.mxu1 %v1447_v3  ;;  %v1453_v10 = vld [vmem:[%s1550_s26 + $0x8] sm:$0xff]   ;;  %v1454_v12 = vld [vmem:[%s1550_s26 + $0x10] sm:$0xff]   ;;  %s229_s20 = scalar_lea.vmem %s1707_s3, %s1146_s17 }
  0x12   : > { %1372 = vmatprep.mubr.bf16.mxu0 %v1452_v4  ;;  %v1460_v7 = vld [vmem:[%s1550_s26 + $0x40] sm:$0xff]   ;;  %v1461_v11 = vld [vmem:[%s1550_s26 + $0x48] sm:$0xff]   ;;  %v1462_v13 = vld [vmem:[%s1550_s26 + $0x50] sm:$0xff]  }
  0x13   : > { %1388 = vmatprep.mubr.bf16.mxu1 %v1460_v7  ;;  %v1455_v14 = vld [vmem:[%s1550_s26 + $0x18] sm:$0xff]   ;;  %v1456_v16 = vld [vmem:[%s1550_s26 + $0x20] sm:$0xff]   ;;  %v1457_v18 = vld [vmem:[%s1550_s26 + $0x28] sm:$0xff]  }
  0x14   : > { %1363 = vmatpush3.bf16.msra.mxu0 %v1447_v3  ;;  %1415 = vmatpush3.bf16.msra.mxu1 %v1447_v3  ;;  %v1463_v15 = vld [vmem:[%s1550_s26 + $0x58] sm:$0xff]   ;;  %v1464_v17 = vld [vmem:[%s1550_s26 + $0x60] sm:$0xff]   ;;  %v1465_v19 = vld [vmem:[%s1550_s26 + $0x68] sm:$0xff]  }
  0x15   : > { %1364 = vmatprep.subr.bf16.mxu0 %v1448_v5  ;;  %1408 = vmatprep.subr.bf16.mxu1 %v1448_v5  ;;  %v1458_v20 = vld [vmem:[%s1550_s26 + $0x30] sm:$0xff]   ;;  %v1459_v22 = vld [vmem:[%s1550_s26 + $0x38] sm:$0xff]  }
  0x16   : > { %v1466_v21 = vld [vmem:[%s1550_s26 + $0x70] sm:$0xff]   ;;  %v1467_v23 = vld [vmem:[%s1550_s26 + $0x78] sm:$0xff]  }
  0x18   : > { %1365 = vmatpush3.bf16.msra.mxu0 %v1448_v5  ;;  %1416 = vmatpush3.bf16.msra.mxu1 %v1448_v5 }
  0x19   : > { %1366 = vmatprep.subr.bf16.mxu0 %v1449_v6  ;;  %1409 = vmatprep.subr.bf16.mxu1 %v1449_v6 }
  0x1c   : > { %1367 = vmatpush3.bf16.msra.mxu0 %v1449_v6  ;;  %1417 = vmatpush3.bf16.msra.mxu1 %v1449_v6 }
  0x1d   : > { %1368 = vmatprep.subr.bf16.mxu0 %v1450_v8  ;;  %1410 = vmatprep.subr.bf16.mxu1 %v1450_v8 }
  0x20   : > { %1369 = vmatpush3.bf16.msra.mxu0 %v1450_v8  ;;  %1418 = vmatpush3.bf16.msra.mxu1 %v1450_v8 }
  0x21   : > { %1370 = vmatprep.subr.bf16.mxu0 %v1451_v9  ;;  %1411 = vmatprep.subr.bf16.mxu1 %v1451_v9 }
  0x24   : > { %1371 = vmatpush3.bf16.msra.mxu0 %v1451_v9  ;;  %1419 = vmatpush3.bf16.msra.mxu1 %v1451_v9 }
  0x27   : > { %1373 = vmatmul.mubr.bf16.vlgmr.msra.gmra.mrb[0].mxu0 %v1453_v10  ;;  %1389 = vmatmul.mubr.bf16.vlgmr.msra.gmra.mrb[0].mxu1 %v1461_v11 }
  0x28   : > { %1376 = vmatprep.mubr.bf16.mxu0 %v1454_v12  ;;  %1392 = vmatprep.mubr.bf16.mxu1 %v1462_v13 }
  0x2f   : > { %1377 = vmatmul.mubr.bf16.gmra.mrb[4].mxu0 %v1455_v14  ;;  %1393 = vmatmul.mubr.bf16.gmra.mrb[4].mxu1 %v1463_v15 }
  0x30   : > { %1380 = vmatprep.mubr.bf16.mxu0 %v1456_v16  ;;  %1396 = vmatprep.mubr.bf16.mxu1 %v1464_v17 }
  0x37   : > { %1381 = vmatmul.mubr.bf16.gmra.mrb[8].mxu0 %v1457_v18  ;;  %1397 = vmatmul.mubr.bf16.gmra.mrb[8].mxu1 %v1465_v19 }
  0x38   : > { %1384 = vmatprep.mubr.bf16.mxu0 %v1458_v20  ;;  %1400 = vmatprep.mubr.bf16.mxu1 %v1466_v21 }
  0x3f   : > { %1385 = vmatmul.mubr.bf16.gmra.mrb[12].mxu0 %v1459_v22  ;;  %1401 = vmatmul.mubr.bf16.gmra.mrb[12].mxu1 %v1467_v23 }
  0xfa   : > { %v1374_v24 = vpop.f32.mrb[0].mxu0  ;;  %v1583_v25 = vpop.f32.mrb[0].mxu1 }
  0xfb   : > { %v525_v26 = vpop.f32.mrb[1].mxu0  ;;  %v1585_v27 = vpop.f32.mrb[1].mxu1  ;;  %v950_v39 = vmul.f32 %v1374_v24, %v1374_v24 }
  0xfc   : > { %v1375_v28 = vpop.f32.mrb[2].mxu0  ;;  %v1594_v29 = vpop.f32.mrb[2].mxu1  ;;  %v948_v30 = vmul.f32 %v525_v26, %v525_v26 }
  0xfd   : > { %v1245_v31 = vpack.c.bf16 %v1375_v28, %v1374_v24  ;;  %v528_v32 = vpop.f32.mrb[3].mxu0  ;;  %v1285_v33 = vpack.c.bf16 %v1594_v29, %v1583_v25  ;;  %v1598_v34 = vpop.f32.mrb[3].mxu1  ;;  %v951_v42 = vmul.f32 %v1375_v28, %v1375_v28 }
  0xfe   : > { %v1240_v35 = vpack.c.bf16 %v528_v32, %v525_v26  ;;  %v911_v36 = vadd.f32 %v528_v32, %v525_v26  ;;  %v949_v37 = vmul.f32 %v528_v32, %v528_v32  ;;  %v1280_v38 = vpack.c.bf16 %v1598_v34, %v1585_v27 }
  0xff   : > { %1317 = vst [vmem:[%s1592_s16 + $0x8] sm:$0xff] %v1245_v31   ;;  %1325 = vst [vmem:[%s1592_s16 + $0x48] sm:$0xff] %v1285_v33  }
 0x100   : > { %1241 = vst [vmem:[%s1592_s16] sm:$0xff] %v1240_v35   ;;  %v912_v40 = vadd.f32 %v1374_v24, %v911_v36  ;;  %v980_v41 = vadd.f32 %v949_v37, %v948_v30  ;;  %1324 = vst [vmem:[%s1592_s16 + $0x40] sm:$0xff] %v1280_v38  }
 0x102   : > { %v981_v43 = vadd.f32 %v980_v41, %v950_v39  ;;  %v1378_v44 = vpop.f32.mrb[4].mxu0  ;;  %v913_v45 = vadd.f32 %v1375_v28, %v912_v40  ;;  %v1606_v46 = vpop.f32.mrb[4].mxu1 }
 0x103   : > { %v541_v47 = vpop.f32.mrb[5].mxu0  ;;  %v1608_v48 = vpop.f32.mrb[5].mxu1  ;;  %v954_v63 = vmul.f32 %v1378_v44, %v1378_v44 }
 0x104   : > { %v914_v49 = vadd.f32 %v913_v45, %v541_v47  ;;  %v952_v50 = vmul.f32 %v541_v47, %v541_v47  ;;  %v982_v51 = vadd.f32 %v981_v43, %v951_v42  ;;  %v1379_v52 = vpop.f32.mrb[6].mxu0  ;;  %v1610_v53 = vpop.f32.mrb[6].mxu1 }
 0x105   : > { %v1255_v54 = vpack.c.bf16 %v1379_v52, %v1378_v44  ;;  %v544_v55 = vpop.f32.mrb[7].mxu0  ;;  %v1295_v56 = vpack.c.bf16 %v1610_v53, %v1606_v46  ;;  %v1614_v57 = vpop.f32.mrb[7].mxu1  ;;  %v955_v2 = vmul.f32 %v1379_v52, %v1379_v52 }
 0x106   : > { %v983_v58 = vadd.f32 %v982_v51, %v952_v50  ;;  %v1250_v59 = vpack.c.bf16 %v544_v55, %v541_v47  ;;  %v915_v60 = vadd.f32 %v914_v49, %v544_v55  ;;  %v953_v61 = vmul.f32 %v544_v55, %v544_v55 }
 0x107   : > { %1319 = vst [vmem:[%s1592_s16 + $0x18] sm:$0xff] %v1255_v54   ;;  %1327 = vst [vmem:[%s1592_s16 + $0x58] sm:$0xff] %v1295_v56   ;;  %v1290_v62 = vpack.c.bf16 %v1614_v57, %v1608_v48 }
 0x108   : > { %1318 = vst [vmem:[%s1592_s16 + $0x10] sm:$0xff] %v1250_v59   ;;  %v916_v0 = vadd.f32 %v1378_v44, %v915_v60  ;;  %v984_v1 = vadd.f32 %v983_v58, %v953_v61  ;;  %v964_v61 = vmul.f32 %v1585_v27, %v1585_v27 }
 0x109   : > { %1326 = vst [vmem:[%s1592_s16 + $0x50] sm:$0xff] %v1290_v62  }
 0x10a   : > { %v985_v3 = vadd.f32 %v984_v1, %v954_v63  ;;  %v1382_v4 = vpop.f32.mrb[8].mxu0  ;;  %v917_v5 = vadd.f32 %v1379_v52, %v916_v0  ;;  %v1622_v6 = vpop.f32.mrb[8].mxu1 }
 0x10b   : > { %v557_v7 = vpop.f32.mrb[9].mxu0  ;;  %v1624_v8 = vpop.f32.mrb[9].mxu1  ;;  %v958_v23 = vmul.f32 %v1382_v4, %v1382_v4 }
 0x10c   : > { %v918_v9 = vadd.f32 %v917_v5, %v557_v7  ;;  %v956_v10 = vmul.f32 %v557_v7, %v557_v7  ;;  %v986_v11 = vadd.f32 %v985_v3, %v955_v2  ;;  %v1383_v12 = vpop.f32.mrb[10].mxu0  ;;  %v1626_v13 = vpop.f32.mrb[10].mxu1  ;;  %v965_v2 = vmul.f32 %v1598_v34, %v1598_v34 }
 0x10d   : > { %v1265_v14 = vpack.c.bf16 %v1383_v12, %v1382_v4  ;;  %v560_v15 = vpop.f32.mrb[11].mxu0  ;;  %v1305_v16 = vpack.c.bf16 %v1626_v13, %v1622_v6  ;;  %v1630_v17 = vpop.f32.mrb[11].mxu1  ;;  %v959_v28 = vmul.f32 %v1383_v12, %v1383_v12  ;;  %v966_v3 = vmul.f32 %v1583_v25, %v1583_v25 }
 0x10e   : > { %v987_v18 = vadd.f32 %v986_v11, %v956_v10  ;;  %v1260_v19 = vpack.c.bf16 %v560_v15, %v557_v7  ;;  %v919_v20 = vadd.f32 %v918_v9, %v560_v15  ;;  %v957_v21 = vmul.f32 %v560_v15, %v560_v15 }
 0x10f   : > { %1321 = vst [vmem:[%s1592_s16 + $0x28] sm:$0xff] %v1265_v14   ;;  %1329 = vst [vmem:[%s1592_s16 + $0x68] sm:$0xff] %v1305_v16   ;;  %v1300_v22 = vpack.c.bf16 %v1630_v17, %v1624_v8  ;;  %v967_v7 = vmul.f32 %v1594_v29, %v1594_v29  ;;  %v969_v15 = vmul.f32 %v1614_v57, %v1614_v57 }
 0x110   : > { %1320 = vst [vmem:[%s1592_s16 + $0x20] sm:$0xff] %v1260_v19   ;;  %v920_v24 = vadd.f32 %v1382_v4, %v919_v20  ;;  %v988_v26 = vadd.f32 %v987_v18, %v957_v21 }
 0x111   : > { %1328 = vst [vmem:[%s1592_s16 + $0x60] sm:$0xff] %v1300_v22  }
 0x112   : > { %v989_v30 = vadd.f32 %v988_v26, %v958_v23  ;;  %v1386_v31 = vpop.f32.mrb[12].mxu0  ;;  %v921_v32 = vadd.f32 %v1383_v12, %v920_v24  ;;  %v1638_v33 = vpop.f32.mrb[12].mxu1  ;;  %v973_v24 = vmul.f32 %v1630_v17, %v1630_v17 }
 0x113   : > { %v573_v35 = vpop.f32.mrb[13].mxu0  ;;  %v637_v36 = vpop.f32.mrb[13].mxu1  ;;  %v962_v54 = vmul.f32 %v1386_v31, %v1386_v31 }
 0x114   : > { %v922_v37 = vadd.f32 %v921_v32, %v573_v35  ;;  %v960_v38 = vmul.f32 %v573_v35, %v573_v35  ;;  %v990_v39 = vadd.f32 %v989_v30, %v959_v28  ;;  %v1387_v40 = vpop.f32.mrb[14].mxu0  ;;  %v1640_v41 = vpop.f32.mrb[14].mxu1 }
 0x115   : > { %v1275_v42 = vpack.c.bf16 %v1387_v40, %v1386_v31  ;;  %v576_v43 = vpop.f32.mrb[15].mxu0  ;;  %v1315_v44 = vpack.c.bf16 %v1640_v41, %v1638_v33  ;;  %v640_v45 = vpop.f32.mrb[15].mxu1  ;;  %v963_v58 = vmul.f32 %v1387_v40, %v1387_v40 }
 0x116   : > { %v991_v47 = vadd.f32 %v990_v39, %v960_v38  ;;  %v1270_v49 = vpack.c.bf16 %v576_v43, %v573_v35  ;;  %v923_v50 = vadd.f32 %v922_v37, %v576_v43  ;;  %v961_v51 = vmul.f32 %v576_v43, %v576_v43 }
 0x117   : > { %1323 = vst [vmem:[%s1592_s16 + $0x38] sm:$0xff] %v1275_v42   ;;  %1331 = vst [vmem:[%s1592_s16 + $0x78] sm:$0xff] %v1315_v44   ;;  %v1310_v52 = vpack.c.bf16 %v640_v45, %v637_v36  ;;  %v978_v39 = vmul.f32 %v1638_v33, %v1638_v33  ;;  %v979_v42 = vmul.f32 %v1640_v41, %v1640_v41 }
 0x118   : > { %1322 = vst [vmem:[%s1592_s16 + $0x30] sm:$0xff] %v1270_v49   ;;  %v924_v55 = vadd.f32 %v1386_v31, %v923_v50  ;;  %v992_v56 = vadd.f32 %v991_v47, %v961_v51  ;;  %v976_v31 = vmul.f32 %v637_v36, %v637_v36 }
 0x119   : > { %1330 = vst [vmem:[%s1592_s16 + $0x70] sm:$0xff] %v1310_v52  }
 0x11a   : > { %v993_v59 = vadd.f32 %v992_v56, %v962_v54  ;;  %v925_v60 = vadd.f32 %v1387_v40, %v924_v55 }
 0x11c   : > { %v926_v62 = vadd.f32 %v925_v60, %v1585_v27  ;;  %v994_v63 = vadd.f32 %v993_v59, %v963_v58  ;;  %v968_v27 = vmul.f32 %v1608_v48, %v1608_v48 }
 0x11e   : > { %v995_v0 = vadd.f32 %v994_v63, %v964_v61  ;;  %v927_v1 = vadd.f32 %v926_v62, %v1598_v34 }
 0x120   : > { %v928_v4 = vadd.f32 %v1583_v25, %v927_v1  ;;  %v996_v5 = vadd.f32 %v995_v0, %v965_v2  ;;  %v970_v25 = vmul.f32 %v1606_v46, %v1606_v46 }
 0x122   : > { %v997_v9 = vadd.f32 %v996_v5, %v966_v3  ;;  %v929_v10 = vadd.f32 %v1594_v29, %v928_v4  ;;  %v971_v29 = vmul.f32 %v1610_v53, %v1610_v53 }
 0x124   : > { %v930_v11 = vadd.f32 %v929_v10, %v1608_v48  ;;  %v998_v12 = vadd.f32 %v997_v9, %v967_v7  ;;  %v972_v48 = vmul.f32 %v1624_v8, %v1624_v8 }
 0x126   : > { %v999_v14 = vadd.f32 %v998_v12, %v968_v27  ;;  %v931_v34 = vadd.f32 %v930_v11, %v1614_v57 }
 0x128   : > { %v932_v16 = vadd.f32 %v1606_v46, %v931_v34  ;;  %v1000_v18 = vadd.f32 %v999_v14, %v969_v15  ;;  %v974_v46 = vmul.f32 %v1622_v6, %v1622_v6 }
 0x12a   : > { %v1001_v19 = vadd.f32 %v1000_v18, %v970_v25  ;;  %v933_v20 = vadd.f32 %v1610_v53, %v932_v16  ;;  %v975_v53 = vmul.f32 %v1626_v13, %v1626_v13 }
 0x12c   : > { %v934_v21 = vadd.f32 %v933_v20, %v1624_v8  ;;  %v1002_v22 = vadd.f32 %v1001_v19, %v971_v29 }
 0x12e   : > { %v1003_v23 = vadd.f32 %v1002_v22, %v972_v48  ;;  %v935_v57 = vadd.f32 %v934_v21, %v1630_v17  ;;  %v977_v17 = vmul.f32 %v640_v45, %v640_v45 }
 0x130   : > { %v936_v26 = vadd.f32 %v1622_v6, %v935_v57  ;;  %v1004_v28 = vadd.f32 %v1003_v23, %v973_v24 }
 0x132   : > { %v1005_v30 = vadd.f32 %v1004_v28, %v974_v46  ;;  %v937_v8 = vadd.f32 %v1626_v13, %v936_v26 }
 0x134   : > { %v938_v32 = vadd.f32 %v937_v8, %v637_v36  ;;  %v1006_v35 = vadd.f32 %v1005_v30, %v975_v53 }
 0x136   : > { %v1007_v37 = vadd.f32 %v1006_v35, %v976_v31  ;;  %v939_v38 = vadd.f32 %v938_v32, %v640_v45 }
 0x138   : > { %v940_v6 = vadd.f32 %v1638_v33, %v939_v38  ;;  %v1008_v40 = vadd.f32 %v1007_v37, %v977_v17 }
 0x13a   : > { %v941_v43 = vadd.f32 %v1640_v41, %v940_v6  ;;  %v1009_v44 = vadd.f32 %v1008_v40, %v978_v39 }
 0x13c   : > { %v942_v13 = vrot.slane %v941_v43, 4  ;;  %v1010_v47 = vadd.f32 %v1009_v44, %v979_v42 }
 0x13e   : > { %v943_v36 = vadd.f32 %v942_v13, %v941_v43  ;;  %v1011_v49 = vrot.slane %v1010_v47, 4 }
 0x140   : > { %v944_v50 = vrot.slane %v943_v36, 2  ;;  %v1012_v51 = vadd.f32 %v1011_v49, %v1010_v47 }
 0x142   : > { %v945_v45 = vadd.f32 %v944_v50, %v943_v36  ;;  %v1013_v52 = vrot.slane %v1012_v51, 2 }
 0x144   : > { %v946_v54 = vrot.slane %v945_v45, 1  ;;  %v1014_v55 = vadd.f32 %v1013_v52, %v1012_v51 }
 0x146   : > { %v1015_v33 = vrot.slane %v1014_v55, 1  ;;  %v947_v56 = vadd.f32 %v946_v54, %v945_v45 }
 0x148   : > { %v1016_v58 = vadd.f32 %v1015_v33, %v1014_v55 }
 0x14a   : > { %v1018_v41 = vsel %vm1017_vm0, %v947_v56, %v1016_v58 }
 0x14b   : > { %v1020_v59 = vsel %vm1019_vm1, %v1018_v41, 0.0 }
 0x14c   : > { %1021 = vst [vmem:[%s229_s20] sm:$0xff] %v1020_v59 }
 0x14d PF: > { %s14_s14 = sadd.s32 1, %s1490_s14   ;;  %s1708_s12 = smov %s1486_s13 }
 0x14e   : > { %p11_p6 = scmp.ge.s32.totalorder %s14_s14, 4   ;;  %s1709_s13 = smov %s1711_s15 }
 0x150   :  { %13 = sbr.rel (!%p11_p6) target bundleno = 2 (0x2), region = 81 }

// kernel: resunet_fwd.98
= control target key start
LH: loop header
LB: loop body
LE: loop exit
PB: predicated region body
PF: predicated region fallthrough
CT: control target
= control target key end

     0   :  { %s1438_s0 = inlined_call_operand.vmem [shape: bf16[512,128], index: 0, kind: input, shape index: {}]   ;;  %s1439_s1 = inlined_call_operand.vmem [shape: f32[1,128], index: 1, kind: input, shape index: {}]   ;;  %s1440_s2 = inlined_call_operand.vmem [shape: f32[1,128], index: 2, kind: input, shape index: {}]   ;;  %s1441_s3 = inlined_call_operand.vmem [shape: bf16[512,128], index: 3, kind: output, shape index: {}]  }
   0x1   :  { %v739_v0 = vld [vmem:[%s1438_s0] sm:$0xff]   ;;  %v1026_v4 = vld [vmem:[%s1438_s0 + $0x8] sm:$0xff]   ;;  %v1027_v5 = vld [vmem:[%s1438_s0 + $0x10] sm:$0xff]  }
   0x2   :  { %v1114_v1 = vld [vmem:[%s1439_s1] ss:$0 sm:$0xff]  ;;  %v740_v2 = vunpack.c.l.bf16 %v739_v0  ;;  %v741_v3 = vunpack.c.h.bf16 %v739_v0  ;;  %v1028_v6 = vld [vmem:[%s1438_s0 + $0x18] sm:$0xff]   ;;  %v744_v8 = vunpack.c.l.bf16 %v1026_v4  ;;  %v745_v9 = vunpack.c.h.bf16 %v1026_v4  ;;  %v1030_v25 = vld [vmem:[%s1438_s0 + $0x28] sm:$0xff]  }
   0x3   :  { %v1128_v7 = vld [vmem:[%s1440_s2] ss:$0 sm:$0xff]  ;;  %v748_v10 = vunpack.c.l.bf16 %v1027_v5  ;;  %v749_v11 = vunpack.c.h.bf16 %v1027_v5  ;;  %v752_v14 = vunpack.c.l.bf16 %v1028_v6  ;;  %v753_v15 = vunpack.c.h.bf16 %v1028_v6  ;;  %v1031_v30 = vld [vmem:[%s1438_s0 + $0x30] sm:$0xff]   ;;  %v1032_v35 = vld [vmem:[%s1438_s0 + $0x38] sm:$0xff]  }
   0x4   :  { %v149_v12 = vmul.f32 %v740_v2, %v1114_v1  ;;  %v150_v13 = vmul.f32 %v741_v3, %v1114_v1  ;;  %v151_v16 = vmul.f32 %v744_v8, %v1114_v1  ;;  %v152_v17 = vmul.f32 %v745_v9, %v1114_v1  ;;  %v1029_v20 = vld [vmem:[%s1438_s0 + $0x20] sm:$0xff]   ;;  %v1034_v57 = vld [vmem:[%s1438_s0 + $0x48] sm:$0xff]   ;;  %v1035_v62 = vld [vmem:[%s1438_s0 + $0x50] sm:$0xff]  }
   0x5   :  { %v153_v18 = vmul.f32 %v748_v10, %v1114_v1  ;;  %v154_v19 = vmul.f32 %v749_v11, %v1114_v1  ;;  %v155_v23 = vmul.f32 %v752_v14, %v1114_v1  ;;  %v156_v24 = vmul.f32 %v753_v15, %v1114_v1  ;;  %v1033_v48 = vld [vmem:[%s1438_s0 + $0x40] sm:$0xff]   ;;  %v1036_v9 = vld [vmem:[%s1438_s0 + $0x58] sm:$0xff]  }
   0x6   :  { %v220_v21 = vadd.f32 %v1128_v7, %v149_v12  ;;  %v221_v22 = vadd.f32 %v1128_v7, %v150_v13  ;;  %v222_v26 = vadd.f32 %v1128_v7, %v151_v16  ;;  %v223_v27 = vadd.f32 %v1128_v7, %v152_v17  ;;  %v1037_v14 = vld [vmem:[%s1438_s0 + $0x60] sm:$0xff]  }
   0x7   :  { %v224_v28 = vadd.f32 %v1128_v7, %v153_v18  ;;  %v225_v29 = vadd.f32 %v1128_v7, %v154_v19  ;;  %v226_v32 = vadd.f32 %v1128_v7, %v155_v23  ;;  %v227_v33 = vadd.f32 %v1128_v7, %v156_v24 }
   0x8   :  { %v869_v31 = vpack.c.bf16 %v221_v22, %v220_v21  ;;  %v756_v34 = vunpack.c.l.bf16 %v1029_v20  ;;  %v874_v36 = vpack.c.bf16 %v223_v27, %v222_v26  ;;  %v757_v38 = vunpack.c.h.bf16 %v1029_v20  ;;  %v1038_v27 = vld [vmem:[%s1438_s0 + $0x68] sm:$0xff]  }
   0x9   :  { %v879_v37 = vpack.c.bf16 %v225_v29, %v224_v28  ;;  %v760_v39 = vunpack.c.l.bf16 %v1030_v25  ;;  %v884_v40 = vpack.c.bf16 %v227_v33, %v226_v32  ;;  %v761_v42 = vunpack.c.h.bf16 %v1030_v25 }
   0xa   :  { %870 = vst [vmem:[%s1441_s3] sm:$0xff] %v869_v31   ;;  %v157_v41 = vmul.f32 %v756_v34, %v1114_v1  ;;  %v764_v43 = vunpack.c.l.bf16 %v1031_v30  ;;  %1057 = vst [vmem:[%s1441_s3 + $0x8] sm:$0xff] %v874_v36   ;;  %v158_v44 = vmul.f32 %v757_v38, %v1114_v1  ;;  %v765_v46 = vunpack.c.h.bf16 %v1031_v30  ;;  %v1039_v36 = vld [vmem:[%s1438_s0 + $0x70] sm:$0xff]  }
   0xb   :  { %1058 = vst [vmem:[%s1441_s3 + $0x10] sm:$0xff] %v879_v37   ;;  %v159_v45 = vmul.f32 %v760_v39, %v1114_v1  ;;  %v768_v47 = vunpack.c.l.bf16 %v1032_v35  ;;  %1059 = vst [vmem:[%s1441_s3 + $0x18] sm:$0xff] %v884_v40   ;;  %v160_v50 = vmul.f32 %v761_v42, %v1114_v1  ;;  %v769_v52 = vunpack.c.h.bf16 %v1032_v35 }
   0xc   :  { %v228_v49 = vadd.f32 %v1128_v7, %v157_v41  ;;  %v161_v51 = vmul.f32 %v764_v43, %v1114_v1  ;;  %v229_v53 = vadd.f32 %v1128_v7, %v158_v44  ;;  %v162_v55 = vmul.f32 %v765_v46, %v1114_v1  ;;  %v1040_v41 = vld [vmem:[%s1438_s0 + $0x78] sm:$0xff]  }
   0xd   :  { %v230_v54 = vadd.f32 %v1128_v7, %v159_v45  ;;  %v163_v56 = vmul.f32 %v768_v47, %v1114_v1  ;;  %v231_v58 = vadd.f32 %v1128_v7, %v160_v50  ;;  %v164_v60 = vmul.f32 %v769_v52, %v1114_v1  ;;  %v1041_v50 = vld [vmem:[%s1438_s0 + $0x80] sm:$0xff]  }
   0xe   :  { %v232_v59 = vadd.f32 %v1128_v7, %v161_v51  ;;  %v772_v61 = vunpack.c.l.bf16 %v1033_v48  ;;  %v889_v63 = vpack.c.bf16 %v229_v53, %v228_v49  ;;  %v233_v0 = vadd.f32 %v1128_v7, %v162_v55 }
   0xf   :  { %v234_v2 = vadd.f32 %v1128_v7, %v163_v56  ;;  %v773_v3 = vunpack.c.h.bf16 %v1033_v48  ;;  %v894_v4 = vpack.c.bf16 %v231_v58, %v230_v54  ;;  %v235_v5 = vadd.f32 %v1128_v7, %v164_v60 }
  0x10   :  { %v165_v6 = vmul.f32 %v772_v61, %v1114_v1  ;;  %v776_v8 = vunpack.c.l.bf16 %v1034_v57  ;;  %1060 = vst [vmem:[%s1441_s3 + $0x20] sm:$0xff] %v889_v63   ;;  %v899_v10 = vpack.c.bf16 %v233_v0, %v232_v59  ;;  %v777_v12 = vunpack.c.h.bf16 %v1034_v57  ;;  %v1042_v59 = vld [vmem:[%s1438_s0 + $0x88] sm:$0xff]   ;;  %v1043_v0 = vld [vmem:[%s1438_s0 + $0x90] sm:$0xff]  }
  0x11   :  { %v166_v11 = vmul.f32 %v773_v3, %v1114_v1  ;;  %v780_v13 = vunpack.c.l.bf16 %v1035_v62  ;;  %1061 = vst [vmem:[%s1441_s3 + $0x28] sm:$0xff] %v894_v4   ;;  %v904_v15 = vpack.c.bf16 %v235_v5, %v234_v2  ;;  %v781_v18 = vunpack.c.h.bf16 %v1035_v62 }
  0x12   :  { %v236_v16 = vadd.f32 %v1128_v7, %v165_v6  ;;  %v167_v17 = vmul.f32 %v776_v8, %v1114_v1  ;;  %1062 = vst [vmem:[%s1441_s3 + $0x30] sm:$0xff] %v899_v10   ;;  %v168_v20 = vmul.f32 %v777_v12, %v1114_v1  ;;  %v784_v22 = vunpack.c.l.bf16 %v1036_v9 }
  0x13   :  { %v237_v19 = vadd.f32 %v1128_v7, %v166_v11  ;;  %v169_v21 = vmul.f32 %v780_v13, %v1114_v1  ;;  %1063 = vst [vmem:[%s1441_s3 + $0x38] sm:$0xff] %v904_v15   ;;  %v170_v24 = vmul.f32 %v781_v18, %v1114_v1  ;;  %v785_v25 = vunpack.c.h.bf16 %v1036_v9  ;;  %v1044_v11 = vld [vmem:[%s1438_s0 + $0x98] sm:$0xff]  }
  0x14   :  { %v238_v23 = vadd.f32 %v1128_v7, %v167_v17  ;;  %v788_v26 = vunpack.c.l.bf16 %v1037_v14  ;;  %v239_v29 = vadd.f32 %v1128_v7, %v168_v20  ;;  %v171_v31 = vmul.f32 %v784_v22, %v1114_v1 }
  0x15   :  { %v909_v28 = vpack.c.bf16 %v237_v19, %v236_v16  ;;  %v240_v30 = vadd.f32 %v1128_v7, %v169_v21  ;;  %v241_v32 = vadd.f32 %v1128_v7, %v170_v24  ;;  %v172_v33 = vmul.f32 %v785_v25, %v1114_v1  ;;  %v1045_v16 = vld [vmem:[%s1438_s0 + $0xa0] sm:$0xff]  }
  0x16   :  { %v789_v34 = vunpack.c.h.bf16 %v1037_v14  ;;  %v173_v35 = vmul.f32 %v788_v26, %v1114_v1  ;;  %v914_v37 = vpack.c.bf16 %v239_v29, %v238_v23  ;;  %v242_v38 = vadd.f32 %v1128_v7, %v171_v31  ;;  %v1046_v29 = vld [vmem:[%s1438_s0 + $0xa8] sm:$0xff]  }
  0x17   :  { %1064 = vst [vmem:[%s1441_s3 + $0x40] sm:$0xff] %v909_v28   ;;  %v792_v39 = vunpack.c.l.bf16 %v1038_v27  ;;  %v793_v40 = vunpack.c.h.bf16 %v1038_v27  ;;  %v919_v42 = vpack.c.bf16 %v241_v32, %v240_v30  ;;  %v243_v43 = vadd.f32 %v1128_v7, %v172_v33 }
  0x18   :  { %v174_v44 = vmul.f32 %v789_v34, %v1114_v1  ;;  %v244_v45 = vadd.f32 %v1128_v7, %v173_v35  ;;  %1065 = vst [vmem:[%s1441_s3 + $0x48] sm:$0xff] %v914_v37   ;;  %v796_v48 = vunpack.c.l.bf16 %v1039_v36  ;;  %v797_v49 = vunpack.c.h.bf16 %v1039_v36 }
  0x19   :  { %v175_v46 = vmul.f32 %v792_v39, %v1114_v1  ;;  %v176_v47 = vmul.f32 %v793_v40, %v1114_v1  ;;  %1066 = vst [vmem:[%s1441_s3 + $0x50] sm:$0xff] %v919_v42   ;;  %v924_v51 = vpack.c.bf16 %v243_v43, %v242_v38  ;;  %v800_v53 = vunpack.c.l.bf16 %v1040_v41  ;;  %v1047_v38 = vld [vmem:[%s1438_s0 + $0xb0] sm:$0xff]   ;;  %v1048_v43 = vld [vmem:[%s1438_s0 + $0xb8] sm:$0xff]  }
  0x1a   :  { %v245_v52 = vadd.f32 %v1128_v7, %v174_v44  ;;  %v801_v54 = vunpack.c.h.bf16 %v1040_v41  ;;  %v177_v57 = vmul.f32 %v796_v48, %v1114_v1  ;;  %v178_v58 = vmul.f32 %v797_v49, %v1114_v1 }
  0x1b   :  { %v246_v55 = vadd.f32 %v1128_v7, %v175_v46  ;;  %v247_v56 = vadd.f32 %v1128_v7, %v176_v47  ;;  %1067 = vst [vmem:[%s1441_s3 + $0x58] sm:$0xff] %v924_v51   ;;  %v179_v61 = vmul.f32 %v800_v53, %v1114_v1  ;;  %v804_v63 = vunpack.c.l.bf16 %v1041_v50 }
  0x1c   :  { %v929_v60 = vpack.c.bf16 %v245_v52, %v244_v45  ;;  %v180_v62 = vmul.f32 %v801_v54, %v1114_v1  ;;  %v248_v3 = vadd.f32 %v1128_v7, %v177_v57  ;;  %v249_v4 = vadd.f32 %v1128_v7, %v178_v58  ;;  %v1049_v52 = vld [vmem:[%s1438_s0 + $0xc0] sm:$0xff]  }
  0x1d   :  { %v934_v2 = vpack.c.bf16 %v247_v56, %v246_v55  ;;  %v805_v5 = vunpack.c.h.bf16 %v1041_v50  ;;  %v250_v6 = vadd.f32 %v1128_v7, %v179_v61  ;;  %v181_v9 = vmul.f32 %v804_v63, %v1114_v1  ;;  %v1050_v61 = vld [vmem:[%s1438_s0 + $0xc8] sm:$0xff]  }
  0x1e   :  { %1068 = vst [vmem:[%s1441_s3 + $0x60] sm:$0xff] %v929_v60   ;;  %v251_v8 = vadd.f32 %v1128_v7, %v180_v62  ;;  %v808_v10 = vunpack.c.l.bf16 %v1042_v59  ;;  %v939_v12 = vpack.c.bf16 %v249_v4, %v248_v3  ;;  %v809_v14 = vunpack.c.h.bf16 %v1042_v59  ;;  %v1051_v3 = vld [vmem:[%s1438_s0 + $0xd0] sm:$0xff]  }
  0x1f   :  { %1069 = vst [vmem:[%s1441_s3 + $0x68] sm:$0xff] %v934_v2   ;;  %v182_v13 = vmul.f32 %v805_v5, %v1114_v1  ;;  %v812_v15 = vunpack.c.l.bf16 %v1043_v0  ;;  %v252_v18 = vadd.f32 %v1128_v7, %v181_v9  ;;  %v813_v20 = vunpack.c.h.bf16 %v1043_v0 }
  0x20   :  { %v944_v17 = vpack.c.bf16 %v251_v8, %v250_v6  ;;  %v183_v19 = vmul.f32 %v808_v10, %v1114_v1  ;;  %1070 = vst [vmem:[%s1441_s3 + $0x70] sm:$0xff] %v939_v12   ;;  %v184_v22 = vmul.f32 %v809_v14, %v1114_v1  ;;  %v816_v24 = vunpack.c.l.bf16 %v1044_v11 }
  0x21   :  { %v253_v21 = vadd.f32 %v1128_v7, %v182_v13  ;;  %v185_v23 = vmul.f32 %v812_v15, %v1114_v1  ;;  %v186_v26 = vmul.f32 %v813_v20, %v1114_v1  ;;  %v817_v27 = vunpack.c.h.bf16 %v1044_v11  ;;  %v1052_v13 = vld [vmem:[%s1438_s0 + $0xd8] sm:$0xff]  }
  0x22   :  { %1071 = vst [vmem:[%s1441_s3 + $0x78] sm:$0xff] %v944_v17   ;;  %v254_v25 = vadd.f32 %v1128_v7, %v183_v19  ;;  %v820_v28 = vunpack.c.l.bf16 %v1045_v16  ;;  %v255_v31 = vadd.f32 %v1128_v7, %v184_v22  ;;  %v187_v33 = vmul.f32 %v816_v24, %v1114_v1 }
  0x23   :  { %v949_v30 = vpack.c.bf16 %v253_v21, %v252_v18  ;;  %v256_v32 = vadd.f32 %v1128_v7, %v185_v23  ;;  %v257_v34 = vadd.f32 %v1128_v7, %v186_v26  ;;  %v188_v35 = vmul.f32 %v817_v27, %v1114_v1  ;;  %v1053_v18 = vld [vmem:[%s1438_s0 + $0xe0] sm:$0xff]  }
  0x24   :  { %v821_v36 = vunpack.c.h.bf16 %v1045_v16  ;;  %v189_v37 = vmul.f32 %v820_v28, %v1114_v1  ;;  %v954_v39 = vpack.c.bf16 %v255_v31, %v254_v25  ;;  %v258_v40 = vadd.f32 %v1128_v7, %v187_v33  ;;  %v1054_v31 = vld [vmem:[%s1438_s0 + $0xe8] sm:$0xff]  }
  0x25   :  { %1072 = vst [vmem:[%s1441_s3 + $0x80] sm:$0xff] %v949_v30   ;;  %v824_v41 = vunpack.c.l.bf16 %v1046_v29  ;;  %v825_v42 = vunpack.c.h.bf16 %v1046_v29  ;;  %v959_v44 = vpack.c.bf16 %v257_v34, %v256_v32  ;;  %v259_v45 = vadd.f32 %v1128_v7, %v188_v35 }
  0x26   :  { %v190_v46 = vmul.f32 %v821_v36, %v1114_v1  ;;  %v260_v47 = vadd.f32 %v1128_v7, %v189_v37  ;;  %1073 = vst [vmem:[%s1441_s3 + $0x88] sm:$0xff] %v954_v39   ;;  %v828_v50 = vunpack.c.l.bf16 %v1047_v38  ;;  %v829_v51 = vunpack.c.h.bf16 %v1047_v38 }
  0x27   :  { %v191_v48 = vmul.f32 %v824_v41, %v1114_v1  ;;  %v192_v49 = vmul.f32 %v825_v42, %v1114_v1  ;;  %1074 = vst [vmem:[%s1441_s3 + $0x90] sm:$0xff] %v959_v44   ;;  %v964_v53 = vpack.c.bf16 %v259_v45, %v258_v40  ;;  %v832_v55 = vunpack.c.l.bf16 %v1048_v43  ;;  %v1055_v40 = vld [vmem:[%s1438_s0 + $0xf0] sm:$0xff]   ;;  %v1056_v45 = vld [vmem:[%s1438_s0 + $0xf8] sm:$0xff]  }
  0x28   :  { %v261_v54 = vadd.f32 %v1128_v7, %v190_v46  ;;  %v833_v56 = vunpack.c.h.bf16 %v1048_v43  ;;  %v193_v59 = vmul.f32 %v828_v50, %v1114_v1  ;;  %v194_v60 = vmul.f32 %v829_v51, %v1114_v1 }
  0x29   :  { %v262_v57 = vadd.f32 %v1128_v7, %v191_v48  ;;  %v263_v58 = vadd.f32 %v1128_v7, %v192_v49  ;;  %1075 = vst [vmem:[%s1441_s3 + $0x98] sm:$0xff] %v964_v53   ;;  %v195_v63 = vmul.f32 %v832_v55, %v1114_v1  ;;  %v836_v2 = vunpack.c.l.bf16 %v1049_v52 }
  0x2a   :  { %v969_v62 = vpack.c.bf16 %v261_v54, %v260_v47  ;;  %v196_v0 = vmul.f32 %v833_v56, %v1114_v1  ;;  %v264_v5 = vadd.f32 %v1128_v7, %v193_v59  ;;  %v265_v6 = vadd.f32 %v1128_v7, %v194_v60 }
  0x2b   :  { %v974_v4 = vpack.c.bf16 %v263_v58, %v262_v57  ;;  %v837_v8 = vunpack.c.h.bf16 %v1049_v52  ;;  %v266_v9 = vadd.f32 %v1128_v7, %v195_v63  ;;  %v197_v11 = vmul.f32 %v836_v2, %v1114_v1 }
  0x2c   :  { %1076 = vst [vmem:[%s1441_s3 + $0xa0] sm:$0xff] %v969_v62   ;;  %v267_v10 = vadd.f32 %v1128_v7, %v196_v0  ;;  %v840_v12 = vunpack.c.l.bf16 %v1050_v61  ;;  %v979_v14 = vpack.c.bf16 %v265_v6, %v264_v5  ;;  %v841_v16 = vunpack.c.h.bf16 %v1050_v61 }
  0x2d   :  { %1077 = vst [vmem:[%s1441_s3 + $0xa8] sm:$0xff] %v974_v4   ;;  %v198_v15 = vmul.f32 %v837_v8, %v1114_v1  ;;  %v844_v17 = vunpack.c.l.bf16 %v1051_v3  ;;  %v268_v20 = vadd.f32 %v1128_v7, %v197_v11  ;;  %v845_v22 = vunpack.c.h.bf16 %v1051_v3 }
  0x2e   :  { %v984_v19 = vpack.c.bf16 %v267_v10, %v266_v9  ;;  %v199_v21 = vmul.f32 %v840_v12, %v1114_v1  ;;  %1078 = vst [vmem:[%s1441_s3 + $0xb0] sm:$0xff] %v979_v14   ;;  %v200_v24 = vmul.f32 %v841_v16, %v1114_v1  ;;  %v848_v26 = vunpack.c.l.bf16 %v1052_v13 }
  0x2f   :  { %v269_v23 = vadd.f32 %v1128_v7, %v198_v15  ;;  %v201_v25 = vmul.f32 %v844_v17, %v1114_v1  ;;  %v202_v28 = vmul.f32 %v845_v22, %v1114_v1  ;;  %v849_v29 = vunpack.c.h.bf16 %v1052_v13 }
  0x30   :  { %1079 = vst [vmem:[%s1441_s3 + $0xb8] sm:$0xff] %v984_v19   ;;  %v270_v27 = vadd.f32 %v1128_v7, %v199_v21  ;;  %v852_v30 = vunpack.c.l.bf16 %v1053_v18  ;;  %v271_v33 = vadd.f32 %v1128_v7, %v200_v24  ;;  %v203_v35 = vmul.f32 %v848_v26, %v1114_v1 }
  0x31   :  { %v989_v32 = vpack.c.bf16 %v269_v23, %v268_v20  ;;  %v272_v34 = vadd.f32 %v1128_v7, %v201_v25  ;;  %v273_v36 = vadd.f32 %v1128_v7, %v202_v28  ;;  %v204_v37 = vmul.f32 %v849_v29, %v1114_v1 }
  0x32   :  { %v853_v38 = vunpack.c.h.bf16 %v1053_v18  ;;  %v205_v39 = vmul.f32 %v852_v30, %v1114_v1  ;;  %v994_v41 = vpack.c.bf16 %v271_v33, %v270_v27  ;;  %v274_v42 = vadd.f32 %v1128_v7, %v203_v35 }
  0x33   :  { %1080 = vst [vmem:[%s1441_s3 + $0xc0] sm:$0xff] %v989_v32   ;;  %v856_v43 = vunpack.c.l.bf16 %v1054_v31  ;;  %v857_v44 = vunpack.c.h.bf16 %v1054_v31  ;;  %v999_v46 = vpack.c.bf16 %v273_v36, %v272_v34  ;;  %v275_v47 = vadd.f32 %v1128_v7, %v204_v37 }
  0x34   :  { %v206_v48 = vmul.f32 %v853_v38, %v1114_v1  ;;  %v276_v49 = vadd.f32 %v1128_v7, %v205_v39  ;;  %1081 = vst [vmem:[%s1441_s3 + $0xc8] sm:$0xff] %v994_v41   ;;  %v860_v52 = vunpack.c.l.bf16 %v1055_v40  ;;  %v861_v53 = vunpack.c.h.bf16 %v1055_v40 }
  0x35   :  { %v207_v50 = vmul.f32 %v856_v43, %v1114_v1  ;;  %v208_v51 = vmul.f32 %v857_v44, %v1114_v1  ;;  %1082 = vst [vmem:[%s1441_s3 + $0xd0] sm:$0xff] %v999_v46   ;;  %v1004_v54 = vpack.c.bf16 %v275_v47, %v274_v42  ;;  %v864_v56 = vunpack.c.l.bf16 %v1056_v45 }
  0x36   :  { %v277_v55 = vadd.f32 %v1128_v7, %v206_v48  ;;  %v865_v57 = vunpack.c.h.bf16 %v1056_v45  ;;  %v209_v60 = vmul.f32 %v860_v52, %v1114_v1  ;;  %v210_v61 = vmul.f32 %v861_v53, %v1114_v1 }
  0x37   :  { %v278_v58 = vadd.f32 %v1128_v7, %v207_v50  ;;  %v279_v59 = vadd.f32 %v1128_v7, %v208_v51  ;;  %1083 = vst [vmem:[%s1441_s3 + $0xd8] sm:$0xff] %v1004_v54   ;;  %v211_v63 = vmul.f32 %v864_v56, %v1114_v1 }
  0x38   :  { %v1009_v62 = vpack.c.bf16 %v277_v55, %v276_v49  ;;  %v212_v0 = vmul.f32 %v865_v57, %v1114_v1  ;;  %v280_v3 = vadd.f32 %v1128_v7, %v209_v60  ;;  %v281_v4 = vadd.f32 %v1128_v7, %v210_v61 }
  0x39   :  { %v1014_v2 = vpack.c.bf16 %v279_v59, %v278_v58  ;;  %v282_v5 = vadd.f32 %v1128_v7, %v211_v63 }
  0x3a   :  { %1084 = vst [vmem:[%s1441_s3 + $0xe0] sm:$0xff] %v1009_v62   ;;  %v283_v6 = vadd.f32 %v1128_v7, %v212_v0  ;;  %v1019_v8 = vpack.c.bf16 %v281_v4, %v280_v3 }
  0x3b   :  { %1085 = vst [vmem:[%s1441_s3 + $0xe8] sm:$0xff] %v1014_v2  }
  0x3c   :  { %v1024_v9 = vpack.c.bf16 %v283_v6, %v282_v5  ;;  %1086 = vst [vmem:[%s1441_s3 + $0xf0] sm:$0xff] %v1019_v8  }
  0x3e   :  { %1087 = vst [vmem:[%s1441_s3 + $0xf8] sm:$0xff] %v1024_v9  }

// kernel: resunet_fwd.107
= control target key start
LH: loop header
LB: loop body
LE: loop exit
PB: predicated region body
PF: predicated region fallthrough
CT: control target
= control target key end

     0   :  { %s1111_s12 = smov 0   ;;  %s1113_s13 = smov 0   ;;  %s1261_s0 = inlined_call_operand.vmem [shape: bf16[512,128], index: 0, kind: input, shape index: {}]   ;;  %s1262_s1 = inlined_call_operand.vmem [shape: bf16[128,128], index: 1, kind: input, shape index: {}]   ;;  %s1263_s2 = inlined_call_operand.vmem [shape: f32[1,128], index: 2, kind: input, shape index: {}]   ;;  %s1264_s3 = inlined_call_operand.vmem [shape: f32[512,128], index: 3, kind: output, shape index: {}]  }
   0x1   :  { %s1115_s14 = smov 0  }
   0x2 LB: > { %s25_s15 = sadd.s32 1, %s1085_s13  ;;  %p899_p0 = scmp.ge.s32.totalorder %s1089_s14, 1  ;;  %s1089_s14 = sphi %s1115_s14, %s13_s14   ;;  %s1085_s13 = sphi %s1113_s13, %s1266_s13   ;;  %s1081_s12 = sphi %s1111_s12, %s1265_s12  }
   0x3   : > { %p27_p1 = scmp.ge.s32.totalorder %s25_s15, 2  ;;  %p166_p2 = scmp.lt.s32.totalorder %s1089_s14, 3 }
   0x5   : > { %s1268_s15 = smov (%p27_p1, %s25_s15), 0  ;;  %p167_p3 = pnand %p899_p0, %p166_p2 }
   0x6   : > { %v1043_v0 = vld [vmem:[%s1262_s1] sm:$0xff] (!%p167_p3)   ;;  %s900_s18 = sshll.u32 (!%p167_p3), %s1081_s12, 5  ;;  %v1044_v1 = vld [vmem:[%s1262_s1 + $0x8] sm:$0xff] (!%p167_p3)   ;;  %v1045_v2 = vld [vmem:[%s1262_s1 + $0x10] sm:$0xff] (!%p167_p3)  }
   0x7   : > { %170 = sbr.rel (%p167_p3) target bundleno = 281 (0x119), region = 32  ;;  %p199_p4 = scmp.lt.s32.totalorder (!%p167_p3), %s900_s18, 63  ;;  %955 = vmatprep.subr.bf16.mxu0 (!%p167_p3), %v1043_v0  ;;  %1003 = vmatprep.subr.bf16.mxu1 (!%p167_p3), %v1043_v0  ;;  %v1046_v3 = vld [vmem:[%s1262_s1 + $0x18] sm:$0xff] (!%p167_p3)   ;;  %v1047_v6 = vld [vmem:[%s1262_s1 + $0x20] sm:$0xff] (!%p167_p3)   ;;  %v1048_v7 = vld [vmem:[%s1262_s1 + $0x28] sm:$0xff] (!%p167_p3)  }
   0x8   : > { %956 = vmatpush3.bf16.msra.mxu0 (!%p167_p3), %v1043_v0  ;;  %1011 = vmatpush3.bf16.msra.mxu1 (!%p167_p3), %v1043_v0  ;;  %v1049_v8 = vld [vmem:[%s1262_s1 + $0x30] sm:$0xff] (!%p167_p3)   ;;  %v1050_v9 = vld [vmem:[%s1262_s1 + $0x38] sm:$0xff] (!%p167_p3)   ;;  %v1181_v24 = vld [vmem:[%s1263_s2] ss:$0 sm:$0xff] (!%p167_p3) }
   0x9   : > { %957 = vmatprep.subr.bf16.mxu0 (!%p167_p3), %v1044_v1  ;;  %1004 = vmatprep.subr.bf16.mxu1 (!%p167_p3), %v1044_v1 }
   0xc   : > { %958 = vmatpush3.bf16.msra.mxu0 (!%p167_p3), %v1044_v1  ;;  %1012 = vmatpush3.bf16.msra.mxu1 (!%p167_p3), %v1044_v1 }
   0xd   : > { %959 = vmatprep.subr.bf16.mxu0 (!%p167_p3), %v1045_v2  ;;  %1005 = vmatprep.subr.bf16.mxu1 (!%p167_p3), %v1045_v2 }
   0xe   : > { %s1270_s18 = smov (!%p199_p4, %s900_s18), 63 }
   0xf   : > { %s901_s23 = sshll.u32 %s1270_s18, 2  ;;  %s903_s10 = sshll.u32 %s1270_s18, 3 }
  0x10   : > { %s1144_s26 = scalar_lea.vmem %s1261_s0, %s901_s23  ;;  %960 = vmatpush3.bf16.msra.mxu0 %v1045_v2  ;;  %1013 = vmatpush3.bf16.msra.mxu1 %v1045_v2  ;;  %s1186_s19 = scalar_lea.vmem %s1264_s3, %s903_s10 }
  0x11   : > { %v1051_v4 = vld [vmem:[%s1144_s26] sm:$0xff]   ;;  %961 = vmatprep.subr.bf16.mxu0 %v1046_v3  ;;  %1006 = vmatprep.subr.bf16.mxu1 %v1046_v3  ;;  %v1053_v10 = vld [vmem:[%s1144_s26 + $0x8] sm:$0xff]   ;;  %v1055_v12 = vld [vmem:[%s1144_s26 + $0x10] sm:$0xff]  }
  0x12   : > { %v1052_v5 = vld [vmem:[%s1144_s26 + $0x40] sm:$0xff]   ;;  %971 = vmatprep.mubr.bf16.mxu0 %v1051_v4  ;;  %v1054_v11 = vld [vmem:[%s1144_s26 + $0x48] sm:$0xff]   ;;  %v1056_v13 = vld [vmem:[%s1144_s26 + $0x50] sm:$0xff]  }
  0x13   : > { %987 = vmatprep.mubr.bf16.mxu1 %v1052_v5  ;;  %v1057_v14 = vld [vmem:[%s1144_s26 + $0x18] sm:$0xff]   ;;  %v1059_v16 = vld [vmem:[%s1144_s26 + $0x20] sm:$0xff]   ;;  %v1061_v18 = vld [vmem:[%s1144_s26 + $0x28] sm:$0xff]  }
  0x14   : > { %962 = vmatpush3.bf16.msra.mxu0 %v1046_v3  ;;  %1014 = vmatpush3.bf16.msra.mxu1 %v1046_v3  ;;  %v1058_v15 = vld [vmem:[%s1144_s26 + $0x58] sm:$0xff]   ;;  %v1060_v17 = vld [vmem:[%s1144_s26 + $0x60] sm:$0xff]   ;;  %v1062_v19 = vld [vmem:[%s1144_s26 + $0x68] sm:$0xff]  }
  0x15   : > { %963 = vmatprep.subr.bf16.mxu0 %v1047_v6  ;;  %1007 = vmatprep.subr.bf16.mxu1 %v1047_v6  ;;  %v1063_v20 = vld [vmem:[%s1144_s26 + $0x30] sm:$0xff]   ;;  %v1065_v22 = vld [vmem:[%s1144_s26 + $0x38] sm:$0xff]  }
  0x16   : > { %v1064_v21 = vld [vmem:[%s1144_s26 + $0x70] sm:$0xff]   ;;  %v1066_v23 = vld [vmem:[%s1144_s26 + $0x78] sm:$0xff]  }
  0x18   : > { %964 = vmatpush3.bf16.msra.mxu0 %v1047_v6  ;;  %1015 = vmatpush3.bf16.msra.mxu1 %v1047_v6 }
  0x19   : > { %965 = vmatprep.subr.bf16.mxu0 %v1048_v7  ;;  %1008 = vmatprep.subr.bf16.mxu1 %v1048_v7 }
  0x1c   : > { %966 = vmatpush3.bf16.msra.mxu0 %v1048_v7  ;;  %1016 = vmatpush3.bf16.msra.mxu1 %v1048_v7 }
  0x1d   : > { %967 = vmatprep.subr.bf16.mxu0 %v1049_v8  ;;  %1009 = vmatprep.subr.bf16.mxu1 %v1049_v8 }
  0x20   : > { %968 = vmatpush3.bf16.msra.mxu0 %v1049_v8  ;;  %1017 = vmatpush3.bf16.msra.mxu1 %v1049_v8 }
  0x21   : > { %969 = vmatprep.subr.bf16.mxu0 %v1050_v9  ;;  %1010 = vmatprep.subr.bf16.mxu1 %v1050_v9 }
  0x24   : > { %970 = vmatpush3.bf16.msra.mxu0 %v1050_v9  ;;  %1018 = vmatpush3.bf16.msra.mxu1 %v1050_v9 }
  0x27   : > { %972 = vmatmul.mubr.bf16.vlgmr.msra.gmra.mrb[0].mxu0 %v1053_v10  ;;  %988 = vmatmul.mubr.bf16.vlgmr.msra.gmra.mrb[0].mxu1 %v1054_v11 }
  0x28   : > { %975 = vmatprep.mubr.bf16.mxu0 %v1055_v12  ;;  %991 = vmatprep.mubr.bf16.mxu1 %v1056_v13 }
  0x2f   : > { %976 = vmatmul.mubr.bf16.gmra.mrb[4].mxu0 %v1057_v14  ;;  %992 = vmatmul.mubr.bf16.gmra.mrb[4].mxu1 %v1058_v15 }
  0x30   : > { %979 = vmatprep.mubr.bf16.mxu0 %v1059_v16  ;;  %995 = vmatprep.mubr.bf16.mxu1 %v1060_v17 }
  0x37   : > { %980 = vmatmul.mubr.bf16.gmra.mrb[8].mxu0 %v1061_v18  ;;  %996 = vmatmul.mubr.bf16.gmra.mrb[8].mxu1 %v1062_v19 }
  0x38   : > { %983 = vmatprep.mubr.bf16.mxu0 %v1063_v20  ;;  %999 = vmatprep.mubr.bf16.mxu1 %v1064_v21 }
  0x3f   : > { %984 = vmatmul.mubr.bf16.gmra.mrb[12].mxu0 %v1065_v22  ;;  %1000 = vmatmul.mubr.bf16.gmra.mrb[12].mxu1 %v1066_v23 }
  0xfa   : > { %v973_v25 = vpop.f32.mrb[0].mxu0  ;;  %v989_v26 = vpop.f32.mrb[0].mxu1 }
  0xfb   : > { %v749_v27 = vadd.f32 %v973_v25, %v1181_v24  ;;  %v765_v28 = vadd.f32 %v989_v26, %v1181_v24  ;;  %v514_v29 = vpop.f32.mrb[1].mxu0  ;;  %v578_v30 = vpop.f32.mrb[1].mxu1 }
  0xfc   : > { %v747_v31 = vadd.f32 %v1181_v24, %v514_v29  ;;  %v763_v32 = vadd.f32 %v1181_v24, %v578_v30  ;;  %v974_v33 = vpop.f32.mrb[2].mxu0  ;;  %v990_v34 = vpop.f32.mrb[2].mxu1 }
  0xfd   : > { %781 = vst [vmem:[%s1186_s19 + $0x10] sm:$0xff] %v749_v27  ;;  %797 = vst [vmem:[%s1186_s19 + $0x90] sm:$0xff] %v765_v28  ;;  %v750_v35 = vadd.f32 %v974_v33, %v1181_v24  ;;  %v766_v36 = vadd.f32 %v990_v34, %v1181_v24  ;;  %v517_v37 = vpop.f32.mrb[3].mxu0  ;;  %v581_v38 = vpop.f32.mrb[3].mxu1 }
  0xfe   : > { %779 = vst [vmem:[%s1186_s19] sm:$0xff] %v747_v31  ;;  %795 = vst [vmem:[%s1186_s19 + $0x80] sm:$0xff] %v763_v32  ;;  %v748_v39 = vadd.f32 %v1181_v24, %v517_v37  ;;  %v764_v40 = vadd.f32 %v1181_v24, %v581_v38 }
  0xff   : > { %782 = vst [vmem:[%s1186_s19 + $0x18] sm:$0xff] %v750_v35  ;;  %798 = vst [vmem:[%s1186_s19 + $0x98] sm:$0xff] %v766_v36 }
 0x100   : > { %780 = vst [vmem:[%s1186_s19 + $0x8] sm:$0xff] %v748_v39  ;;  %796 = vst [vmem:[%s1186_s19 + $0x88] sm:$0xff] %v764_v40 }
 0x102   : > { %v977_v41 = vpop.f32.mrb[4].mxu0  ;;  %v993_v42 = vpop.f32.mrb[4].mxu1 }
 0x103   : > { %v753_v43 = vadd.f32 %v977_v41, %v1181_v24  ;;  %v769_v44 = vadd.f32 %v993_v42, %v1181_v24  ;;  %v530_v45 = vpop.f32.mrb[5].mxu0  ;;  %v594_v46 = vpop.f32.mrb[5].mxu1 }
 0x104   : > { %v751_v47 = vadd.f32 %v1181_v24, %v530_v45  ;;  %v767_v48 = vadd.f32 %v1181_v24, %v594_v46  ;;  %v978_v49 = vpop.f32.mrb[6].mxu0  ;;  %v994_v50 = vpop.f32.mrb[6].mxu1 }
 0x105   : > { %785 = vst [vmem:[%s1186_s19 + $0x30] sm:$0xff] %v753_v43  ;;  %801 = vst [vmem:[%s1186_s19 + $0xb0] sm:$0xff] %v769_v44  ;;  %v754_v51 = vadd.f32 %v978_v49, %v1181_v24  ;;  %v770_v52 = vadd.f32 %v994_v50, %v1181_v24  ;;  %v533_v53 = vpop.f32.mrb[7].mxu0  ;;  %v597_v54 = vpop.f32.mrb[7].mxu1 }
 0x106   : > { %783 = vst [vmem:[%s1186_s19 + $0x20] sm:$0xff] %v751_v47  ;;  %799 = vst [vmem:[%s1186_s19 + $0xa0] sm:$0xff] %v767_v48  ;;  %v752_v55 = vadd.f32 %v1181_v24, %v533_v53  ;;  %v768_v56 = vadd.f32 %v1181_v24, %v597_v54 }
 0x107   : > { %786 = vst [vmem:[%s1186_s19 + $0x38] sm:$0xff] %v754_v51  ;;  %802 = vst [vmem:[%s1186_s19 + $0xb8] sm:$0xff] %v770_v52 }
 0x108   : > { %784 = vst [vmem:[%s1186_s19 + $0x28] sm:$0xff] %v752_v55  ;;  %800 = vst [vmem:[%s1186_s19 + $0xa8] sm:$0xff] %v768_v56 }
 0x10a   : > { %v981_v57 = vpop.f32.mrb[8].mxu0  ;;  %v997_v58 = vpop.f32.mrb[8].mxu1 }
 0x10b   : > { %v757_v59 = vadd.f32 %v981_v57, %v1181_v24  ;;  %v773_v60 = vadd.f32 %v997_v58, %v1181_v24  ;;  %v546_v61 = vpop.f32.mrb[9].mxu0  ;;  %v610_v62 = vpop.f32.mrb[9].mxu1 }
 0x10c   : > { %v755_v63 = vadd.f32 %v1181_v24, %v546_v61  ;;  %v771_v0 = vadd.f32 %v1181_v24, %v610_v62  ;;  %v982_v1 = vpop.f32.mrb[10].mxu0  ;;  %v998_v2 = vpop.f32.mrb[10].mxu1 }
 0x10d   : > { %789 = vst [vmem:[%s1186_s19 + $0x50] sm:$0xff] %v757_v59  ;;  %805 = vst [vmem:[%s1186_s19 + $0xd0] sm:$0xff] %v773_v60  ;;  %v758_v3 = vadd.f32 %v982_v1, %v1181_v24  ;;  %v774_v4 = vadd.f32 %v998_v2, %v1181_v24  ;;  %v549_v5 = vpop.f32.mrb[11].mxu0  ;;  %v613_v6 = vpop.f32.mrb[11].mxu1 }
 0x10e   : > { %787 = vst [vmem:[%s1186_s19 + $0x40] sm:$0xff] %v755_v63  ;;  %803 = vst [vmem:[%s1186_s19 + $0xc0] sm:$0xff] %v771_v0  ;;  %v756_v7 = vadd.f32 %v1181_v24, %v549_v5  ;;  %v772_v8 = vadd.f32 %v1181_v24, %v613_v6 }
 0x10f   : > { %790 = vst [vmem:[%s1186_s19 + $0x58] sm:$0xff] %v758_v3  ;;  %806 = vst [vmem:[%s1186_s19 + $0xd8] sm:$0xff] %v774_v4 }
 0x110   : > { %788 = vst [vmem:[%s1186_s19 + $0x48] sm:$0xff] %v756_v7  ;;  %804 = vst [vmem:[%s1186_s19 + $0xc8] sm:$0xff] %v772_v8 }
 0x112   : > { %v985_v9 = vpop.f32.mrb[12].mxu0  ;;  %v1001_v10 = vpop.f32.mrb[12].mxu1 }
 0x113   : > { %v761_v11 = vadd.f32 %v985_v9, %v1181_v24  ;;  %v777_v12 = vadd.f32 %v1001_v10, %v1181_v24  ;;  %v562_v13 = vpop.f32.mrb[13].mxu0  ;;  %v626_v14 = vpop.f32.mrb[13].mxu1 }
 0x114   : > { %v759_v15 = vadd.f32 %v1181_v24, %v562_v13  ;;  %v775_v16 = vadd.f32 %v1181_v24, %v626_v14  ;;  %v986_v17 = vpop.f32.mrb[14].mxu0  ;;  %v1002_v18 = vpop.f32.mrb[14].mxu1 }
 0x115   : > { %793 = vst [vmem:[%s1186_s19 + $0x70] sm:$0xff] %v761_v11  ;;  %809 = vst [vmem:[%s1186_s19 + $0xf0] sm:$0xff] %v777_v12  ;;  %v762_v19 = vadd.f32 %v986_v17, %v1181_v24  ;;  %v778_v20 = vadd.f32 %v1002_v18, %v1181_v24  ;;  %v565_v21 = vpop.f32.mrb[15].mxu0  ;;  %v629_v22 = vpop.f32.mrb[15].mxu1 }
 0x116   : > { %791 = vst [vmem:[%s1186_s19 + $0x60] sm:$0xff] %v759_v15  ;;  %807 = vst [vmem:[%s1186_s19 + $0xe0] sm:$0xff] %v775_v16  ;;  %v760_v23 = vadd.f32 %v1181_v24, %v565_v21  ;;  %v776_v25 = vadd.f32 %v1181_v24, %v629_v22 }
 0x117   : > { %794 = vst [vmem:[%s1186_s19 + $0x78] sm:$0xff] %v762_v19  ;;  %810 = vst [vmem:[%s1186_s19 + $0xf8] sm:$0xff] %v778_v20 }
 0x118   : > { %792 = vst [vmem:[%s1186_s19 + $0x68] sm:$0xff] %v760_v23  ;;  %808 = vst [vmem:[%s1186_s19 + $0xe8] sm:$0xff] %v776_v25 }
 0x119 PF: > { %s13_s14 = sadd.s32 1, %s1089_s14   ;;  %s1265_s12 = smov %s1085_s13 }
 0x11a   : > { %p10_p5 = scmp.ge.s32.totalorder %s13_s14, 4   ;;  %s1266_s13 = smov %s1268_s15 }
 0x11c   :  { %12 = sbr.rel (!%p10_p5) target bundleno = 2 (0x2), region = 73 }

</bundles_post_ra>
